<compile_context>
chip_gen: v7x
topology: tpu7x:2x2x1
jax: 0.10.0
libtpu: 0.0.40
codegen_flags: <defaults>
</compile_context>

<pallas_src>
import functools

import jax
import jax.numpy as jnp
from jax import lax
from jax.experimental import pallas as pl
from jax.experimental.pallas import tpu as pltpu


# ----------------------------------------------------------------------------
# Fused Bottleneck3D kernel.  One grid step = (batch element n, depth tile dt).
# ----------------------------------------------------------------------------
def _bottleneck_kernel(x_ref, w1_ref, w2_ref, w3_ref,
                       s1_ref, b1_ref, s2_ref, b2_ref, s3_ref, b3_ref,
                       o_ref, t1_ref, patch_ref,
                       *, D, H, W, td, cin, width, cout):
    dt = pl.program_id(1)          # depth-tile index
    HW = H * W

    # Weights arrive pre-cast to bf16 (halves weight DMA, feeds the MXU directly).
    w1 = w1_ref[...]               # (cin, width)        bf16
    w2 = w2_ref[...]               # (27*width, width)   bf16 (im2col-flattened)
    w3 = w3_ref[...]               # (width, cout)       bf16

    # Hoist the (1, C) -> (H*W, C) BN scale/bias broadcasts out of the depth loops.
    s1b = jnp.broadcast_to(s1_ref[...], (HW, width))
    b1b = jnp.broadcast_to(b1_ref[...], (HW, width))
    s2b = jnp.broadcast_to(s2_ref[...], (HW, width))
    b2b = jnp.broadcast_to(b2_ref[...], (HW, width))
    s3b = jnp.broadcast_to(s3_ref[...], (HW, cout))
    b3b = jnp.broadcast_to(b3_ref[...], (HW, cout))

    # ---- Stage 1: conv1 (1x1x1) + bn1 + relu into a zero-padded VMEM scratch ----
    # t1_ref is (td+2, H+2, W+2, width): depth halo of 1 (recomputed per tile, so
    # there is no cross-tile state) and spatial halo of 1 so conv2 needs no
    # host-side jnp.pad of the activation in HBM.  Halo stays zero.
    t1_ref[...] = jnp.zeros_like(t1_ref)

    for dp in range(td + 2):                 # static: td is a small tile parameter
        g = dt * td + dp - 1                 # global input depth of this slice

        def _conv1_slice(dp=dp, g=g):
            rows = x_ref[0, pl.ds(g, 1), :, :].reshape(HW, cin)
            y1 = jnp.dot(rows.astype(jnp.bfloat16), w1,
                         preferred_element_type=jnp.float32)
            y1 = jnp.maximum(y1 * s1b + b1b, 0.0)            # f32 epilogue
            t1_ref[dp, 1:H + 1, 1:W + 1, :] = y1.reshape(H, W, width)

        if 1 <= dp <= td:
            _conv1_slice()                   # always in range
        else:
            # Only the first/last padded slice can fall outside [0, D).
            pl.when(jnp.logical_and(g >= 0, g < D))(_conv1_slice)

    # ---- Stage 2+3: conv2 (3x3x3, pad=1) + bn2 + relu, conv3 + bn3 + id + relu ----
    for dl in range(td):                     # static: bounded by the depth tile
        # im2col: fold all 27 taps into the matmul K dimension via a VMEM patch
        # buffer -> a single (H*W, 27*width) @ (27*width, width) MXU matmul.
        for kd in range(3):
            slab = t1_ref[dl + kd]           # (H+2, W+2, width) f32
            for kh in range(3):
                for kw in range(3):
                    t = (kd * 3 + kh) * 3 + kw
                    patch_ref[:, :, t * width:(t + 1) * width] = (
                        slab[kh:kh + H, kw:kw + W, :])

        patches = patch_ref[...].reshape(HW, 27 * width).astype(jnp.bfloat16)
        y2 = jnp.dot(patches, w2, preferred_element_type=jnp.float32)
        y2 = jnp.maximum(y2 * s2b + b2b, 0.0)                 # f32 epilogue

        y3 = jnp.dot(y2.astype(jnp.bfloat16), w3,
                     preferred_element_type=jnp.float32)
        res = x_ref[0, pl.ds(dt * td + dl, 1), :, :].reshape(HW, cout)
        out = jnp.maximum(y3 * s3b + b3b + res.astype(jnp.float32), 0.0)

        # Store into the lane-dense (H, W*cout) output block.  The per-column
        # sub-stores avoid a sublane->lane shape_cast inside the kernel while the
        # output BlockSpec (and the HBM writeback DMA) stays lane-dense.
        out = out.reshape(H, W, cout).astype(o_ref.dtype)
        for w in range(W):
            o_ref[0, dl, :, w * cout:(w + 1) * cout] = out[:, w, :]


def _const2d(shape):
    return pl.BlockSpec(shape, lambda n, d: (0, 0))


def _pick_depth_tile(D, target):
    td = max(1, min(target, D))
    while D % td:
        td -= 1
    return td


# ----------------------------------------------------------------------------
# Bottleneck3D forward (stride=1, downsample=None, groups=1, base_width=64)
# ----------------------------------------------------------------------------
def bottleneck3d_forward(x, params, *, depth_tile=2):
    """x: (N, D, H, W, Cin) channels-last, Cin == planes * expansion."""
    N, D, H, W, cin = x.shape
    width = params["w1"].shape[1]
    cout = params["w3"].shape[1]
    assert cout == cin, "identity path requires inplanes == planes * expansion"
    td = _pick_depth_tile(D, depth_tile)

    # Lane-friendly host-side views (contiguous -> free in HBM):
    #   input  as (N, D, H*W, Cin)  : rows feed the MXU directly
    #   output as (N, D, H, W*Cout) : lane-dense output block
    x_rows = x.reshape(N, D, H * W, cin)
    w1 = params["w1"].astype(jnp.bfloat16)
    w2 = params["w2"].reshape(27 * width, width).astype(jnp.bfloat16)
    w3 = params["w3"].astype(jnp.bfloat16)
    s1 = params["s1"].reshape(1, width).astype(jnp.float32)
    b1 = params["b1"].reshape(1, width).astype(jnp.float32)
    s2 = params["s2"].reshape(1, width).astype(jnp.float32)
    b2 = params["b2"].reshape(1, width).astype(jnp.float32)
    s3 = params["s3"].reshape(1, cout).astype(jnp.float32)
    b3 = params["b3"].reshape(1, cout).astype(jnp.float32)

    kernel = functools.partial(
        _bottleneck_kernel, D=D, H=H, W=W, td=td,
        cin=cin, width=width, cout=cout)

    out = pl.pallas_call(
        kernel,
        out_shape=jax.ShapeDtypeStruct((N, D, H, W * cout), x.dtype),
        grid_spec=pltpu.PrefetchScalarGridSpec(
            num_scalar_prefetch=0,
            grid=(N, D // td),
            in_specs=[
                # Full-depth activation block per batch element; block index is
                # constant across the depth-tile axis, so it stays VMEM-resident
                # (no re-DMA) while the tile axis walks the output.
                pl.BlockSpec((1, D, H * W, cin), lambda n, d: (n, 0, 0, 0)),
                _const2d((cin, width)),            # w1
                _const2d((27 * width, width)),     # w2 (im2col-flattened)
                _const2d((width, cout)),           # w3
                _const2d((1, width)), _const2d((1, width)),   # s1, b1
                _const2d((1, width)), _const2d((1, width)),   # s2, b2
                _const2d((1, cout)), _const2d((1, cout)),     # s3, b3
            ],
            out_specs=pl.BlockSpec((1, td, H, W * cout),
                                   lambda n, d: (n, d, 0, 0)),
            scratch_shapes=[
                # conv1 output with depth + spatial halo (zero padding lives here)
                pltpu.VMEM((td + 2, H + 2, W + 2, width), jnp.float32),
                # im2col patch buffer for one output depth slice
                pltpu.VMEM((H, W, 27 * width), jnp.float32),
            ],
        ),
        compiler_params=pltpu.CompilerParams(
            dimension_semantics=("parallel", "parallel"),
            vmem_limit_bytes=48 * 1024 * 1024,
        ),
    )(x_rows, w1, w2, w3, s1, b1, s2, b2, s3, b3)
    return out.reshape(N, D, H, W, cout)


# ----------------------------------------------------------------------------
# Pure-JAX reference (for verification).  Uses the same bf16-rounded weights the
# kernel feeds the MXU; activations / accumulation stay f32.
# ----------------------------------------------------------------------------
def bottleneck3d_reference(x, p):
    def rd(w):
        return w.astype(jnp.bfloat16).astype(jnp.float32)

    def bnrelu(v, s, b):
        return jnp.maximum(v * s + b, 0.0)

    hi = lax.Precision.HIGHEST
    y = bnrelu(jnp.einsum("ndhwc,co->ndhwo", x, rd(p["w1"]), precision=hi),
               p["s1"], p["b1"])
    y = lax.conv_general_dilated(
        y, rd(p["w2"]), window_strides=(1, 1, 1), padding=[(1, 1)] * 3,
        dimension_numbers=("NDHWC", "DHWIO", "NDHWC"), precision=hi)
    y = bnrelu(y, p["s2"], p["b2"])
    y = (jnp.einsum("ndhwc,co->ndhwo", y, rd(p["w3"]), precision=hi)
         * p["s3"] + p["b3"] + x)
    return jnp.maximum(y, 0.0)


# ----------------------------------------------------------------------------
# Deterministic parameter construction (mirrors Bottleneck3D.__init__ shapes)
# ----------------------------------------------------------------------------
def make_params(key, inplanes, planes, base_width=64, groups=1, eps=1e-5):
    expansion = 4
    width = int(planes * (base_width / 64.0)) * groups
    outplanes = planes * expansion
    ks = jax.random.split(key, 12)

    def bn_fold(kg, kb, km, kv, c):
        gamma = 1.0 + 0.1 * jax.random.normal(kg, (c,), jnp.float32)
        beta = 0.1 * jax.random.normal(kb, (c,), jnp.float32)
        mean = 0.1 * jax.random.normal(km, (c,), jnp.float32)
        var = jnp.abs(jax.random.normal(kv, (c,), jnp.float32)) + 0.5
        scale = gamma / jnp.sqrt(var + eps)
        bias = beta - mean * scale
        return scale, bias

    # PyTorch weight layouts: conv1 (width, inplanes, 1,1,1)  -> (inplanes, width)
    #                         conv2 (width, width, 3,3,3)     -> (3,3,3,width,width)
    #                         conv3 (outplanes, width, 1,1,1) -> (width, outplanes)
    w1 = 0.1 * jax.random.normal(ks[0], (inplanes, width), jnp.float32)
    w2 = 0.1 * jax.random.normal(ks[1], (3, 3, 3, width, width), jnp.float32)
    w3 = 0.1 * jax.random.normal(ks[2], (width, outplanes), jnp.float32)
    s1, b1 = bn_fold(ks[3], ks[4], ks[5], ks[6], width)
    s2, b2 = bn_fold(ks[7], ks[8], ks[9], ks[10], width)
    s3, b3 = bn_fold(*jax.random.split(ks[11], 4), outplanes)
    return dict(w1=w1, w2=w2, w3=w3, s1=s1, b1=b1, s2=s2, b2=b2, s3=s3, b3=b3)


if __name__ == "__main__":
    # PyTorch-equivalent input: (2, 16, 4, 8, 8) NCDHW (inplanes=16, planes=4,
    # expansion 4 -> out channels 16).  W * Cout = 8 * 16 = 128 -> the kernel's
    # output block is exactly one full lane tile wide.
    N, inplanes, planes = 2, 16, 4
    D, H, W = 4, 8, 8

    key = jax.random.PRNGKey(0)
    kx, kp = jax.random.split(key)
    x_ncdhw = jax.random.normal(kx, (N, inplanes, D, H, W), jnp.float32)
    x = jnp.transpose(x_ncdhw, (0, 2, 3, 4, 1))   # -> (N, D, H, W, C)

    params = make_params(kp, inplanes, planes)

    out = jax.block_until_ready(bottleneck3d_forward(x, params, depth_tile=2))
    ref = jax.block_until_ready(bottleneck3d_reference(x, params))

    assert out.shape == (N, D, H, W, planes * 4)
    max_err = float(jnp.max(jnp.abs(out - ref)))
    # bf16 MXU inputs vs f32 reference activations -> loosened tolerance.
    assert jnp.allclose(out, ref, atol=5e-2, rtol=5e-2), max_err

    print("KERNEL_OK")
</pallas_src>

<mosaic_0001>
module attributes {stable_mosaic.version = 11 : i64} {
  func.func @_bottleneck_kernel(%arg0: i32, %arg1: i32, %arg2: memref<1x4x64x16xf32, #tpu.memory_space<vmem>>, %arg3: memref<16x4xbf16, #tpu.memory_space<vmem>>, %arg4: memref<108x4xbf16, #tpu.memory_space<vmem>>, %arg5: memref<4x16xbf16, #tpu.memory_space<vmem>>, %arg6: memref<1x4xf32, #tpu.memory_space<vmem>>, %arg7: memref<1x4xf32, #tpu.memory_space<vmem>>, %arg8: memref<1x4xf32, #tpu.memory_space<vmem>>, %arg9: memref<1x4xf32, #tpu.memory_space<vmem>>, %arg10: memref<1x16xf32, #tpu.memory_space<vmem>>, %arg11: memref<1x16xf32, #tpu.memory_space<vmem>>, %arg12: memref<1x2x8x128xf32, #tpu.memory_space<vmem>>, %arg13: memref<4x10x10x4xf32, #tpu.memory_space<vmem>>, %arg14: memref<8x8x108xf32, #tpu.memory_space<vmem>>) attributes {dimension_semantics = [#tpu.dimension_semantics<parallel>, #tpu.dimension_semantics<parallel>], iteration_bounds = array<i64: 2, 2>, scalar_prefetch = 0 : i64, scratch_operands = 2 : i64, tpu.core_type = #tpu.core_type<tc>, window_params = [{transform_indices = @transform_0, window_bounds = array<i64: 1, 4, 64, 16>}, {pipeline_mode = #tpu.pipeline_mode<synchronous>, transform_indices = @transform_1, window_bounds = array<i64: 16, 4>}, {pipeline_mode = #tpu.pipeline_mode<synchronous>, transform_indices = @transform_2, window_bounds = array<i64: 108, 4>}, {pipeline_mode = #tpu.pipeline_mode<synchronous>, transform_indices = @transform_3, window_bounds = array<i64: 4, 16>}, {pipeline_mode = #tpu.pipeline_mode<synchronous>, transform_indices = @transform_4, window_bounds = array<i64: 1, 4>}, {pipeline_mode = #tpu.pipeline_mode<synchronous>, transform_indices = @transform_5, window_bounds = array<i64: 1, 4>}, {pipeline_mode = #tpu.pipeline_mode<synchronous>, transform_indices = @transform_6, window_bounds = array<i64: 1, 4>}, {pipeline_mode = #tpu.pipeline_mode<synchronous>, transform_indices = @transform_7, window_bounds = array<i64: 1, 4>}, {pipeline_mode = #tpu.pipeline_mode<synchronous>, transform_indices = @transform_8, window_bounds = array<i64: 1, 16>}, {pipeline_mode = #tpu.pipeline_mode<synchronous>, transform_indices = @transform_9, window_bounds = array<i64: 1, 16>}, {transform_indices = @transform_10, window_bounds = array<i64: 1, 2, 8, 128>}]} {
    %c0 = arith.constant 0 : index
    %c0_0 = arith.constant 0 : index
    %0 = vector.load %arg3[%c0, %c0_0] : memref<16x4xbf16, #tpu.memory_space<vmem>>, vector<16x4xbf16>
    %c0_1 = arith.constant 0 : index
    %c0_2 = arith.constant 0 : index
    %1 = vector.load %arg4[%c0_1, %c0_2] : memref<108x4xbf16, #tpu.memory_space<vmem>>, vector<108x4xbf16>
    %c0_3 = arith.constant 0 : index
    %c0_4 = arith.constant 0 : index
    %2 = vector.load %arg5[%c0_3, %c0_4] : memref<4x16xbf16, #tpu.memory_space<vmem>>, vector<4x16xbf16>
    %c0_5 = arith.constant 0 : index
    %c0_6 = arith.constant 0 : index
    %3 = vector.load %arg6[%c0_5, %c0_6] : memref<1x4xf32, #tpu.memory_space<vmem>>, vector<1x4xf32>
    %4 = vector.shape_cast %3 : vector<1x4xf32> to vector<1x4xf32>
    %5 = vector.broadcast %4 : vector<1x4xf32> to vector<64x4xf32>
    %c0_7 = arith.constant 0 : index
    %c0_8 = arith.constant 0 : index
    %6 = vector.load %arg7[%c0_7, %c0_8] : memref<1x4xf32, #tpu.memory_space<vmem>>, vector<1x4xf32>
    %7 = vector.shape_cast %6 : vector<1x4xf32> to vector<1x4xf32>
    %8 = vector.broadcast %7 : vector<1x4xf32> to vector<64x4xf32>
    %c0_9 = arith.constant 0 : index
    %c0_10 = arith.constant 0 : index
    %9 = vector.load %arg8[%c0_9, %c0_10] : memref<1x4xf32, #tpu.memory_space<vmem>>, vector<1x4xf32>
    %10 = vector.shape_cast %9 : vector<1x4xf32> to vector<1x4xf32>
    %11 = vector.broadcast %10 : vector<1x4xf32> to vector<64x4xf32>
    %c0_11 = arith.constant 0 : index
    %c0_12 = arith.constant 0 : index
    %12 = vector.load %arg9[%c0_11, %c0_12] : memref<1x4xf32, #tpu.memory_space<vmem>>, vector<1x4xf32>
    %13 = vector.shape_cast %12 : vector<1x4xf32> to vector<1x4xf32>
    %14 = vector.broadcast %13 : vector<1x4xf32> to vector<64x4xf32>
    %c0_13 = arith.constant 0 : index
    %c0_14 = arith.constant 0 : index
    %15 = vector.load %arg10[%c0_13, %c0_14] : memref<1x16xf32, #tpu.memory_space<vmem>>, vector<1x16xf32>
    %16 = vector.shape_cast %15 : vector<1x16xf32> to vector<1x16xf32>
    %17 = vector.broadcast %16 : vector<1x16xf32> to vector<64x16xf32>
    %c0_15 = arith.constant 0 : index
    %c0_16 = arith.constant 0 : index
    %18 = vector.load %arg11[%c0_15, %c0_16] : memref<1x16xf32, #tpu.memory_space<vmem>>, vector<1x16xf32>
    %19 = vector.shape_cast %18 : vector<1x16xf32> to vector<1x16xf32>
    %20 = vector.broadcast %19 : vector<1x16xf32> to vector<64x16xf32>
    %cst = arith.constant 0.000000e+00 : f32
    %21 = vector.broadcast %cst : f32 to vector<4x10x10x4xf32>
    %c0_17 = arith.constant 0 : index
    %c0_18 = arith.constant 0 : index
    %c0_19 = arith.constant 0 : index
    %c0_20 = arith.constant 0 : index
    %22 = vector.load %arg13[%c0_17, %c0_18, %c0_19, %c0_20] : memref<4x10x10x4xf32, #tpu.memory_space<vmem>>, vector<4x10x10x4xf32>
    tpu.vector_store %arg13[%c0_17, %c0_18, %c0_19, %c0_20], %21 {strides = array<i32>} : memref<4x10x10x4xf32, #tpu.memory_space<vmem>>, vector<4x10x10x4xf32>,
    %c2_i32 = arith.constant 2 : i32
    %23 = arith.muli %arg1, %c2_i32 : i32
    %c0_i32 = arith.constant 0 : i32
    %24 = arith.addi %23, %c0_i32 : i32
    %c1_i32 = arith.constant 1 : i32
    %25 = arith.subi %24, %c1_i32 : i32
    %c0_i32_21 = arith.constant 0 : i32
    %26 = arith.cmpi sge, %25, %c0_i32_21 : i32
    %c4_i32 = arith.constant 4 : i32
    %27 = arith.cmpi slt, %25, %c4_i32 : i32
    %28 = arith.andi %26, %27 : i1
    %29 = arith.extui %28 : i1 to i32
    %c0_i32_22 = arith.constant 0 : i32
    %30 = arith.cmpi ne, %29, %c0_i32_22 : i32
    scf.if %30 {
      %c0_296 = arith.constant 0 : index
      %317 = arith.index_cast %25 : i32 to index
      %c0_297 = arith.constant 0 : index
      %c0_298 = arith.constant 0 : index
      %318 = vector.load %arg2[%c0_296, %317, %c0_297, %c0_298] : memref<1x4x64x16xf32, #tpu.memory_space<vmem>>, vector<1x1x64x16xf32>
      %319 = vector.shape_cast %318 : vector<1x1x64x16xf32> to vector<1x64x16xf32>
      %320 = vector.shape_cast %319 : vector<1x64x16xf32> to vector<64x16xf32>
      %321 = arith.truncf %320 : vector<64x16xf32> to vector<64x16xbf16>
      %cst_299 = arith.constant dense<0.000000e+00> : vector<64x4xf32>
      %322 = tpu.matmul %321, %0, %cst_299 {dimension_numbers = #tpu.dot_dimension_numbers<[1], [0], [0], [1], [0, 0, 1, 1], [], []>} : vector<64x16xbf16>, vector<16x4xbf16>, vector<64x4xf32> -> vector<64x4xf32>
      %323 = arith.mulf %322, %5 : vector<64x4xf32>
      %324 = arith.addf %323, %8 : vector<64x4xf32>
      %cst_300 = arith.constant 0.000000e+00 : f32
      %325 = vector.broadcast %cst_300 : f32 to vector<64x4xf32>
      %326 = arith.maximumf %324, %325 : vector<64x4xf32>
      %327 = vector.shape_cast %326 : vector<64x4xf32> to vector<8x8x4xf32>
      %c0_301 = arith.constant 0 : index
      %c1_302 = arith.constant 1 : index
      %c1_303 = arith.constant 1 : index
      %c0_304 = arith.constant 0 : index
      %328 = vector.load %arg13[%c0_301, %c1_302, %c1_303, %c0_304] : memref<4x10x10x4xf32, #tpu.memory_space<vmem>>, vector<1x8x8x4xf32>
      %329 = vector.shape_cast %328 : vector<1x8x8x4xf32> to vector<8x8x4xf32>
      %330 = vector.shape_cast %327 : vector<8x8x4xf32> to vector<1x8x8x4xf32>
      tpu.vector_store %arg13[%c0_301, %c1_302, %c1_303, %c0_304], %330 {strides = array<i32>} : memref<4x10x10x4xf32, #tpu.memory_space<vmem>>, vector<1x8x8x4xf32>,
    } else {
    }
    %c2_i32_23 = arith.constant 2 : i32
    %31 = arith.muli %arg1, %c2_i32_23 : i32
    %c1_i32_24 = arith.constant 1 : i32
    %32 = arith.addi %31, %c1_i32_24 : i32
    %c1_i32_25 = arith.constant 1 : i32
    %33 = arith.subi %32, %c1_i32_25 : i32
    %c0_26 = arith.constant 0 : index
    %34 = arith.index_cast %33 : i32 to index
    %c0_27 = arith.constant 0 : index
    %c0_28 = arith.constant 0 : index
    %35 = vector.load %arg2[%c0_26, %34, %c0_27, %c0_28] : memref<1x4x64x16xf32, #tpu.memory_space<vmem>>, vector<1x1x64x16xf32>
    %36 = vector.shape_cast %35 : vector<1x1x64x16xf32> to vector<1x64x16xf32>
    %37 = vector.shape_cast %36 : vector<1x64x16xf32> to vector<64x16xf32>
    %38 = arith.truncf %37 : vector<64x16xf32> to vector<64x16xbf16>
    %cst_29 = arith.constant dense<0.000000e+00> : vector<64x4xf32>
    %39 = tpu.matmul %38, %0, %cst_29 {dimension_numbers = #tpu.dot_dimension_numbers<[1], [0], [0], [1], [0, 0, 1, 1], [], []>} : vector<64x16xbf16>, vector<16x4xbf16>, vector<64x4xf32> -> vector<64x4xf32>
    %40 = arith.mulf %39, %5 : vector<64x4xf32>
    %41 = arith.addf %40, %8 : vector<64x4xf32>
    %cst_30 = arith.constant 0.000000e+00 : f32
    %42 = vector.broadcast %cst_30 : f32 to vector<64x4xf32>
    %43 = arith.maximumf %41, %42 : vector<64x4xf32>
    %44 = vector.shape_cast %43 : vector<64x4xf32> to vector<8x8x4xf32>
    %c1 = arith.constant 1 : index
    %c1_31 = arith.constant 1 : index
    %c1_32 = arith.constant 1 : index
    %c0_33 = arith.constant 0 : index
    %45 = vector.load %arg13[%c1, %c1_31, %c1_32, %c0_33] : memref<4x10x10x4xf32, #tpu.memory_space<vmem>>, vector<1x8x8x4xf32>
    %46 = vector.shape_cast %45 : vector<1x8x8x4xf32> to vector<8x8x4xf32>
    %47 = vector.shape_cast %44 : vector<8x8x4xf32> to vector<1x8x8x4xf32>
    tpu.vector_store %arg13[%c1, %c1_31, %c1_32, %c0_33], %47 {strides = array<i32>} : memref<4x10x10x4xf32, #tpu.memory_space<vmem>>, vector<1x8x8x4xf32>,
    %c2_i32_34 = arith.constant 2 : i32
    %48 = arith.muli %arg1, %c2_i32_34 : i32
    %c2_i32_35 = arith.constant 2 : i32
    %49 = arith.addi %48, %c2_i32_35 : i32
    %c1_i32_36 = arith.constant 1 : i32
    %50 = arith.subi %49, %c1_i32_36 : i32
    %c0_37 = arith.constant 0 : index
    %51 = arith.index_cast %50 : i32 to index
    %c0_38 = arith.constant 0 : index
    %c0_39 = arith.constant 0 : index
    %52 = vector.load %arg2[%c0_37, %51, %c0_38, %c0_39] : memref<1x4x64x16xf32, #tpu.memory_space<vmem>>, vector<1x1x64x16xf32>
    %53 = vector.shape_cast %52 : vector<1x1x64x16xf32> to vector<1x64x16xf32>
    %54 = vector.shape_cast %53 : vector<1x64x16xf32> to vector<64x16xf32>
    %55 = arith.truncf %54 : vector<64x16xf32> to vector<64x16xbf16>
    %cst_40 = arith.constant dense<0.000000e+00> : vector<64x4xf32>
    %56 = tpu.matmul %55, %0, %cst_40 {dimension_numbers = #tpu.dot_dimension_numbers<[1], [0], [0], [1], [0, 0, 1, 1], [], []>} : vector<64x16xbf16>, vector<16x4xbf16>, vector<64x4xf32> -> vector<64x4xf32>
    %57 = arith.mulf %56, %5 : vector<64x4xf32>
    %58 = arith.addf %57, %8 : vector<64x4xf32>
    %cst_41 = arith.constant 0.000000e+00 : f32
    %59 = vector.broadcast %cst_41 : f32 to vector<64x4xf32>
    %60 = arith.maximumf %58, %59 : vector<64x4xf32>
    %61 = vector.shape_cast %60 : vector<64x4xf32> to vector<8x8x4xf32>
    %c2 = arith.constant 2 : index
    %c1_42 = arith.constant 1 : index
    %c1_43 = arith.constant 1 : index
    %c0_44 = arith.constant 0 : index
    %62 = vector.load %arg13[%c2, %c1_42, %c1_43, %c0_44] : memref<4x10x10x4xf32, #tpu.memory_space<vmem>>, vector<1x8x8x4xf32>
    %63 = vector.shape_cast %62 : vector<1x8x8x4xf32> to vector<8x8x4xf32>
    %64 = vector.shape_cast %61 : vector<8x8x4xf32> to vector<1x8x8x4xf32>
    tpu.vector_store %arg13[%c2, %c1_42, %c1_43, %c0_44], %64 {strides = array<i32>} : memref<4x10x10x4xf32, #tpu.memory_space<vmem>>, vector<1x8x8x4xf32>,
    %c2_i32_45 = arith.constant 2 : i32
    %65 = arith.muli %arg1, %c2_i32_45 : i32
    %c3_i32 = arith.constant 3 : i32
    %66 = arith.addi %65, %c3_i32 : i32
    %c1_i32_46 = arith.constant 1 : i32
    %67 = arith.subi %66, %c1_i32_46 : i32
    %c0_i32_47 = arith.constant 0 : i32
    %68 = arith.cmpi sge, %67, %c0_i32_47 : i32
    %c4_i32_48 = arith.constant 4 : i32
    %69 = arith.cmpi slt, %67, %c4_i32_48 : i32
    %70 = arith.andi %68, %69 : i1
    %71 = arith.extui %70 : i1 to i32
    %c0_i32_49 = arith.constant 0 : i32
    %72 = arith.cmpi ne, %71, %c0_i32_49 : i32
    scf.if %72 {
      %c0_296 = arith.constant 0 : index
      %317 = arith.index_cast %67 : i32 to index
      %c0_297 = arith.constant 0 : index
      %c0_298 = arith.constant 0 : index
      %318 = vector.load %arg2[%c0_296, %317, %c0_297, %c0_298] : memref<1x4x64x16xf32, #tpu.memory_space<vmem>>, vector<1x1x64x16xf32>
      %319 = vector.shape_cast %318 : vector<1x1x64x16xf32> to vector<1x64x16xf32>
      %320 = vector.shape_cast %319 : vector<1x64x16xf32> to vector<64x16xf32>
      %321 = arith.truncf %320 : vector<64x16xf32> to vector<64x16xbf16>
      %cst_299 = arith.constant dense<0.000000e+00> : vector<64x4xf32>
      %322 = tpu.matmul %321, %0, %cst_299 {dimension_numbers = #tpu.dot_dimension_numbers<[1], [0], [0], [1], [0, 0, 1, 1], [], []>} : vector<64x16xbf16>, vector<16x4xbf16>, vector<64x4xf32> -> vector<64x4xf32>
      %323 = arith.mulf %322, %5 : vector<64x4xf32>
      %324 = arith.addf %323, %8 : vector<64x4xf32>
      %cst_300 = arith.constant 0.000000e+00 : f32
      %325 = vector.broadcast %cst_300 : f32 to vector<64x4xf32>
      %326 = arith.maximumf %324, %325 : vector<64x4xf32>
      %327 = vector.shape_cast %326 : vector<64x4xf32> to vector<8x8x4xf32>
      %c3_301 = arith.constant 3 : index
      %c1_302 = arith.constant 1 : index
      %c1_303 = arith.constant 1 : index
      %c0_304 = arith.constant 0 : index
      %328 = vector.load %arg13[%c3_301, %c1_302, %c1_303, %c0_304] : memref<4x10x10x4xf32, #tpu.memory_space<vmem>>, vector<1x8x8x4xf32>
      %329 = vector.shape_cast %328 : vector<1x8x8x4xf32> to vector<8x8x4xf32>
      %330 = vector.shape_cast %327 : vector<8x8x4xf32> to vector<1x8x8x4xf32>
      tpu.vector_store %arg13[%c3_301, %c1_302, %c1_303, %c0_304], %330 {strides = array<i32>} : memref<4x10x10x4xf32, #tpu.memory_space<vmem>>, vector<1x8x8x4xf32>,
    } else {
    }
    %c0_50 = arith.constant 0 : index
    %c0_51 = arith.constant 0 : index
    %c0_52 = arith.constant 0 : index
    %c0_53 = arith.constant 0 : index
    %73 = vector.load %arg13[%c0_50, %c0_51, %c0_52, %c0_53] : memref<4x10x10x4xf32, #tpu.memory_space<vmem>>, vector<1x10x10x4xf32>
    %74 = vector.shape_cast %73 : vector<1x10x10x4xf32> to vector<10x10x4xf32>
    %75 = vector.extract_strided_slice %74 {offsets = [0, 0, 0], sizes = [8, 8, 4], strides = [1, 1, 1]} : vector<10x10x4xf32> to vector<8x8x4xf32>
    %c0_54 = arith.constant 0 : index
    %c0_55 = arith.constant 0 : index
    %c0_56 = arith.constant 0 : index
    %76 = vector.load %arg14[%c0_54, %c0_55, %c0_56] : memref<8x8x108xf32, #tpu.memory_space<vmem>>, vector<8x8x4xf32>
    tpu.vector_store %arg14[%c0_54, %c0_55, %c0_56], %75 {strides = array<i32>} : memref<8x8x108xf32, #tpu.memory_space<vmem>>, vector<8x8x4xf32>,
    %77 = vector.extract_strided_slice %74 {offsets = [0, 1, 0], sizes = [8, 8, 4], strides = [1, 1, 1]} : vector<10x10x4xf32> to vector<8x8x4xf32>
    %c0_57 = arith.constant 0 : index
    %c0_58 = arith.constant 0 : index
    %c4 = arith.constant 4 : index
    %78 = vector.load %arg14[%c0_57, %c0_58, %c4] : memref<8x8x108xf32, #tpu.memory_space<vmem>>, vector<8x8x4xf32>
    tpu.vector_store %arg14[%c0_57, %c0_58, %c4], %77 {strides = array<i32>} : memref<8x8x108xf32, #tpu.memory_space<vmem>>, vector<8x8x4xf32>,
    %79 = vector.extract_strided_slice %74 {offsets = [0, 2, 0], sizes = [8, 8, 4], strides = [1, 1, 1]} : vector<10x10x4xf32> to vector<8x8x4xf32>
    %c0_59 = arith.constant 0 : index
    %c0_60 = arith.constant 0 : index
    %c8 = arith.constant 8 : index
    %80 = vector.load %arg14[%c0_59, %c0_60, %c8] : memref<8x8x108xf32, #tpu.memory_space<vmem>>, vector<8x8x4xf32>
    tpu.vector_store %arg14[%c0_59, %c0_60, %c8], %79 {strides = array<i32>} : memref<8x8x108xf32, #tpu.memory_space<vmem>>, vector<8x8x4xf32>,
    %81 = vector.extract_strided_slice %74 {offsets = [1, 0, 0], sizes = [8, 8, 4], strides = [1, 1, 1]} : vector<10x10x4xf32> to vector<8x8x4xf32>
    %c0_61 = arith.constant 0 : index
    %c0_62 = arith.constant 0 : index
    %c12 = arith.constant 12 : index
    %82 = vector.load %arg14[%c0_61, %c0_62, %c12] : memref<8x8x108xf32, #tpu.memory_space<vmem>>, vector<8x8x4xf32>
    tpu.vector_store %arg14[%c0_61, %c0_62, %c12], %81 {strides = array<i32>} : memref<8x8x108xf32, #tpu.memory_space<vmem>>, vector<8x8x4xf32>,
    %83 = vector.extract_strided_slice %74 {offsets = [1, 1, 0], sizes = [8, 8, 4], strides = [1, 1, 1]} : vector<10x10x4xf32> to vector<8x8x4xf32>
    %c0_63 = arith.constant 0 : index
    %c0_64 = arith.constant 0 : index
    %c16 = arith.constant 16 : index
    %84 = vector.load %arg14[%c0_63, %c0_64, %c16] : memref<8x8x108xf32, #tpu.memory_space<vmem>>, vector<8x8x4xf32>
    tpu.vector_store %arg14[%c0_63, %c0_64, %c16], %83 {strides = array<i32>} : memref<8x8x108xf32, #tpu.memory_space<vmem>>, vector<8x8x4xf32>,
    %85 = vector.extract_strided_slice %74 {offsets = [1, 2, 0], sizes = [8, 8, 4], strides = [1, 1, 1]} : vector<10x10x4xf32> to vector<8x8x4xf32>
    %c0_65 = arith.constant 0 : index
    %c0_66 = arith.constant 0 : index
    %c20 = arith.constant 20 : index
    %86 = vector.load %arg14[%c0_65, %c0_66, %c20] : memref<8x8x108xf32, #tpu.memory_space<vmem>>, vector<8x8x4xf32>
    tpu.vector_store %arg14[%c0_65, %c0_66, %c20], %85 {strides = array<i32>} : memref<8x8x108xf32, #tpu.memory_space<vmem>>, vector<8x8x4xf32>,
    %87 = vector.extract_strided_slice %74 {offsets = [2, 0, 0], sizes = [8, 8, 4], strides = [1, 1, 1]} : vector<10x10x4xf32> to vector<8x8x4xf32>
    %c0_67 = arith.constant 0 : index
    %c0_68 = arith.constant 0 : index
    %c24 = arith.constant 24 : index
    %88 = vector.load %arg14[%c0_67, %c0_68, %c24] : memref<8x8x108xf32, #tpu.memory_space<vmem>>, vector<8x8x4xf32>
    tpu.vector_store %arg14[%c0_67, %c0_68, %c24], %87 {strides = array<i32>} : memref<8x8x108xf32, #tpu.memory_space<vmem>>, vector<8x8x4xf32>,
    %89 = vector.extract_strided_slice %74 {offsets = [2, 1, 0], sizes = [8, 8, 4], strides = [1, 1, 1]} : vector<10x10x4xf32> to vector<8x8x4xf32>
    %c0_69 = arith.constant 0 : index
    %c0_70 = arith.constant 0 : index
    %c28 = arith.constant 28 : index
    %90 = vector.load %arg14[%c0_69, %c0_70, %c28] : memref<8x8x108xf32, #tpu.memory_space<vmem>>, vector<8x8x4xf32>
    tpu.vector_store %arg14[%c0_69, %c0_70, %c28], %89 {strides = array<i32>} : memref<8x8x108xf32, #tpu.memory_space<vmem>>, vector<8x8x4xf32>,
    %91 = vector.extract_strided_slice %74 {offsets = [2, 2, 0], sizes = [8, 8, 4], strides = [1, 1, 1]} : vector<10x10x4xf32> to vector<8x8x4xf32>
    %c0_71 = arith.constant 0 : index
    %c0_72 = arith.constant 0 : index
    %c32 = arith.constant 32 : index
    %92 = vector.load %arg14[%c0_71, %c0_72, %c32] : memref<8x8x108xf32, #tpu.memory_space<vmem>>, vector<8x8x4xf32>
    tpu.vector_store %arg14[%c0_71, %c0_72, %c32], %91 {strides = array<i32>} : memref<8x8x108xf32, #tpu.memory_space<vmem>>, vector<8x8x4xf32>,
    %c1_73 = arith.constant 1 : index
    %c0_74 = arith.constant 0 : index
    %c0_75 = arith.constant 0 : index
    %c0_76 = arith.constant 0 : index
    %93 = vector.load %arg13[%c1_73, %c0_74, %c0_75, %c0_76] : memref<4x10x10x4xf32, #tpu.memory_space<vmem>>, vector<1x10x10x4xf32>
    %94 = vector.shape_cast %93 : vector<1x10x10x4xf32> to vector<10x10x4xf32>
    %95 = vector.extract_strided_slice %94 {offsets = [0, 0, 0], sizes = [8, 8, 4], strides = [1, 1, 1]} : vector<10x10x4xf32> to vector<8x8x4xf32>
    %c0_77 = arith.constant 0 : index
    %c0_78 = arith.constant 0 : index
    %c36 = arith.constant 36 : index
    %96 = vector.load %arg14[%c0_77, %c0_78, %c36] : memref<8x8x108xf32, #tpu.memory_space<vmem>>, vector<8x8x4xf32>
    tpu.vector_store %arg14[%c0_77, %c0_78, %c36], %95 {strides = array<i32>} : memref<8x8x108xf32, #tpu.memory_space<vmem>>, vector<8x8x4xf32>,
    %97 = vector.extract_strided_slice %94 {offsets = [0, 1, 0], sizes = [8, 8, 4], strides = [1, 1, 1]} : vector<10x10x4xf32> to vector<8x8x4xf32>
    %c0_79 = arith.constant 0 : index
    %c0_80 = arith.constant 0 : index
    %c40 = arith.constant 40 : index
    %98 = vector.load %arg14[%c0_79, %c0_80, %c40] : memref<8x8x108xf32, #tpu.memory_space<vmem>>, vector<8x8x4xf32>
    tpu.vector_store %arg14[%c0_79, %c0_80, %c40], %97 {strides = array<i32>} : memref<8x8x108xf32, #tpu.memory_space<vmem>>, vector<8x8x4xf32>,
    %99 = vector.extract_strided_slice %94 {offsets = [0, 2, 0], sizes = [8, 8, 4], strides = [1, 1, 1]} : vector<10x10x4xf32> to vector<8x8x4xf32>
    %c0_81 = arith.constant 0 : index
    %c0_82 = arith.constant 0 : index
    %c44 = arith.constant 44 : index
    %100 = vector.load %arg14[%c0_81, %c0_82, %c44] : memref<8x8x108xf32, #tpu.memory_space<vmem>>, vector<8x8x4xf32>
    tpu.vector_store %arg14[%c0_81, %c0_82, %c44], %99 {strides = array<i32>} : memref<8x8x108xf32, #tpu.memory_space<vmem>>, vector<8x8x4xf32>,
    %101 = vector.extract_strided_slice %94 {offsets = [1, 0, 0], sizes = [8, 8, 4], strides = [1, 1, 1]} : vector<10x10x4xf32> to vector<8x8x4xf32>
    %c0_83 = arith.constant 0 : index
    %c0_84 = arith.constant 0 : index
    %c48 = arith.constant 48 : index
    %102 = vector.load %arg14[%c0_83, %c0_84, %c48] : memref<8x8x108xf32, #tpu.memory_space<vmem>>, vector<8x8x4xf32>
    tpu.vector_store %arg14[%c0_83, %c0_84, %c48], %101 {strides = array<i32>} : memref<8x8x108xf32, #tpu.memory_space<vmem>>, vector<8x8x4xf32>,
    %103 = vector.extract_strided_slice %94 {offsets = [1, 1, 0], sizes = [8, 8, 4], strides = [1, 1, 1]} : vector<10x10x4xf32> to vector<8x8x4xf32>
    %c0_85 = arith.constant 0 : index
    %c0_86 = arith.constant 0 : index
    %c52 = arith.constant 52 : index
    %104 = vector.load %arg14[%c0_85, %c0_86, %c52] : memref<8x8x108xf32, #tpu.memory_space<vmem>>, vector<8x8x4xf32>
    tpu.vector_store %arg14[%c0_85, %c0_86, %c52], %103 {strides = array<i32>} : memref<8x8x108xf32, #tpu.memory_space<vmem>>, vector<8x8x4xf32>,
    %105 = vector.extract_strided_slice %94 {offsets = [1, 2, 0], sizes = [8, 8, 4], strides = [1, 1, 1]} : vector<10x10x4xf32> to vector<8x8x4xf32>
    %c0_87 = arith.constant 0 : index
    %c0_88 = arith.constant 0 : index
    %c56 = arith.constant 56 : index
    %106 = vector.load %arg14[%c0_87, %c0_88, %c56] : memref<8x8x108xf32, #tpu.memory_space<vmem>>, vector<8x8x4xf32>
    tpu.vector_store %arg14[%c0_87, %c0_88, %c56], %105 {strides = array<i32>} : memref<8x8x108xf32, #tpu.memory_space<vmem>>, vector<8x8x4xf32>,
    %107 = vector.extract_strided_slice %94 {offsets = [2, 0, 0], sizes = [8, 8, 4], strides = [1, 1, 1]} : vector<10x10x4xf32> to vector<8x8x4xf32>
    %c0_89 = arith.constant 0 : index
    %c0_90 = arith.constant 0 : index
    %c60 = arith.constant 60 : index
    %108 = vector.load %arg14[%c0_89, %c0_90, %c60] : memref<8x8x108xf32, #tpu.memory_space<vmem>>, vector<8x8x4xf32>
    tpu.vector_store %arg14[%c0_89, %c0_90, %c60], %107 {strides = array<i32>} : memref<8x8x108xf32, #tpu.memory_space<vmem>>, vector<8x8x4xf32>,
    %109 = vector.extract_strided_slice %94 {offsets = [2, 1, 0], sizes = [8, 8, 4], strides = [1, 1, 1]} : vector<10x10x4xf32> to vector<8x8x4xf32>
    %c0_91 = arith.constant 0 : index
    %c0_92 = arith.constant 0 : index
    %c64 = arith.constant 64 : index
    %110 = vector.load %arg14[%c0_91, %c0_92, %c64] : memref<8x8x108xf32, #tpu.memory_space<vmem>>, vector<8x8x4xf32>
    tpu.vector_store %arg14[%c0_91, %c0_92, %c64], %109 {strides = array<i32>} : memref<8x8x108xf32, #tpu.memory_space<vmem>>, vector<8x8x4xf32>,
    %111 = vector.extract_strided_slice %94 {offsets = [2, 2, 0], sizes = [8, 8, 4], strides = [1, 1, 1]} : vector<10x10x4xf32> to vector<8x8x4xf32>
    %c0_93 = arith.constant 0 : index
    %c0_94 = arith.constant 0 : index
    %c68 = arith.constant 68 : index
    %112 = vector.load %arg14[%c0_93, %c0_94, %c68] : memref<8x8x108xf32, #tpu.memory_space<vmem>>, vector<8x8x4xf32>
    tpu.vector_store %arg14[%c0_93, %c0_94, %c68], %111 {strides = array<i32>} : memref<8x8x108xf32, #tpu.memory_space<vmem>>, vector<8x8x4xf32>,
    %c2_95 = arith.constant 2 : index
    %c0_96 = arith.constant 0 : index
    %c0_97 = arith.constant 0 : index
    %c0_98 = arith.constant 0 : index
    %113 = vector.load %arg13[%c2_95, %c0_96, %c0_97, %c0_98] : memref<4x10x10x4xf32, #tpu.memory_space<vmem>>, vector<1x10x10x4xf32>
    %114 = vector.shape_cast %113 : vector<1x10x10x4xf32> to vector<10x10x4xf32>
    %115 = vector.extract_strided_slice %114 {offsets = [0, 0, 0], sizes = [8, 8, 4], strides = [1, 1, 1]} : vector<10x10x4xf32> to vector<8x8x4xf32>
    %c0_99 = arith.constant 0 : index
    %c0_100 = arith.constant 0 : index
    %c72 = arith.constant 72 : index
    %116 = vector.load %arg14[%c0_99, %c0_100, %c72] : memref<8x8x108xf32, #tpu.memory_space<vmem>>, vector<8x8x4xf32>
    tpu.vector_store %arg14[%c0_99, %c0_100, %c72], %115 {strides = array<i32>} : memref<8x8x108xf32, #tpu.memory_space<vmem>>, vector<8x8x4xf32>,
    %117 = vector.extract_strided_slice %114 {offsets = [0, 1, 0], sizes = [8, 8, 4], strides = [1, 1, 1]} : vector<10x10x4xf32> to vector<8x8x4xf32>
    %c0_101 = arith.constant 0 : index
    %c0_102 = arith.constant 0 : index
    %c76 = arith.constant 76 : index
    %118 = vector.load %arg14[%c0_101, %c0_102, %c76] : memref<8x8x108xf32, #tpu.memory_space<vmem>>, vector<8x8x4xf32>
    tpu.vector_store %arg14[%c0_101, %c0_102, %c76], %117 {strides = array<i32>} : memref<8x8x108xf32, #tpu.memory_space<vmem>>, vector<8x8x4xf32>,
    %119 = vector.extract_strided_slice %114 {offsets = [0, 2, 0], sizes = [8, 8, 4], strides = [1, 1, 1]} : vector<10x10x4xf32> to vector<8x8x4xf32>
    %c0_103 = arith.constant 0 : index
    %c0_104 = arith.constant 0 : index
    %c80 = arith.constant 80 : index
    %120 = vector.load %arg14[%c0_103, %c0_104, %c80] : memref<8x8x108xf32, #tpu.memory_space<vmem>>, vector<8x8x4xf32>
    tpu.vector_store %arg14[%c0_103, %c0_104, %c80], %119 {strides = array<i32>} : memref<8x8x108xf32, #tpu.memory_space<vmem>>, vector<8x8x4xf32>,
    %121 = vector.extract_strided_slice %114 {offsets = [1, 0, 0], sizes = [8, 8, 4], strides = [1, 1, 1]} : vector<10x10x4xf32> to vector<8x8x4xf32>
    %c0_105 = arith.constant 0 : index
    %c0_106 = arith.constant 0 : index
    %c84 = arith.constant 84 : index
    %122 = vector.load %arg14[%c0_105, %c0_106, %c84] : memref<8x8x108xf32, #tpu.memory_space<vmem>>, vector<8x8x4xf32>
    tpu.vector_store %arg14[%c0_105, %c0_106, %c84], %121 {strides = array<i32>} : memref<8x8x108xf32, #tpu.memory_space<vmem>>, vector<8x8x4xf32>,
    %123 = vector.extract_strided_slice %114 {offsets = [1, 1, 0], sizes = [8, 8, 4], strides = [1, 1, 1]} : vector<10x10x4xf32> to vector<8x8x4xf32>
    %c0_107 = arith.constant 0 : index
    %c0_108 = arith.constant 0 : index
    %c88 = arith.constant 88 : index
    %124 = vector.load %arg14[%c0_107, %c0_108, %c88] : memref<8x8x108xf32, #tpu.memory_space<vmem>>, vector<8x8x4xf32>
    tpu.vector_store %arg14[%c0_107, %c0_108, %c88], %123 {strides = array<i32>} : memref<8x8x108xf32, #tpu.memory_space<vmem>>, vector<8x8x4xf32>,
    %125 = vector.extract_strided_slice %114 {offsets = [1, 2, 0], sizes = [8, 8, 4], strides = [1, 1, 1]} : vector<10x10x4xf32> to vector<8x8x4xf32>
    %c0_109 = arith.constant 0 : index
    %c0_110 = arith.constant 0 : index
    %c92 = arith.constant 92 : index
    %126 = vector.load %arg14[%c0_109, %c0_110, %c92] : memref<8x8x108xf32, #tpu.memory_space<vmem>>, vector<8x8x4xf32>
    tpu.vector_store %arg14[%c0_109, %c0_110, %c92], %125 {strides = array<i32>} : memref<8x8x108xf32, #tpu.memory_space<vmem>>, vector<8x8x4xf32>,
    %127 = vector.extract_strided_slice %114 {offsets = [2, 0, 0], sizes = [8, 8, 4], strides = [1, 1, 1]} : vector<10x10x4xf32> to vector<8x8x4xf32>
    %c0_111 = arith.constant 0 : index
    %c0_112 = arith.constant 0 : index
    %c96 = arith.constant 96 : index
    %128 = vector.load %arg14[%c0_111, %c0_112, %c96] : memref<8x8x108xf32, #tpu.memory_space<vmem>>, vector<8x8x4xf32>
    tpu.vector_store %arg14[%c0_111, %c0_112, %c96], %127 {strides = array<i32>} : memref<8x8x108xf32, #tpu.memory_space<vmem>>, vector<8x8x4xf32>,
    %129 = vector.extract_strided_slice %114 {offsets = [2, 1, 0], sizes = [8, 8, 4], strides = [1, 1, 1]} : vector<10x10x4xf32> to vector<8x8x4xf32>
    %c0_113 = arith.constant 0 : index
    %c0_114 = arith.constant 0 : index
    %c100 = arith.constant 100 : index
    %130 = vector.load %arg14[%c0_113, %c0_114, %c100] : memref<8x8x108xf32, #tpu.memory_space<vmem>>, vector<8x8x4xf32>
    tpu.vector_store %arg14[%c0_113, %c0_114, %c100], %129 {strides = array<i32>} : memref<8x8x108xf32, #tpu.memory_space<vmem>>, vector<8x8x4xf32>,
    %131 = vector.extract_strided_slice %114 {offsets = [2, 2, 0], sizes = [8, 8, 4], strides = [1, 1, 1]} : vector<10x10x4xf32> to vector<8x8x4xf32>
    %c0_115 = arith.constant 0 : index
    %c0_116 = arith.constant 0 : index
    %c104 = arith.constant 104 : index
    %132 = vector.load %arg14[%c0_115, %c0_116, %c104] : memref<8x8x108xf32, #tpu.memory_space<vmem>>, vector<8x8x4xf32>
    tpu.vector_store %arg14[%c0_115, %c0_116, %c104], %131 {strides = array<i32>} : memref<8x8x108xf32, #tpu.memory_space<vmem>>, vector<8x8x4xf32>,
    %c0_117 = arith.constant 0 : index
    %c0_118 = arith.constant 0 : index
    %c0_119 = arith.constant 0 : index
    %133 = vector.load %arg14[%c0_117, %c0_118, %c0_119] : memref<8x8x108xf32, #tpu.memory_space<vmem>>, vector<8x8x108xf32>
    %134 = vector.shape_cast %133 : vector<8x8x108xf32> to vector<64x108xf32>
    %135 = arith.truncf %134 : vector<64x108xf32> to vector<64x108xbf16>
    %cst_120 = arith.constant dense<0.000000e+00> : vector<64x4xf32>
    %136 = tpu.matmul %135, %1, %cst_120 {dimension_numbers = #tpu.dot_dimension_numbers<[1], [0], [0], [1], [0, 0, 1, 1], [], []>} : vector<64x108xbf16>, vector<108x4xbf16>, vector<64x4xf32> -> vector<64x4xf32>
    %137 = arith.mulf %136, %11 : vector<64x4xf32>
    %138 = arith.addf %137, %14 : vector<64x4xf32>
    %cst_121 = arith.constant 0.000000e+00 : f32
    %139 = vector.broadcast %cst_121 : f32 to vector<64x4xf32>
    %140 = arith.maximumf %138, %139 : vector<64x4xf32>
    %141 = arith.truncf %140 : vector<64x4xf32> to vector<64x4xbf16>
    %cst_122 = arith.constant dense<0.000000e+00> : vector<64x16xf32>
    %142 = tpu.matmul %141, %2, %cst_122 {dimension_numbers = #tpu.dot_dimension_numbers<[1], [0], [0], [1], [0, 0, 1, 1], [], []>} : vector<64x4xbf16>, vector<4x16xbf16>, vector<64x16xf32> -> vector<64x16xf32>
    %c2_i32_123 = arith.constant 2 : i32
    %143 = arith.muli %arg1, %c2_i32_123 : i32
    %c0_i32_124 = arith.constant 0 : i32
    %144 = arith.addi %143, %c0_i32_124 : i32
    %c0_125 = arith.constant 0 : index
    %145 = arith.index_cast %144 : i32 to index
    %c0_126 = arith.constant 0 : index
    %c0_127 = arith.constant 0 : index
    %146 = vector.load %arg2[%c0_125, %145, %c0_126, %c0_127] : memref<1x4x64x16xf32, #tpu.memory_space<vmem>>, vector<1x1x64x16xf32>
    %147 = vector.shape_cast %146 : vector<1x1x64x16xf32> to vector<1x64x16xf32>
    %148 = vector.shape_cast %147 : vector<1x64x16xf32> to vector<64x16xf32>
    %149 = arith.mulf %142, %17 : vector<64x16xf32>
    %150 = arith.addf %149, %20 : vector<64x16xf32>
    %151 = arith.addf %150, %148 : vector<64x16xf32>
    %cst_128 = arith.constant 0.000000e+00 : f32
    %152 = vector.broadcast %cst_128 : f32 to vector<64x16xf32>
    %153 = arith.maximumf %151, %152 : vector<64x16xf32>
    %154 = vector.shape_cast %153 : vector<64x16xf32> to vector<8x8x16xf32>
    %155 = vector.extract_strided_slice %154 {offsets = [0, 0, 0], sizes = [8, 1, 16], strides = [1, 1, 1]} : vector<8x8x16xf32> to vector<8x1x16xf32>
    %156 = vector.shape_cast %155 : vector<8x1x16xf32> to vector<8x16xf32>
    %c0_129 = arith.constant 0 : index
    %c0_130 = arith.constant 0 : index
    %c0_131 = arith.constant 0 : index
    %c0_132 = arith.constant 0 : index
    %157 = vector.load %arg12[%c0_129, %c0_130, %c0_131, %c0_132] : memref<1x2x8x128xf32, #tpu.memory_space<vmem>>, vector<1x1x8x16xf32>
    %158 = vector.shape_cast %157 : vector<1x1x8x16xf32> to vector<8x16xf32>
    %159 = vector.shape_cast %156 : vector<8x16xf32> to vector<1x1x8x16xf32>
    tpu.vector_store %arg12[%c0_129, %c0_130, %c0_131, %c0_132], %159 {strides = array<i32>} : memref<1x2x8x128xf32, #tpu.memory_space<vmem>>, vector<1x1x8x16xf32>,
    %160 = vector.extract_strided_slice %154 {offsets = [0, 1, 0], sizes = [8, 1, 16], strides = [1, 1, 1]} : vector<8x8x16xf32> to vector<8x1x16xf32>
    %161 = vector.shape_cast %160 : vector<8x1x16xf32> to vector<8x16xf32>
    %c0_133 = arith.constant 0 : index
    %c0_134 = arith.constant 0 : index
    %c0_135 = arith.constant 0 : index
    %c16_136 = arith.constant 16 : index
    %162 = vector.load %arg12[%c0_133, %c0_134, %c0_135, %c16_136] : memref<1x2x8x128xf32, #tpu.memory_space<vmem>>, vector<1x1x8x16xf32>
    %163 = vector.shape_cast %162 : vector<1x1x8x16xf32> to vector<8x16xf32>
    %164 = vector.shape_cast %161 : vector<8x16xf32> to vector<1x1x8x16xf32>
    tpu.vector_store %arg12[%c0_133, %c0_134, %c0_135, %c16_136], %164 {strides = array<i32>} : memref<1x2x8x128xf32, #tpu.memory_space<vmem>>, vector<1x1x8x16xf32>,
    %165 = vector.extract_strided_slice %154 {offsets = [0, 2, 0], sizes = [8, 1, 16], strides = [1, 1, 1]} : vector<8x8x16xf32> to vector<8x1x16xf32>
    %166 = vector.shape_cast %165 : vector<8x1x16xf32> to vector<8x16xf32>
    %c0_137 = arith.constant 0 : index
    %c0_138 = arith.constant 0 : index
    %c0_139 = arith.constant 0 : index
    %c32_140 = arith.constant 32 : index
    %167 = vector.load %arg12[%c0_137, %c0_138, %c0_139, %c32_140] : memref<1x2x8x128xf32, #tpu.memory_space<vmem>>, vector<1x1x8x16xf32>
    %168 = vector.shape_cast %167 : vector<1x1x8x16xf32> to vector<8x16xf32>
    %169 = vector.shape_cast %166 : vector<8x16xf32> to vector<1x1x8x16xf32>
    tpu.vector_store %arg12[%c0_137, %c0_138, %c0_139, %c32_140], %169 {strides = array<i32>} : memref<1x2x8x128xf32, #tpu.memory_space<vmem>>, vector<1x1x8x16xf32>,
    %170 = vector.extract_strided_slice %154 {offsets = [0, 3, 0], sizes = [8, 1, 16], strides = [1, 1, 1]} : vector<8x8x16xf32> to vector<8x1x16xf32>
    %171 = vector.shape_cast %170 : vector<8x1x16xf32> to vector<8x16xf32>
    %c0_141 = arith.constant 0 : index
    %c0_142 = arith.constant 0 : index
    %c0_143 = arith.constant 0 : index
    %c48_144 = arith.constant 48 : index
    %172 = vector.load %arg12[%c0_141, %c0_142, %c0_143, %c48_144] : memref<1x2x8x128xf32, #tpu.memory_space<vmem>>, vector<1x1x8x16xf32>
    %173 = vector.shape_cast %172 : vector<1x1x8x16xf32> to vector<8x16xf32>
    %174 = vector.shape_cast %171 : vector<8x16xf32> to vector<1x1x8x16xf32>
    tpu.vector_store %arg12[%c0_141, %c0_142, %c0_143, %c48_144], %174 {strides = array<i32>} : memref<1x2x8x128xf32, #tpu.memory_space<vmem>>, vector<1x1x8x16xf32>,
    %175 = vector.extract_strided_slice %154 {offsets = [0, 4, 0], sizes = [8, 1, 16], strides = [1, 1, 1]} : vector<8x8x16xf32> to vector<8x1x16xf32>
    %176 = vector.shape_cast %175 : vector<8x1x16xf32> to vector<8x16xf32>
    %c0_145 = arith.constant 0 : index
    %c0_146 = arith.constant 0 : index
    %c0_147 = arith.constant 0 : index
    %c64_148 = arith.constant 64 : index
    %177 = vector.load %arg12[%c0_145, %c0_146, %c0_147, %c64_148] : memref<1x2x8x128xf32, #tpu.memory_space<vmem>>, vector<1x1x8x16xf32>
    %178 = vector.shape_cast %177 : vector<1x1x8x16xf32> to vector<8x16xf32>
    %179 = vector.shape_cast %176 : vector<8x16xf32> to vector<1x1x8x16xf32>
    tpu.vector_store %arg12[%c0_145, %c0_146, %c0_147, %c64_148], %179 {strides = array<i32>} : memref<1x2x8x128xf32, #tpu.memory_space<vmem>>, vector<1x1x8x16xf32>,
    %180 = vector.extract_strided_slice %154 {offsets = [0, 5, 0], sizes = [8, 1, 16], strides = [1, 1, 1]} : vector<8x8x16xf32> to vector<8x1x16xf32>
    %181 = vector.shape_cast %180 : vector<8x1x16xf32> to vector<8x16xf32>
    %c0_149 = arith.constant 0 : index
    %c0_150 = arith.constant 0 : index
    %c0_151 = arith.constant 0 : index
    %c80_152 = arith.constant 80 : index
    %182 = vector.load %arg12[%c0_149, %c0_150, %c0_151, %c80_152] : memref<1x2x8x128xf32, #tpu.memory_space<vmem>>, vector<1x1x8x16xf32>
    %183 = vector.shape_cast %182 : vector<1x1x8x16xf32> to vector<8x16xf32>
    %184 = vector.shape_cast %181 : vector<8x16xf32> to vector<1x1x8x16xf32>
    tpu.vector_store %arg12[%c0_149, %c0_150, %c0_151, %c80_152], %184 {strides = array<i32>} : memref<1x2x8x128xf32, #tpu.memory_space<vmem>>, vector<1x1x8x16xf32>,
    %185 = vector.extract_strided_slice %154 {offsets = [0, 6, 0], sizes = [8, 1, 16], strides = [1, 1, 1]} : vector<8x8x16xf32> to vector<8x1x16xf32>
    %186 = vector.shape_cast %185 : vector<8x1x16xf32> to vector<8x16xf32>
    %c0_153 = arith.constant 0 : index
    %c0_154 = arith.constant 0 : index
    %c0_155 = arith.constant 0 : index
    %c96_156 = arith.constant 96 : index
    %187 = vector.load %arg12[%c0_153, %c0_154, %c0_155, %c96_156] : memref<1x2x8x128xf32, #tpu.memory_space<vmem>>, vector<1x1x8x16xf32>
    %188 = vector.shape_cast %187 : vector<1x1x8x16xf32> to vector<8x16xf32>
    %189 = vector.shape_cast %186 : vector<8x16xf32> to vector<1x1x8x16xf32>
    tpu.vector_store %arg12[%c0_153, %c0_154, %c0_155, %c96_156], %189 {strides = array<i32>} : memref<1x2x8x128xf32, #tpu.memory_space<vmem>>, vector<1x1x8x16xf32>,
    %190 = vector.extract_strided_slice %154 {offsets = [0, 7, 0], sizes = [8, 1, 16], strides = [1, 1, 1]} : vector<8x8x16xf32> to vector<8x1x16xf32>
    %191 = vector.shape_cast %190 : vector<8x1x16xf32> to vector<8x16xf32>
    %c0_157 = arith.constant 0 : index
    %c0_158 = arith.constant 0 : index
    %c0_159 = arith.constant 0 : index
    %c112 = arith.constant 112 : index
    %192 = vector.load %arg12[%c0_157, %c0_158, %c0_159, %c112] : memref<1x2x8x128xf32, #tpu.memory_space<vmem>>, vector<1x1x8x16xf32>
    %193 = vector.shape_cast %192 : vector<1x1x8x16xf32> to vector<8x16xf32>
    %194 = vector.shape_cast %191 : vector<8x16xf32> to vector<1x1x8x16xf32>
    tpu.vector_store %arg12[%c0_157, %c0_158, %c0_159, %c112], %194 {strides = array<i32>} : memref<1x2x8x128xf32, #tpu.memory_space<vmem>>, vector<1x1x8x16xf32>,
    %c1_160 = arith.constant 1 : index
    %c0_161 = arith.constant 0 : index
    %c0_162 = arith.constant 0 : index
    %c0_163 = arith.constant 0 : index
    %195 = vector.load %arg13[%c1_160, %c0_161, %c0_162, %c0_163] : memref<4x10x10x4xf32, #tpu.memory_space<vmem>>, vector<1x10x10x4xf32>
    %196 = vector.shape_cast %195 : vector<1x10x10x4xf32> to vector<10x10x4xf32>
    %197 = vector.extract_strided_slice %196 {offsets = [0, 0, 0], sizes = [8, 8, 4], strides = [1, 1, 1]} : vector<10x10x4xf32> to vector<8x8x4xf32>
    %c0_164 = arith.constant 0 : index
    %c0_165 = arith.constant 0 : index
    %c0_166 = arith.constant 0 : index
    %198 = vector.load %arg14[%c0_164, %c0_165, %c0_166] : memref<8x8x108xf32, #tpu.memory_space<vmem>>, vector<8x8x4xf32>
    tpu.vector_store %arg14[%c0_164, %c0_165, %c0_166], %197 {strides = array<i32>} : memref<8x8x108xf32, #tpu.memory_space<vmem>>, vector<8x8x4xf32>,
    %199 = vector.extract_strided_slice %196 {offsets = [0, 1, 0], sizes = [8, 8, 4], strides = [1, 1, 1]} : vector<10x10x4xf32> to vector<8x8x4xf32>
    %c0_167 = arith.constant 0 : index
    %c0_168 = arith.constant 0 : index
    %c4_169 = arith.constant 4 : index
    %200 = vector.load %arg14[%c0_167, %c0_168, %c4_169] : memref<8x8x108xf32, #tpu.memory_space<vmem>>, vector<8x8x4xf32>
    tpu.vector_store %arg14[%c0_167, %c0_168, %c4_169], %199 {strides = array<i32>} : memref<8x8x108xf32, #tpu.memory_space<vmem>>, vector<8x8x4xf32>,
    %201 = vector.extract_strided_slice %196 {offsets = [0, 2, 0], sizes = [8, 8, 4], strides = [1, 1, 1]} : vector<10x10x4xf32> to vector<8x8x4xf32>
    %c0_170 = arith.constant 0 : index
    %c0_171 = arith.constant 0 : index
    %c8_172 = arith.constant 8 : index
    %202 = vector.load %arg14[%c0_170, %c0_171, %c8_172] : memref<8x8x108xf32, #tpu.memory_space<vmem>>, vector<8x8x4xf32>
    tpu.vector_store %arg14[%c0_170, %c0_171, %c8_172], %201 {strides = array<i32>} : memref<8x8x108xf32, #tpu.memory_space<vmem>>, vector<8x8x4xf32>,
    %203 = vector.extract_strided_slice %196 {offsets = [1, 0, 0], sizes = [8, 8, 4], strides = [1, 1, 1]} : vector<10x10x4xf32> to vector<8x8x4xf32>
    %c0_173 = arith.constant 0 : index
    %c0_174 = arith.constant 0 : index
    %c12_175 = arith.constant 12 : index
    %204 = vector.load %arg14[%c0_173, %c0_174, %c12_175] : memref<8x8x108xf32, #tpu.memory_space<vmem>>, vector<8x8x4xf32>
    tpu.vector_store %arg14[%c0_173, %c0_174, %c12_175], %203 {strides = array<i32>} : memref<8x8x108xf32, #tpu.memory_space<vmem>>, vector<8x8x4xf32>,
    %205 = vector.extract_strided_slice %196 {offsets = [1, 1, 0], sizes = [8, 8, 4], strides = [1, 1, 1]} : vector<10x10x4xf32> to vector<8x8x4xf32>
    %c0_176 = arith.constant 0 : index
    %c0_177 = arith.constant 0 : index
    %c16_178 = arith.constant 16 : index
    %206 = vector.load %arg14[%c0_176, %c0_177, %c16_178] : memref<8x8x108xf32, #tpu.memory_space<vmem>>, vector<8x8x4xf32>
    tpu.vector_store %arg14[%c0_176, %c0_177, %c16_178], %205 {strides = array<i32>} : memref<8x8x108xf32, #tpu.memory_space<vmem>>, vector<8x8x4xf32>,
    %207 = vector.extract_strided_slice %196 {offsets = [1, 2, 0], sizes = [8, 8, 4], strides = [1, 1, 1]} : vector<10x10x4xf32> to vector<8x8x4xf32>
    %c0_179 = arith.constant 0 : index
    %c0_180 = arith.constant 0 : index
    %c20_181 = arith.constant 20 : index
    %208 = vector.load %arg14[%c0_179, %c0_180, %c20_181] : memref<8x8x108xf32, #tpu.memory_space<vmem>>, vector<8x8x4xf32>
    tpu.vector_store %arg14[%c0_179, %c0_180, %c20_181], %207 {strides = array<i32>} : memref<8x8x108xf32, #tpu.memory_space<vmem>>, vector<8x8x4xf32>,
    %209 = vector.extract_strided_slice %196 {offsets = [2, 0, 0], sizes = [8, 8, 4], strides = [1, 1, 1]} : vector<10x10x4xf32> to vector<8x8x4xf32>
    %c0_182 = arith.constant 0 : index
    %c0_183 = arith.constant 0 : index
    %c24_184 = arith.constant 24 : index
    %210 = vector.load %arg14[%c0_182, %c0_183, %c24_184] : memref<8x8x108xf32, #tpu.memory_space<vmem>>, vector<8x8x4xf32>
    tpu.vector_store %arg14[%c0_182, %c0_183, %c24_184], %209 {strides = array<i32>} : memref<8x8x108xf32, #tpu.memory_space<vmem>>, vector<8x8x4xf32>,
    %211 = vector.extract_strided_slice %196 {offsets = [2, 1, 0], sizes = [8, 8, 4], strides = [1, 1, 1]} : vector<10x10x4xf32> to vector<8x8x4xf32>
    %c0_185 = arith.constant 0 : index
    %c0_186 = arith.constant 0 : index
    %c28_187 = arith.constant 28 : index
    %212 = vector.load %arg14[%c0_185, %c0_186, %c28_187] : memref<8x8x108xf32, #tpu.memory_space<vmem>>, vector<8x8x4xf32>
    tpu.vector_store %arg14[%c0_185, %c0_186, %c28_187], %211 {strides = array<i32>} : memref<8x8x108xf32, #tpu.memory_space<vmem>>, vector<8x8x4xf32>,
    %213 = vector.extract_strided_slice %196 {offsets = [2, 2, 0], sizes = [8, 8, 4], strides = [1, 1, 1]} : vector<10x10x4xf32> to vector<8x8x4xf32>
    %c0_188 = arith.constant 0 : index
    %c0_189 = arith.constant 0 : index
    %c32_190 = arith.constant 32 : index
    %214 = vector.load %arg14[%c0_188, %c0_189, %c32_190] : memref<8x8x108xf32, #tpu.memory_space<vmem>>, vector<8x8x4xf32>
    tpu.vector_store %arg14[%c0_188, %c0_189, %c32_190], %213 {strides = array<i32>} : memref<8x8x108xf32, #tpu.memory_space<vmem>>, vector<8x8x4xf32>,
    %c2_191 = arith.constant 2 : index
    %c0_192 = arith.constant 0 : index
    %c0_193 = arith.constant 0 : index
    %c0_194 = arith.constant 0 : index
    %215 = vector.load %arg13[%c2_191, %c0_192, %c0_193, %c0_194] : memref<4x10x10x4xf32, #tpu.memory_space<vmem>>, vector<1x10x10x4xf32>
    %216 = vector.shape_cast %215 : vector<1x10x10x4xf32> to vector<10x10x4xf32>
    %217 = vector.extract_strided_slice %216 {offsets = [0, 0, 0], sizes = [8, 8, 4], strides = [1, 1, 1]} : vector<10x10x4xf32> to vector<8x8x4xf32>
    %c0_195 = arith.constant 0 : index
    %c0_196 = arith.constant 0 : index
    %c36_197 = arith.constant 36 : index
    %218 = vector.load %arg14[%c0_195, %c0_196, %c36_197] : memref<8x8x108xf32, #tpu.memory_space<vmem>>, vector<8x8x4xf32>
    tpu.vector_store %arg14[%c0_195, %c0_196, %c36_197], %217 {strides = array<i32>} : memref<8x8x108xf32, #tpu.memory_space<vmem>>, vector<8x8x4xf32>,
    %219 = vector.extract_strided_slice %216 {offsets = [0, 1, 0], sizes = [8, 8, 4], strides = [1, 1, 1]} : vector<10x10x4xf32> to vector<8x8x4xf32>
    %c0_198 = arith.constant 0 : index
    %c0_199 = arith.constant 0 : index
    %c40_200 = arith.constant 40 : index
    %220 = vector.load %arg14[%c0_198, %c0_199, %c40_200] : memref<8x8x108xf32, #tpu.memory_space<vmem>>, vector<8x8x4xf32>
    tpu.vector_store %arg14[%c0_198, %c0_199, %c40_200], %219 {strides = array<i32>} : memref<8x8x108xf32, #tpu.memory_space<vmem>>, vector<8x8x4xf32>,
    %221 = vector.extract_strided_slice %216 {offsets = [0, 2, 0], sizes = [8, 8, 4], strides = [1, 1, 1]} : vector<10x10x4xf32> to vector<8x8x4xf32>
    %c0_201 = arith.constant 0 : index
    %c0_202 = arith.constant 0 : index
    %c44_203 = arith.constant 44 : index
    %222 = vector.load %arg14[%c0_201, %c0_202, %c44_203] : memref<8x8x108xf32, #tpu.memory_space<vmem>>, vector<8x8x4xf32>
    tpu.vector_store %arg14[%c0_201, %c0_202, %c44_203], %221 {strides = array<i32>} : memref<8x8x108xf32, #tpu.memory_space<vmem>>, vector<8x8x4xf32>,
    %223 = vector.extract_strided_slice %216 {offsets = [1, 0, 0], sizes = [8, 8, 4], strides = [1, 1, 1]} : vector<10x10x4xf32> to vector<8x8x4xf32>
    %c0_204 = arith.constant 0 : index
    %c0_205 = arith.constant 0 : index
    %c48_206 = arith.constant 48 : index
    %224 = vector.load %arg14[%c0_204, %c0_205, %c48_206] : memref<8x8x108xf32, #tpu.memory_space<vmem>>, vector<8x8x4xf32>
    tpu.vector_store %arg14[%c0_204, %c0_205, %c48_206], %223 {strides = array<i32>} : memref<8x8x108xf32, #tpu.memory_space<vmem>>, vector<8x8x4xf32>,
    %225 = vector.extract_strided_slice %216 {offsets = [1, 1, 0], sizes = [8, 8, 4], strides = [1, 1, 1]} : vector<10x10x4xf32> to vector<8x8x4xf32>
    %c0_207 = arith.constant 0 : index
    %c0_208 = arith.constant 0 : index
    %c52_209 = arith.constant 52 : index
    %226 = vector.load %arg14[%c0_207, %c0_208, %c52_209] : memref<8x8x108xf32, #tpu.memory_space<vmem>>, vector<8x8x4xf32>
    tpu.vector_store %arg14[%c0_207, %c0_208, %c52_209], %225 {strides = array<i32>} : memref<8x8x108xf32, #tpu.memory_space<vmem>>, vector<8x8x4xf32>,
    %227 = vector.extract_strided_slice %216 {offsets = [1, 2, 0], sizes = [8, 8, 4], strides = [1, 1, 1]} : vector<10x10x4xf32> to vector<8x8x4xf32>
    %c0_210 = arith.constant 0 : index
    %c0_211 = arith.constant 0 : index
    %c56_212 = arith.constant 56 : index
    %228 = vector.load %arg14[%c0_210, %c0_211, %c56_212] : memref<8x8x108xf32, #tpu.memory_space<vmem>>, vector<8x8x4xf32>
    tpu.vector_store %arg14[%c0_210, %c0_211, %c56_212], %227 {strides = array<i32>} : memref<8x8x108xf32, #tpu.memory_space<vmem>>, vector<8x8x4xf32>,
    %229 = vector.extract_strided_slice %216 {offsets = [2, 0, 0], sizes = [8, 8, 4], strides = [1, 1, 1]} : vector<10x10x4xf32> to vector<8x8x4xf32>
    %c0_213 = arith.constant 0 : index
    %c0_214 = arith.constant 0 : index
    %c60_215 = arith.constant 60 : index
    %230 = vector.load %arg14[%c0_213, %c0_214, %c60_215] : memref<8x8x108xf32, #tpu.memory_space<vmem>>, vector<8x8x4xf32>
    tpu.vector_store %arg14[%c0_213, %c0_214, %c60_215], %229 {strides = array<i32>} : memref<8x8x108xf32, #tpu.memory_space<vmem>>, vector<8x8x4xf32>,
    %231 = vector.extract_strided_slice %216 {offsets = [2, 1, 0], sizes = [8, 8, 4], strides = [1, 1, 1]} : vector<10x10x4xf32> to vector<8x8x4xf32>
    %c0_216 = arith.constant 0 : index
    %c0_217 = arith.constant 0 : index
    %c64_218 = arith.constant 64 : index
    %232 = vector.load %arg14[%c0_216, %c0_217, %c64_218] : memref<8x8x108xf32, #tpu.memory_space<vmem>>, vector<8x8x4xf32>
    tpu.vector_store %arg14[%c0_216, %c0_217, %c64_218], %231 {strides = array<i32>} : memref<8x8x108xf32, #tpu.memory_space<vmem>>, vector<8x8x4xf32>,
    %233 = vector.extract_strided_slice %216 {offsets = [2, 2, 0], sizes = [8, 8, 4], strides = [1, 1, 1]} : vector<10x10x4xf32> to vector<8x8x4xf32>
    %c0_219 = arith.constant 0 : index
    %c0_220 = arith.constant 0 : index
    %c68_221 = arith.constant 68 : index
    %234 = vector.load %arg14[%c0_219, %c0_220, %c68_221] : memref<8x8x108xf32, #tpu.memory_space<vmem>>, vector<8x8x4xf32>
    tpu.vector_store %arg14[%c0_219, %c0_220, %c68_221], %233 {strides = array<i32>} : memref<8x8x108xf32, #tpu.memory_space<vmem>>, vector<8x8x4xf32>,
    %c3 = arith.constant 3 : index
    %c0_222 = arith.constant 0 : index
    %c0_223 = arith.constant 0 : index
    %c0_224 = arith.constant 0 : index
    %235 = vector.load %arg13[%c3, %c0_222, %c0_223, %c0_224] : memref<4x10x10x4xf32, #tpu.memory_space<vmem>>, vector<1x10x10x4xf32>
    %236 = vector.shape_cast %235 : vector<1x10x10x4xf32> to vector<10x10x4xf32>
    %237 = vector.extract_strided_slice %236 {offsets = [0, 0, 0], sizes = [8, 8, 4], strides = [1, 1, 1]} : vector<10x10x4xf32> to vector<8x8x4xf32>
    %c0_225 = arith.constant 0 : index
    %c0_226 = arith.constant 0 : index
    %c72_227 = arith.constant 72 : index
    %238 = vector.load %arg14[%c0_225, %c0_226, %c72_227] : memref<8x8x108xf32, #tpu.memory_space<vmem>>, vector<8x8x4xf32>
    tpu.vector_store %arg14[%c0_225, %c0_226, %c72_227], %237 {strides = array<i32>} : memref<8x8x108xf32, #tpu.memory_space<vmem>>, vector<8x8x4xf32>,
    %239 = vector.extract_strided_slice %236 {offsets = [0, 1, 0], sizes = [8, 8, 4], strides = [1, 1, 1]} : vector<10x10x4xf32> to vector<8x8x4xf32>
    %c0_228 = arith.constant 0 : index
    %c0_229 = arith.constant 0 : index
    %c76_230 = arith.constant 76 : index
    %240 = vector.load %arg14[%c0_228, %c0_229, %c76_230] : memref<8x8x108xf32, #tpu.memory_space<vmem>>, vector<8x8x4xf32>
    tpu.vector_store %arg14[%c0_228, %c0_229, %c76_230], %239 {strides = array<i32>} : memref<8x8x108xf32, #tpu.memory_space<vmem>>, vector<8x8x4xf32>,
    %241 = vector.extract_strided_slice %236 {offsets = [0, 2, 0], sizes = [8, 8, 4], strides = [1, 1, 1]} : vector<10x10x4xf32> to vector<8x8x4xf32>
    %c0_231 = arith.constant 0 : index
    %c0_232 = arith.constant 0 : index
    %c80_233 = arith.constant 80 : index
    %242 = vector.load %arg14[%c0_231, %c0_232, %c80_233] : memref<8x8x108xf32, #tpu.memory_space<vmem>>, vector<8x8x4xf32>
    tpu.vector_store %arg14[%c0_231, %c0_232, %c80_233], %241 {strides = array<i32>} : memref<8x8x108xf32, #tpu.memory_space<vmem>>, vector<8x8x4xf32>,
    %243 = vector.extract_strided_slice %236 {offsets = [1, 0, 0], sizes = [8, 8, 4], strides = [1, 1, 1]} : vector<10x10x4xf32> to vector<8x8x4xf32>
    %c0_234 = arith.constant 0 : index
    %c0_235 = arith.constant 0 : index
    %c84_236 = arith.constant 84 : index
    %244 = vector.load %arg14[%c0_234, %c0_235, %c84_236] : memref<8x8x108xf32, #tpu.memory_space<vmem>>, vector<8x8x4xf32>
    tpu.vector_store %arg14[%c0_234, %c0_235, %c84_236], %243 {strides = array<i32>} : memref<8x8x108xf32, #tpu.memory_space<vmem>>, vector<8x8x4xf32>,
    %245 = vector.extract_strided_slice %236 {offsets = [1, 1, 0], sizes = [8, 8, 4], strides = [1, 1, 1]} : vector<10x10x4xf32> to vector<8x8x4xf32>
    %c0_237 = arith.constant 0 : index
    %c0_238 = arith.constant 0 : index
    %c88_239 = arith.constant 88 : index
    %246 = vector.load %arg14[%c0_237, %c0_238, %c88_239] : memref<8x8x108xf32, #tpu.memory_space<vmem>>, vector<8x8x4xf32>
    tpu.vector_store %arg14[%c0_237, %c0_238, %c88_239], %245 {strides = array<i32>} : memref<8x8x108xf32, #tpu.memory_space<vmem>>, vector<8x8x4xf32>,
    %247 = vector.extract_strided_slice %236 {offsets = [1, 2, 0], sizes = [8, 8, 4], strides = [1, 1, 1]} : vector<10x10x4xf32> to vector<8x8x4xf32>
    %c0_240 = arith.constant 0 : index
    %c0_241 = arith.constant 0 : index
    %c92_242 = arith.constant 92 : index
    %248 = vector.load %arg14[%c0_240, %c0_241, %c92_242] : memref<8x8x108xf32, #tpu.memory_space<vmem>>, vector<8x8x4xf32>
    tpu.vector_store %arg14[%c0_240, %c0_241, %c92_242], %247 {strides = array<i32>} : memref<8x8x108xf32, #tpu.memory_space<vmem>>, vector<8x8x4xf32>,
    %249 = vector.extract_strided_slice %236 {offsets = [2, 0, 0], sizes = [8, 8, 4], strides = [1, 1, 1]} : vector<10x10x4xf32> to vector<8x8x4xf32>
    %c0_243 = arith.constant 0 : index
    %c0_244 = arith.constant 0 : index
    %c96_245 = arith.constant 96 : index
    %250 = vector.load %arg14[%c0_243, %c0_244, %c96_245] : memref<8x8x108xf32, #tpu.memory_space<vmem>>, vector<8x8x4xf32>
    tpu.vector_store %arg14[%c0_243, %c0_244, %c96_245], %249 {strides = array<i32>} : memref<8x8x108xf32, #tpu.memory_space<vmem>>, vector<8x8x4xf32>,
    %251 = vector.extract_strided_slice %236 {offsets = [2, 1, 0], sizes = [8, 8, 4], strides = [1, 1, 1]} : vector<10x10x4xf32> to vector<8x8x4xf32>
    %c0_246 = arith.constant 0 : index
    %c0_247 = arith.constant 0 : index
    %c100_248 = arith.constant 100 : index
    %252 = vector.load %arg14[%c0_246, %c0_247, %c100_248] : memref<8x8x108xf32, #tpu.memory_space<vmem>>, vector<8x8x4xf32>
    tpu.vector_store %arg14[%c0_246, %c0_247, %c100_248], %251 {strides = array<i32>} : memref<8x8x108xf32, #tpu.memory_space<vmem>>, vector<8x8x4xf32>,
    %253 = vector.extract_strided_slice %236 {offsets = [2, 2, 0], sizes = [8, 8, 4], strides = [1, 1, 1]} : vector<10x10x4xf32> to vector<8x8x4xf32>
    %c0_249 = arith.constant 0 : index
    %c0_250 = arith.constant 0 : index
    %c104_251 = arith.constant 104 : index
    %254 = vector.load %arg14[%c0_249, %c0_250, %c104_251] : memref<8x8x108xf32, #tpu.memory_space<vmem>>, vector<8x8x4xf32>
    tpu.vector_store %arg14[%c0_249, %c0_250, %c104_251], %253 {strides = array<i32>} : memref<8x8x108xf32, #tpu.memory_space<vmem>>, vector<8x8x4xf32>,
    %c0_252 = arith.constant 0 : index
    %c0_253 = arith.constant 0 : index
    %c0_254 = arith.constant 0 : index
    %255 = vector.load %arg14[%c0_252, %c0_253, %c0_254] : memref<8x8x108xf32, #tpu.memory_space<vmem>>, vector<8x8x108xf32>
    %256 = vector.shape_cast %255 : vector<8x8x108xf32> to vector<64x108xf32>
    %257 = arith.truncf %256 : vector<64x108xf32> to vector<64x108xbf16>
    %cst_255 = arith.constant dense<0.000000e+00> : vector<64x4xf32>
    %258 = tpu.matmul %257, %1, %cst_255 {dimension_numbers = #tpu.dot_dimension_numbers<[1], [0], [0], [1], [0, 0, 1, 1], [], []>} : vector<64x108xbf16>, vector<108x4xbf16>, vector<64x4xf32> -> vector<64x4xf32>
    %259 = arith.mulf %258, %11 : vector<64x4xf32>
    %260 = arith.addf %259, %14 : vector<64x4xf32>
    %cst_256 = arith.constant 0.000000e+00 : f32
    %261 = vector.broadcast %cst_256 : f32 to vector<64x4xf32>
    %262 = arith.maximumf %260, %261 : vector<64x4xf32>
    %263 = arith.truncf %262 : vector<64x4xf32> to vector<64x4xbf16>
    %cst_257 = arith.constant dense<0.000000e+00> : vector<64x16xf32>
    %264 = tpu.matmul %263, %2, %cst_257 {dimension_numbers = #tpu.dot_dimension_numbers<[1], [0], [0], [1], [0, 0, 1, 1], [], []>} : vector<64x4xbf16>, vector<4x16xbf16>, vector<64x16xf32> -> vector<64x16xf32>
    %c2_i32_258 = arith.constant 2 : i32
    %265 = arith.muli %arg1, %c2_i32_258 : i32
    %c1_i32_259 = arith.constant 1 : i32
    %266 = arith.addi %265, %c1_i32_259 : i32
    %c0_260 = arith.constant 0 : index
    %267 = arith.index_cast %266 : i32 to index
    %c0_261 = arith.constant 0 : index
    %c0_262 = arith.constant 0 : index
    %268 = vector.load %arg2[%c0_260, %267, %c0_261, %c0_262] : memref<1x4x64x16xf32, #tpu.memory_space<vmem>>, vector<1x1x64x16xf32>
    %269 = vector.shape_cast %268 : vector<1x1x64x16xf32> to vector<1x64x16xf32>
    %270 = vector.shape_cast %269 : vector<1x64x16xf32> to vector<64x16xf32>
    %271 = arith.mulf %264, %17 : vector<64x16xf32>
    %272 = arith.addf %271, %20 : vector<64x16xf32>
    %273 = arith.addf %272, %270 : vector<64x16xf32>
    %cst_263 = arith.constant 0.000000e+00 : f32
    %274 = vector.broadcast %cst_263 : f32 to vector<64x16xf32>
    %275 = arith.maximumf %273, %274 : vector<64x16xf32>
    %276 = vector.shape_cast %275 : vector<64x16xf32> to vector<8x8x16xf32>
    %277 = vector.extract_strided_slice %276 {offsets = [0, 0, 0], sizes = [8, 1, 16], strides = [1, 1, 1]} : vector<8x8x16xf32> to vector<8x1x16xf32>
    %278 = vector.shape_cast %277 : vector<8x1x16xf32> to vector<8x16xf32>
    %c0_264 = arith.constant 0 : index
    %c1_265 = arith.constant 1 : index
    %c0_266 = arith.constant 0 : index
    %c0_267 = arith.constant 0 : index
    %279 = vector.load %arg12[%c0_264, %c1_265, %c0_266, %c0_267] : memref<1x2x8x128xf32, #tpu.memory_space<vmem>>, vector<1x1x8x16xf32>
    %280 = vector.shape_cast %279 : vector<1x1x8x16xf32> to vector<8x16xf32>
    %281 = vector.shape_cast %278 : vector<8x16xf32> to vector<1x1x8x16xf32>
    tpu.vector_store %arg12[%c0_264, %c1_265, %c0_266, %c0_267], %281 {strides = array<i32>} : memref<1x2x8x128xf32, #tpu.memory_space<vmem>>, vector<1x1x8x16xf32>,
    %282 = vector.extract_strided_slice %276 {offsets = [0, 1, 0], sizes = [8, 1, 16], strides = [1, 1, 1]} : vector<8x8x16xf32> to vector<8x1x16xf32>
    %283 = vector.shape_cast %282 : vector<8x1x16xf32> to vector<8x16xf32>
    %c0_268 = arith.constant 0 : index
    %c1_269 = arith.constant 1 : index
    %c0_270 = arith.constant 0 : index
    %c16_271 = arith.constant 16 : index
    %284 = vector.load %arg12[%c0_268, %c1_269, %c0_270, %c16_271] : memref<1x2x8x128xf32, #tpu.memory_space<vmem>>, vector<1x1x8x16xf32>
    %285 = vector.shape_cast %284 : vector<1x1x8x16xf32> to vector<8x16xf32>
    %286 = vector.shape_cast %283 : vector<8x16xf32> to vector<1x1x8x16xf32>
    tpu.vector_store %arg12[%c0_268, %c1_269, %c0_270, %c16_271], %286 {strides = array<i32>} : memref<1x2x8x128xf32, #tpu.memory_space<vmem>>, vector<1x1x8x16xf32>,
    %287 = vector.extract_strided_slice %276 {offsets = [0, 2, 0], sizes = [8, 1, 16], strides = [1, 1, 1]} : vector<8x8x16xf32> to vector<8x1x16xf32>
    %288 = vector.shape_cast %287 : vector<8x1x16xf32> to vector<8x16xf32>
    %c0_272 = arith.constant 0 : index
    %c1_273 = arith.constant 1 : index
    %c0_274 = arith.constant 0 : index
    %c32_275 = arith.constant 32 : index
    %289 = vector.load %arg12[%c0_272, %c1_273, %c0_274, %c32_275] : memref<1x2x8x128xf32, #tpu.memory_space<vmem>>, vector<1x1x8x16xf32>
    %290 = vector.shape_cast %289 : vector<1x1x8x16xf32> to vector<8x16xf32>
    %291 = vector.shape_cast %288 : vector<8x16xf32> to vector<1x1x8x16xf32>
    tpu.vector_store %arg12[%c0_272, %c1_273, %c0_274, %c32_275], %291 {strides = array<i32>} : memref<1x2x8x128xf32, #tpu.memory_space<vmem>>, vector<1x1x8x16xf32>,
    %292 = vector.extract_strided_slice %276 {offsets = [0, 3, 0], sizes = [8, 1, 16], strides = [1, 1, 1]} : vector<8x8x16xf32> to vector<8x1x16xf32>
    %293 = vector.shape_cast %292 : vector<8x1x16xf32> to vector<8x16xf32>
    %c0_276 = arith.constant 0 : index
    %c1_277 = arith.constant 1 : index
    %c0_278 = arith.constant 0 : index
    %c48_279 = arith.constant 48 : index
    %294 = vector.load %arg12[%c0_276, %c1_277, %c0_278, %c48_279] : memref<1x2x8x128xf32, #tpu.memory_space<vmem>>, vector<1x1x8x16xf32>
    %295 = vector.shape_cast %294 : vector<1x1x8x16xf32> to vector<8x16xf32>
    %296 = vector.shape_cast %293 : vector<8x16xf32> to vector<1x1x8x16xf32>
    tpu.vector_store %arg12[%c0_276, %c1_277, %c0_278, %c48_279], %296 {strides = array<i32>} : memref<1x2x8x128xf32, #tpu.memory_space<vmem>>, vector<1x1x8x16xf32>,
    %297 = vector.extract_strided_slice %276 {offsets = [0, 4, 0], sizes = [8, 1, 16], strides = [1, 1, 1]} : vector<8x8x16xf32> to vector<8x1x16xf32>
    %298 = vector.shape_cast %297 : vector<8x1x16xf32> to vector<8x16xf32>
    %c0_280 = arith.constant 0 : index
    %c1_281 = arith.constant 1 : index
    %c0_282 = arith.constant 0 : index
    %c64_283 = arith.constant 64 : index
    %299 = vector.load %arg12[%c0_280, %c1_281, %c0_282, %c64_283] : memref<1x2x8x128xf32, #tpu.memory_space<vmem>>, vector<1x1x8x16xf32>
    %300 = vector.shape_cast %299 : vector<1x1x8x16xf32> to vector<8x16xf32>
    %301 = vector.shape_cast %298 : vector<8x16xf32> to vector<1x1x8x16xf32>
    tpu.vector_store %arg12[%c0_280, %c1_281, %c0_282, %c64_283], %301 {strides = array<i32>} : memref<1x2x8x128xf32, #tpu.memory_space<vmem>>, vector<1x1x8x16xf32>,
    %302 = vector.extract_strided_slice %276 {offsets = [0, 5, 0], sizes = [8, 1, 16], strides = [1, 1, 1]} : vector<8x8x16xf32> to vector<8x1x16xf32>
    %303 = vector.shape_cast %302 : vector<8x1x16xf32> to vector<8x16xf32>
    %c0_284 = arith.constant 0 : index
    %c1_285 = arith.constant 1 : index
    %c0_286 = arith.constant 0 : index
    %c80_287 = arith.constant 80 : index
    %304 = vector.load %arg12[%c0_284, %c1_285, %c0_286, %c80_287] : memref<1x2x8x128xf32, #tpu.memory_space<vmem>>, vector<1x1x8x16xf32>
    %305 = vector.shape_cast %304 : vector<1x1x8x16xf32> to vector<8x16xf32>
    %306 = vector.shape_cast %303 : vector<8x16xf32> to vector<1x1x8x16xf32>
    tpu.vector_store %arg12[%c0_284, %c1_285, %c0_286, %c80_287], %306 {strides = array<i32>} : memref<1x2x8x128xf32, #tpu.memory_space<vmem>>, vector<1x1x8x16xf32>,
    %307 = vector.extract_strided_slice %276 {offsets = [0, 6, 0], sizes = [8, 1, 16], strides = [1, 1, 1]} : vector<8x8x16xf32> to vector<8x1x16xf32>
    %308 = vector.shape_cast %307 : vector<8x1x16xf32> to vector<8x16xf32>
    %c0_288 = arith.constant 0 : index
    %c1_289 = arith.constant 1 : index
    %c0_290 = arith.constant 0 : index
    %c96_291 = arith.constant 96 : index
    %309 = vector.load %arg12[%c0_288, %c1_289, %c0_290, %c96_291] : memref<1x2x8x128xf32, #tpu.memory_space<vmem>>, vector<1x1x8x16xf32>
    %310 = vector.shape_cast %309 : vector<1x1x8x16xf32> to vector<8x16xf32>
    %311 = vector.shape_cast %308 : vector<8x16xf32> to vector<1x1x8x16xf32>
    tpu.vector_store %arg12[%c0_288, %c1_289, %c0_290, %c96_291], %311 {strides = array<i32>} : memref<1x2x8x128xf32, #tpu.memory_space<vmem>>, vector<1x1x8x16xf32>,
    %312 = vector.extract_strided_slice %276 {offsets = [0, 7, 0], sizes = [8, 1, 16], strides = [1, 1, 1]} : vector<8x8x16xf32> to vector<8x1x16xf32>
    %313 = vector.shape_cast %312 : vector<8x1x16xf32> to vector<8x16xf32>
    %c0_292 = arith.constant 0 : index
    %c1_293 = arith.constant 1 : index
    %c0_294 = arith.constant 0 : index
    %c112_295 = arith.constant 112 : index
    %314 = vector.load %arg12[%c0_292, %c1_293, %c0_294, %c112_295] : memref<1x2x8x128xf32, #tpu.memory_space<vmem>>, vector<1x1x8x16xf32>
    %315 = vector.shape_cast %314 : vector<1x1x8x16xf32> to vector<8x16xf32>
    %316 = vector.shape_cast %313 : vector<8x16xf32> to vector<1x1x8x16xf32>
    tpu.vector_store %arg12[%c0_292, %c1_293, %c0_294, %c112_295], %316 {strides = array<i32>} : memref<1x2x8x128xf32, #tpu.memory_space<vmem>>, vector<1x1x8x16xf32>,
    return
  }
  func.func @transform_0(%arg0: i32, %arg1: i32) -> (i32, i32, i32, i32) {
    %c0_i32 = arith.constant 0 : i32
    %c0_i32_0 = arith.constant 0 : i32
    %c0_i32_1 = arith.constant 0 : i32
    %c0_i32_2 = arith.constant 0 : i32
    return %arg0, %c0_i32, %c0_i32_0, %c0_i32_1 : i32, i32, i32, i32
  }
  func.func @transform_1(%arg0: i32, %arg1: i32) -> (i32, i32) {
    %c0_i32 = arith.constant 0 : i32
    %c0_i32_0 = arith.constant 0 : i32
    %c0_i32_1 = arith.constant 0 : i32
    return %c0_i32, %c0_i32_0 : i32, i32
  }
  func.func @transform_2(%arg0: i32, %arg1: i32) -> (i32, i32) {
    %c0_i32 = arith.constant 0 : i32
    %c0_i32_0 = arith.constant 0 : i32
    %c0_i32_1 = arith.constant 0 : i32
    return %c0_i32, %c0_i32_0 : i32, i32
  }
  func.func @transform_3(%arg0: i32, %arg1: i32) -> (i32, i32) {
    %c0_i32 = arith.constant 0 : i32
    %c0_i32_0 = arith.constant 0 : i32
    %c0_i32_1 = arith.constant 0 : i32
    return %c0_i32, %c0_i32_0 : i32, i32
  }
  func.func @transform_4(%arg0: i32, %arg1: i32) -> (i32, i32) {
    %c0_i32 = arith.constant 0 : i32
    %c0_i32_0 = arith.constant 0 : i32
    %c0_i32_1 = arith.constant 0 : i32
    return %c0_i32, %c0_i32_0 : i32, i32
  }
  func.func @transform_5(%arg0: i32, %arg1: i32) -> (i32, i32) {
    %c0_i32 = arith.constant 0 : i32
    %c0_i32_0 = arith.constant 0 : i32
    %c0_i32_1 = arith.constant 0 : i32
    return %c0_i32, %c0_i32_0 : i32, i32
  }
  func.func @transform_6(%arg0: i32, %arg1: i32) -> (i32, i32) {
    %c0_i32 = arith.constant 0 : i32
    %c0_i32_0 = arith.constant 0 : i32
    %c0_i32_1 = arith.constant 0 : i32
    return %c0_i32, %c0_i32_0 : i32, i32
  }
  func.func @transform_7(%arg0: i32, %arg1: i32) -> (i32, i32) {
    %c0_i32 = arith.constant 0 : i32
    %c0_i32_0 = arith.constant 0 : i32
    %c0_i32_1 = arith.constant 0 : i32
    return %c0_i32, %c0_i32_0 : i32, i32
  }
  func.func @transform_8(%arg0: i32, %arg1: i32) -> (i32, i32) {
    %c0_i32 = arith.constant 0 : i32
    %c0_i32_0 = arith.constant 0 : i32
    %c0_i32_1 = arith.constant 0 : i32
    return %c0_i32, %c0_i32_0 : i32, i32
  }
  func.func @transform_9(%arg0: i32, %arg1: i32) -> (i32, i32) {
    %c0_i32 = arith.constant 0 : i32
    %c0_i32_0 = arith.constant 0 : i32
    %c0_i32_1 = arith.constant 0 : i32
    return %c0_i32, %c0_i32_0 : i32, i32
  }
  func.func @transform_10(%arg0: i32, %arg1: i32) -> (i32, i32, i32, i32) {
    %c0_i32 = arith.constant 0 : i32
    %c0_i32_0 = arith.constant 0 : i32
    %c0_i32_1 = arith.constant 0 : i32
    return %arg0, %arg1, %c0_i32, %c0_i32_0 : i32, i32, i32, i32
  }
}

</mosaic_0001>

<bundles_post_ra>
// kernel: tpu_custom_call.1
= control target key start
LH: loop header
LB: loop body
LE: loop exit
PB: predicated region body
PF: predicated region fallthrough
CT: control target
= control target key end

     0   :  { %s8937_s0 = inlined_call_operand.vmem [shape: f32[2,4,64,16], index: 0, kind: input, shape index: {}]   ;;  %s8938_s1 = inlined_call_operand.vmem [shape: bf16[16,4], index: 1, kind: input, shape index: {}]   ;;  %s8939_s2 = inlined_call_operand.vmem [shape: bf16[108,4], index: 2, kind: input, shape index: {}]   ;;  %s8940_s3 = inlined_call_operand.vmem [shape: bf16[4,16], index: 3, kind: input, shape index: {}]   ;;  %s8941_s4 = inlined_call_operand.vmem [shape: f32[1,4], index: 4, kind: input, shape index: {}]   ;;  %s8942_s5 = inlined_call_operand.vmem [shape: f32[1,4], index: 5, kind: input, shape index: {}]   ;;  %s8943_s6 = inlined_call_operand.vmem [shape: f32[1,4], index: 6, kind: input, shape index: {}]   ;;  %s8944_s7 = inlined_call_operand.vmem [shape: f32[1,4], index: 7, kind: input, shape index: {}]   ;;  %s8945_s8 = inlined_call_operand.vmem [shape: f32[1,16], index: 8, kind: input, shape index: {}]   ;;  %s8946_s9 = inlined_call_operand.vmem [shape: f32[1,16], index: 9, kind: input, shape index: {}]   ;;  %s8947_s10 = inlined_call_operand.hbm [shape: f32[2,4,8,128], index: 10, kind: output, shape index: {}]  }
   0x1   :  { %9053 = sst [smem:[#allocation11_spill]] %s8937_s0 }
   0x2   :  { %9054 = sst [smem:[#allocation12_spill]] %s8938_s1 }
   0x3   :  { %15 = vsyncpa [#allocation5], 0 }
   0x4   :  { %17 = vsyncpa [#allocation5 + $0x1], 0  ;;  %s5619_s13 = smov 0   ;;  %s5621_s14 = smov 0  }
   0x5   :  { %s5623_s15 = smov 0   ;;  %s5625_s16 = smov 0  }
   0x6   :  { %s5627_s17 = smov 0   ;;  %s5629_s18 = smov 0  }
   0x7   :  { %s5631_s19 = smov 0   ;;  %s5633_s20 = smov 0  }
   0x8 LB: > { %9055 = sst [smem:[#allocation7_spill]] %s5524_s18  ;;  %s5050_s21 = sadd.s32 4294967295, %s5532_s20   ;;  %s5532_s20 = sphi %s5633_s20, %s23_s20   ;;  %s5528_s19 = sphi %s5631_s19, %s9420_s19   ;;  %s5524_s18 = sphi %s5629_s18, %s9419_s18   ;;  %s5520_s17 = sphi %s5627_s17, %s9418_s17   ;;  %s5516_s16 = sphi %s5625_s16, %s9417_s16   ;;  %s5512_s15 = sphi %s5623_s15, %s9423_s15   ;;  %s5508_s14 = sphi %s5621_s14, %s9422_s14   ;;  %s5504_s13 = sphi %s5619_s13, %s9421_s13  }
   0x9   : > { %9056 = sst [smem:[#allocation8_spill]] %s5528_s19  ;;  %s5051_s22 = sadd.s32 4294967294, %s5532_s20  }
   0xa   : > { %s32_s23 = sadd.s32 1, %s5524_s18  ;;  %s35_s24 = sadd.s32 1, %s5528_s19 }
   0xb   : > { %p33_p0 = scmp.ge.s32.totalorder %s32_s23, 2  ;;  %p269_p1 = scmp.ne.s32.totalorder %s5512_s15, %s5508_s14 }
   0xc   : > { %p270_p2 = scmp.eq.s32.totalorder %s5050_s21, 3  ;;  %p275_p5 = scmp.ne.s32.totalorder %s5508_s14, %s5504_s13 }
   0xd   : > { %s9425_s23 = smov (%p33_p0, %s32_s23), 0  ;;  %s9427_s24 = smov (!%p33_p0, %s35_s24), %s5528_s19 }
   0xe   : > { %9057 = sst [smem:[#allocation9_spill]] %s9425_s23  ;;  %s255_s25 = ssub.s32 %s5524_s18, %s9425_s23 }
   0xf   : > { %p5670_p3 = por %p270_p2, %p269_p1  ;;  %p37_p4 = scmp.ge.s32.totalorder %s9427_s24, 2 }
  0x10   : > { %p276_p6 = scmp.eq.s32.totalorder %s5051_s22, 3  ;;  %p5054_p7 = scmp.ge.s32.totalorder %s5532_s20, 1 }
  0x11   : > { %s9429_s24 = smov (%p37_p4, %s9427_s24), 0  ;;  %p329_p9 = scmp.lt.s32.totalorder %s5532_s20, 5 }
  0x12   : > { %9059 = sst [smem:[#allocation10_spill]] %s9429_s24  ;;  %p5679_p8 = por %p276_p6, %p275_p5 }
  0x13   : > { %s254_s28 = ssub.s32 %s5528_s19, %s9429_s24  ;;  %s259_s29 = sadd.s32 1, %s5512_s15 }
  0x14   : > { %s256_s30 = sor.u32 %s255_s25, %s254_s28  ;;  %p330_p10 = pnand %p5054_p7, %p329_p9 }
  0x15   : > { %p257_p11 = scmp.eq.s32.totalorder %s256_s30, 0  ;;  %s8951_s12 = sand.u32 (!%p330_p10), 1, %s5508_s14   ;;  %v5709_v2 = vld [vmem:[%s8939_s2] sm:$0xf] (!%p330_p10)  ;;  %v5714_v3 = vld [vmem:[%s8939_s2 + $0x4] sm:$0xf] (!%p330_p10) }
  0x16   : > { %333 = sbr.rel (%p330_p10) target bundleno = 3460 (0xd84), region = 60  ;;  %p367_p12 = scmp.lt.s32.totalorder (!%p330_p10), %s5520_s17, 1  ;;  %vm9016_vm0 = vcmask (!%p330_p10), 31744   ;;  %v5719_v4 = vld [vmem:[%s8939_s2 + $0x8] sm:$0xf] (!%p330_p10)  ;;  %v5534_v8 = vmov (!%p330_p10), 0.0  }
  0x17   : > { %s5688_s11 = scalar_select %p257_p11, %s5512_s15, %s259_s29  }
  0x18   : > { %s9061_s1 = sld [smem:[#allocation12_spill]] (!%p330_p10)  ;;  %s5704_s25 = sshll.u32 (!%p330_p10), %s8951_s12, 4  ;;  %v5724_v5 = vld [vmem:[%s8939_s2 + $0xc] sm:$0xf] (!%p330_p10)  ;;  %v5732_v6 = vld [vmem:[%s8939_s2 + $0x10] sm:$0xf] (!%p330_p10) }
  0x19   : > { %v5737_v7 = vld [vmem:[%s8939_s2 + $0x14] sm:$0xf] (!%p330_p10)  ;;  %434 = vst.msk [vmem:[#allocation2] sm:$0xff] (!%p330_p10), %vm9016_vm0, %v5534_v8  ;;  %437 = vst.msk [vmem:[#allocation2 + $0x10] sm:$0xff] (!%p330_p10), %vm9016_vm0, %v5534_v8  ;;  %vm435_vm1 = vcmask (!%p330_p10), 25600   ;;  %s5926_s24 = sshll.u32 (!%p330_p10), %s5516_s16, 1 }
  0x1a   : > { %439 = vst.msk [vmem:[#allocation2 + $0x20] sm:$0xff] (!%p330_p10), %vm9016_vm0, %v5534_v8  ;;  %441 = vst.msk [vmem:[#allocation2 + $0x30] sm:$0xff] (!%p330_p10), %vm9016_vm0, %v5534_v8  ;;  %v5822_v9 = vld [vmem:[%s8939_s2 + $0x18] sm:$0xf] (!%p330_p10)  ;;  %v5827_v10 = vld [vmem:[%s8939_s2 + $0x1c] sm:$0xf] (!%p330_p10) }
  0x1b   : > { %443 = vst.msk [vmem:[#allocation2 + $0x40] sm:$0xff] (!%p330_p10), %vm9016_vm0, %v5534_v8  ;;  %445 = vst.msk [vmem:[#allocation2 + $0x50] sm:$0xff] (!%p330_p10), %vm9016_vm0, %v5534_v8  ;;  %v5832_v11 = vld [vmem:[%s8939_s2 + $0x20] sm:$0xf] (!%p330_p10)  ;;  %v5918_v12 = vld [vmem:[%s8939_s2 + $0x24] sm:$0xf] (!%p330_p10) }
  0x1c   : > { %447 = vst.msk [vmem:[#allocation2 + $0x60] sm:$0xff] (!%p330_p10), %vm9016_vm0, %v5534_v8  ;;  %449 = vst.msk [vmem:[#allocation2 + $0x70] sm:$0xff] (!%p330_p10), %vm9016_vm0, %v5534_v8  ;;  %v5923_v13 = vld [vmem:[%s8939_s2 + $0x28] sm:$0xf] (!%p330_p10)  ;;  %s9062_s0 = sld [smem:[#allocation11_spill]] (!%p330_p10)  ;;  %s516_s18 = sadd.s32 (!%p330_p10), 4294967295, %s5926_s24 }
  0x1d   : > { %s5727_s12 = scalar_select %p367_p12, %s5520_s17, 1  ;;  %451 = vst.msk [vmem:[#allocation2 + $0x80] sm:$0xff] %vm9016_vm0, %v5534_v8  ;;  %453 = vst.msk [vmem:[#allocation2 + $0x90] sm:$0xff] %vm9016_vm0, %v5534_v8  ;;  %v5936_v14 = vld [vmem:[%s8939_s2 + $0x2c] sm:$0xf] }
  0x1e   : > { %v5695_v0 = vld [vmem:[%s9061_s1] sm:$0xf]  ;;  %v5700_v1 = vld [vmem:[%s9061_s1 + $0x4] sm:$0xf]  ;;  %455 = vst.msk [vmem:[#allocation2 + $0xa0] sm:$0xff] %vm9016_vm0, %v5534_v8  ;;  %457 = vst.msk [vmem:[#allocation2 + $0xb0] sm:$0xff] %vm9016_vm0, %v5534_v8 }
  0x1f   : > { %459 = vst.msk [vmem:[#allocation2 + $0xc0] sm:$0xff] %vm9016_vm0, %v5534_v8  ;;  %461 = vst.msk [vmem:[#allocation2 + $0xd0] sm:$0xff] %vm9016_vm0, %v5534_v8  ;;  %s5166_s19 = sshll.u32 %s5727_s12, 8  ;;  %v5941_v15 = vld [vmem:[%s8939_s2 + $0x30] sm:$0xf]  ;;  %p517_p13 = scmp.ge.s32.totalorder %s516_s18, 0 }
  0x20   : > { %463 = vst.msk [vmem:[#allocation2 + $0xe0] sm:$0xff] %vm9016_vm0, %v5534_v8  ;;  %465 = vst.msk [vmem:[#allocation2 + $0xf0] sm:$0xff] %vm9016_vm0, %v5534_v8  ;;  %v5946_v16 = vld [vmem:[%s8939_s2 + $0x34] sm:$0x3]  ;;  %v5951_v17 = vld [vmem:[%s8940_s3] sm:$0x3] }
  0x21   : > { %467 = vst.msk [vmem:[#allocation2 + $0x100] sm:$0xff] %vm9016_vm0, %v5534_v8  ;;  %469 = vst.msk [vmem:[#allocation2 + $0x110] sm:$0xff] %vm9016_vm0, %v5534_v8  ;;  %v5956_v18 = vld [vmem:[%s8941_s4] ss:$0 sm:$0xff]  ;;  %p518_p0 = scmp.lt.s32.totalorder %s516_s18, 4  ;;  %s5985_s12 = scalar_lea.vmem [#allocation4], %s5704_s25 }
  0x22   : > { %471 = vst.msk [vmem:[#allocation2 + $0x120] sm:$0xff] %vm9016_vm0, %v5534_v8  ;;  %473 = vst.msk [vmem:[#allocation2 + $0x130] sm:$0xff] %vm9016_vm0, %v5534_v8  ;;  %s5931_s1 = scalar_lea.vmem %s9062_s0, %s5166_s19  ;;  %v5961_v19 = vld [vmem:[%s8942_s5] ss:$0 sm:$0xff] }
  0x23   : > { %475 = vst.msk [vmem:[#allocation2 + $0x140] sm:$0xff] %vm9016_vm0, %v5534_v8  ;;  %477 = vst.msk [vmem:[#allocation2 + $0x150] sm:$0xff] %vm9016_vm0, %v5534_v8  ;;  %v5966_v20 = vld [vmem:[%s8943_s6] ss:$0 sm:$0xff]  ;;  %p519_p1 = pnand %p518_p0, %p517_p13 }
  0x24   : > { %479 = vst.msk [vmem:[#allocation2 + $0x160] sm:$0xff] %vm9016_vm0, %v5534_v8  ;;  %481 = vst.msk [vmem:[#allocation2 + $0x170] sm:$0xff] %vm9016_vm0, %v5534_v8  ;;  %v5971_v21 = vld [vmem:[%s8944_s7] ss:$0 sm:$0xff]  ;;  %v5075_v24 = vcombine.low (!%p519_p1), %v5695_v0, %v5700_v1  ;;  %s5167_s30 = sshll.u32 (!%p519_p1), %s5516_s16, 7  ;;  %vm543_vm2 = vcmask (!%p519_p1), 130048  }
  0x25   : > { %483 = vst.msk [vmem:[#allocation2 + $0x180] sm:$0xff] %vm9016_vm0, %v5534_v8  ;;  %485 = vst.msk [vmem:[#allocation2 + $0x190] sm:$0xff] %vm9016_vm0, %v5534_v8  ;;  %v5976_v22 = vld [vmem:[%s8945_s8] ss:$0 sm:$0xff]  ;;  %s4995_s21 = scalar_lea.vmem (!%p519_p1), %s5931_s1, %s5167_s30 }
  0x26   : > { %487 = vst.msk [vmem:[#allocation2 + $0x1a0] sm:$0xff] %vm9016_vm0, %v5534_v8  ;;  %489 = vst.msk [vmem:[#allocation2 + $0x1b0] sm:$0xff] %vm9016_vm0, %v5534_v8  ;;  %v5981_v23 = vld [vmem:[%s8946_s9] ss:$0 sm:$0xff]  ;;  %5223 = vmatprep.subr.bf16.mxu0 (!%p519_p1), %v5075_v24  ;;  %5327 = vmatprep.subr.bf16.mxu1 (!%p519_p1), %v5075_v24  ;;  %v5068_v26 = vld [vmem:[%s4995_s21 - $0x38] sm:$0xff] (!%p519_p1) }
  0x27   : > { %491 = vst.msk [vmem:[#allocation2 + $0x1c0] sm:$0xff] %vm9016_vm0, %v5534_v8  ;;  %493 = vst.msk [vmem:[#allocation2 + $0x1d0] sm:$0xff] %vm9016_vm0, %v5534_v8  ;;  %v5067_v25 = vld [vmem:[%s4995_s21 - $0x40] sm:$0xff] (!%p519_p1)  ;;  %5224 = vmatpush3.bf16.msra.mxu0 (!%p519_p1), %v5075_v24  ;;  %5328 = vmatpush3.bf16.msra.mxu1 (!%p519_p1), %v5075_v24  ;;  %v5072_v29 = vld [vmem:[%s4995_s21 - $0x18] sm:$0xff] (!%p519_p1) }
  0x28   : > { %495 = vst.msk [vmem:[#allocation2 + $0x1e0] sm:$0xff] %vm9016_vm0, %v5534_v8  ;;  %497 = vst.msk [vmem:[#allocation2 + $0x1f0] sm:$0xff] %vm9016_vm0, %v5534_v8  ;;  %v5071_v27 = vld [vmem:[%s4995_s21 - $0x20] sm:$0xff] (!%p519_p1)  ;;  %v533_v28 = vpack.c.bf16 (!%p519_p1), %v5068_v26, %v5067_v25  ;;  %v5069_v30 = vld [vmem:[%s4995_s21 - $0x30] sm:$0xff] (!%p519_p1) }
  0x29   : > { %499 = vst.msk [vmem:[#allocation2 + $0x200] sm:$0xff] %vm9016_vm0, %v5534_v8  ;;  %501 = vst.msk [vmem:[#allocation2 + $0x210] sm:$0xff] %vm9016_vm0, %v5534_v8  ;;  %v5070_v31 = vld [vmem:[%s4995_s21 - $0x28] sm:$0xff] (!%p519_p1)  ;;  %v535_v32 = vpack.c.bf16 (!%p519_p1), %v5072_v29, %v5071_v27  ;;  %v5073_v34 = vld [vmem:[%s4995_s21 - $0x10] sm:$0xff] (!%p519_p1) }
  0x2a   : > { %503 = vst.msk [vmem:[#allocation2 + $0x220] sm:$0xff] %vm9016_vm0, %v5534_v8  ;;  %505 = vst.msk [vmem:[#allocation2 + $0x230] sm:$0xff] %vm9016_vm0, %v5534_v8  ;;  %v534_v33 = vpack.c.bf16 (!%p519_p1), %v5070_v31, %v5069_v30  ;;  %v5074_v35 = vld [vmem:[%s4995_s21 - $0x8] sm:$0xff] (!%p519_p1)  ;;  %5225 = vmatprep.mubr.msk.bf16.mxu0 (!%p519_p1), %vm543_vm2, %v533_v28 }
  0x2b   : > { %507 = vst.msk [vmem:[#allocation2 + $0x240] sm:$0xff] %vm9016_vm0, %v5534_v8  ;;  %509 = vst.msk [vmem:[#allocation2 + $0x250] sm:$0xff] %vm9016_vm0, %v5534_v8  ;;  %v536_v36 = vpack.c.bf16 (!%p519_p1), %v5074_v35, %v5073_v34  ;;  %5229 = vmatprep.mubr.msk.bf16.mxu1 (!%p519_p1), %vm543_vm2, %v535_v32 }
  0x2c   : > { %511 = vst.msk [vmem:[#allocation2 + $0x260] sm:$0xff] %vm9016_vm0, %v5534_v8  ;;  %513 = vst.msk [vmem:[#allocation2 + $0x270] sm:$0xff] %vm9016_vm0, %v5534_v8  ;;  %5226 = vmatmul.mubr.msk.bf16.vlgmr.msra.gmra.mrb[0].mxu0 (!%p519_p1), %vm543_vm2, %v534_v33 }
  0x2d   : > { %436 = vst.msk [vmem:[#allocation2 + $0x8] sm:$0x3] %vm435_vm1, %v5534_v8  ;;  %438 = vst.msk [vmem:[#allocation2 + $0x18] sm:$0x3] %vm435_vm1, %v5534_v8  ;;  %5230 = vmatmul.mubr.msk.bf16.vlgmr.msra.gmra.mrb[0].mxu1 (!%p519_p1), %vm543_vm2, %v536_v36 }
  0x2e   : > { %440 = vst.msk [vmem:[#allocation2 + $0x28] sm:$0x3] %vm435_vm1, %v5534_v8  ;;  %442 = vst.msk [vmem:[#allocation2 + $0x38] sm:$0x3] %vm435_vm1, %v5534_v8 }
  0x2f   : > { %444 = vst.msk [vmem:[#allocation2 + $0x48] sm:$0x3] %vm435_vm1, %v5534_v8  ;;  %446 = vst.msk [vmem:[#allocation2 + $0x58] sm:$0x3] %vm435_vm1, %v5534_v8 }
  0x30   : > { %448 = vst.msk [vmem:[#allocation2 + $0x68] sm:$0x3] %vm435_vm1, %v5534_v8  ;;  %450 = vst.msk [vmem:[#allocation2 + $0x78] sm:$0x3] %vm435_vm1, %v5534_v8 }
  0x31   : > { %452 = vst.msk [vmem:[#allocation2 + $0x88] sm:$0x3] %vm435_vm1, %v5534_v8  ;;  %454 = vst.msk [vmem:[#allocation2 + $0x98] sm:$0x3] %vm435_vm1, %v5534_v8 }
  0x32   : > { %456 = vst.msk [vmem:[#allocation2 + $0xa8] sm:$0x3] %vm435_vm1, %v5534_v8  ;;  %458 = vst.msk [vmem:[#allocation2 + $0xb8] sm:$0x3] %vm435_vm1, %v5534_v8 }
  0x33   : > { %460 = vst.msk [vmem:[#allocation2 + $0xc8] sm:$0x3] %vm435_vm1, %v5534_v8  ;;  %462 = vst.msk [vmem:[#allocation2 + $0xd8] sm:$0x3] %vm435_vm1, %v5534_v8 }
  0x34   : > { %464 = vst.msk [vmem:[#allocation2 + $0xe8] sm:$0x3] %vm435_vm1, %v5534_v8  ;;  %466 = vst.msk [vmem:[#allocation2 + $0xf8] sm:$0x3] %vm435_vm1, %v5534_v8 }
  0x35   : > { %468 = vst.msk [vmem:[#allocation2 + $0x108] sm:$0x3] %vm435_vm1, %v5534_v8  ;;  %470 = vst.msk [vmem:[#allocation2 + $0x118] sm:$0x3] %vm435_vm1, %v5534_v8 }
  0x36   : > { %472 = vst.msk [vmem:[#allocation2 + $0x128] sm:$0x3] %vm435_vm1, %v5534_v8  ;;  %474 = vst.msk [vmem:[#allocation2 + $0x138] sm:$0x3] %vm435_vm1, %v5534_v8 }
  0x37   : > { %476 = vst.msk [vmem:[#allocation2 + $0x148] sm:$0x3] %vm435_vm1, %v5534_v8  ;;  %478 = vst.msk [vmem:[#allocation2 + $0x158] sm:$0x3] %vm435_vm1, %v5534_v8 }
  0x38   : > { %480 = vst.msk [vmem:[#allocation2 + $0x168] sm:$0x3] %vm435_vm1, %v5534_v8  ;;  %482 = vst.msk [vmem:[#allocation2 + $0x178] sm:$0x3] %vm435_vm1, %v5534_v8 }
  0x39   : > { %484 = vst.msk [vmem:[#allocation2 + $0x188] sm:$0x3] %vm435_vm1, %v5534_v8  ;;  %486 = vst.msk [vmem:[#allocation2 + $0x198] sm:$0x3] %vm435_vm1, %v5534_v8 }
  0x3a   : > { %488 = vst.msk [vmem:[#allocation2 + $0x1a8] sm:$0x3] %vm435_vm1, %v5534_v8  ;;  %490 = vst.msk [vmem:[#allocation2 + $0x1b8] sm:$0x3] %vm435_vm1, %v5534_v8  ;;  %522 = sbr.rel (%p519_p1) target bundleno = 267 (0x10b), region = 64 }
  0x3b   : > { %492 = vst.msk [vmem:[#allocation2 + $0x1c8] sm:$0x3] %vm435_vm1, %v5534_v8  ;;  %494 = vst.msk [vmem:[#allocation2 + $0x1d8] sm:$0x3] %vm435_vm1, %v5534_v8 }
  0x3c   : > { %496 = vst.msk [vmem:[#allocation2 + $0x1e8] sm:$0x3] %vm435_vm1, %v5534_v8  ;;  %498 = vst.msk [vmem:[#allocation2 + $0x1f8] sm:$0x3] %vm435_vm1, %v5534_v8 }
  0x3d   : > { %500 = vst.msk [vmem:[#allocation2 + $0x208] sm:$0x3] %vm435_vm1, %v5534_v8  ;;  %502 = vst.msk [vmem:[#allocation2 + $0x218] sm:$0x3] %vm435_vm1, %v5534_v8 }
  0x3e   : > { %504 = vst.msk [vmem:[#allocation2 + $0x228] sm:$0x3] %vm435_vm1, %v5534_v8  ;;  %506 = vst.msk [vmem:[#allocation2 + $0x238] sm:$0x3] %vm435_vm1, %v5534_v8 }
  0x3f   : > { %508 = vst.msk [vmem:[#allocation2 + $0x248] sm:$0x3] %vm435_vm1, %v5534_v8  ;;  %510 = vst.msk [vmem:[#allocation2 + $0x258] sm:$0x3] %vm435_vm1, %v5534_v8 }
  0x40   : > { %512 = vst.msk [vmem:[#allocation2 + $0x268] sm:$0x3] %vm435_vm1, %v5534_v8  ;;  %514 = vst.msk [vmem:[#allocation2 + $0x278] sm:$0x3] %vm435_vm1, %v5534_v8 }
  0xff   : > { %v5227_v37 = vpop.f32.mrb[0].mxu0 }
 0x100   : > { %v623_v38 = vmul.f32 %v5227_v37, %v5956_v18  ;;  %v5231_v39 = vpop.f32.mrb[0].mxu1  ;;  %v590_v40 = vpop.f32.mrb[1].mxu0 }
 0x101   : > { %v627_v41 = vmul.f32 %v5231_v39, %v5956_v18  ;;  %v621_v42 = vmul.f32 %v5956_v18, %v590_v40  ;;  %v606_v43 = vpop.f32.mrb[1].mxu1  ;;  %v5228_v44 = vpop.f32.mrb[2].mxu0 }
 0x102   : > { %v631_v45 = vadd.f32 %v5961_v19, %v623_v38  ;;  %v625_v46 = vmul.f32 %v5956_v18, %v606_v43  ;;  %v624_v47 = vmul.f32 %v5228_v44, %v5956_v18  ;;  %v5232_v48 = vpop.f32.mrb[2].mxu1  ;;  %v593_v49 = vpop.f32.mrb[3].mxu0 }
 0x103   : > { %v635_v50 = vadd.f32 %v5961_v19, %v627_v41  ;;  %v629_v51 = vadd.f32 %v5961_v19, %v621_v42  ;;  %v628_v52 = vmul.f32 %v5232_v48, %v5956_v18  ;;  %v622_v53 = vmul.f32 %v5956_v18, %v593_v49  ;;  %v609_v54 = vpop.f32.mrb[3].mxu1 }
 0x104   : > { %v639_v55 = vmax.f32 %v631_v45, 0.0  ;;  %v633_v56 = vadd.f32 %v5961_v19, %v625_v46  ;;  %v632_v57 = vadd.f32 %v5961_v19, %v624_v47  ;;  %v626_v58 = vmul.f32 %v5956_v18, %v609_v54 }
 0x105   : > { %v643_v59 = vmax.f32 %v635_v50, 0.0  ;;  %v637_v60 = vmax.f32 %v629_v51, 0.0  ;;  %v636_v61 = vadd.f32 %v5961_v19, %v628_v52  ;;  %v630_v62 = vadd.f32 %v5961_v19, %v622_v53 }
 0x106   : > { %648 = vst.msk [vmem:[#allocation2 + $0x31] sm:$0xff] %vm9016_vm0, %v639_v55  ;;  %v641_v63 = vmax.f32 %v633_v56, 0.0  ;;  %v640_v8 = vmax.f32 %v632_v57, 0.0  ;;  %v634_v24 = vadd.f32 %v5961_v19, %v626_v58 }
 0x107   : > { %652 = vst.msk [vmem:[#allocation2 + $0x71] sm:$0xff] %vm9016_vm0, %v643_v59  ;;  %646 = vst.msk [vmem:[#allocation2 + $0x11] sm:$0xff] %vm9016_vm0, %v637_v60  ;;  %v644_v25 = vmax.f32 %v636_v61, 0.0  ;;  %v638_v26 = vmax.f32 %v630_v62, 0.0 }
 0x108   : > { %650 = vst.msk [vmem:[#allocation2 + $0x51] sm:$0xff] %vm9016_vm0, %v641_v63  ;;  %649 = vst.msk [vmem:[#allocation2 + $0x41] sm:$0xff] %vm9016_vm0, %v640_v8  ;;  %v642_v27 = vmax.f32 %v634_v24, 0.0 }
 0x109   : > { %653 = vst.msk [vmem:[#allocation2 + $0x81] sm:$0xff] %vm9016_vm0, %v644_v25  ;;  %647 = vst.msk [vmem:[#allocation2 + $0x21] sm:$0xff] %vm9016_vm0, %v638_v26 }
 0x10a   : > { %651 = vst.msk [vmem:[#allocation2 + $0x61] sm:$0xff] %vm9016_vm0, %v642_v27 }
 0x10b PF: > { %v6021_v28 = vcombine.low %v5695_v0, %v5700_v1  ;;  %s5168_s25 = sshll.u32 %s5516_s16, 7  ;;  %vm9023_vm3 = vcmask 130048  }
 0x10c   : > { %s6025_s22 = scalar_lea.vmem %s5931_s1, %s5168_s25  ;;  %s910_s1 = sadd.s32 2, %s5926_s24 }
 0x10d   : > { %5233 = vmatprep.subr.bf16.mxu0 %v6021_v28  ;;  %5243 = vmatprep.subr.bf16.mxu1 %v6021_v28  ;;  %v656_v29 = vld [vmem:[%s6025_s22] sm:$0xff]  ;;  %v657_v30 = vld [vmem:[%s6025_s22 + $0x8] sm:$0xff]  ;;  %v658_v32 = vld [vmem:[%s6025_s22 + $0x10] sm:$0xff]  ;;  %p6056_p2 = scmp.ge.s32.totalorder %s910_s1, 0  ;;  %p6060_p4 = scmp.lt.s32.totalorder %s910_s1, 4 }
 0x10e   : > { %v5088_v0 = vld [vmem:[%s6025_s22 + $0x40] sm:$0xff]  ;;  %5234 = vmatpush3.bf16.msra.mxu0 %v6021_v28  ;;  %5244 = vmatpush3.bf16.msra.mxu1 %v6021_v28  ;;  %v664_v1 = vpack.c.bf16 %v657_v30, %v656_v29  ;;  %v5089_v31 = vld [vmem:[%s6025_s22 + $0x48] sm:$0xff]  ;;  %v659_v33 = vld [vmem:[%s6025_s22 + $0x18] sm:$0xff] }
 0x10f   : > { %v796_v34 = vpack.c.bf16 %v5089_v31, %v5088_v0  ;;  %v665_v35 = vpack.c.bf16 %v659_v33, %v658_v32  ;;  %v5090_v36 = vld [vmem:[%s6025_s22 + $0x50] sm:$0xff]  ;;  %v5091_v37 = vld [vmem:[%s6025_s22 + $0x58] sm:$0xff]  ;;  %v660_v38 = vld [vmem:[%s6025_s22 + $0x20] sm:$0xff]  ;;  %p913_p5 = pnand %p6060_p4, %p6056_p2 }
 0x110   : > { %5235 = vmatprep.mubr.msk.bf16.mxu0 %vm9023_vm3, %v664_v1  ;;  %v797_v39 = vpack.c.bf16 %v5091_v37, %v5090_v36  ;;  %v661_v40 = vld [vmem:[%s6025_s22 + $0x28] sm:$0xff]  ;;  %v5092_v41 = vld [vmem:[%s6025_s22 + $0x60] sm:$0xff]  ;;  %v662_v45 = vld [vmem:[%s6025_s22 + $0x30] sm:$0xff]  ;;  %5253 = vmatprep.subr.bf16.mxu0 (!%p913_p5), %v6021_v28 }
 0x111   : > { %v5093_v42 = vld [vmem:[%s6025_s22 + $0x68] sm:$0xff]  ;;  %5245 = vmatprep.mubr.msk.bf16.mxu1 %vm9023_vm3, %v796_v34  ;;  %5236 = vmatmul.mubr.msk.bf16.vlgmr.msra.gmra.mrb[0].mxu0 %vm9023_vm3, %v665_v35  ;;  %v666_v43 = vpack.c.bf16 %v661_v40, %v660_v38  ;;  %v663_v46 = vld [vmem:[%s6025_s22 + $0x38] sm:$0xff]  ;;  %v5094_v47 = vld [vmem:[%s6025_s22 + $0x70] sm:$0xff] }
 0x112   : > { %v798_v44 = vpack.c.bf16 %v5093_v42, %v5092_v41  ;;  %5246 = vmatmul.mubr.msk.bf16.vlgmr.msra.gmra.mrb[0].mxu1 %vm9023_vm3, %v797_v39  ;;  %v5095_v48 = vld [vmem:[%s6025_s22 + $0x78] sm:$0xff]  ;;  %v667_v49 = vpack.c.bf16 %v663_v46, %v662_v45  ;;  %5329 = vmatprep.subr.bf16.mxu1 (!%p913_p5), %v6021_v28 }
 0x113   : > { %5239 = vmatprep.mubr.msk.bf16.mxu0 %vm9023_vm3, %v666_v43  ;;  %v799_v50 = vpack.c.bf16 %v5095_v48, %v5094_v47  ;;  %5254 = vmatpush3.bf16.msra.mxu0 (!%p913_p5), %v6021_v28 }
 0x114   : > { %5249 = vmatprep.mubr.msk.bf16.mxu1 %vm9023_vm3, %v798_v44  ;;  %5330 = vmatpush3.bf16.msra.mxu1 (!%p913_p5), %v6021_v28 }
 0x119   : > { %5240 = vmatmul.mubr.msk.bf16.gmra.mrb[4].mxu0 %vm9023_vm3, %v667_v49 }
 0x11a   : > { %5250 = vmatmul.mubr.msk.bf16.gmra.mrb[4].mxu1 %vm9023_vm3, %v799_v50 }
 0x1e4   : > { %v5237_v51 = vpop.f32.mrb[0].mxu0 }
 0x1e5   : > { %v754_v52 = vmul.f32 %v5237_v51, %v5956_v18  ;;  %v5247_v53 = vpop.f32.mrb[0].mxu1  ;;  %v721_v54 = vpop.f32.mrb[1].mxu0 }
 0x1e6   : > { %v879_v55 = vmul.f32 %v5247_v53, %v5956_v18  ;;  %v752_v56 = vmul.f32 %v5956_v18, %v721_v54  ;;  %v846_v57 = vpop.f32.mrb[1].mxu1  ;;  %v5238_v58 = vpop.f32.mrb[2].mxu0 }
 0x1e7   : > { %v762_v59 = vadd.f32 %v5961_v19, %v754_v52  ;;  %v877_v60 = vmul.f32 %v5956_v18, %v846_v57  ;;  %v755_v61 = vmul.f32 %v5238_v58, %v5956_v18  ;;  %v5248_v62 = vpop.f32.mrb[2].mxu1  ;;  %v724_v63 = vpop.f32.mrb[3].mxu0 }
 0x1e8   : > { %v887_v8 = vadd.f32 %v5961_v19, %v879_v55  ;;  %v760_v24 = vadd.f32 %v5961_v19, %v752_v56  ;;  %v880_v25 = vmul.f32 %v5248_v62, %v5956_v18  ;;  %v753_v26 = vmul.f32 %v5956_v18, %v724_v63  ;;  %v849_v27 = vpop.f32.mrb[3].mxu1 }
 0x1e9   : > { %v770_v29 = vmax.f32 %v762_v59, 0.0  ;;  %v885_v30 = vadd.f32 %v5961_v19, %v877_v60  ;;  %v763_v0 = vadd.f32 %v5961_v19, %v755_v61  ;;  %v878_v1 = vmul.f32 %v5956_v18, %v849_v27 }
 0x1ea   : > { %v895_v31 = vmax.f32 %v887_v8, 0.0  ;;  %v768_v32 = vmax.f32 %v760_v24, 0.0  ;;  %v888_v33 = vadd.f32 %v5961_v19, %v880_v25  ;;  %v761_v34 = vadd.f32 %v5961_v19, %v753_v26 }
 0x1eb   : > { %779 = vst.msk [vmem:[#allocation2 + $0xd1] sm:$0xff] %vm9016_vm0, %v770_v29  ;;  %v893_v35 = vmax.f32 %v885_v30, 0.0  ;;  %v771_v36 = vmax.f32 %v763_v0, 0.0  ;;  %v886_v37 = vadd.f32 %v5961_v19, %v878_v1 }
 0x1ec   : > { %904 = vst.msk [vmem:[#allocation2 + $0x171] sm:$0xff] %vm9016_vm0, %v895_v31  ;;  %777 = vst.msk [vmem:[#allocation2 + $0xb1] sm:$0xff] %vm9016_vm0, %v768_v32  ;;  %v896_v38 = vmax.f32 %v888_v33, 0.0  ;;  %v769_v39 = vmax.f32 %v761_v34, 0.0  ;;  %v5241_v40 = vpop.f32.mrb[4].mxu0  ;;  %v5102_v31 = vld [vmem:[%s6025_s22 + $0x80] sm:$0xff] (!%p913_p5) }
 0x1ed   : > { %902 = vst.msk [vmem:[#allocation2 + $0x151] sm:$0xff] %vm9016_vm0, %v893_v35  ;;  %780 = vst.msk [vmem:[#allocation2 + $0xe1] sm:$0xff] %vm9016_vm0, %v771_v36  ;;  %v894_v41 = vmax.f32 %v886_v37, 0.0  ;;  %v758_v42 = vmul.f32 %v5241_v40, %v5956_v18  ;;  %v5251_v43 = vpop.f32.mrb[4].mxu1  ;;  %v737_v44 = vpop.f32.mrb[5].mxu0  ;;  %v5103_v32 = vld [vmem:[%s6025_s22 + $0x88] sm:$0xff] (!%p913_p5) }
 0x1ee   : > { %905 = vst.msk [vmem:[#allocation2 + $0x181] sm:$0xff] %vm9016_vm0, %v896_v38  ;;  %778 = vst.msk [vmem:[#allocation2 + $0xc1] sm:$0xff] %vm9016_vm0, %v769_v39  ;;  %v883_v45 = vmul.f32 %v5251_v43, %v5956_v18  ;;  %v756_v46 = vmul.f32 %v5956_v18, %v737_v44  ;;  %v862_v47 = vpop.f32.mrb[5].mxu1  ;;  %v5242_v48 = vpop.f32.mrb[6].mxu0  ;;  %v5106_v33 = vld [vmem:[%s6025_s22 + $0xa0] sm:$0xff] (!%p913_p5)  ;;  %v927_v34 = vpack.c.bf16 (!%p913_p5), %v5103_v32, %v5102_v31  ;;  %v5107_v35 = vld [vmem:[%s6025_s22 + $0xa8] sm:$0xff] (!%p913_p5) }
 0x1ef   : > { %903 = vst.msk [vmem:[#allocation2 + $0x161] sm:$0xff] %vm9016_vm0, %v894_v41  ;;  %v766_v49 = vadd.f32 %v5961_v19, %v758_v42  ;;  %v881_v50 = vmul.f32 %v5956_v18, %v862_v47  ;;  %v759_v51 = vmul.f32 %v5242_v48, %v5956_v18  ;;  %v5252_v52 = vpop.f32.mrb[6].mxu1  ;;  %v740_v53 = vpop.f32.mrb[7].mxu0  ;;  %v5104_v36 = vld [vmem:[%s6025_s22 + $0x90] sm:$0xff] (!%p913_p5)  ;;  %v5105_v37 = vld [vmem:[%s6025_s22 + $0x98] sm:$0xff] (!%p913_p5)  ;;  %v929_v38 = vpack.c.bf16 (!%p913_p5), %v5107_v35, %v5106_v33 }
 0x1f0   : > { %v891_v54 = vadd.f32 %v5961_v19, %v883_v45  ;;  %v764_v55 = vadd.f32 %v5961_v19, %v756_v46  ;;  %v884_v56 = vmul.f32 %v5252_v52, %v5956_v18  ;;  %v757_v57 = vmul.f32 %v5956_v18, %v740_v53  ;;  %v865_v58 = vpop.f32.mrb[7].mxu1  ;;  %v5108_v40 = vld [vmem:[%s6025_s22 + $0xb0] sm:$0xff] (!%p913_p5)  ;;  %v5109_v41 = vld [vmem:[%s6025_s22 + $0xb8] sm:$0xff] (!%p913_p5)  ;;  %5255 = vmatprep.mubr.msk.bf16.mxu0 (!%p913_p5), %vm9023_vm3, %v927_v34 }
 0x1f1   : > { %v774_v59 = vmax.f32 %v766_v49, 0.0  ;;  %v889_v60 = vadd.f32 %v5961_v19, %v881_v50  ;;  %v767_v61 = vadd.f32 %v5961_v19, %v759_v51  ;;  %v882_v62 = vmul.f32 %v5956_v18, %v865_v58  ;;  %916 = sbr.rel (%p913_p5) target bundleno = 724 (0x2d4), region = 68  ;;  %5259 = vmatprep.mubr.msk.bf16.mxu1 (!%p913_p5), %vm9023_vm3, %v929_v38 }
 0x1f2   : > { %v899_v63 = vmax.f32 %v891_v54, 0.0  ;;  %v772_v8 = vmax.f32 %v764_v55, 0.0  ;;  %v892_v24 = vadd.f32 %v5961_v19, %v884_v56  ;;  %v765_v25 = vadd.f32 %v5961_v19, %v757_v57 }
 0x1f3   : > { %783 = vst.msk [vmem:[#allocation2 + $0x111] sm:$0xff] %vm9016_vm0, %v774_v59  ;;  %v897_v26 = vmax.f32 %v889_v60, 0.0  ;;  %v775_v27 = vmax.f32 %v767_v61, 0.0  ;;  %v890_v29 = vadd.f32 %v5961_v19, %v882_v62  ;;  %v928_v39 = vpack.c.bf16 (!%p913_p5), %v5105_v37, %v5104_v36 }
 0x1f4   : > { %908 = vst.msk [vmem:[#allocation2 + $0x1b1] sm:$0xff] %vm9016_vm0, %v899_v63  ;;  %781 = vst.msk [vmem:[#allocation2 + $0xf1] sm:$0xff] %vm9016_vm0, %v772_v8  ;;  %v900_v30 = vmax.f32 %v892_v24, 0.0  ;;  %v773_v0 = vmax.f32 %v765_v25, 0.0  ;;  %v930_v42 = vpack.c.bf16 (!%p913_p5), %v5109_v41, %v5108_v40 }
 0x1f5   : > { %906 = vst.msk [vmem:[#allocation2 + $0x191] sm:$0xff] %vm9016_vm0, %v897_v26  ;;  %784 = vst.msk [vmem:[#allocation2 + $0x121] sm:$0xff] %vm9016_vm0, %v775_v27  ;;  %v898_v1 = vmax.f32 %v890_v29, 0.0  ;;  %5256 = vmatmul.mubr.msk.bf16.vlgmr.msra.gmra.mrb[0].mxu0 (!%p913_p5), %vm9023_vm3, %v928_v39 }
 0x1f6   : > { %909 = vst.msk [vmem:[#allocation2 + $0x1c1] sm:$0xff] %vm9016_vm0, %v900_v30  ;;  %782 = vst.msk [vmem:[#allocation2 + $0x101] sm:$0xff] %vm9016_vm0, %v773_v0  ;;  %5260 = vmatmul.mubr.msk.bf16.vlgmr.msra.gmra.mrb[0].mxu1 (!%p913_p5), %vm9023_vm3, %v930_v42 }
 0x1f7   : > { %907 = vst.msk [vmem:[#allocation2 + $0x1a1] sm:$0xff] %vm9016_vm0, %v898_v1 }
 0x2c8   : > { %v5257_v43 = vpop.f32.mrb[0].mxu0 }
 0x2c9   : > { %v1010_v28 = vmul.f32 %v5257_v43, %v5956_v18  ;;  %v5261_v44 = vpop.f32.mrb[0].mxu1  ;;  %v977_v45 = vpop.f32.mrb[1].mxu0 }
 0x2ca   : > { %v1014_v46 = vmul.f32 %v5261_v44, %v5956_v18  ;;  %v1008_v47 = vmul.f32 %v5956_v18, %v977_v45  ;;  %v993_v48 = vpop.f32.mrb[1].mxu1  ;;  %v5258_v49 = vpop.f32.mrb[2].mxu0 }
 0x2cb   : > { %v1018_v50 = vadd.f32 %v5961_v19, %v1010_v28  ;;  %v1012_v51 = vmul.f32 %v5956_v18, %v993_v48  ;;  %v1011_v52 = vmul.f32 %v5258_v49, %v5956_v18  ;;  %v5262_v53 = vpop.f32.mrb[2].mxu1  ;;  %v980_v54 = vpop.f32.mrb[3].mxu0 }
 0x2cc   : > { %v1022_v55 = vadd.f32 %v5961_v19, %v1014_v46  ;;  %v1016_v56 = vadd.f32 %v5961_v19, %v1008_v47  ;;  %v1015_v57 = vmul.f32 %v5262_v53, %v5956_v18  ;;  %v1009_v58 = vmul.f32 %v5956_v18, %v980_v54  ;;  %v996_v59 = vpop.f32.mrb[3].mxu1 }
 0x2cd   : > { %v1026_v60 = vmax.f32 %v1018_v50, 0.0  ;;  %v1020_v61 = vadd.f32 %v5961_v19, %v1012_v51  ;;  %v1019_v62 = vadd.f32 %v5961_v19, %v1011_v52  ;;  %v1013_v63 = vmul.f32 %v5956_v18, %v996_v59 }
 0x2ce   : > { %v1030_v8 = vmax.f32 %v1022_v55, 0.0  ;;  %v1024_v24 = vmax.f32 %v1016_v56, 0.0  ;;  %v1023_v25 = vadd.f32 %v5961_v19, %v1015_v57  ;;  %v1017_v26 = vadd.f32 %v5961_v19, %v1009_v58 }
 0x2cf   : > { %1035 = vst.msk [vmem:[#allocation2 + $0x211] sm:$0xff] %vm9016_vm0, %v1026_v60  ;;  %v1028_v27 = vmax.f32 %v1020_v61, 0.0  ;;  %v1027_v29 = vmax.f32 %v1019_v62, 0.0  ;;  %v1021_v30 = vadd.f32 %v5961_v19, %v1013_v63 }
 0x2d0   : > { %1039 = vst.msk [vmem:[#allocation2 + $0x251] sm:$0xff] %vm9016_vm0, %v1030_v8  ;;  %1033 = vst.msk [vmem:[#allocation2 + $0x1f1] sm:$0xff] %vm9016_vm0, %v1024_v24  ;;  %v1031_v0 = vmax.f32 %v1023_v25, 0.0  ;;  %v1025_v1 = vmax.f32 %v1017_v26, 0.0 }
 0x2d1   : > { %1037 = vst.msk [vmem:[#allocation2 + $0x231] sm:$0xff] %vm9016_vm0, %v1028_v27  ;;  %1036 = vst.msk [vmem:[#allocation2 + $0x221] sm:$0xff] %vm9016_vm0, %v1027_v29  ;;  %v1029_v18 = vmax.f32 %v1021_v30, 0.0 }
 0x2d2   : > { %1040 = vst.msk [vmem:[#allocation2 + $0x261] sm:$0xff] %vm9016_vm0, %v1031_v0  ;;  %1034 = vst.msk [vmem:[#allocation2 + $0x201] sm:$0xff] %vm9016_vm0, %v1025_v1 }
 0x2d3   : > { %1038 = vst.msk [vmem:[#allocation2 + $0x241] sm:$0xff] %vm9016_vm0, %v1029_v18 }
 0x2d4 PF: > { %v6161_v31 = vld [vmem:[#allocation2 + $0x10] sm:$0xff]  ;;  %v1041_v19 = vld [vmem:[#allocation2] sm:$0xff]  ;;  %s5535_s28 = smov 4   ;;  %v6171_v33 = vld [vmem:[#allocation2 + $0x18] sm:$0x3]  ;;  %s9037_s29 = smov 8  }
 0x2d5   : > { %1089 = vrot.lane.b32.xlu1 %v6161_v31, %s5535_s28  ;;  %1062 = vst.msk [vmem:[#allocation3 + $0x8] sm:$0xff] %vm9016_vm0, %v6161_v31  ;;  %1085 = vrot.lane.b32.xlu0 %v1041_v19, %s5535_s28  ;;  %1061 = vst.msk [vmem:[#allocation3] sm:$0xff] %vm9016_vm0, %v1041_v19  ;;  %v6169_v32 = vld [vmem:[#allocation2 + $0x20] sm:$0xff]  ;;  %v1042_v34 = vld [vmem:[#allocation2 + $0x8] sm:$0x3]  ;;  %s9001_s0 = smov 12  }
 0x2d6   : > { %1063 = vst.msk [vmem:[#allocation3 + $0x10] sm:$0xff] %vm9016_vm0, %v6169_v32  ;;  %v6175_v35 = vld [vmem:[#allocation2 + $0x30] sm:$0xff]  ;;  %v6179_v36 = vld [vmem:[#allocation2 + $0x40] sm:$0xff]  ;;  %v6196_v40 = vld [vmem:[#allocation2 + $0x28] sm:$0x3]  ;;  %s9040_s19 = smov 16  }
 0x2d7   : > { %1064 = vst.msk [vmem:[#allocation3 + $0x18] sm:$0xff] %vm9016_vm0, %v6175_v35  ;;  %v6181_v37 = vld [vmem:[#allocation2 + $0x50] sm:$0xff]  ;;  %1065 = vst.msk [vmem:[#allocation3 + $0x20] sm:$0xff] %vm9016_vm0, %v6179_v36  ;;  %v6187_v38 = vld [vmem:[#allocation2 + $0x60] sm:$0xff]  ;;  %s8997_s18 = smov 20   ;;  %vm1133_vm4 = vcmask 64545  }
 0x2d8   : > { %1066 = vst.msk [vmem:[#allocation3 + $0x28] sm:$0xff] %vm9016_vm0, %v6181_v37  ;;  %1067 = vst.msk [vmem:[#allocation3 + $0x30] sm:$0xff] %vm9016_vm0, %v6187_v38  ;;  %v6194_v39 = vld [vmem:[#allocation2 + $0x70] sm:$0xff]  ;;  %v6204_v41 = vld [vmem:[#allocation2 + $0x38] sm:$0x3]  ;;  %vm1135_vm5 = vcmask 57376  }
 0x2d9   : > { %1091 = vrot.lane.b32.xlu1 %v6171_v33, %s5535_s28  ;;  %1087 = vrot.lane.b32.xlu0 %v1042_v34, %s5535_s28  ;;  %1068 = vst.msk [vmem:[#allocation3 + $0x38] sm:$0xff] %vm9016_vm0, %v6194_v39  ;;  %v6210_v42 = vld [vmem:[#allocation2 + $0x48] sm:$0x3]  ;;  %v6216_v43 = vld [vmem:[#allocation2 + $0x58] sm:$0x3]  ;;  %v6276_v45 = vld [vmem:[#allocation2 + $0x80] sm:$0xff] }
 0x2da   : > { %v6222_v28 = vld [vmem:[#allocation2 + $0x68] sm:$0x3]  ;;  %v6228_v44 = vld [vmem:[#allocation2 + $0x78] sm:$0x3]  ;;  %s8988_s30 = smov 24   ;;  %vm1201_vm6 = vcmask 91200  }
 0x2db   : > { %v6310_v46 = vld [vmem:[#allocation2 + $0x88] sm:$0x3]  ;;  %vm1199_vm7 = vcmask 97346   ;;  %v6380_v26 = vld [vmem:[#allocation2 + $0x90] sm:$0xff]  ;;  %s8973_s21 = smov 28   ;;  %vm1242_vm8 = vcmask 130144  }
 0x2dc   : > { %s5542_s25 = smov 32   ;;  %vm9014_vm9 = vcmask 155776   ;;  %vm9013_vm10 = vcmask 162945   ;;  %s8958_s1 = smov 36   ;;  %vm9012_vm11 = vcmask 189600   ;;  %vm9011_vm12 = vcmask 195746  }
 0x2dd   : > { %1095 = vrot.lane.b32.xlu1 %v6196_v40, %s5535_s28  ;;  %1093 = vrot.lane.b32.xlu0 %v6169_v32, %s5535_s28  ;;  %s8953_s16 = smov 40   ;;  %vm9008_vm13 = vcmask 228544   ;;  %s8955_s23 = smov 44   ;;  %vm8965_vm14 = vcmask 254176   ;;  %vm8957_vm15 = vcmask 261345   ;;  %vm8961_vm1 = vcmask 288000  }
 0x2de   : > { %vm8960_vm2 = vcmask 294146  }
 0x2e1   : > { %1099 = vrot.lane.b32.xlu1 %v6204_v41, %s5535_s28  ;;  %1097 = vrot.lane.b32.xlu0 %v6175_v35, %s5535_s28 }
 0x2e5   : > { %1103 = vrot.lane.b32.xlu1 %v6210_v42, %s5535_s28  ;;  %1101 = vrot.lane.b32.xlu0 %v6179_v36, %s5535_s28 }
 0x2e9   : > { %1107 = vrot.lane.b32.xlu1 %v6216_v43, %s5535_s28  ;;  %1105 = vrot.lane.b32.xlu0 %v6181_v37, %s5535_s28 }
 0x2ed   : > { %1111 = vrot.lane.b32.xlu1 %v6222_v28, %s5535_s28  ;;  %1109 = vrot.lane.b32.xlu0 %v6187_v38, %s5535_s28 }
 0x2f1   : > { %1115 = vrot.lane.b32.xlu1 %v6228_v44, %s5535_s28  ;;  %1113 = vrot.lane.b32.xlu0 %v6194_v39, %s5535_s28 }
 0x2f5   : > { %1153 = vrot.lane.b32.xlu1 %v1042_v34, %s9037_s29  ;;  %1151 = vrot.lane.b32.xlu0 %v1041_v19, %s9037_s29 }
 0x2f9   : > { %1157 = vrot.lane.b32.xlu1 %v6171_v33, %s9037_s29  ;;  %1155 = vrot.lane.b32.xlu0 %v6161_v31, %s9037_s29 }
 0x2fd   : > { %1161 = vrot.lane.b32.xlu1 %v6196_v40, %s9037_s29  ;;  %1159 = vrot.lane.b32.xlu0 %v6169_v32, %s9037_s29 }
 0x301   : > { %1165 = vrot.lane.b32.xlu1 %v6204_v41, %s9037_s29  ;;  %1163 = vrot.lane.b32.xlu0 %v6175_v35, %s9037_s29 }
 0x305   : > { %1169 = vrot.lane.b32.xlu1 %v6210_v42, %s9037_s29  ;;  %1167 = vrot.lane.b32.xlu0 %v6179_v36, %s9037_s29 }
 0x309   : > { %1173 = vrot.lane.b32.xlu1 %v6216_v43, %s9037_s29  ;;  %1171 = vrot.lane.b32.xlu0 %v6181_v37, %s9037_s29 }
 0x30d   : > { %1177 = vrot.lane.b32.xlu1 %v6222_v28, %s9037_s29  ;;  %1175 = vrot.lane.b32.xlu0 %v6187_v38, %s9037_s29 }
 0x311   : > { %1181 = vrot.lane.b32.xlu1 %v6228_v44, %s9037_s29  ;;  %1179 = vrot.lane.b32.xlu0 %v6194_v39, %s9037_s29 }
 0x315   : > { %1220 = vrot.lane.b32.xlu1 %v6169_v32, %s9001_s0  ;;  %1218 = vrot.lane.b32.xlu0 %v6161_v31, %s9001_s0 }
 0x319   : > { %1224 = vrot.lane.b32.xlu1 %v6179_v36, %s9001_s0  ;;  %1222 = vrot.lane.b32.xlu0 %v6175_v35, %s9001_s0 }
 0x31d   : > { %1228 = vrot.lane.b32.xlu1 %v6187_v38, %s9001_s0  ;;  %1226 = vrot.lane.b32.xlu0 %v6181_v37, %s9001_s0 }
 0x321   : > { %1232 = vrot.lane.b32.xlu1 %v6276_v45, %s9001_s0  ;;  %1230 = vrot.lane.b32.xlu0 %v6194_v39, %s9001_s0  ;;  %s9021_s0 = smov 104  }
 0x325   : > { %1254 = vrot.lane.b32.xlu1 %v6171_v33, %s9040_s19  ;;  %1252 = vrot.lane.b32.xlu0 %v6161_v31, %s9040_s19 }
 0x329   : > { %1258 = vrot.lane.b32.xlu1 %v6196_v40, %s9040_s19  ;;  %1256 = vrot.lane.b32.xlu0 %v6169_v32, %s9040_s19 }
 0x32d   : > { %1262 = vrot.lane.b32.xlu1 %v6204_v41, %s9040_s19  ;;  %1260 = vrot.lane.b32.xlu0 %v6175_v35, %s9040_s19 }
 0x331   : > { %1266 = vrot.lane.b32.xlu1 %v6210_v42, %s9040_s19  ;;  %1264 = vrot.lane.b32.xlu0 %v6179_v36, %s9040_s19 }
 0x335   : > { %1270 = vrot.lane.b32.xlu1 %v6216_v43, %s9040_s19  ;;  %1268 = vrot.lane.b32.xlu0 %v6181_v37, %s9040_s19 }
 0x339   : > { %1274 = vrot.lane.b32.xlu1 %v6222_v28, %s9040_s19  ;;  %1272 = vrot.lane.b32.xlu0 %v6187_v38, %s9040_s19 }
 0x33d   : > { %1278 = vrot.lane.b32.xlu1 %v6228_v44, %s9040_s19  ;;  %1276 = vrot.lane.b32.xlu0 %v6194_v39, %s9040_s19 }
 0x341   : > { %1282 = vrot.lane.b32.xlu1 %v6310_v46, %s9040_s19  ;;  %1280 = vrot.lane.b32.xlu0 %v6276_v45, %s9040_s19 }
 0x345   : > { %1320 = vrot.lane.b32.xlu1 %v6171_v33, %s8997_s18  ;;  %1318 = vrot.lane.b32.xlu0 %v6161_v31, %s8997_s18 }
 0x347   : > { %v1090_v47 = vpop.permute.xlu1 %1089  ;;  %v1086_v48 = vpop.permute.xlu0 %1085 }
 0x348   : > { %1137 = vst.msk [vmem:[#allocation3 + $0x7] sm:$0xfe] %vm1133_vm4, %v1090_v47  ;;  %1134 = vst.msk [vmem:[#allocation3 - $0x1] sm:$0xfe] %vm1133_vm4, %v1086_v48 }
 0x349   : > { %1324 = vrot.lane.b32.xlu1 %v6196_v40, %s8997_s18  ;;  %1322 = vrot.lane.b32.xlu0 %v6169_v32, %s8997_s18 }
 0x34b   : > { %v1092_v49 = vpop.permute.xlu1 %1091  ;;  %v1088_v50 = vpop.permute.xlu0 %1087 }
 0x34c   : > { %1138 = vst.msk [vmem:[#allocation3 + $0xf] sm:$0x1] %vm1135_vm5, %v1092_v49  ;;  %1136 = vst.msk [vmem:[#allocation3 + $0x7] sm:$0x1] %vm1135_vm5, %v1088_v50 }
 0x34d   : > { %1328 = vrot.lane.b32.xlu1 %v6204_v41, %s8997_s18  ;;  %1326 = vrot.lane.b32.xlu0 %v6175_v35, %s8997_s18 }
 0x34f   : > { %v1096_v51 = vpop.permute.xlu1 %1095  ;;  %v1094_v52 = vpop.permute.xlu0 %1093 }
 0x350   : > { %1140 = vst.msk [vmem:[#allocation3 + $0x17] sm:$0x1] %vm1135_vm5, %v1096_v51 }
 0x351   : > { %1139 = vst.msk [vmem:[#allocation3 + $0xf] sm:$0xfe] %vm1133_vm4, %v1094_v52  ;;  %1332 = vrot.lane.b32.xlu1 %v6210_v42, %s8997_s18  ;;  %1330 = vrot.lane.b32.xlu0 %v6179_v36, %s8997_s18 }
 0x353   : > { %v1100_v53 = vpop.permute.xlu1 %1099  ;;  %v1098_v54 = vpop.permute.xlu0 %1097 }
 0x354   : > { %1142 = vst.msk [vmem:[#allocation3 + $0x1f] sm:$0x1] %vm1135_vm5, %v1100_v53  ;;  %v1060_v53 = vld [vmem:[#allocation2 + $0x98] sm:$0x3] }
 0x355   : > { %1141 = vst.msk [vmem:[#allocation3 + $0x17] sm:$0xfe] %vm1133_vm4, %v1098_v54  ;;  %1336 = vrot.lane.b32.xlu1 %v6216_v43, %s8997_s18  ;;  %1334 = vrot.lane.b32.xlu0 %v6181_v37, %s8997_s18 }
 0x357   : > { %v1104_v55 = vpop.permute.xlu1 %1103  ;;  %v1102_v56 = vpop.permute.xlu0 %1101 }
 0x358   : > { %1144 = vst.msk [vmem:[#allocation3 + $0x27] sm:$0x1] %vm1135_vm5, %v1104_v55 }
 0x359   : > { %1143 = vst.msk [vmem:[#allocation3 + $0x1f] sm:$0xfe] %vm1133_vm4, %v1102_v56  ;;  %1340 = vrot.lane.b32.xlu1 %v6222_v28, %s8997_s18  ;;  %1338 = vrot.lane.b32.xlu0 %v6187_v38, %s8997_s18 }
 0x35b   : > { %v1108_v57 = vpop.permute.xlu1 %1107  ;;  %v1106_v58 = vpop.permute.xlu0 %1105 }
 0x35c   : > { %1146 = vst.msk [vmem:[#allocation3 + $0x2f] sm:$0x1] %vm1135_vm5, %v1108_v57 }
 0x35d   : > { %1145 = vst.msk [vmem:[#allocation3 + $0x27] sm:$0xfe] %vm1133_vm4, %v1106_v58  ;;  %1344 = vrot.lane.b32.xlu1 %v6228_v44, %s8997_s18  ;;  %1342 = vrot.lane.b32.xlu0 %v6194_v39, %s8997_s18 }
 0x35f   : > { %v1112_v59 = vpop.permute.xlu1 %1111  ;;  %v1110_v60 = vpop.permute.xlu0 %1109 }
 0x360   : > { %1148 = vst.msk [vmem:[#allocation3 + $0x37] sm:$0x1] %vm1135_vm5, %v1112_v59 }
 0x361   : > { %1147 = vst.msk [vmem:[#allocation3 + $0x2f] sm:$0xfe] %vm1133_vm4, %v1110_v60  ;;  %1348 = vrot.lane.b32.xlu1 %v6310_v46, %s8997_s18  ;;  %1346 = vrot.lane.b32.xlu0 %v6276_v45, %s8997_s18  ;;  %s9042_s18 = smov 100  }
 0x363   : > { %v1116_v61 = vpop.permute.xlu1 %1115  ;;  %v1114_v62 = vpop.permute.xlu0 %1113 }
 0x364   : > { %1150 = vst.msk [vmem:[#allocation3 + $0x3f] sm:$0x1] %vm1135_vm5, %v1116_v61 }
 0x365   : > { %1149 = vst.msk [vmem:[#allocation3 + $0x37] sm:$0xfe] %vm1133_vm4, %v1114_v62  ;;  %1387 = vrot.lane.b32.xlu1 %v6175_v35, %s8988_s30  ;;  %1385 = vrot.lane.b32.xlu0 %v6169_v32, %s8988_s30 }
 0x367   : > { %v1154_v63 = vpop.permute.xlu1 %1153  ;;  %v1152_v8 = vpop.permute.xlu0 %1151 }
 0x368   : > { %1202 = vst.msk [vmem:[#allocation3 + $0x6] sm:$0x3] %vm1201_vm6, %v1154_v63  ;;  %v6494_v63 = vld [vmem:[#allocation2 + $0xc0] sm:$0xff] }
 0x369   : > { %1200 = vst.msk [vmem:[#allocation3 - $0x2] sm:$0xfc] %vm1199_vm7, %v1152_v8  ;;  %1391 = vrot.lane.b32.xlu1 %v6181_v37, %s8988_s30  ;;  %1389 = vrot.lane.b32.xlu0 %v6179_v36, %s8988_s30 }
 0x36b   : > { %v1158_v24 = vpop.permute.xlu1 %1157  ;;  %v1156_v25 = vpop.permute.xlu0 %1155 }
 0x36c   : > { %1204 = vst.msk [vmem:[#allocation3 + $0xe] sm:$0x3] %vm1201_vm6, %v1158_v24 }
 0x36d   : > { %1203 = vst.msk [vmem:[#allocation3 + $0x6] sm:$0xfc] %vm1199_vm7, %v1156_v25  ;;  %1395 = vrot.lane.b32.xlu1 %v6194_v39, %s8988_s30  ;;  %1393 = vrot.lane.b32.xlu0 %v6187_v38, %s8988_s30  ;;  %v6502_v25 = vld [vmem:[#allocation2 + $0xf0] sm:$0xff] }
 0x36f   : > { %v1162_v27 = vpop.permute.xlu1 %1161  ;;  %v1160_v29 = vpop.permute.xlu0 %1159 }
 0x370   : > { %1206 = vst.msk [vmem:[#allocation3 + $0x16] sm:$0x3] %vm1201_vm6, %v1162_v27 }
 0x371   : > { %1205 = vst.msk [vmem:[#allocation3 + $0xe] sm:$0xfc] %vm1199_vm7, %v1160_v29  ;;  %1399 = vrot.lane.b32.xlu1 %v6380_v26, %s8988_s30  ;;  %1397 = vrot.lane.b32.xlu0 %v6276_v45, %s8988_s30  ;;  %s8995_s30 = smov 88  }
 0x373   : > { %v1166_v30 = vpop.permute.xlu1 %1165  ;;  %v1164_v0 = vpop.permute.xlu0 %1163 }
 0x374   : > { %1208 = vst.msk [vmem:[#allocation3 + $0x1e] sm:$0x3] %vm1201_vm6, %v1166_v30  ;;  %v6512_v30 = vld [vmem:[#allocation2 + $0x110] sm:$0xff] }
 0x375   : > { %1207 = vst.msk [vmem:[#allocation3 + $0x16] sm:$0xfc] %vm1199_vm7, %v1164_v0  ;;  %1421 = vrot.lane.b32.xlu1 %v6196_v40, %s8973_s21  ;;  %1419 = vrot.lane.b32.xlu0 %v6169_v32, %s8973_s21  ;;  %v6514_v0 = vld [vmem:[#allocation2 + $0x100] sm:$0xff] }
 0x377   : > { %v1170_v1 = vpop.permute.xlu1 %1169  ;;  %v1168_v18 = vpop.permute.xlu0 %1167 }
 0x378   : > { %1210 = vst.msk [vmem:[#allocation3 + $0x26] sm:$0x3] %vm1201_vm6, %v1170_v1 }
 0x379   : > { %1209 = vst.msk [vmem:[#allocation3 + $0x1e] sm:$0xfc] %vm1199_vm7, %v1168_v18  ;;  %1425 = vrot.lane.b32.xlu1 %v6204_v41, %s8973_s21  ;;  %1423 = vrot.lane.b32.xlu0 %v6175_v35, %s8973_s21 }
 0x37b   : > { %v1174_v31 = vpop.permute.xlu1 %1173  ;;  %v1172_v19 = vpop.permute.xlu0 %1171 }
 0x37c   : > { %1212 = vst.msk [vmem:[#allocation3 + $0x2e] sm:$0x3] %vm1201_vm6, %v1174_v31  ;;  %v1553_v31 = vld [vmem:[#allocation2 + $0xa8] sm:$0x3] }
 0x37d   : > { %1211 = vst.msk [vmem:[#allocation3 + $0x26] sm:$0xfc] %vm1199_vm7, %v1172_v19  ;;  %1429 = vrot.lane.b32.xlu1 %v6210_v42, %s8973_s21  ;;  %1427 = vrot.lane.b32.xlu0 %v6179_v36, %s8973_s21 }
 0x37f   : > { %v1178_v33 = vpop.permute.xlu1 %1177  ;;  %v1176_v34 = vpop.permute.xlu0 %1175 }
 0x380   : > { %1214 = vst.msk [vmem:[#allocation3 + $0x36] sm:$0x3] %vm1201_vm6, %v1178_v33 }
 0x381   : > { %1213 = vst.msk [vmem:[#allocation3 + $0x2e] sm:$0xfc] %vm1199_vm7, %v1176_v34  ;;  %1433 = vrot.lane.b32.xlu1 %v6216_v43, %s8973_s21  ;;  %1431 = vrot.lane.b32.xlu0 %v6181_v37, %s8973_s21  ;;  %v6527_v34 = vld [vmem:[#allocation2 + $0xb8] sm:$0x3] }
 0x383   : > { %v1182_v47 = vpop.permute.xlu1 %1181  ;;  %v1180_v48 = vpop.permute.xlu0 %1179 }
 0x384   : > { %1216 = vst.msk [vmem:[#allocation3 + $0x3e] sm:$0x3] %vm1201_vm6, %v1182_v47 }
 0x385   : > { %1215 = vst.msk [vmem:[#allocation3 + $0x36] sm:$0xfc] %vm1199_vm7, %v1180_v48  ;;  %1437 = vrot.lane.b32.xlu1 %v6222_v28, %s8973_s21  ;;  %1435 = vrot.lane.b32.xlu0 %v6187_v38, %s8973_s21 }
 0x387   : > { %v1221_v49 = vpop.permute.xlu1 %1220  ;;  %v1219_v50 = vpop.permute.xlu0 %1218 }
 0x388   : > { %1244 = vst.msk [vmem:[#allocation3 + $0x8] sm:$0xff] %vm1242_vm8, %v1221_v49  ;;  %1243 = vst.msk [vmem:[#allocation3] sm:$0xff] %vm1242_vm8, %v1219_v50  ;;  %v6535_v49 = vld [vmem:[#allocation2 + $0xc8] sm:$0x3] }
 0x389   : > { %1441 = vrot.lane.b32.xlu1 %v6228_v44, %s8973_s21  ;;  %1439 = vrot.lane.b32.xlu0 %v6194_v39, %s8973_s21 }
 0x38b   : > { %v1225_v51 = vpop.permute.xlu1 %1224  ;;  %v1223_v52 = vpop.permute.xlu0 %1222 }
 0x38c   : > { %1246 = vst.msk [vmem:[#allocation3 + $0x18] sm:$0xff] %vm1242_vm8, %v1225_v51  ;;  %1245 = vst.msk [vmem:[#allocation3 + $0x10] sm:$0xff] %vm1242_vm8, %v1223_v52  ;;  %v6543_v52 = vld [vmem:[#allocation2 + $0xd8] sm:$0x3] }
 0x38d   : > { %1445 = vrot.lane.b32.xlu1 %v6310_v46, %s8973_s21  ;;  %1443 = vrot.lane.b32.xlu0 %v6276_v45, %s8973_s21 }
 0x38f   : > { %v1229_v54 = vpop.permute.xlu1 %1228  ;;  %v1227_v55 = vpop.permute.xlu0 %1226 }
 0x390   : > { %1248 = vst.msk [vmem:[#allocation3 + $0x28] sm:$0xff] %vm1242_vm8, %v1229_v54  ;;  %1247 = vst.msk [vmem:[#allocation3 + $0x20] sm:$0xff] %vm1242_vm8, %v1227_v55  ;;  %v6551_v55 = vld [vmem:[#allocation2 + $0xe8] sm:$0x3] }
 0x391   : > { %1449 = vrot.lane.b32.xlu1 %v1060_v53, %s8973_s21  ;;  %1447 = vrot.lane.b32.xlu0 %v6380_v26, %s8973_s21  ;;  %s8980_s21 = smov 72  }
 0x393   : > { %v1233_v56 = vpop.permute.xlu1 %1232  ;;  %v1231_v57 = vpop.permute.xlu0 %1230 }
 0x394   : > { %1250 = vst.msk [vmem:[#allocation3 + $0x38] sm:$0xff] %vm1242_vm8, %v1233_v56  ;;  %1249 = vst.msk [vmem:[#allocation3 + $0x30] sm:$0xff] %vm1242_vm8, %v1231_v57 }
 0x395   : > { %1487 = vrot.lane.b32.xlu1 %v6196_v40, %s5542_s25  ;;  %1485 = vrot.lane.b32.xlu0 %v6169_v32, %s5542_s25 }
 0x397   : > { %v1255_v58 = vpop.permute.xlu1 %1254  ;;  %v1253_v59 = vpop.permute.xlu0 %1252 }
 0x398   : > { %1303 = vst.msk [vmem:[#allocation3 + $0x7] sm:$0x1] %vm9014_vm9, %v1255_v58  ;;  %v6559_v58 = vld [vmem:[#allocation2 + $0xf8] sm:$0x3] }
 0x399   : > { %1301 = vst.msk [vmem:[#allocation3 - $0x1] sm:$0xfe] %vm9013_vm10, %v1253_v59  ;;  %1491 = vrot.lane.b32.xlu1 %v6204_v41, %s5542_s25  ;;  %1489 = vrot.lane.b32.xlu0 %v6175_v35, %s5542_s25 }
 0x39b   : > { %v1259_v60 = vpop.permute.xlu1 %1258  ;;  %v1257_v61 = vpop.permute.xlu0 %1256 }
 0x39c   : > { %1305 = vst.msk [vmem:[#allocation3 + $0xf] sm:$0x1] %vm9014_vm9, %v1259_v60 }
 0x39d   : > { %1304 = vst.msk [vmem:[#allocation3 + $0x7] sm:$0xfe] %vm9013_vm10, %v1257_v61  ;;  %1495 = vrot.lane.b32.xlu1 %v6210_v42, %s5542_s25  ;;  %1493 = vrot.lane.b32.xlu0 %v6179_v36, %s5542_s25  ;;  %v6567_v61 = vld [vmem:[#allocation2 + $0x108] sm:$0x3] }
 0x39f   : > { %v1263_v32 = vpop.permute.xlu1 %1262  ;;  %v1261_v40 = vpop.permute.xlu0 %1260 }
 0x3a0   : > { %1307 = vst.msk [vmem:[#allocation3 + $0x17] sm:$0x1] %vm9014_vm9, %v1263_v32 }
 0x3a1   : > { %1306 = vst.msk [vmem:[#allocation3 + $0xf] sm:$0xfe] %vm9013_vm10, %v1261_v40  ;;  %1499 = vrot.lane.b32.xlu1 %v6216_v43, %s5542_s25  ;;  %1497 = vrot.lane.b32.xlu0 %v6181_v37, %s5542_s25 }
 0x3a3   : > { %v1267_v35 = vpop.permute.xlu1 %1266  ;;  %v1265_v41 = vpop.permute.xlu0 %1264 }
 0x3a4   : > { %1309 = vst.msk [vmem:[#allocation3 + $0x1f] sm:$0x1] %vm9014_vm9, %v1267_v35  ;;  %v6575_v35 = vld [vmem:[#allocation2 + $0x118] sm:$0x3] }
 0x3a5   : > { %1308 = vst.msk [vmem:[#allocation3 + $0x17] sm:$0xfe] %vm9013_vm10, %v1265_v41  ;;  %1503 = vrot.lane.b32.xlu1 %v6222_v28, %s5542_s25  ;;  %1501 = vrot.lane.b32.xlu0 %v6187_v38, %s5542_s25 }
 0x3a7   : > { %v1271_v36 = vpop.permute.xlu1 %1270  ;;  %v1269_v42 = vpop.permute.xlu0 %1268 }
 0x3a8   : > { %1311 = vst.msk [vmem:[#allocation3 + $0x27] sm:$0x1] %vm9014_vm9, %v1271_v36 }
 0x3a9   : > { %1310 = vst.msk [vmem:[#allocation3 + $0x1f] sm:$0xfe] %vm9013_vm10, %v1269_v42  ;;  %1507 = vrot.lane.b32.xlu1 %v6228_v44, %s5542_s25  ;;  %1505 = vrot.lane.b32.xlu0 %v6194_v39, %s5542_s25  ;;  %v6482_v39 = vld [vmem:[#allocation2 + $0xb0] sm:$0xff]  ;;  %v6484_v44 = vld [vmem:[#allocation2 + $0xa0] sm:$0xff] }
 0x3ab   : > { %v1275_v37 = vpop.permute.xlu1 %1274  ;;  %v1273_v43 = vpop.permute.xlu0 %1272 }
 0x3ac   : > { %1313 = vst.msk [vmem:[#allocation3 + $0x2f] sm:$0x1] %vm9014_vm9, %v1275_v37 }
 0x3ad   : > { %1312 = vst.msk [vmem:[#allocation3 + $0x27] sm:$0xfe] %vm9013_vm10, %v1273_v43  ;;  %1511 = vrot.lane.b32.xlu1 %v6310_v46, %s5542_s25  ;;  %1509 = vrot.lane.b32.xlu0 %v6276_v45, %s5542_s25  ;;  %v6492_v45 = vld [vmem:[#allocation2 + $0xd0] sm:$0xff] }
 0x3af   : > { %v1279_v38 = vpop.permute.xlu1 %1278  ;;  %v1277_v28 = vpop.permute.xlu0 %1276 }
 0x3b0   : > { %1315 = vst.msk [vmem:[#allocation3 + $0x37] sm:$0x1] %vm9014_vm9, %v1279_v38 }
 0x3b1   : > { %1314 = vst.msk [vmem:[#allocation3 + $0x2f] sm:$0xfe] %vm9013_vm10, %v1277_v28  ;;  %1515 = vrot.lane.b32.xlu1 %v1060_v53, %s5542_s25  ;;  %1513 = vrot.lane.b32.xlu0 %v6380_v26, %s5542_s25  ;;  %v6504_v26 = vld [vmem:[#allocation2 + $0xe0] sm:$0xff] }
 0x3b3   : > { %v1283_v62 = vpop.permute.xlu1 %1282  ;;  %v1281_v46 = vpop.permute.xlu0 %1280 }
 0x3b4   : > { %1317 = vst.msk [vmem:[#allocation3 + $0x3f] sm:$0x1] %vm9014_vm9, %v1283_v62  ;;  %vm9017_vm9 = vcmask 883712  }
 0x3b5   : > { %1316 = vst.msk [vmem:[#allocation3 + $0x37] sm:$0xfe] %vm9013_vm10, %v1281_v46  ;;  %1582 = vrot.lane.b32.xlu1 %v6482_v39, %s8958_s1  ;;  %1580 = vrot.lane.b32.xlu0 %v6484_v44, %s8958_s1  ;;  %vm9019_vm10 = vcmask 878400  }
 0x3b7   : > { %v1321_v8 = vpop.permute.xlu1 %1320  ;;  %v1319_v24 = vpop.permute.xlu0 %1318 }
 0x3b8   : > { %1369 = vst.msk [vmem:[#allocation3 + $0x6] sm:$0x3] %vm9012_vm11, %v1321_v8 }
 0x3b9   : > { %1367 = vst.msk [vmem:[#allocation3 - $0x2] sm:$0xfc] %vm9011_vm12, %v1319_v24  ;;  %1586 = vrot.lane.b32.xlu1 %v6492_v45, %s8958_s1  ;;  %1584 = vrot.lane.b32.xlu0 %v6494_v63, %s8958_s1 }
 0x3bb   : > { %v1325_v27 = vpop.permute.xlu1 %1324  ;;  %v1323_v29 = vpop.permute.xlu0 %1322 }
 0x3bc   : > { %1371 = vst.msk [vmem:[#allocation3 + $0xe] sm:$0x3] %vm9012_vm11, %v1325_v27 }
 0x3bd   : > { %1370 = vst.msk [vmem:[#allocation3 + $0x6] sm:$0xfc] %vm9011_vm12, %v1323_v29  ;;  %1590 = vrot.lane.b32.xlu1 %v6502_v25, %s8958_s1  ;;  %1588 = vrot.lane.b32.xlu0 %v6504_v26, %s8958_s1 }
 0x3bf   : > { %v1329_v1 = vpop.permute.xlu1 %1328  ;;  %v1327_v18 = vpop.permute.xlu0 %1326 }
 0x3c0   : > { %1373 = vst.msk [vmem:[#allocation3 + $0x16] sm:$0x3] %vm9012_vm11, %v1329_v1 }
 0x3c1   : > { %1372 = vst.msk [vmem:[#allocation3 + $0xe] sm:$0xfc] %vm9011_vm12, %v1327_v18  ;;  %1594 = vrot.lane.b32.xlu1 %v6512_v30, %s8958_s1  ;;  %1592 = vrot.lane.b32.xlu0 %v6514_v0, %s8958_s1  ;;  %s8966_s1 = smov 56  }
 0x3c3   : > { %v1333_v19 = vpop.permute.xlu1 %1332  ;;  %v1331_v33 = vpop.permute.xlu0 %1330 }
 0x3c4   : > { %1375 = vst.msk [vmem:[#allocation3 + $0x1e] sm:$0x3] %vm9012_vm11, %v1333_v19 }
 0x3c5   : > { %1374 = vst.msk [vmem:[#allocation3 + $0x16] sm:$0xfc] %vm9011_vm12, %v1331_v33  ;;  %1623 = vrot.lane.b32.xlu1 %v1553_v31, %s8953_s16  ;;  %1621 = vrot.lane.b32.xlu0 %v6484_v44, %s8953_s16 }
 0x3c7   : > { %v1337_v47 = vpop.permute.xlu1 %1336  ;;  %v1335_v48 = vpop.permute.xlu0 %1334 }
 0x3c8   : > { %1377 = vst.msk [vmem:[#allocation3 + $0x26] sm:$0x3] %vm9012_vm11, %v1337_v47 }
 0x3c9   : > { %1376 = vst.msk [vmem:[#allocation3 + $0x1e] sm:$0xfc] %vm9011_vm12, %v1335_v48  ;;  %1627 = vrot.lane.b32.xlu1 %v6527_v34, %s8953_s16  ;;  %1625 = vrot.lane.b32.xlu0 %v6482_v39, %s8953_s16 }
 0x3cb   : > { %v1341_v50 = vpop.permute.xlu1 %1340  ;;  %v1339_v51 = vpop.permute.xlu0 %1338 }
 0x3cc   : > { %1379 = vst.msk [vmem:[#allocation3 + $0x2e] sm:$0x3] %vm9012_vm11, %v1341_v50 }
 0x3cd   : > { %1378 = vst.msk [vmem:[#allocation3 + $0x26] sm:$0xfc] %vm9011_vm12, %v1339_v51  ;;  %1631 = vrot.lane.b32.xlu1 %v6535_v49, %s8953_s16  ;;  %1629 = vrot.lane.b32.xlu0 %v6494_v63, %s8953_s16 }
 0x3cf   : > { %v1345_v53 = vpop.permute.xlu1 %1344  ;;  %v1343_v54 = vpop.permute.xlu0 %1342 }
 0x3d0   : > { %1381 = vst.msk [vmem:[#allocation3 + $0x36] sm:$0x3] %vm9012_vm11, %v1345_v53 }
 0x3d1   : > { %1380 = vst.msk [vmem:[#allocation3 + $0x2e] sm:$0xfc] %vm9011_vm12, %v1343_v54  ;;  %1635 = vrot.lane.b32.xlu1 %v6543_v52, %s8953_s16  ;;  %1633 = vrot.lane.b32.xlu0 %v6492_v45, %s8953_s16  ;;  %v6648_v54 = vld [vmem:[#allocation2 + $0x120] sm:$0xff] }
 0x3d3   : > { %v1349_v56 = vpop.permute.xlu1 %1348  ;;  %v1347_v57 = vpop.permute.xlu0 %1346 }
 0x3d4   : > { %1383 = vst.msk [vmem:[#allocation3 + $0x3e] sm:$0x3] %vm9012_vm11, %v1349_v56  ;;  %vm9018_vm11 = vcmask 884546  }
 0x3d5   : > { %1382 = vst.msk [vmem:[#allocation3 + $0x36] sm:$0xfc] %vm9011_vm12, %v1347_v57  ;;  %1639 = vrot.lane.b32.xlu1 %v6551_v55, %s8953_s16  ;;  %1637 = vrot.lane.b32.xlu0 %v6504_v26, %s8953_s16  ;;  %vm9020_vm12 = vcmask 844576  }
 0x3d7   : > { %v1388_v59 = vpop.permute.xlu1 %1387  ;;  %v1386_v60 = vpop.permute.xlu0 %1385 }
 0x3d8   : > { %1411 = vst.msk [vmem:[#allocation3 + $0x8] sm:$0xff] %vm9008_vm13, %v1388_v59  ;;  %1410 = vst.msk [vmem:[#allocation3] sm:$0xff] %vm9008_vm13, %v1386_v60 }
 0x3d9   : > { %1643 = vrot.lane.b32.xlu1 %v6559_v58, %s8953_s16  ;;  %1641 = vrot.lane.b32.xlu0 %v6502_v25, %s8953_s16 }
 0x3db   : > { %v1392_v32 = vpop.permute.xlu1 %1391  ;;  %v1390_v40 = vpop.permute.xlu0 %1389 }
 0x3dc   : > { %1413 = vst.msk [vmem:[#allocation3 + $0x18] sm:$0xff] %vm9008_vm13, %v1392_v32  ;;  %1412 = vst.msk [vmem:[#allocation3 + $0x10] sm:$0xff] %vm9008_vm13, %v1390_v40 }
 0x3dd   : > { %1647 = vrot.lane.b32.xlu1 %v6567_v61, %s8953_s16  ;;  %1645 = vrot.lane.b32.xlu0 %v6514_v0, %s8953_s16 }
 0x3df   : > { %v1396_v41 = vpop.permute.xlu1 %1395  ;;  %v1394_v36 = vpop.permute.xlu0 %1393 }
 0x3e0   : > { %1415 = vst.msk [vmem:[#allocation3 + $0x28] sm:$0xff] %vm9008_vm13, %v1396_v41  ;;  %1414 = vst.msk [vmem:[#allocation3 + $0x20] sm:$0xff] %vm9008_vm13, %v1394_v36 }
 0x3e1   : > { %1651 = vrot.lane.b32.xlu1 %v6575_v35, %s8953_s16  ;;  %1649 = vrot.lane.b32.xlu0 %v6512_v30, %s8953_s16  ;;  %s5546_s16 = smov 48  }
 0x3e3   : > { %v1400_v42 = vpop.permute.xlu1 %1399  ;;  %v1398_v37 = vpop.permute.xlu0 %1397 }
 0x3e4   : > { %1417 = vst.msk [vmem:[#allocation3 + $0x38] sm:$0xff] %vm9008_vm13, %v1400_v42  ;;  %1416 = vst.msk [vmem:[#allocation3 + $0x30] sm:$0xff] %vm9008_vm13, %v1398_v37  ;;  %vm2438_vm13 = vcmask 786146  }
 0x3e5   : > { %1689 = vrot.lane.b32.xlu1 %v1553_v31, %s8955_s23  ;;  %1687 = vrot.lane.b32.xlu0 %v6484_v44, %s8955_s23 }
 0x3e7   : > { %v1422_v43 = vpop.permute.xlu1 %1421  ;;  %v1420_v38 = vpop.permute.xlu0 %1419 }
 0x3e8   : > { %1470 = vst.msk [vmem:[#allocation3 + $0x7] sm:$0x1] %vm8965_vm14, %v1422_v43 }
 0x3e9   : > { %1468 = vst.msk [vmem:[#allocation3 - $0x1] sm:$0xfe] %vm8957_vm15, %v1420_v38  ;;  %1693 = vrot.lane.b32.xlu1 %v6527_v34, %s8955_s23  ;;  %1691 = vrot.lane.b32.xlu0 %v6482_v39, %s8955_s23 }
 0x3eb   : > { %v1426_v28 = vpop.permute.xlu1 %1425  ;;  %v1424_v62 = vpop.permute.xlu0 %1423 }
 0x3ec   : > { %1472 = vst.msk [vmem:[#allocation3 + $0xf] sm:$0x1] %vm8965_vm14, %v1426_v28 }
 0x3ed   : > { %1471 = vst.msk [vmem:[#allocation3 + $0x7] sm:$0xfe] %vm8957_vm15, %v1424_v62  ;;  %1697 = vrot.lane.b32.xlu1 %v6535_v49, %s8955_s23  ;;  %1695 = vrot.lane.b32.xlu0 %v6494_v63, %s8955_s23 }
 0x3ef   : > { %v1430_v44 = vpop.permute.xlu1 %1429  ;;  %v1428_v46 = vpop.permute.xlu0 %1427 }
 0x3f0   : > { %1474 = vst.msk [vmem:[#allocation3 + $0x17] sm:$0x1] %vm8965_vm14, %v1430_v44 }
 0x3f1   : > { %1473 = vst.msk [vmem:[#allocation3 + $0xf] sm:$0xfe] %vm8957_vm15, %v1428_v46  ;;  %1701 = vrot.lane.b32.xlu1 %v6543_v52, %s8955_s23  ;;  %1699 = vrot.lane.b32.xlu0 %v6492_v45, %s8955_s23 }
 0x3f3   : > { %v1434_v8 = vpop.permute.xlu1 %1433  ;;  %v1432_v24 = vpop.permute.xlu0 %1431 }
 0x3f4   : > { %1476 = vst.msk [vmem:[#allocation3 + $0x1f] sm:$0x1] %vm8965_vm14, %v1434_v8  ;;  %v6698_v8 = vld [vmem:[#allocation2 + $0x128] sm:$0x3] }
 0x3f5   : > { %1475 = vst.msk [vmem:[#allocation3 + $0x17] sm:$0xfe] %vm8957_vm15, %v1432_v24  ;;  %1705 = vrot.lane.b32.xlu1 %v6551_v55, %s8955_s23  ;;  %1703 = vrot.lane.b32.xlu0 %v6504_v26, %s8955_s23 }
 0x3f7   : > { %v1438_v27 = vpop.permute.xlu1 %1437  ;;  %v1436_v29 = vpop.permute.xlu0 %1435 }
 0x3f8   : > { %1478 = vst.msk [vmem:[#allocation3 + $0x27] sm:$0x1] %vm8965_vm14, %v1438_v27 }
 0x3f9   : > { %1477 = vst.msk [vmem:[#allocation3 + $0x1f] sm:$0xfe] %vm8957_vm15, %v1436_v29  ;;  %1709 = vrot.lane.b32.xlu1 %v6559_v58, %s8955_s23  ;;  %1707 = vrot.lane.b32.xlu0 %v6502_v25, %s8955_s23 }
 0x3fb   : > { %v1442_v1 = vpop.permute.xlu1 %1441  ;;  %v1440_v18 = vpop.permute.xlu0 %1439 }
 0x3fc   : > { %1480 = vst.msk [vmem:[#allocation3 + $0x2f] sm:$0x1] %vm8965_vm14, %v1442_v1 }
 0x3fd   : > { %1479 = vst.msk [vmem:[#allocation3 + $0x27] sm:$0xfe] %vm8957_vm15, %v1440_v18  ;;  %1713 = vrot.lane.b32.xlu1 %v6567_v61, %s8955_s23  ;;  %1711 = vrot.lane.b32.xlu0 %v6514_v0, %s8955_s23 }
 0x3ff   : > { %v1446_v31 = vpop.permute.xlu1 %1445  ;;  %v1444_v19 = vpop.permute.xlu0 %1443 }
 0x400   : > { %1482 = vst.msk [vmem:[#allocation3 + $0x37] sm:$0x1] %vm8965_vm14, %v1446_v31 }
 0x401   : > { %1481 = vst.msk [vmem:[#allocation3 + $0x2f] sm:$0xfe] %vm8957_vm15, %v1444_v19  ;;  %1717 = vrot.lane.b32.xlu1 %v6575_v35, %s8955_s23  ;;  %1715 = vrot.lane.b32.xlu0 %v6512_v30, %s8955_s23  ;;  %s8962_s23 = smov 52  }
 0x403   : > { %v1450_v33 = vpop.permute.xlu1 %1449  ;;  %v1448_v47 = vpop.permute.xlu0 %1447 }
 0x404   : > { %1484 = vst.msk [vmem:[#allocation3 + $0x3f] sm:$0x1] %vm8965_vm14, %v1450_v33  ;;  %vm8971_vm14 = vcmask 392546  }
 0x405   : > { %1483 = vst.msk [vmem:[#allocation3 + $0x37] sm:$0xfe] %vm8957_vm15, %v1448_v47  ;;  %1756 = vrot.lane.b32.xlu1 %v6494_v63, %s5546_s16  ;;  %1754 = vrot.lane.b32.xlu0 %v6482_v39, %s5546_s16  ;;  %vm8964_vm15 = vcmask 326944  }
 0x407   : > { %v1488_v48 = vpop.permute.xlu1 %1487  ;;  %v1486_v50 = vpop.permute.xlu0 %1485 }
 0x408   : > { %1536 = vst.msk [vmem:[#allocation3 + $0x6] sm:$0x3] %vm8961_vm1, %v1488_v48 }
 0x409   : > { %1534 = vst.msk [vmem:[#allocation3 - $0x2] sm:$0xfc] %vm8960_vm2, %v1486_v50  ;;  %1760 = vrot.lane.b32.xlu1 %v6504_v26, %s5546_s16  ;;  %1758 = vrot.lane.b32.xlu0 %v6492_v45, %s5546_s16 }
 0x40b   : > { %v1492_v51 = vpop.permute.xlu1 %1491  ;;  %v1490_v53 = vpop.permute.xlu0 %1489 }
 0x40c   : > { %1538 = vst.msk [vmem:[#allocation3 + $0xe] sm:$0x3] %vm8961_vm1, %v1492_v51 }
 0x40d   : > { %1537 = vst.msk [vmem:[#allocation3 + $0x6] sm:$0xfc] %vm8960_vm2, %v1490_v53  ;;  %1764 = vrot.lane.b32.xlu1 %v6514_v0, %s5546_s16  ;;  %1762 = vrot.lane.b32.xlu0 %v6502_v25, %s5546_s16 }
 0x40f   : > { %v1496_v56 = vpop.permute.xlu1 %1495  ;;  %v1494_v57 = vpop.permute.xlu0 %1493 }
 0x410   : > { %1540 = vst.msk [vmem:[#allocation3 + $0x16] sm:$0x3] %vm8961_vm1, %v1496_v56 }
 0x411   : > { %1539 = vst.msk [vmem:[#allocation3 + $0xe] sm:$0xfc] %vm8960_vm2, %v1494_v57  ;;  %1768 = vrot.lane.b32.xlu1 %v6648_v54, %s5546_s16  ;;  %1766 = vrot.lane.b32.xlu0 %v6512_v30, %s5546_s16 }
 0x413   : > { %v1500_v59 = vpop.permute.xlu1 %1499  ;;  %v1498_v60 = vpop.permute.xlu0 %1497 }
 0x414   : > { %1542 = vst.msk [vmem:[#allocation3 + $0x1e] sm:$0x3] %vm8961_vm1, %v1500_v59 }
 0x415   : > { %1541 = vst.msk [vmem:[#allocation3 + $0x16] sm:$0xfc] %vm8960_vm2, %v1498_v60  ;;  %1790 = vrot.lane.b32.xlu1 %v6527_v34, %s8962_s23  ;;  %1788 = vrot.lane.b32.xlu0 %v6482_v39, %s8962_s23 }
 0x417   : > { %v1504_v32 = vpop.permute.xlu1 %1503  ;;  %v1502_v40 = vpop.permute.xlu0 %1501 }
 0x418   : > { %1544 = vst.msk [vmem:[#allocation3 + $0x26] sm:$0x3] %vm8961_vm1, %v1504_v32 }
 0x419   : > { %1543 = vst.msk [vmem:[#allocation3 + $0x1e] sm:$0xfc] %vm8960_vm2, %v1502_v40  ;;  %1794 = vrot.lane.b32.xlu1 %v6535_v49, %s8962_s23  ;;  %1792 = vrot.lane.b32.xlu0 %v6494_v63, %s8962_s23 }
 0x41b   : > { %v1508_v41 = vpop.permute.xlu1 %1507  ;;  %v1506_v36 = vpop.permute.xlu0 %1505 }
 0x41c   : > { %1546 = vst.msk [vmem:[#allocation3 + $0x2e] sm:$0x3] %vm8961_vm1, %v1508_v41 }
 0x41d   : > { %1545 = vst.msk [vmem:[#allocation3 + $0x26] sm:$0xfc] %vm8960_vm2, %v1506_v36  ;;  %1798 = vrot.lane.b32.xlu1 %v6543_v52, %s8962_s23  ;;  %1796 = vrot.lane.b32.xlu0 %v6492_v45, %s8962_s23 }
 0x41f   : > { %v1512_v42 = vpop.permute.xlu1 %1511  ;;  %v1510_v37 = vpop.permute.xlu0 %1509 }
 0x420   : > { %1548 = vst.msk [vmem:[#allocation3 + $0x36] sm:$0x3] %vm8961_vm1, %v1512_v42 }
 0x421   : > { %1547 = vst.msk [vmem:[#allocation3 + $0x2e] sm:$0xfc] %vm8960_vm2, %v1510_v37  ;;  %1802 = vrot.lane.b32.xlu1 %v6551_v55, %s8962_s23  ;;  %1800 = vrot.lane.b32.xlu0 %v6504_v26, %s8962_s23  ;;  %v6772_v37 = vld [vmem:[#allocation2 + $0x130] sm:$0xff] }
 0x423   : > { %v1516_v43 = vpop.permute.xlu1 %1515  ;;  %v1514_v38 = vpop.permute.xlu0 %1513 }
 0x424   : > { %1550 = vst.msk [vmem:[#allocation3 + $0x3e] sm:$0x3] %vm8961_vm1, %v1516_v43  ;;  %vm8968_vm1 = vcmask 359745  }
 0x425   : > { %1549 = vst.msk [vmem:[#allocation3 + $0x36] sm:$0xfc] %vm8960_vm2, %v1514_v38  ;;  %1806 = vrot.lane.b32.xlu1 %v6559_v58, %s8962_s23  ;;  %1804 = vrot.lane.b32.xlu0 %v6502_v25, %s8962_s23  ;;  %vm8976_vm2 = vcmask 352576  }
 0x427   : > { %v1583_v28 = vpop.permute.xlu1 %1582  ;;  %v1581_v62 = vpop.permute.xlu0 %1580 }
 0x428   : > { %1606 = vst.msk [vmem:[#allocation3 + $0x8] sm:$0xff] %vm8964_vm15, %v1583_v28  ;;  %1605 = vst.msk [vmem:[#allocation3] sm:$0xff] %vm8964_vm15, %v1581_v62 }
 0x429   : > { %1810 = vrot.lane.b32.xlu1 %v6567_v61, %s8962_s23  ;;  %1808 = vrot.lane.b32.xlu0 %v6514_v0, %s8962_s23 }
 0x42b   : > { %v1587_v44 = vpop.permute.xlu1 %1586  ;;  %v1585_v46 = vpop.permute.xlu0 %1584 }
 0x42c   : > { %1608 = vst.msk [vmem:[#allocation3 + $0x18] sm:$0xff] %vm8964_vm15, %v1587_v44  ;;  %1607 = vst.msk [vmem:[#allocation3 + $0x10] sm:$0xff] %vm8964_vm15, %v1585_v46 }
 0x42d   : > { %1814 = vrot.lane.b32.xlu1 %v6575_v35, %s8962_s23  ;;  %1812 = vrot.lane.b32.xlu0 %v6512_v30, %s8962_s23 }
 0x42f   : > { %v1591_v24 = vpop.permute.xlu1 %1590  ;;  %v1589_v27 = vpop.permute.xlu0 %1588 }
 0x430   : > { %1610 = vst.msk [vmem:[#allocation3 + $0x28] sm:$0xff] %vm8964_vm15, %v1591_v24  ;;  %1609 = vst.msk [vmem:[#allocation3 + $0x20] sm:$0xff] %vm8964_vm15, %v1589_v27 }
 0x431   : > { %1818 = vrot.lane.b32.xlu1 %v6698_v8, %s8962_s23  ;;  %1816 = vrot.lane.b32.xlu0 %v6648_v54, %s8962_s23  ;;  %s8969_s23 = smov 60  }
 0x433   : > { %v1595_v29 = vpop.permute.xlu1 %1594  ;;  %v1593_v1 = vpop.permute.xlu0 %1592 }
 0x434   : > { %1612 = vst.msk [vmem:[#allocation3 + $0x38] sm:$0xff] %vm8964_vm15, %v1595_v29  ;;  %1611 = vst.msk [vmem:[#allocation3 + $0x30] sm:$0xff] %vm8964_vm15, %v1593_v1  ;;  %vm8972_vm15 = vcmask 386400  }
 0x435   : > { %1856 = vrot.lane.b32.xlu1 %v6527_v34, %s8966_s1  ;;  %1854 = vrot.lane.b32.xlu0 %v6482_v39, %s8966_s1 }
 0x437   : > { %v1624_v18 = vpop.permute.xlu1 %1623  ;;  %v1622_v31 = vpop.permute.xlu0 %1621 }
 0x438   : > { %1672 = vst.msk [vmem:[#allocation3 + $0x7] sm:$0x1] %vm8976_vm2, %v1624_v18 }
 0x439   : > { %1670 = vst.msk [vmem:[#allocation3 - $0x1] sm:$0xfe] %vm8968_vm1, %v1622_v31  ;;  %1860 = vrot.lane.b32.xlu1 %v6535_v49, %s8966_s1  ;;  %1858 = vrot.lane.b32.xlu0 %v6494_v63, %s8966_s1 }
 0x43b   : > { %v1628_v19 = vpop.permute.xlu1 %1627  ;;  %v1626_v33 = vpop.permute.xlu0 %1625 }
 0x43c   : > { %1674 = vst.msk [vmem:[#allocation3 + $0xf] sm:$0x1] %vm8976_vm2, %v1628_v19 }
 0x43d   : > { %1673 = vst.msk [vmem:[#allocation3 + $0x7] sm:$0xfe] %vm8968_vm1, %v1626_v33  ;;  %1864 = vrot.lane.b32.xlu1 %v6543_v52, %s8966_s1  ;;  %1862 = vrot.lane.b32.xlu0 %v6492_v45, %s8966_s1 }
 0x43f   : > { %v1632_v39 = vpop.permute.xlu1 %1631  ;;  %v1630_v34 = vpop.permute.xlu0 %1629 }
 0x440   : > { %1676 = vst.msk [vmem:[#allocation3 + $0x17] sm:$0x1] %vm8976_vm2, %v1632_v39 }
 0x441   : > { %1675 = vst.msk [vmem:[#allocation3 + $0xf] sm:$0xfe] %vm8968_vm1, %v1630_v34  ;;  %1868 = vrot.lane.b32.xlu1 %v6551_v55, %s8966_s1  ;;  %1866 = vrot.lane.b32.xlu0 %v6504_v26, %s8966_s1 }
 0x443   : > { %v1636_v47 = vpop.permute.xlu1 %1635  ;;  %v1634_v48 = vpop.permute.xlu0 %1633 }
 0x444   : > { %1678 = vst.msk [vmem:[#allocation3 + $0x1f] sm:$0x1] %vm8976_vm2, %v1636_v47  ;;  %v1571_v47 = vld [vmem:[#allocation2 + $0x138] sm:$0x3] }
 0x445   : > { %1677 = vst.msk [vmem:[#allocation3 + $0x17] sm:$0xfe] %vm8968_vm1, %v1634_v48  ;;  %1872 = vrot.lane.b32.xlu1 %v6559_v58, %s8966_s1  ;;  %1870 = vrot.lane.b32.xlu0 %v6502_v25, %s8966_s1 }
 0x447   : > { %v1640_v50 = vpop.permute.xlu1 %1639  ;;  %v1638_v51 = vpop.permute.xlu0 %1637 }
 0x448   : > { %1680 = vst.msk [vmem:[#allocation3 + $0x27] sm:$0x1] %vm8976_vm2, %v1640_v50 }
 0x449   : > { %1679 = vst.msk [vmem:[#allocation3 + $0x1f] sm:$0xfe] %vm8968_vm1, %v1638_v51  ;;  %1876 = vrot.lane.b32.xlu1 %v6567_v61, %s8966_s1  ;;  %1874 = vrot.lane.b32.xlu0 %v6514_v0, %s8966_s1 }
 0x44b   : > { %v1644_v53 = vpop.permute.xlu1 %1643  ;;  %v1642_v56 = vpop.permute.xlu0 %1641 }
 0x44c   : > { %1682 = vst.msk [vmem:[#allocation3 + $0x2f] sm:$0x1] %vm8976_vm2, %v1644_v53 }
 0x44d   : > { %1681 = vst.msk [vmem:[#allocation3 + $0x27] sm:$0xfe] %vm8968_vm1, %v1642_v56  ;;  %1880 = vrot.lane.b32.xlu1 %v6575_v35, %s8966_s1  ;;  %1878 = vrot.lane.b32.xlu0 %v6512_v30, %s8966_s1 }
 0x44f   : > { %v1648_v57 = vpop.permute.xlu1 %1647  ;;  %v1646_v59 = vpop.permute.xlu0 %1645 }
 0x450   : > { %1684 = vst.msk [vmem:[#allocation3 + $0x37] sm:$0x1] %vm8976_vm2, %v1648_v57 }
 0x451   : > { %1683 = vst.msk [vmem:[#allocation3 + $0x2f] sm:$0xfe] %vm8968_vm1, %v1646_v59  ;;  %1884 = vrot.lane.b32.xlu1 %v6698_v8, %s8966_s1  ;;  %1882 = vrot.lane.b32.xlu0 %v6648_v54, %s8966_s1  ;;  %s9048_s1 = smov 64  }
 0x453   : > { %v1652_v60 = vpop.permute.xlu1 %1651  ;;  %v1650_v32 = vpop.permute.xlu0 %1649 }
 0x454   : > { %1686 = vst.msk [vmem:[#allocation3 + $0x3f] sm:$0x1] %vm8976_vm2, %v1652_v60  ;;  %vm8982_vm2 = vcmask 490946  }
 0x455   : > { %1685 = vst.msk [vmem:[#allocation3 + $0x37] sm:$0xfe] %vm8968_vm1, %v1650_v32  ;;  %1923 = vrot.lane.b32.xlu1 %v6492_v45, %s8969_s23  ;;  %1921 = vrot.lane.b32.xlu0 %v6494_v63, %s8969_s23  ;;  %vm8975_vm1 = vcmask 425344  }
 0x457   : > { %v1690_v40 = vpop.permute.xlu1 %1689  ;;  %v1688_v41 = vpop.permute.xlu0 %1687 }
 0x458   : > { %1738 = vst.msk [vmem:[#allocation3 + $0x6] sm:$0x3] %vm8972_vm15, %v1690_v40  ;;  %v6886_v40 = vld [vmem:[#allocation2 + $0x160] sm:$0xff] }
 0x459   : > { %1736 = vst.msk [vmem:[#allocation3 - $0x2] sm:$0xfc] %vm8971_vm14, %v1688_v41  ;;  %1927 = vrot.lane.b32.xlu1 %v6502_v25, %s8969_s23  ;;  %1925 = vrot.lane.b32.xlu0 %v6504_v26, %s8969_s23 }
 0x45b   : > { %v1694_v36 = vpop.permute.xlu1 %1693  ;;  %v1692_v42 = vpop.permute.xlu0 %1691 }
 0x45c   : > { %1740 = vst.msk [vmem:[#allocation3 + $0xe] sm:$0x3] %vm8972_vm15, %v1694_v36 }
 0x45d   : > { %1739 = vst.msk [vmem:[#allocation3 + $0x6] sm:$0xfc] %vm8971_vm14, %v1692_v42  ;;  %1931 = vrot.lane.b32.xlu1 %v6512_v30, %s8969_s23  ;;  %1929 = vrot.lane.b32.xlu0 %v6514_v0, %s8969_s23  ;;  %v6894_v42 = vld [vmem:[#allocation2 + $0x190] sm:$0xff] }
 0x45f   : > { %v1698_v43 = vpop.permute.xlu1 %1697  ;;  %v1696_v38 = vpop.permute.xlu0 %1695 }
 0x460   : > { %1742 = vst.msk [vmem:[#allocation3 + $0x16] sm:$0x3] %vm8972_vm15, %v1698_v43 }
 0x461   : > { %1741 = vst.msk [vmem:[#allocation3 + $0xe] sm:$0xfc] %vm8971_vm14, %v1696_v38  ;;  %1935 = vrot.lane.b32.xlu1 %v6772_v37, %s8969_s23  ;;  %1933 = vrot.lane.b32.xlu0 %v6648_v54, %s8969_s23  ;;  %s8977_s23 = smov 68  }
 0x463   : > { %v1702_v28 = vpop.permute.xlu1 %1701  ;;  %v1700_v62 = vpop.permute.xlu0 %1699 }
 0x464   : > { %1744 = vst.msk [vmem:[#allocation3 + $0x1e] sm:$0x3] %vm8972_vm15, %v1702_v28  ;;  %v6904_v28 = vld [vmem:[#allocation2 + $0x1b0] sm:$0xff] }
 0x465   : > { %1743 = vst.msk [vmem:[#allocation3 + $0x16] sm:$0xfc] %vm8971_vm14, %v1700_v62  ;;  %1957 = vrot.lane.b32.xlu1 %v6535_v49, %s9048_s1  ;;  %1955 = vrot.lane.b32.xlu0 %v6494_v63, %s9048_s1  ;;  %v6906_v62 = vld [vmem:[#allocation2 + $0x1a0] sm:$0xff] }
 0x467   : > { %v1706_v44 = vpop.permute.xlu1 %1705  ;;  %v1704_v46 = vpop.permute.xlu0 %1703 }
 0x468   : > { %1746 = vst.msk [vmem:[#allocation3 + $0x26] sm:$0x3] %vm8972_vm15, %v1706_v44 }
 0x469   : > { %1745 = vst.msk [vmem:[#allocation3 + $0x1e] sm:$0xfc] %vm8971_vm14, %v1704_v46  ;;  %1961 = vrot.lane.b32.xlu1 %v6543_v52, %s9048_s1  ;;  %1959 = vrot.lane.b32.xlu0 %v6492_v45, %s9048_s1 }
 0x46b   : > { %v1710_v24 = vpop.permute.xlu1 %1709  ;;  %v1708_v27 = vpop.permute.xlu0 %1707 }
 0x46c   : > { %1748 = vst.msk [vmem:[#allocation3 + $0x2e] sm:$0x3] %vm8972_vm15, %v1710_v24  ;;  %v2089_v24 = vld [vmem:[#allocation2 + $0x148] sm:$0x3] }
 0x46d   : > { %1747 = vst.msk [vmem:[#allocation3 + $0x26] sm:$0xfc] %vm8971_vm14, %v1708_v27  ;;  %1965 = vrot.lane.b32.xlu1 %v6551_v55, %s9048_s1  ;;  %1963 = vrot.lane.b32.xlu0 %v6504_v26, %s9048_s1 }
 0x46f   : > { %v1714_v29 = vpop.permute.xlu1 %1713  ;;  %v1712_v1 = vpop.permute.xlu0 %1711 }
 0x470   : > { %1750 = vst.msk [vmem:[#allocation3 + $0x36] sm:$0x3] %vm8972_vm15, %v1714_v29 }
 0x471   : > { %1749 = vst.msk [vmem:[#allocation3 + $0x2e] sm:$0xfc] %vm8971_vm14, %v1712_v1  ;;  %1969 = vrot.lane.b32.xlu1 %v6559_v58, %s9048_s1  ;;  %1967 = vrot.lane.b32.xlu0 %v6502_v25, %s9048_s1  ;;  %v6919_v1 = vld [vmem:[#allocation2 + $0x158] sm:$0x3] }
 0x473   : > { %v1718_v18 = vpop.permute.xlu1 %1717  ;;  %v1716_v31 = vpop.permute.xlu0 %1715 }
 0x474   : > { %1752 = vst.msk [vmem:[#allocation3 + $0x3e] sm:$0x3] %vm8972_vm15, %v1718_v18  ;;  %vm8979_vm15 = vcmask 458145  }
 0x475   : > { %1751 = vst.msk [vmem:[#allocation3 + $0x36] sm:$0xfc] %vm8971_vm14, %v1716_v31  ;;  %1973 = vrot.lane.b32.xlu1 %v6567_v61, %s9048_s1  ;;  %1971 = vrot.lane.b32.xlu0 %v6514_v0, %s9048_s1  ;;  %vm8987_vm14 = vcmask 450976  }
 0x477   : > { %v1757_v19 = vpop.permute.xlu1 %1756  ;;  %v1755_v33 = vpop.permute.xlu0 %1754 }
 0x478   : > { %1780 = vst.msk [vmem:[#allocation3 + $0x8] sm:$0xff] %vm8975_vm1, %v1757_v19  ;;  %1779 = vst.msk [vmem:[#allocation3] sm:$0xff] %vm8975_vm1, %v1755_v33  ;;  %v6927_v19 = vld [vmem:[#allocation2 + $0x168] sm:$0x3] }
 0x479   : > { %1977 = vrot.lane.b32.xlu1 %v6575_v35, %s9048_s1  ;;  %1975 = vrot.lane.b32.xlu0 %v6512_v30, %s9048_s1 }
 0x47b   : > { %v1761_v39 = vpop.permute.xlu1 %1760  ;;  %v1759_v34 = vpop.permute.xlu0 %1758 }
 0x47c   : > { %1782 = vst.msk [vmem:[#allocation3 + $0x18] sm:$0xff] %vm8975_vm1, %v1761_v39  ;;  %1781 = vst.msk [vmem:[#allocation3 + $0x10] sm:$0xff] %vm8975_vm1, %v1759_v34  ;;  %v6935_v34 = vld [vmem:[#allocation2 + $0x178] sm:$0x3] }
 0x47d   : > { %1981 = vrot.lane.b32.xlu1 %v6698_v8, %s9048_s1  ;;  %1979 = vrot.lane.b32.xlu0 %v6648_v54, %s9048_s1 }
 0x47f   : > { %v1765_v48 = vpop.permute.xlu1 %1764  ;;  %v1763_v50 = vpop.permute.xlu0 %1762 }
 0x480   : > { %1784 = vst.msk [vmem:[#allocation3 + $0x28] sm:$0xff] %vm8975_vm1, %v1765_v48  ;;  %1783 = vst.msk [vmem:[#allocation3 + $0x20] sm:$0xff] %vm8975_vm1, %v1763_v50  ;;  %v6943_v50 = vld [vmem:[#allocation2 + $0x188] sm:$0x3] }
 0x481   : > { %1985 = vrot.lane.b32.xlu1 %v1571_v47, %s9048_s1  ;;  %1983 = vrot.lane.b32.xlu0 %v6772_v37, %s9048_s1 }
 0x483   : > { %v1769_v51 = vpop.permute.xlu1 %1768  ;;  %v1767_v53 = vpop.permute.xlu0 %1766 }
 0x484   : > { %1786 = vst.msk [vmem:[#allocation3 + $0x38] sm:$0xff] %vm8975_vm1, %v1769_v51  ;;  %1785 = vst.msk [vmem:[#allocation3 + $0x30] sm:$0xff] %vm8975_vm1, %v1767_v53  ;;  %vm8983_vm1 = vcmask 484800  }
 0x485   : > { %2023 = vrot.lane.b32.xlu1 %v6535_v49, %s8977_s23  ;;  %2021 = vrot.lane.b32.xlu0 %v6494_v63, %s8977_s23 }
 0x487   : > { %v1791_v56 = vpop.permute.xlu1 %1790  ;;  %v1789_v57 = vpop.permute.xlu0 %1788 }
 0x488   : > { %1839 = vst.msk [vmem:[#allocation3 + $0x7] sm:$0x1] %vm8987_vm14, %v1791_v56  ;;  %v6951_v56 = vld [vmem:[#allocation2 + $0x198] sm:$0x3] }
 0x489   : > { %1837 = vst.msk [vmem:[#allocation3 - $0x1] sm:$0xfe] %vm8979_vm15, %v1789_v57  ;;  %2027 = vrot.lane.b32.xlu1 %v6543_v52, %s8977_s23  ;;  %2025 = vrot.lane.b32.xlu0 %v6492_v45, %s8977_s23 }
 0x48b   : > { %v1795_v59 = vpop.permute.xlu1 %1794  ;;  %v1793_v60 = vpop.permute.xlu0 %1792 }
 0x48c   : > { %1841 = vst.msk [vmem:[#allocation3 + $0xf] sm:$0x1] %vm8987_vm14, %v1795_v59 }
 0x48d   : > { %1840 = vst.msk [vmem:[#allocation3 + $0x7] sm:$0xfe] %vm8979_vm15, %v1793_v60  ;;  %2031 = vrot.lane.b32.xlu1 %v6551_v55, %s8977_s23  ;;  %2029 = vrot.lane.b32.xlu0 %v6504_v26, %s8977_s23  ;;  %v6959_v60 = vld [vmem:[#allocation2 + $0x1a8] sm:$0x3] }
 0x48f   : > { %v1799_v63 = vpop.permute.xlu1 %1798  ;;  %v1797_v49 = vpop.permute.xlu0 %1796 }
 0x490   : > { %1843 = vst.msk [vmem:[#allocation3 + $0x17] sm:$0x1] %vm8987_vm14, %v1799_v63 }
 0x491   : > { %1842 = vst.msk [vmem:[#allocation3 + $0xf] sm:$0xfe] %vm8979_vm15, %v1797_v49  ;;  %2035 = vrot.lane.b32.xlu1 %v6559_v58, %s8977_s23  ;;  %2033 = vrot.lane.b32.xlu0 %v6502_v25, %s8977_s23 }
 0x493   : > { %v1803_v45 = vpop.permute.xlu1 %1802  ;;  %v1801_v52 = vpop.permute.xlu0 %1800 }
 0x494   : > { %1845 = vst.msk [vmem:[#allocation3 + $0x1f] sm:$0x1] %vm8987_vm14, %v1803_v45  ;;  %v6967_v45 = vld [vmem:[#allocation2 + $0x1b8] sm:$0x3] }
 0x495   : > { %1844 = vst.msk [vmem:[#allocation3 + $0x17] sm:$0xfe] %vm8979_vm15, %v1801_v52  ;;  %2039 = vrot.lane.b32.xlu1 %v6567_v61, %s8977_s23  ;;  %2037 = vrot.lane.b32.xlu0 %v6514_v0, %s8977_s23 }
 0x497   : > { %v1807_v26 = vpop.permute.xlu1 %1806  ;;  %v1805_v55 = vpop.permute.xlu0 %1804 }
 0x498   : > { %1847 = vst.msk [vmem:[#allocation3 + $0x27] sm:$0x1] %vm8987_vm14, %v1807_v26 }
 0x499   : > { %1846 = vst.msk [vmem:[#allocation3 + $0x1f] sm:$0xfe] %vm8979_vm15, %v1805_v55  ;;  %2043 = vrot.lane.b32.xlu1 %v6575_v35, %s8977_s23  ;;  %2041 = vrot.lane.b32.xlu0 %v6512_v30, %s8977_s23  ;;  %v6874_v30 = vld [vmem:[#allocation2 + $0x150] sm:$0xff]  ;;  %v6876_v35 = vld [vmem:[#allocation2 + $0x140] sm:$0xff] }
 0x49b   : > { %v1811_v25 = vpop.permute.xlu1 %1810  ;;  %v1809_v58 = vpop.permute.xlu0 %1808 }
 0x49c   : > { %1849 = vst.msk [vmem:[#allocation3 + $0x2f] sm:$0x1] %vm8987_vm14, %v1811_v25 }
 0x49d   : > { %1848 = vst.msk [vmem:[#allocation3 + $0x27] sm:$0xfe] %vm8979_vm15, %v1809_v58  ;;  %2047 = vrot.lane.b32.xlu1 %v6698_v8, %s8977_s23  ;;  %2045 = vrot.lane.b32.xlu0 %v6648_v54, %s8977_s23  ;;  %v6884_v54 = vld [vmem:[#allocation2 + $0x170] sm:$0xff] }
 0x49f   : > { %v1815_v0 = vpop.permute.xlu1 %1814  ;;  %v1813_v61 = vpop.permute.xlu0 %1812 }
 0x4a0   : > { %1851 = vst.msk [vmem:[#allocation3 + $0x37] sm:$0x1] %vm8987_vm14, %v1815_v0 }
 0x4a1   : > { %1850 = vst.msk [vmem:[#allocation3 + $0x2f] sm:$0xfe] %vm8979_vm15, %v1813_v61  ;;  %2051 = vrot.lane.b32.xlu1 %v1571_v47, %s8977_s23  ;;  %2049 = vrot.lane.b32.xlu0 %v6772_v37, %s8977_s23  ;;  %v6896_v37 = vld [vmem:[#allocation2 + $0x180] sm:$0xff]  ;;  %s8984_s23 = smov 76  }
 0x4a3   : > { %v1819_v32 = vpop.permute.xlu1 %1818  ;;  %v1817_v8 = vpop.permute.xlu0 %1816 }
 0x4a4   : > { %1853 = vst.msk [vmem:[#allocation3 + $0x3f] sm:$0x1] %vm8987_vm14, %v1819_v32  ;;  %vm8993_vm14 = vcmask 589346  }
 0x4a5   : > { %1852 = vst.msk [vmem:[#allocation3 + $0x37] sm:$0xfe] %vm8979_vm15, %v1817_v8  ;;  %2118 = vrot.lane.b32.xlu1 %v6874_v30, %s8980_s21  ;;  %2116 = vrot.lane.b32.xlu0 %v6876_v35, %s8980_s21  ;;  %vm8986_vm15 = vcmask 523744  }
 0x4a7   : > { %v1857_v41 = vpop.permute.xlu1 %1856  ;;  %v1855_v36 = vpop.permute.xlu0 %1854 }
 0x4a8   : > { %1905 = vst.msk [vmem:[#allocation3 + $0x6] sm:$0x3] %vm8983_vm1, %v1857_v41 }
 0x4a9   : > { %1903 = vst.msk [vmem:[#allocation3 - $0x2] sm:$0xfc] %vm8982_vm2, %v1855_v36  ;;  %2122 = vrot.lane.b32.xlu1 %v6884_v54, %s8980_s21  ;;  %2120 = vrot.lane.b32.xlu0 %v6886_v40, %s8980_s21 }
 0x4ab   : > { %v1861_v43 = vpop.permute.xlu1 %1860  ;;  %v1859_v38 = vpop.permute.xlu0 %1858 }
 0x4ac   : > { %1907 = vst.msk [vmem:[#allocation3 + $0xe] sm:$0x3] %vm8983_vm1, %v1861_v43 }
 0x4ad   : > { %1906 = vst.msk [vmem:[#allocation3 + $0x6] sm:$0xfc] %vm8982_vm2, %v1859_v38  ;;  %2126 = vrot.lane.b32.xlu1 %v6894_v42, %s8980_s21  ;;  %2124 = vrot.lane.b32.xlu0 %v6896_v37, %s8980_s21 }
 0x4af   : > { %v1865_v44 = vpop.permute.xlu1 %1864  ;;  %v1863_v46 = vpop.permute.xlu0 %1862 }
 0x4b0   : > { %1909 = vst.msk [vmem:[#allocation3 + $0x16] sm:$0x3] %vm8983_vm1, %v1865_v44 }
 0x4b1   : > { %1908 = vst.msk [vmem:[#allocation3 + $0xe] sm:$0xfc] %vm8982_vm2, %v1863_v46  ;;  %2130 = vrot.lane.b32.xlu1 %v6904_v28, %s8980_s21  ;;  %2128 = vrot.lane.b32.xlu0 %v6906_v62, %s8980_s21  ;;  %s5554_s21 = smov 80  }
 0x4b3   : > { %v1869_v27 = vpop.permute.xlu1 %1868  ;;  %v1867_v29 = vpop.permute.xlu0 %1866 }
 0x4b4   : > { %1911 = vst.msk [vmem:[#allocation3 + $0x1e] sm:$0x3] %vm8983_vm1, %v1869_v27 }
 0x4b5   : > { %1910 = vst.msk [vmem:[#allocation3 + $0x16] sm:$0xfc] %vm8982_vm2, %v1867_v29  ;;  %2159 = vrot.lane.b32.xlu1 %v2089_v24, %s8984_s23  ;;  %2157 = vrot.lane.b32.xlu0 %v6876_v35, %s8984_s23 }
 0x4b7   : > { %v1873_v18 = vpop.permute.xlu1 %1872  ;;  %v1871_v31 = vpop.permute.xlu0 %1870 }
 0x4b8   : > { %1913 = vst.msk [vmem:[#allocation3 + $0x26] sm:$0x3] %vm8983_vm1, %v1873_v18 }
 0x4b9   : > { %1912 = vst.msk [vmem:[#allocation3 + $0x1e] sm:$0xfc] %vm8982_vm2, %v1871_v31  ;;  %2163 = vrot.lane.b32.xlu1 %v6919_v1, %s8984_s23  ;;  %2161 = vrot.lane.b32.xlu0 %v6874_v30, %s8984_s23 }
 0x4bb   : > { %v1877_v33 = vpop.permute.xlu1 %1876  ;;  %v1875_v39 = vpop.permute.xlu0 %1874 }
 0x4bc   : > { %1915 = vst.msk [vmem:[#allocation3 + $0x2e] sm:$0x3] %vm8983_vm1, %v1877_v33 }
 0x4bd   : > { %1914 = vst.msk [vmem:[#allocation3 + $0x26] sm:$0xfc] %vm8982_vm2, %v1875_v39  ;;  %2167 = vrot.lane.b32.xlu1 %v6927_v19, %s8984_s23  ;;  %2165 = vrot.lane.b32.xlu0 %v6886_v40, %s8984_s23 }
 0x4bf   : > { %v1881_v47 = vpop.permute.xlu1 %1880  ;;  %v1879_v48 = vpop.permute.xlu0 %1878 }
 0x4c0   : > { %1917 = vst.msk [vmem:[#allocation3 + $0x36] sm:$0x3] %vm8983_vm1, %v1881_v47 }
 0x4c1   : > { %1916 = vst.msk [vmem:[#allocation3 + $0x2e] sm:$0xfc] %vm8982_vm2, %v1879_v48  ;;  %2171 = vrot.lane.b32.xlu1 %v6935_v34, %s8984_s23  ;;  %2169 = vrot.lane.b32.xlu0 %v6884_v54, %s8984_s23  ;;  %v7040_v48 = vld [vmem:[#allocation2 + $0x1c0] sm:$0xff] }
 0x4c3   : > { %v1885_v51 = vpop.permute.xlu1 %1884  ;;  %v1883_v53 = vpop.permute.xlu0 %1882 }
 0x4c4   : > { %1919 = vst.msk [vmem:[#allocation3 + $0x3e] sm:$0x3] %vm8983_vm1, %v1885_v51  ;;  %vm8990_vm1 = vcmask 556545  }
 0x4c5   : > { %1918 = vst.msk [vmem:[#allocation3 + $0x36] sm:$0xfc] %vm8982_vm2, %v1883_v53  ;;  %2175 = vrot.lane.b32.xlu1 %v6943_v50, %s8984_s23  ;;  %2173 = vrot.lane.b32.xlu0 %v6896_v37, %s8984_s23  ;;  %vm9000_vm2 = vcmask 549376  }
 0x4c7   : > { %v1924_v57 = vpop.permute.xlu1 %1923  ;;  %v1922_v59 = vpop.permute.xlu0 %1921 }
 0x4c8   : > { %1947 = vst.msk [vmem:[#allocation3 + $0x8] sm:$0xff] %vm8986_vm15, %v1924_v57  ;;  %1946 = vst.msk [vmem:[#allocation3] sm:$0xff] %vm8986_vm15, %v1922_v59 }
 0x4c9   : > { %2179 = vrot.lane.b32.xlu1 %v6951_v56, %s8984_s23  ;;  %2177 = vrot.lane.b32.xlu0 %v6894_v42, %s8984_s23 }
 0x4cb   : > { %v1928_v63 = vpop.permute.xlu1 %1927  ;;  %v1926_v49 = vpop.permute.xlu0 %1925 }
 0x4cc   : > { %1949 = vst.msk [vmem:[#allocation3 + $0x18] sm:$0xff] %vm8986_vm15, %v1928_v63  ;;  %1948 = vst.msk [vmem:[#allocation3 + $0x10] sm:$0xff] %vm8986_vm15, %v1926_v49 }
 0x4cd   : > { %2183 = vrot.lane.b32.xlu1 %v6959_v60, %s8984_s23  ;;  %2181 = vrot.lane.b32.xlu0 %v6906_v62, %s8984_s23 }
 0x4cf   : > { %v1932_v52 = vpop.permute.xlu1 %1931  ;;  %v1930_v26 = vpop.permute.xlu0 %1929 }
 0x4d0   : > { %1951 = vst.msk [vmem:[#allocation3 + $0x28] sm:$0xff] %vm8986_vm15, %v1932_v52  ;;  %1950 = vst.msk [vmem:[#allocation3 + $0x20] sm:$0xff] %vm8986_vm15, %v1930_v26 }
 0x4d1   : > { %2187 = vrot.lane.b32.xlu1 %v6967_v45, %s8984_s23  ;;  %2185 = vrot.lane.b32.xlu0 %v6904_v28, %s8984_s23  ;;  %s8991_s23 = smov 84  }
 0x4d3   : > { %v1936_v55 = vpop.permute.xlu1 %1935  ;;  %v1934_v25 = vpop.permute.xlu0 %1933 }
 0x4d4   : > { %1953 = vst.msk [vmem:[#allocation3 + $0x38] sm:$0xff] %vm8986_vm15, %v1936_v55  ;;  %1952 = vst.msk [vmem:[#allocation3 + $0x30] sm:$0xff] %vm8986_vm15, %v1934_v25  ;;  %vm8994_vm15 = vcmask 583200  }
 0x4d5   : > { %2225 = vrot.lane.b32.xlu1 %v2089_v24, %s5554_s21  ;;  %2223 = vrot.lane.b32.xlu0 %v6876_v35, %s5554_s21 }
 0x4d7   : > { %v1958_v58 = vpop.permute.xlu1 %1957  ;;  %v1956_v0 = vpop.permute.xlu0 %1955 }
 0x4d8   : > { %2006 = vst.msk [vmem:[#allocation3 + $0x7] sm:$0x1] %vm9000_vm2, %v1958_v58 }
 0x4d9   : > { %2004 = vst.msk [vmem:[#allocation3 - $0x1] sm:$0xfe] %vm8990_vm1, %v1956_v0  ;;  %2229 = vrot.lane.b32.xlu1 %v6919_v1, %s5554_s21  ;;  %2227 = vrot.lane.b32.xlu0 %v6874_v30, %s5554_s21 }
 0x4db   : > { %v1962_v61 = vpop.permute.xlu1 %1961  ;;  %v1960_v32 = vpop.permute.xlu0 %1959 }
 0x4dc   : > { %2008 = vst.msk [vmem:[#allocation3 + $0xf] sm:$0x1] %vm9000_vm2, %v1962_v61 }
 0x4dd   : > { %2007 = vst.msk [vmem:[#allocation3 + $0x7] sm:$0xfe] %vm8990_vm1, %v1960_v32  ;;  %2233 = vrot.lane.b32.xlu1 %v6927_v19, %s5554_s21  ;;  %2231 = vrot.lane.b32.xlu0 %v6886_v40, %s5554_s21 }
 0x4df   : > { %v1966_v35 = vpop.permute.xlu1 %1965  ;;  %v1964_v8 = vpop.permute.xlu0 %1963 }
 0x4e0   : > { %2010 = vst.msk [vmem:[#allocation3 + $0x17] sm:$0x1] %vm9000_vm2, %v1966_v35 }
 0x4e1   : > { %2009 = vst.msk [vmem:[#allocation3 + $0xf] sm:$0xfe] %vm8990_vm1, %v1964_v8  ;;  %2237 = vrot.lane.b32.xlu1 %v6935_v34, %s5554_s21  ;;  %2235 = vrot.lane.b32.xlu0 %v6884_v54, %s5554_s21 }
 0x4e3   : > { %v1970_v41 = vpop.permute.xlu1 %1969  ;;  %v1968_v36 = vpop.permute.xlu0 %1967 }
 0x4e4   : > { %2012 = vst.msk [vmem:[#allocation3 + $0x1f] sm:$0x1] %vm9000_vm2, %v1970_v41  ;;  %v7090_v41 = vld [vmem:[#allocation2 + $0x1c8] sm:$0x3] }
 0x4e5   : > { %2011 = vst.msk [vmem:[#allocation3 + $0x17] sm:$0xfe] %vm8990_vm1, %v1968_v36  ;;  %2241 = vrot.lane.b32.xlu1 %v6943_v50, %s5554_s21  ;;  %2239 = vrot.lane.b32.xlu0 %v6896_v37, %s5554_s21 }
 0x4e7   : > { %v1974_v43 = vpop.permute.xlu1 %1973  ;;  %v1972_v38 = vpop.permute.xlu0 %1971 }
 0x4e8   : > { %2014 = vst.msk [vmem:[#allocation3 + $0x27] sm:$0x1] %vm9000_vm2, %v1974_v43 }
 0x4e9   : > { %2013 = vst.msk [vmem:[#allocation3 + $0x1f] sm:$0xfe] %vm8990_vm1, %v1972_v38  ;;  %2245 = vrot.lane.b32.xlu1 %v6951_v56, %s5554_s21  ;;  %2243 = vrot.lane.b32.xlu0 %v6894_v42, %s5554_s21 }
 0x4eb   : > { %v1978_v44 = vpop.permute.xlu1 %1977  ;;  %v1976_v46 = vpop.permute.xlu0 %1975 }
 0x4ec   : > { %2016 = vst.msk [vmem:[#allocation3 + $0x2f] sm:$0x1] %vm9000_vm2, %v1978_v44 }
 0x4ed   : > { %2015 = vst.msk [vmem:[#allocation3 + $0x27] sm:$0xfe] %vm8990_vm1, %v1976_v46  ;;  %2249 = vrot.lane.b32.xlu1 %v6959_v60, %s5554_s21  ;;  %2247 = vrot.lane.b32.xlu0 %v6906_v62, %s5554_s21 }
 0x4ef   : > { %v1982_v24 = vpop.permute.xlu1 %1981  ;;  %v1980_v27 = vpop.permute.xlu0 %1979 }
 0x4f0   : > { %2018 = vst.msk [vmem:[#allocation3 + $0x37] sm:$0x1] %vm9000_vm2, %v1982_v24 }
 0x4f1   : > { %2017 = vst.msk [vmem:[#allocation3 + $0x2f] sm:$0xfe] %vm8990_vm1, %v1980_v27  ;;  %2253 = vrot.lane.b32.xlu1 %v6967_v45, %s5554_s21  ;;  %2251 = vrot.lane.b32.xlu0 %v6904_v28, %s5554_s21 }
 0x4f3   : > { %v1986_v29 = vpop.permute.xlu1 %1985  ;;  %v1984_v18 = vpop.permute.xlu0 %1983 }
 0x4f4   : > { %2020 = vst.msk [vmem:[#allocation3 + $0x3f] sm:$0x1] %vm9000_vm2, %v1986_v29  ;;  %vm9005_vm2 = vcmask 687746  }
 0x4f5   : > { %2019 = vst.msk [vmem:[#allocation3 + $0x37] sm:$0xfe] %vm8990_vm1, %v1984_v18  ;;  %2292 = vrot.lane.b32.xlu1 %v6886_v40, %s8991_s23  ;;  %2290 = vrot.lane.b32.xlu0 %v6874_v30, %s8991_s23  ;;  %vm8999_vm1 = vcmask 622144  }
 0x4f7   : > { %v2024_v31 = vpop.permute.xlu1 %2023  ;;  %v2022_v33 = vpop.permute.xlu0 %2021 }
 0x4f8   : > { %2072 = vst.msk [vmem:[#allocation3 + $0x6] sm:$0x3] %vm8994_vm15, %v2024_v31 }
 0x4f9   : > { %2070 = vst.msk [vmem:[#allocation3 - $0x2] sm:$0xfc] %vm8993_vm14, %v2022_v33  ;;  %2296 = vrot.lane.b32.xlu1 %v6896_v37, %s8991_s23  ;;  %2294 = vrot.lane.b32.xlu0 %v6884_v54, %s8991_s23 }
 0x4fb   : > { %v2028_v39 = vpop.permute.xlu1 %2027  ;;  %v2026_v47 = vpop.permute.xlu0 %2025 }
 0x4fc   : > { %2074 = vst.msk [vmem:[#allocation3 + $0xe] sm:$0x3] %vm8994_vm15, %v2028_v39 }
 0x4fd   : > { %2073 = vst.msk [vmem:[#allocation3 + $0x6] sm:$0xfc] %vm8993_vm14, %v2026_v47  ;;  %2300 = vrot.lane.b32.xlu1 %v6906_v62, %s8991_s23  ;;  %2298 = vrot.lane.b32.xlu0 %v6894_v42, %s8991_s23 }
 0x4ff   : > { %v2032_v51 = vpop.permute.xlu1 %2031  ;;  %v2030_v53 = vpop.permute.xlu0 %2029 }
 0x500   : > { %2076 = vst.msk [vmem:[#allocation3 + $0x16] sm:$0x3] %vm8994_vm15, %v2032_v51 }
 0x501   : > { %2075 = vst.msk [vmem:[#allocation3 + $0xe] sm:$0xfc] %vm8993_vm14, %v2030_v53  ;;  %2304 = vrot.lane.b32.xlu1 %v7040_v48, %s8991_s23  ;;  %2302 = vrot.lane.b32.xlu0 %v6904_v28, %s8991_s23  ;;  %s9046_s23 = smov 92  }
 0x503   : > { %v2036_v57 = vpop.permute.xlu1 %2035  ;;  %v2034_v59 = vpop.permute.xlu0 %2033 }
 0x504   : > { %2078 = vst.msk [vmem:[#allocation3 + $0x1e] sm:$0x3] %vm8994_vm15, %v2036_v57 }
 0x505   : > { %2077 = vst.msk [vmem:[#allocation3 + $0x16] sm:$0xfc] %vm8993_vm14, %v2034_v59  ;;  %2326 = vrot.lane.b32.xlu1 %v6919_v1, %s8995_s30  ;;  %2324 = vrot.lane.b32.xlu0 %v6874_v30, %s8995_s30 }
 0x507   : > { %v2040_v63 = vpop.permute.xlu1 %2039  ;;  %v2038_v49 = vpop.permute.xlu0 %2037 }
 0x508   : > { %2080 = vst.msk [vmem:[#allocation3 + $0x26] sm:$0x3] %vm8994_vm15, %v2040_v63 }
 0x509   : > { %2079 = vst.msk [vmem:[#allocation3 + $0x1e] sm:$0xfc] %vm8993_vm14, %v2038_v49  ;;  %2330 = vrot.lane.b32.xlu1 %v6927_v19, %s8995_s30  ;;  %2328 = vrot.lane.b32.xlu0 %v6886_v40, %s8995_s30  ;;  %v7150_v49 = vcombine.low %v5709_v2, %v5714_v3  ;;  %v7162_v2 = vcombine.low %v5719_v4, %v5724_v5 }
 0x50a   : > { %v7174_v4 = vcombine.low %v5732_v6, %v5737_v7  ;;  %v7186_v6 = vcombine.low %v5822_v9, %v5827_v10  ;;  %v7198_v9 = vcombine.low %v5832_v11, %v5918_v12  ;;  %v7210_v11 = vcombine.low %v5923_v13, %v5936_v14 }
 0x50b   : > { %v2044_v52 = vpop.permute.xlu1 %2043  ;;  %v2042_v26 = vpop.permute.xlu0 %2041  ;;  %5263 = vmatprep.subr.bf16.mxu0 %v7150_v49  ;;  %v7222_v13 = vcombine.low %v5941_v15, %v5946_v16 }
 0x50c   : > { %2082 = vst.msk [vmem:[#allocation3 + $0x2e] sm:$0x3] %vm8994_vm15, %v2044_v52  ;;  %5264 = vmatpush3.bf16.msra.mxu0 %v7150_v49 }
 0x50d   : > { %2081 = vst.msk [vmem:[#allocation3 + $0x26] sm:$0xfc] %vm8993_vm14, %v2042_v26  ;;  %2334 = vrot.lane.b32.xlu1 %v6935_v34, %s8995_s30  ;;  %2332 = vrot.lane.b32.xlu0 %v6884_v54, %s8995_s30 }
 0x50e   : > { %5265 = vmatprep.subr.bf16.mxu0 %v7162_v2 }
 0x50f   : > { %v2048_v55 = vpop.permute.xlu1 %2047  ;;  %v2046_v25 = vpop.permute.xlu0 %2045 }
 0x510   : > { %2084 = vst.msk [vmem:[#allocation3 + $0x36] sm:$0x3] %vm8994_vm15, %v2048_v55  ;;  %5266 = vmatpush3.bf16.msra.mxu0 %v7162_v2 }
 0x511   : > { %2083 = vst.msk [vmem:[#allocation3 + $0x2e] sm:$0xfc] %vm8993_vm14, %v2046_v25  ;;  %2338 = vrot.lane.b32.xlu1 %v6943_v50, %s8995_s30  ;;  %2336 = vrot.lane.b32.xlu0 %v6896_v37, %s8995_s30 }
 0x512   : > { %5267 = vmatprep.subr.bf16.mxu0 %v7174_v4 }
 0x513   : > { %v2052_v58 = vpop.permute.xlu1 %2051  ;;  %v2050_v0 = vpop.permute.xlu0 %2049 }
 0x514   : > { %2086 = vst.msk [vmem:[#allocation3 + $0x3e] sm:$0x3] %vm8994_vm15, %v2052_v58  ;;  %vm9003_vm15 = vcmask 654945   ;;  %5268 = vmatpush3.bf16.msra.mxu0 %v7174_v4 }
 0x515   : > { %2085 = vst.msk [vmem:[#allocation3 + $0x36] sm:$0xfc] %vm8993_vm14, %v2050_v0  ;;  %2342 = vrot.lane.b32.xlu1 %v6951_v56, %s8995_s30  ;;  %2340 = vrot.lane.b32.xlu0 %v6894_v42, %s8995_s30  ;;  %vm9004_vm14 = vcmask 647776  }
 0x516   : > { %5269 = vmatprep.subr.bf16.mxu0 %v7186_v6 }
 0x517   : > { %v2119_v61 = vpop.permute.xlu1 %2118  ;;  %v2117_v32 = vpop.permute.xlu0 %2116 }
 0x518   : > { %2142 = vst.msk [vmem:[#allocation3 + $0x8] sm:$0xff] %vm8999_vm1, %v2119_v61  ;;  %2141 = vst.msk [vmem:[#allocation3] sm:$0xff] %vm8999_vm1, %v2117_v32  ;;  %5270 = vmatpush3.bf16.msra.mxu0 %v7186_v6 }
 0x519   : > { %2346 = vrot.lane.b32.xlu1 %v6959_v60, %s8995_s30  ;;  %2344 = vrot.lane.b32.xlu0 %v6906_v62, %s8995_s30 }
 0x51a   : > { %5271 = vmatprep.subr.bf16.mxu0 %v7198_v9 }
 0x51b   : > { %v2123_v35 = vpop.permute.xlu1 %2122  ;;  %v2121_v8 = vpop.permute.xlu0 %2120 }
 0x51c   : > { %2144 = vst.msk [vmem:[#allocation3 + $0x18] sm:$0xff] %vm8999_vm1, %v2123_v35  ;;  %2143 = vst.msk [vmem:[#allocation3 + $0x10] sm:$0xff] %vm8999_vm1, %v2121_v8  ;;  %5272 = vmatpush3.bf16.msra.mxu0 %v7198_v9 }
 0x51d   : > { %2350 = vrot.lane.b32.xlu1 %v6967_v45, %s8995_s30  ;;  %2348 = vrot.lane.b32.xlu0 %v6904_v28, %s8995_s30 }
 0x51e   : > { %5273 = vmatprep.subr.bf16.mxu0 %v7210_v11 }
 0x51f   : > { %v2127_v36 = vpop.permute.xlu1 %2126  ;;  %v2125_v43 = vpop.permute.xlu0 %2124 }
 0x520   : > { %2146 = vst.msk [vmem:[#allocation3 + $0x28] sm:$0xff] %vm8999_vm1, %v2127_v36  ;;  %2145 = vst.msk [vmem:[#allocation3 + $0x20] sm:$0xff] %vm8999_vm1, %v2125_v43  ;;  %5274 = vmatpush3.bf16.msra.mxu0 %v7210_v11 }
 0x521   : > { %2354 = vrot.lane.b32.xlu1 %v7090_v41, %s8995_s30  ;;  %2352 = vrot.lane.b32.xlu0 %v7040_v48, %s8995_s30  ;;  %s9044_s30 = smov 96  }
 0x523   : > { %v2131_v38 = vpop.permute.xlu1 %2130  ;;  %v2129_v44 = vpop.permute.xlu0 %2128 }
 0x524   : > { %2148 = vst.msk [vmem:[#allocation3 + $0x38] sm:$0xff] %vm8999_vm1, %v2131_v38  ;;  %2147 = vst.msk [vmem:[#allocation3 + $0x30] sm:$0xff] %vm8999_vm1, %v2129_v44  ;;  %vm9006_vm1 = vcmask 681600  }
 0x525   : > { %2392 = vrot.lane.b32.xlu1 %v6919_v1, %s9046_s23  ;;  %2390 = vrot.lane.b32.xlu0 %v6874_v30, %s9046_s23 }
 0x527   : > { %v2160_v46 = vpop.permute.xlu1 %2159  ;;  %v2158_v24 = vpop.permute.xlu0 %2157 }
 0x528   : > { %2208 = vst.msk [vmem:[#allocation3 + $0x7] sm:$0x1] %vm9004_vm14, %v2160_v46  ;;  %v2107_v46 = vld [vmem:[#allocation2 + $0x1d8] sm:$0x3] }
 0x529   : > { %2206 = vst.msk [vmem:[#allocation3 - $0x1] sm:$0xfe] %vm9003_vm15, %v2158_v24  ;;  %2396 = vrot.lane.b32.xlu1 %v6927_v19, %s9046_s23  ;;  %2394 = vrot.lane.b32.xlu0 %v6886_v40, %s9046_s23 }
 0x52b   : > { %v2164_v27 = vpop.permute.xlu1 %2163  ;;  %v2162_v29 = vpop.permute.xlu0 %2161 }
 0x52c   : > { %2210 = vst.msk [vmem:[#allocation3 + $0xf] sm:$0x1] %vm9004_vm14, %v2164_v27 }
 0x52d   : > { %2209 = vst.msk [vmem:[#allocation3 + $0x7] sm:$0xfe] %vm9003_vm15, %v2162_v29  ;;  %2400 = vrot.lane.b32.xlu1 %v6935_v34, %s9046_s23  ;;  %2398 = vrot.lane.b32.xlu0 %v6884_v54, %s9046_s23 }
 0x52f   : > { %v2168_v30 = vpop.permute.xlu1 %2167  ;;  %v2166_v1 = vpop.permute.xlu0 %2165 }
 0x530   : > { %2212 = vst.msk [vmem:[#allocation3 + $0x17] sm:$0x1] %vm9004_vm14, %v2168_v30 }
 0x531   : > { %2211 = vst.msk [vmem:[#allocation3 + $0xf] sm:$0xfe] %vm9003_vm15, %v2166_v1  ;;  %2404 = vrot.lane.b32.xlu1 %v6943_v50, %s9046_s23  ;;  %2402 = vrot.lane.b32.xlu0 %v6896_v37, %s9046_s23 }
 0x533   : > { %v2172_v18 = vpop.permute.xlu1 %2171  ;;  %v2170_v31 = vpop.permute.xlu0 %2169 }
 0x534   : > { %2214 = vst.msk [vmem:[#allocation3 + $0x1f] sm:$0x1] %vm9004_vm14, %v2172_v18 }
 0x535   : > { %2213 = vst.msk [vmem:[#allocation3 + $0x17] sm:$0xfe] %vm9003_vm15, %v2170_v31  ;;  %2408 = vrot.lane.b32.xlu1 %v6951_v56, %s9046_s23  ;;  %2406 = vrot.lane.b32.xlu0 %v6894_v42, %s9046_s23 }
 0x537   : > { %v2176_v33 = vpop.permute.xlu1 %2175  ;;  %v2174_v39 = vpop.permute.xlu0 %2173 }
 0x538   : > { %2216 = vst.msk [vmem:[#allocation3 + $0x27] sm:$0x1] %vm9004_vm14, %v2176_v33 }
 0x539   : > { %2215 = vst.msk [vmem:[#allocation3 + $0x1f] sm:$0xfe] %vm9003_vm15, %v2174_v39  ;;  %2412 = vrot.lane.b32.xlu1 %v6959_v60, %s9046_s23  ;;  %2410 = vrot.lane.b32.xlu0 %v6906_v62, %s9046_s23 }
 0x53b   : > { %v2180_v47 = vpop.permute.xlu1 %2179  ;;  %v2178_v51 = vpop.permute.xlu0 %2177 }
 0x53c   : > { %2218 = vst.msk [vmem:[#allocation3 + $0x2f] sm:$0x1] %vm9004_vm14, %v2180_v47 }
 0x53d   : > { %2217 = vst.msk [vmem:[#allocation3 + $0x27] sm:$0xfe] %vm9003_vm15, %v2178_v51  ;;  %2457 = vrot.lane.b32.xlu1 %v6886_v40, %s9044_s30  ;;  %2414 = vrot.lane.b32.xlu0 %v6904_v28, %s9046_s23 }
 0x53f   : > { %v2184_v53 = vpop.permute.xlu1 %2183  ;;  %v2182_v57 = vpop.permute.xlu0 %2181 }
 0x540   : > { %2220 = vst.msk [vmem:[#allocation3 + $0x37] sm:$0x1] %vm9004_vm14, %v2184_v53 }
 0x541   : > { %2219 = vst.msk [vmem:[#allocation3 + $0x2f] sm:$0xfe] %vm9003_vm15, %v2182_v57  ;;  %2461 = vrot.lane.b32.xlu1 %v6896_v37, %s9044_s30  ;;  %2459 = vrot.lane.b32.xlu0 %v6884_v54, %s9044_s30 }
 0x543   : > { %v2188_v59 = vpop.permute.xlu1 %2187  ;;  %v2186_v63 = vpop.permute.xlu0 %2185 }
 0x544   : > { %2222 = vst.msk [vmem:[#allocation3 + $0x3f] sm:$0x1] %vm9004_vm14, %v2188_v59  ;;  %vm9007_vm14 = vcmask 720544  }
 0x545   : > { %2221 = vst.msk [vmem:[#allocation3 + $0x37] sm:$0xfe] %vm9003_vm15, %v2186_v63  ;;  %2491 = vrot.lane.b32.xlu1 %v6886_v40, %s9042_s18  ;;  %2463 = vrot.lane.b32.xlu0 %v6894_v42, %s9044_s30  ;;  %vm2689_vm15 = vcmask 1045504  }
 0x546   : > { %5333 = vmatprep.subr.msk.bf16.mxu0 %vm2689_vm15, %v7222_v13  ;;  %v7232_v14 = vsel %vm2689_vm15, %v7222_v13, 0 }
 0x547   : > { %v2226_v52 = vpop.permute.xlu1 %2225  ;;  %v2224_v26 = vpop.permute.xlu0 %2223  ;;  %5276 = vmatpush3.bf16.msra.mxu0 %v7232_v14 }
 0x548   : > { %2274 = vst.msk [vmem:[#allocation3 + $0x6] sm:$0x3] %vm9006_vm1, %v2226_v52 }
 0x549   : > { %2272 = vst.msk [vmem:[#allocation3 - $0x2] sm:$0xfc] %vm9005_vm2, %v2224_v26  ;;  %2495 = vrot.lane.b32.xlu1 %v6884_v54, %s9042_s18  ;;  %2493 = vrot.lane.b32.xlu0 %v6927_v19, %s9042_s18 }
 0x54b   : > { %v2230_v3 = vpop.permute.xlu1 %2229  ;;  %v2228_v55 = vpop.permute.xlu0 %2227 }
 0x54c   : > { %2276 = vst.msk [vmem:[#allocation3 + $0xe] sm:$0x3] %vm9006_vm1, %v2230_v3 }
 0x54d   : > { %2275 = vst.msk [vmem:[#allocation3 + $0x6] sm:$0xfc] %vm9005_vm2, %v2228_v55  ;;  %2499 = vrot.lane.b32.xlu1 %v6896_v37, %s9042_s18  ;;  %2497 = vrot.lane.b32.xlu0 %v6935_v34, %s9042_s18 }
 0x54f   : > { %v2234_v5 = vpop.permute.xlu1 %2233  ;;  %v2232_v25 = vpop.permute.xlu0 %2231 }
 0x550   : > { %2278 = vst.msk [vmem:[#allocation3 + $0x16] sm:$0x3] %vm9006_vm1, %v2234_v5 }
 0x551   : > { %2277 = vst.msk [vmem:[#allocation3 + $0xe] sm:$0xfc] %vm9005_vm2, %v2232_v25  ;;  %2503 = vrot.lane.b32.xlu1 %v6894_v42, %s9042_s18  ;;  %2501 = vrot.lane.b32.xlu0 %v6943_v50, %s9042_s18 }
 0x553   : > { %v2238_v7 = vpop.permute.xlu1 %2237  ;;  %v2236_v58 = vpop.permute.xlu0 %2235 }
 0x554   : > { %2280 = vst.msk [vmem:[#allocation3 + $0x1e] sm:$0x3] %vm9006_vm1, %v2238_v7 }
 0x555   : > { %2279 = vst.msk [vmem:[#allocation3 + $0x16] sm:$0xfc] %vm9005_vm2, %v2236_v58  ;;  %2557 = vrot.lane.b32.xlu1 %v6886_v40, %s9021_s0  ;;  %2505 = vrot.lane.b32.xlu0 %v6951_v56, %s9042_s18 }
 0x557   : > { %v2242_v10 = vpop.permute.xlu1 %2241  ;;  %v2240_v0 = vpop.permute.xlu0 %2239 }
 0x558   : > { %2282 = vst.msk [vmem:[#allocation3 + $0x26] sm:$0x3] %vm9006_vm1, %v2242_v10 }
 0x559   : > { %2281 = vst.msk [vmem:[#allocation3 + $0x1e] sm:$0xfc] %vm9005_vm2, %v2240_v0  ;;  %2561 = vrot.lane.b32.xlu1 %v6884_v54, %s9021_s0  ;;  %2559 = vrot.lane.b32.xlu0 %v6927_v19, %s9021_s0 }
 0x55b   : > { %v2246_v12 = vpop.permute.xlu1 %2245  ;;  %v2244_v40 = vpop.permute.xlu0 %2243 }
 0x55c   : > { %2284 = vst.msk [vmem:[#allocation3 + $0x2e] sm:$0x3] %vm9006_vm1, %v2246_v12 }
 0x55d   : > { %2283 = vst.msk [vmem:[#allocation3 + $0x26] sm:$0xfc] %vm9005_vm2, %v2244_v40  ;;  %2565 = vrot.lane.b32.xlu1 %v6896_v37, %s9021_s0  ;;  %2563 = vrot.lane.b32.xlu0 %v6935_v34, %s9021_s0 }
 0x55f   : > { %v2250_v54 = vpop.permute.xlu1 %2249  ;;  %v2248_v19 = vpop.permute.xlu0 %2247 }
 0x560   : > { %2286 = vst.msk [vmem:[#allocation3 + $0x36] sm:$0x3] %vm9006_vm1, %v2250_v54 }
 0x561   : > { %2285 = vst.msk [vmem:[#allocation3 + $0x2e] sm:$0xfc] %vm9005_vm2, %v2248_v19  ;;  %2569 = vrot.lane.b32.xlu1 %v6894_v42, %s9021_s0  ;;  %2567 = vrot.lane.b32.xlu0 %v6943_v50, %s9021_s0 }
 0x563   : > { %v2254_v15 = vpop.permute.xlu1 %2253  ;;  %v2252_v16 = vpop.permute.xlu0 %2251 }
 0x564   : > { %2288 = vst.msk [vmem:[#allocation3 + $0x3e] sm:$0x3] %vm9006_vm1, %v2254_v15  ;;  %vm9009_vm1 = vcmask 753345  }
 0x565   : > { %2287 = vst.msk [vmem:[#allocation3 + $0x36] sm:$0xfc] %vm9005_vm2, %v2252_v16  ;;  %2416 = vrot.lane.b32.xlu1 %v6967_v45, %s9046_s23  ;;  %2571 = vrot.lane.b32.xlu0 %v6951_v56, %s9021_s0  ;;  %v2106_v56 = vld [vmem:[#allocation2 + $0x1d0] sm:$0xff]  ;;  %vm9010_vm2 = vcmask 746176  }
 0x567   : > { %v2293_v37 = vpop.permute.xlu1 %2292  ;;  %v2291_v34 = vpop.permute.xlu0 %2290 }
 0x568   : > { %2316 = vst.msk [vmem:[#allocation3 + $0x8] sm:$0xff] %vm9007_vm14, %v2293_v37  ;;  %2315 = vst.msk [vmem:[#allocation3] sm:$0xff] %vm9007_vm14, %v2291_v34 }
 0x569   : > { %2420 = vrot.lane.b32.xlu1 %v7090_v41, %s9046_s23  ;;  %2418 = vrot.lane.b32.xlu0 %v7040_v48, %s9046_s23  ;;  %s9087_s23 = smov 52  }
 0x56b   : > { %v2297_v42 = vpop.permute.xlu1 %2296  ;;  %v2295_v50 = vpop.permute.xlu0 %2294 }
 0x56c   : > { %2318 = vst.msk [vmem:[#allocation3 + $0x18] sm:$0xff] %vm9007_vm14, %v2297_v42  ;;  %2317 = vst.msk [vmem:[#allocation3 + $0x10] sm:$0xff] %vm9007_vm14, %v2295_v50 }
 0x56d   : > { %2467 = vrot.lane.b32.xlu1 %v6904_v28, %s9044_s30  ;;  %2465 = vrot.lane.b32.xlu0 %v6906_v62, %s9044_s30 }
 0x56f   : > { %v2301_v61 = vpop.permute.xlu1 %2300  ;;  %v2299_v32 = vpop.permute.xlu0 %2298 }
 0x570   : > { %2320 = vst.msk [vmem:[#allocation3 + $0x28] sm:$0xff] %vm9007_vm14, %v2301_v61  ;;  %2319 = vst.msk [vmem:[#allocation3 + $0x20] sm:$0xff] %vm9007_vm14, %v2299_v32 }
 0x571   : > { %2471 = vrot.lane.b32.xlu1 %v2106_v56, %s9044_s30  ;;  %2469 = vrot.lane.b32.xlu0 %v7040_v48, %s9044_s30 }
 0x573   : > { %v2305_v35 = vpop.permute.xlu1 %2304  ;;  %v2303_v8 = vpop.permute.xlu0 %2302 }
 0x574   : > { %2322 = vst.msk [vmem:[#allocation3 + $0x38] sm:$0xff] %vm9007_vm14, %v2305_v35  ;;  %2321 = vst.msk [vmem:[#allocation3 + $0x30] sm:$0xff] %vm9007_vm14, %v2303_v8  ;;  %vm2440_vm14 = vcmask 780000  }
 0x575   : > { %2509 = vrot.lane.b32.xlu1 %v6959_v60, %s9042_s18  ;;  %2507 = vrot.lane.b32.xlu0 %v6906_v62, %s9042_s18 }
 0x577   : > { %v2327_v36 = vpop.permute.xlu1 %2326  ;;  %v2325_v43 = vpop.permute.xlu0 %2324 }
 0x578   : > { %2375 = vst.msk [vmem:[#allocation3 + $0x7] sm:$0x1] %vm9010_vm2, %v2327_v36 }
 0x579   : > { %2373 = vst.msk [vmem:[#allocation3 - $0x1] sm:$0xfe] %vm9009_vm1, %v2325_v43  ;;  %2513 = vrot.lane.b32.xlu1 %v6967_v45, %s9042_s18  ;;  %2511 = vrot.lane.b32.xlu0 %v6904_v28, %s9042_s18 }
 0x57b   : > { %v2331_v38 = vpop.permute.xlu1 %2330  ;;  %v2329_v44 = vpop.permute.xlu0 %2328 }
 0x57c   : > { %2377 = vst.msk [vmem:[#allocation3 + $0xf] sm:$0x1] %vm9010_vm2, %v2331_v38 }
 0x57d   : > { %2376 = vst.msk [vmem:[#allocation3 + $0x7] sm:$0xfe] %vm9009_vm1, %v2329_v44  ;;  %2517 = vrot.lane.b32.xlu1 %v7090_v41, %s9042_s18  ;;  %2515 = vrot.lane.b32.xlu0 %v7040_v48, %s9042_s18 }
 0x57f   : > { %v2335_v24 = vpop.permute.xlu1 %2334  ;;  %v2333_v27 = vpop.permute.xlu0 %2332 }
 0x580   : > { %2379 = vst.msk [vmem:[#allocation3 + $0x17] sm:$0x1] %vm9010_vm2, %v2335_v24 }
 0x581   : > { %2378 = vst.msk [vmem:[#allocation3 + $0xf] sm:$0xfe] %vm9009_vm1, %v2333_v27  ;;  %2521 = vrot.lane.b32.xlu1 %v2107_v46, %s9042_s18  ;;  %2519 = vrot.lane.b32.xlu0 %v2106_v56, %s9042_s18  ;;  %s9070_s18 = smov 40  }
 0x583   : > { %v2339_v29 = vpop.permute.xlu1 %2338  ;;  %v2337_v30 = vpop.permute.xlu0 %2336 }
 0x584   : > { %2381 = vst.msk [vmem:[#allocation3 + $0x1f] sm:$0x1] %vm9010_vm2, %v2339_v29 }
 0x585   : > { %2380 = vst.msk [vmem:[#allocation3 + $0x17] sm:$0xfe] %vm9009_vm1, %v2337_v30  ;;  %2575 = vrot.lane.b32.xlu1 %v6959_v60, %s9021_s0  ;;  %2573 = vrot.lane.b32.xlu0 %v6906_v62, %s9021_s0 }
 0x587   : > { %v2343_v1 = vpop.permute.xlu1 %2342  ;;  %v2341_v18 = vpop.permute.xlu0 %2340 }
 0x588   : > { %2383 = vst.msk [vmem:[#allocation3 + $0x27] sm:$0x1] %vm9010_vm2, %v2343_v1 }
 0x589   : > { %2382 = vst.msk [vmem:[#allocation3 + $0x1f] sm:$0xfe] %vm9009_vm1, %v2341_v18  ;;  %2579 = vrot.lane.b32.xlu1 %v6967_v45, %s9021_s0  ;;  %2577 = vrot.lane.b32.xlu0 %v6904_v28, %s9021_s0 }
 0x58b   : > { %v2347_v31 = vpop.permute.xlu1 %2346  ;;  %v2345_v33 = vpop.permute.xlu0 %2344 }
 0x58c   : > { %2385 = vst.msk [vmem:[#allocation3 + $0x2f] sm:$0x1] %vm9010_vm2, %v2347_v31 }
 0x58d   : > { %2384 = vst.msk [vmem:[#allocation3 + $0x27] sm:$0xfe] %vm9009_vm1, %v2345_v33  ;;  %2583 = vrot.lane.b32.xlu1 %v7090_v41, %s9021_s0  ;;  %2581 = vrot.lane.b32.xlu0 %v7040_v48, %s9021_s0 }
 0x58f   : > { %v2351_v62 = vpop.permute.xlu1 %2350  ;;  %v2349_v60 = vpop.permute.xlu0 %2348 }
 0x590   : > { %2387 = vst.msk [vmem:[#allocation3 + $0x37] sm:$0x1] %vm9010_vm2, %v2351_v62 }
 0x591   : > { %2386 = vst.msk [vmem:[#allocation3 + $0x2f] sm:$0xfe] %vm9009_vm1, %v2349_v60  ;;  %2587 = vrot.lane.b32.xlu1 %v2107_v46, %s9021_s0  ;;  %2585 = vrot.lane.b32.xlu0 %v2106_v56, %s9021_s0  ;;  %s9038_s0 = smov 112  }
 0x593   : > { %v2355_v28 = vpop.permute.xlu1 %2354  ;;  %v2353_v45 = vpop.permute.xlu0 %2352 }
 0x594   : > { %2389 = vst.msk [vmem:[#allocation3 + $0x3f] sm:$0x1] %vm9010_vm2, %v2355_v28  ;;  %vm9015_vm2 = vcmask 851745  }
 0x595   : > { %2388 = vst.msk [vmem:[#allocation3 + $0x37] sm:$0xfe] %vm9009_vm1, %v2353_v45  ;;  %vm2481_vm1 = vcmask 818944  }
 0x597   : > { %v2393_v41 = vpop.permute.xlu1 %2392  ;;  %v2391_v48 = vpop.permute.xlu0 %2390 }
 0x598   : > { %2441 = vst.msk [vmem:[#allocation3 + $0x6] sm:$0x3] %vm2440_vm14, %v2393_v41 }
 0x599   : > { %2439 = vst.msk [vmem:[#allocation3 - $0x2] sm:$0xfc] %vm2438_vm13, %v2391_v48 }
 0x59b   : > { %v2397_v39 = vpop.permute.xlu1 %2396  ;;  %v2395_v47 = vpop.permute.xlu0 %2394 }
 0x59c   : > { %2443 = vst.msk [vmem:[#allocation3 + $0xe] sm:$0x3] %vm2440_vm14, %v2397_v39 }
 0x59d   : > { %2442 = vst.msk [vmem:[#allocation3 + $0x6] sm:$0xfc] %vm2438_vm13, %v2395_v47 }
 0x59f   : > { %v2401_v51 = vpop.permute.xlu1 %2400  ;;  %v2399_v53 = vpop.permute.xlu0 %2398 }
 0x5a0   : > { %2445 = vst.msk [vmem:[#allocation3 + $0x16] sm:$0x3] %vm2440_vm14, %v2401_v51 }
 0x5a1   : > { %2444 = vst.msk [vmem:[#allocation3 + $0xe] sm:$0xfc] %vm2438_vm13, %v2399_v53 }
 0x5a3   : > { %v2405_v57 = vpop.permute.xlu1 %2404  ;;  %v2403_v59 = vpop.permute.xlu0 %2402 }
 0x5a4   : > { %2447 = vst.msk [vmem:[#allocation3 + $0x1e] sm:$0x3] %vm2440_vm14, %v2405_v57 }
 0x5a5   : > { %2446 = vst.msk [vmem:[#allocation3 + $0x16] sm:$0xfc] %vm2438_vm13, %v2403_v59 }
 0x5a7   : > { %v2409_v63 = vpop.permute.xlu1 %2408  ;;  %v2407_v52 = vpop.permute.xlu0 %2406 }
 0x5a8   : > { %2449 = vst.msk [vmem:[#allocation3 + $0x26] sm:$0x3] %vm2440_vm14, %v2409_v63 }
 0x5a9   : > { %2448 = vst.msk [vmem:[#allocation3 + $0x1e] sm:$0xfc] %vm2438_vm13, %v2407_v52 }
 0x5ab   : > { %v2413_v26 = vpop.permute.xlu1 %2412  ;;  %v2411_v3 = vpop.permute.xlu0 %2410 }
 0x5ac   : > { %2451 = vst.msk [vmem:[#allocation3 + $0x2e] sm:$0x3] %vm2440_vm14, %v2413_v26 }
 0x5ad   : > { %2450 = vst.msk [vmem:[#allocation3 + $0x26] sm:$0xfc] %vm2438_vm13, %v2411_v3 }
 0x5af   : > { %v2458_v55 = vpop.permute.xlu1 %2457  ;;  %v2415_v5 = vpop.permute.xlu0 %2414 }
 0x5b0   : > { %2482 = vst.msk [vmem:[#allocation3] sm:$0xff] %vm2481_vm1, %v2458_v55 }
 0x5b1   : > { %2452 = vst.msk [vmem:[#allocation3 + $0x2e] sm:$0xfc] %vm2438_vm13, %v2415_v5 }
 0x5b3   : > { %v2462_v25 = vpop.permute.xlu1 %2461  ;;  %v2460_v7 = vpop.permute.xlu0 %2459 }
 0x5b4   : > { %2484 = vst.msk [vmem:[#allocation3 + $0x10] sm:$0xff] %vm2481_vm1, %v2462_v25  ;;  %2483 = vst.msk [vmem:[#allocation3 + $0x8] sm:$0xff] %vm2481_vm1, %v2460_v7 }
 0x5b7   : > { %v2492_v58 = vpop.permute.xlu1 %2491  ;;  %v2464_v10 = vpop.permute.xlu0 %2463 }
 0x5b8   : > { %2540 = vst.msk [vmem:[#allocation3 - $0x1] sm:$0xfe] %vm9015_vm2, %v2492_v58 }
 0x5b9   : > { %2485 = vst.msk [vmem:[#allocation3 + $0x18] sm:$0xff] %vm2481_vm1, %v2464_v10 }
 0x5bb   : > { %v2496_v0 = vpop.permute.xlu1 %2495  ;;  %v2494_v12 = vpop.permute.xlu0 %2493 }
 0x5bc   : > { %2543 = vst.msk [vmem:[#allocation3 + $0x7] sm:$0xfe] %vm9015_vm2, %v2496_v0 }
 0x5bd   : > { %2542 = vst.msk [vmem:[#allocation3 + $0x7] sm:$0x1] %vm9020_vm12, %v2494_v12 }
 0x5bf   : > { %v2500_v40 = vpop.permute.xlu1 %2499  ;;  %v2498_v54 = vpop.permute.xlu0 %2497 }
 0x5c0   : > { %2545 = vst.msk [vmem:[#allocation3 + $0xf] sm:$0xfe] %vm9015_vm2, %v2500_v40 }
 0x5c1   : > { %2544 = vst.msk [vmem:[#allocation3 + $0xf] sm:$0x1] %vm9020_vm12, %v2498_v54 }
 0x5c3   : > { %v2504_v19 = vpop.permute.xlu1 %2503  ;;  %v2502_v15 = vpop.permute.xlu0 %2501 }
 0x5c4   : > { %2547 = vst.msk [vmem:[#allocation3 + $0x17] sm:$0xfe] %vm9015_vm2, %v2504_v19 }
 0x5c5   : > { %2546 = vst.msk [vmem:[#allocation3 + $0x17] sm:$0x1] %vm9020_vm12, %v2502_v15 }
 0x5c7   : > { %v2558_v16 = vpop.permute.xlu1 %2557  ;;  %v2506_v37 = vpop.permute.xlu0 %2505 }
 0x5c8   : > { %2606 = vst.msk [vmem:[#allocation3 - $0x2] sm:$0xfc] %vm9018_vm11, %v2558_v16 }
 0x5c9   : > { %2548 = vst.msk [vmem:[#allocation3 + $0x1f] sm:$0x1] %vm9020_vm12, %v2506_v37 }
 0x5cb   : > { %v2562_v34 = vpop.permute.xlu1 %2561  ;;  %v2560_v42 = vpop.permute.xlu0 %2559 }
 0x5cc   : > { %2609 = vst.msk [vmem:[#allocation3 + $0x6] sm:$0xfc] %vm9018_vm11, %v2562_v34 }
 0x5cd   : > { %2608 = vst.msk [vmem:[#allocation3 + $0x6] sm:$0x3] %vm9019_vm10, %v2560_v42 }
 0x5cf   : > { %v2566_v50 = vpop.permute.xlu1 %2565  ;;  %v2564_v56 = vpop.permute.xlu0 %2563 }
 0x5d0   : > { %2611 = vst.msk [vmem:[#allocation3 + $0xe] sm:$0xfc] %vm9018_vm11, %v2566_v50 }
 0x5d1   : > { %2610 = vst.msk [vmem:[#allocation3 + $0xe] sm:$0x3] %vm9019_vm10, %v2564_v56 }
 0x5d3   : > { %v2570_v61 = vpop.permute.xlu1 %2569  ;;  %v2568_v32 = vpop.permute.xlu0 %2567 }
 0x5d4   : > { %2613 = vst.msk [vmem:[#allocation3 + $0x16] sm:$0xfc] %vm9018_vm11, %v2570_v61  ;;  %v2623_v36 = vld [vmem:[#allocation3] sm:$0xff] }
 0x5d5   : > { %2612 = vst.msk [vmem:[#allocation3 + $0x16] sm:$0x3] %vm9019_vm10, %v2568_v32 }
 0x5d7   : > { %v2417_v35 = vpop.permute.xlu1 %2416  ;;  %v2572_v8 = vpop.permute.xlu0 %2571 }
 0x5d8   : > { %v2624_v43 = vld [vmem:[#allocation3 + $0x8] sm:$0xff]  ;;  %2453 = vst.msk [vmem:[#allocation3 + $0x36] sm:$0x3] %vm2440_vm14, %v2417_v35 }
 0x5d9   : > { %2614 = vst.msk [vmem:[#allocation3 + $0x1e] sm:$0x3] %vm9019_vm10, %v2572_v8  ;;  %v2631_v38 = vpack.c.bf16 %v2624_v43, %v2623_v36 }
 0x5db   : > { %5277 = vmatprep.mubr.msk.bf16.mxu0 %vm9017_vm9, %v2631_v38  ;;  %v2421_v44 = vpop.permute.xlu1 %2420  ;;  %v2419_v46 = vpop.permute.xlu0 %2418 }
 0x5dc   : > { %2455 = vst.msk [vmem:[#allocation3 + $0x3e] sm:$0x3] %vm2440_vm14, %v2421_v44  ;;  %v2625_v29 = vld [vmem:[#allocation3 + $0x10] sm:$0xff] }
 0x5dd   : > { %2454 = vst.msk [vmem:[#allocation3 + $0x36] sm:$0xfc] %vm2438_vm13, %v2419_v46 }
 0x5df   : > { %v2468_v24 = vpop.permute.xlu1 %2467  ;;  %v2466_v27 = vpop.permute.xlu0 %2465 }
 0x5e0   : > { %v2626_v30 = vld [vmem:[#allocation3 + $0x18] sm:$0xff]  ;;  %2487 = vst.msk [vmem:[#allocation3 + $0x28] sm:$0xff] %vm2481_vm1, %v2468_v24  ;;  %2486 = vst.msk [vmem:[#allocation3 + $0x20] sm:$0xff] %vm2481_vm1, %v2466_v27 }
 0x5e1   : > { %v2632_v1 = vpack.c.bf16 %v2626_v30, %v2625_v29 }
 0x5e3   : > { %5278 = vmatmul.mubr.msk.bf16.vlgmr.msra.gmra.mrb[0].mxu0 %vm9017_vm9, %v2632_v1  ;;  %v2472_v18 = vpop.permute.xlu1 %2471  ;;  %v2470_v31 = vpop.permute.xlu0 %2469 }
 0x5e4   : > { %2489 = vst.msk [vmem:[#allocation3 + $0x38] sm:$0xff] %vm2481_vm1, %v2472_v18  ;;  %2488 = vst.msk [vmem:[#allocation3 + $0x30] sm:$0xff] %vm2481_vm1, %v2470_v31  ;;  %v7417_v31 = vld [vmem:[#allocation2 + $0xa0] sm:$0xff] }
 0x5e5   : > { %3070 = vst.msk [vmem:[#allocation3] sm:$0xff] %vm9016_vm0, %v7417_v31 }
 0x5e7   : > { %v2510_v33 = vpop.permute.xlu1 %2509  ;;  %v2508_v62 = vpop.permute.xlu0 %2507 }
 0x5e8   : > { %2550 = vst.msk [vmem:[#allocation3 + $0x27] sm:$0x1] %vm9020_vm12, %v2510_v33  ;;  %v7421_v33 = vld [vmem:[#allocation2 + $0xb0] sm:$0xff] }
 0x5e9   : > { %2549 = vst.msk [vmem:[#allocation3 + $0x1f] sm:$0xfe] %vm9015_vm2, %v2508_v62  ;;  %v7425_v62 = vld [vmem:[#allocation2 + $0xc0] sm:$0xff] }
 0x5ea   : > { %3071 = vst.msk [vmem:[#allocation3 + $0x8] sm:$0xff] %vm9016_vm0, %v7421_v33  ;;  %3072 = vst.msk [vmem:[#allocation3 + $0x10] sm:$0xff] %vm9016_vm0, %v7425_v62 }
 0x5eb   : > { %v2514_v60 = vpop.permute.xlu1 %2513  ;;  %v2512_v28 = vpop.permute.xlu0 %2511 }
 0x5ec   : > { %2552 = vst.msk [vmem:[#allocation3 + $0x2f] sm:$0x1] %vm9020_vm12, %v2514_v60  ;;  %v7429_v60 = vld [vmem:[#allocation2 + $0xd0] sm:$0xff] }
 0x5ed   : > { %2551 = vst.msk [vmem:[#allocation3 + $0x27] sm:$0xfe] %vm9015_vm2, %v2512_v28  ;;  %v7433_v28 = vld [vmem:[#allocation2 + $0xe0] sm:$0xff] }
 0x5ee   : > { %3073 = vst.msk [vmem:[#allocation3 + $0x18] sm:$0xff] %vm9016_vm0, %v7429_v60 }
 0x5ef   : > { %v2518_v45 = vpop.permute.xlu1 %2517  ;;  %v2516_v41 = vpop.permute.xlu0 %2515 }
 0x5f0   : > { %2554 = vst.msk [vmem:[#allocation3 + $0x37] sm:$0x1] %vm9020_vm12, %v2518_v45  ;;  %v7437_v45 = vld [vmem:[#allocation2 + $0xf0] sm:$0xff] }
 0x5f1   : > { %2553 = vst.msk [vmem:[#allocation3 + $0x2f] sm:$0xfe] %vm9015_vm2, %v2516_v41  ;;  %v7441_v41 = vld [vmem:[#allocation2 + $0x100] sm:$0xff] }
 0x5f3   : > { %v2522_v48 = vpop.permute.xlu1 %2521  ;;  %v2520_v39 = vpop.permute.xlu0 %2519 }
 0x5f4   : > { %2556 = vst.msk [vmem:[#allocation3 + $0x3f] sm:$0x1] %vm9020_vm12, %v2522_v48  ;;  %v7445_v48 = vld [vmem:[#allocation2 + $0x110] sm:$0xff]  ;;  %vm9024_vm12 = vcmask 1047559  }
 0x5f5   : > { %2555 = vst.msk [vmem:[#allocation3 + $0x37] sm:$0xfe] %vm9015_vm2, %v2520_v39  ;;  %vm2798_vm2 = vcmask 1041408  }
 0x5f6   : > { %5334 = vmatprep.subr.msk.bf16.mxu1 %vm2798_vm2, %v5951_v17  ;;  %v7374_v10 = vsel %vm2798_vm2, %v5951_v17, 0  ;;  %5336 = vmatprep.subr.msk.bf16.mxu0 %vm2798_vm2, %v5951_v17 }
 0x5f7   : > { %v2576_v47 = vpop.permute.xlu1 %2575  ;;  %v2574_v51 = vpop.permute.xlu0 %2573  ;;  %5286 = vmatpush3.bf16.msra.mxu1 %v7374_v10  ;;  %5318 = vmatpush3.bf16.msra.mxu0 %v7374_v10 }
 0x5f8   : > { %2616 = vst.msk [vmem:[#allocation3 + $0x26] sm:$0x3] %vm9019_vm10, %v2576_v47  ;;  %5295 = vmatprep.subr.bf16.mxu1 %v7150_v49 }
 0x5f9   : > { %2615 = vst.msk [vmem:[#allocation3 + $0x1e] sm:$0xfc] %vm9018_vm11, %v2574_v51 }
 0x5fb   : > { %v2580_v53 = vpop.permute.xlu1 %2579  ;;  %v2578_v57 = vpop.permute.xlu0 %2577 }
 0x5fc   : > { %2618 = vst.msk [vmem:[#allocation3 + $0x2e] sm:$0x3] %vm9019_vm10, %v2580_v53  ;;  %v2869_v53 = vld [vmem:[%s6025_s22 + $0x10] sm:$0xff] }
 0x5fd   : > { %2617 = vst.msk [vmem:[#allocation3 + $0x26] sm:$0xfc] %vm9018_vm11, %v2578_v57 }
 0x5ff   : > { %v2584_v59 = vpop.permute.xlu1 %2583  ;;  %v2582_v63 = vpop.permute.xlu0 %2581 }
 0x600   : > { %2620 = vst.msk [vmem:[#allocation3 + $0x36] sm:$0x3] %vm9019_vm10, %v2584_v59  ;;  %v2627_v3 = vld [vmem:[#allocation3 + $0x20] sm:$0xff] }
 0x601   : > { %2619 = vst.msk [vmem:[#allocation3 + $0x2e] sm:$0xfc] %vm9018_vm11, %v2582_v63 }
 0x602   : > { %3074 = vst.msk [vmem:[#allocation3 + $0x20] sm:$0xff] %vm9016_vm0, %v7433_v28 }
 0x603   : > { %v2588_v52 = vpop.permute.xlu1 %2587  ;;  %v2586_v26 = vpop.permute.xlu0 %2585 }
 0x604   : > { %v2628_v55 = vld [vmem:[#allocation3 + $0x28] sm:$0xff]  ;;  %2622 = vst.msk [vmem:[#allocation3 + $0x3e] sm:$0x3] %vm9019_vm10, %v2588_v52  ;;  %vm9025_vm10 = vcmask 1046534  }
 0x605   : > { %2621 = vst.msk [vmem:[#allocation3 + $0x36] sm:$0xfc] %vm9018_vm11, %v2586_v26  ;;  %v2633_v5 = vpack.c.bf16 %v2628_v55, %v2627_v3  ;;  %v2870_v55 = vld [vmem:[%s6025_s22 + $0x18] sm:$0xff]  ;;  %vm9027_vm11 = vcmask 1045509  }
 0x606   : > { %3075 = vst.msk [vmem:[#allocation3 + $0x28] sm:$0xff] %vm9016_vm0, %v7437_v45 }
 0x607   : > { %5281 = vmatprep.mubr.msk.bf16.mxu0 %vm9017_vm9, %v2633_v5 }
 0x608   : > { %v2629_v25 = vld [vmem:[#allocation3 + $0x30] sm:$0xff] }
 0x609   : > { %3076 = vst.msk [vmem:[#allocation3 + $0x30] sm:$0xff] %vm9016_vm0, %v7441_v41 }
 0x60c   : > { %v2630_v7 = vld [vmem:[#allocation3 + $0x38] sm:$0xff] }
 0x60d   : > { %v2634_v58 = vpack.c.bf16 %v2630_v7, %v2629_v25  ;;  %3077 = vst.msk [vmem:[#allocation3 + $0x38] sm:$0xff] %vm9016_vm0, %v7445_v48  ;;  %v2867_v7 = vld [vmem:[%s6025_s22] sm:$0xff] }
 0x60f   : > { %5282 = vmatmul.mubr.msk.bf16.gmra.mrb[4].mxu0 %vm9017_vm9, %v2634_v58  ;;  %vm2925_vm9 = vcmask 1044484  }
 0x6b6   : > { %v5279_v0 = vpop.f32.mrb[0].mxu0 }
 0x6b7   : > { %v2760_v12 = vmul.f32 %v5279_v0, %v5966_v20  ;;  %v2727_v40 = vpop.f32.mrb[1].mxu0  ;;  %v2868_v0 = vld [vmem:[%s6025_s22 + $0x8] sm:$0xff] }
 0x6b8   : > { %v2758_v54 = vmul.f32 %v5966_v20, %v2727_v40  ;;  %v5280_v19 = vpop.f32.mrb[2].mxu0 }
 0x6b9   : > { %v2768_v15 = vadd.f32 %v5971_v21, %v2760_v12  ;;  %v2761_v16 = vmul.f32 %v5280_v19, %v5966_v20  ;;  %v2730_v37 = vpop.f32.mrb[3].mxu0 }
 0x6ba   : > { %v2766_v34 = vadd.f32 %v5971_v21, %v2758_v54  ;;  %v2759_v42 = vmul.f32 %v5966_v20, %v2730_v37 }
 0x6bb   : > { %v2769_v50 = vadd.f32 %v5971_v21, %v2761_v16  ;;  %v2776_v61 = vmax.f32 %v2768_v15, 0.0 }
 0x6bc   : > { %v2767_v56 = vadd.f32 %v5971_v21, %v2759_v42  ;;  %v2774_v35 = vmax.f32 %v2766_v34, 0.0 }
 0x6bd   : > { %v2777_v32 = vmax.f32 %v2769_v50, 0.0 }
 0x6be   : > { %v2775_v8 = vmax.f32 %v2767_v56, 0.0 }
 0x6bf   : > { %v2783_v36 = vpack.c.bf16 %v2777_v32, %v2776_v61 }
 0x6c0   : > { %v2782_v43 = vpack.c.bf16 %v2775_v8, %v2774_v35 }
 0x6c2   : > { %5287 = vmatprep.mubr.msk.bf16.mxu1 %vm9016_vm0, %v2782_v43 }
 0x6c3   : > { %5288 = vmatmul.mubr.msk.bf16.vlgmr.msra.gmra.mrb[0].mxu1 %vm9016_vm0, %v2783_v36 }
 0x6c4   : > { %5296 = vmatpush3.bf16.msra.mxu1 %v7150_v49 }
 0x6c5   : > { %5297 = vmatprep.subr.bf16.mxu1 %v7162_v2 }
 0x6c8   : > { %5298 = vmatpush3.bf16.msra.mxu1 %v7162_v2 }
 0x6c9   : > { %5299 = vmatprep.subr.bf16.mxu1 %v7174_v4 }
 0x6cc   : > { %5300 = vmatpush3.bf16.msra.mxu1 %v7174_v4 }
 0x6cd   : > { %5301 = vmatprep.subr.bf16.mxu1 %v7186_v6 }
 0x6d0   : > { %5302 = vmatpush3.bf16.msra.mxu1 %v7186_v6 }
 0x6d1   : > { %5303 = vmatprep.subr.bf16.mxu1 %v7198_v9 }
 0x6d4   : > { %5304 = vmatpush3.bf16.msra.mxu1 %v7198_v9 }
 0x6d5   : > { %5305 = vmatprep.subr.bf16.mxu1 %v7210_v11 }
 0x6d8   : > { %5306 = vmatpush3.bf16.msra.mxu1 %v7210_v11 }
 0x6d9   : > { %5335 = vmatprep.subr.msk.bf16.mxu1 %vm2689_vm15, %v7222_v13  ;;  %vm2919_vm15 = vcmask 1042434  }
 0x6dc   : > { %5308 = vmatpush3.bf16.msra.mxu1 %v7232_v14 }
 0x6dd   : > { %5337 = vmatprep.subr.msk.bf16.mxu1 %vm2798_vm2, %v5951_v17  ;;  %vm2922_vm2 = vcmask 1043459  }
 0x6e2   : > { %v5283_v49 = vpop.f32.mrb[4].mxu0 }
 0x6e3   : > { %v2764_v2 = vmul.f32 %v5283_v49, %v5966_v20  ;;  %v2743_v4 = vpop.f32.mrb[5].mxu0 }
 0x6e4   : > { %v2762_v6 = vmul.f32 %v5966_v20, %v2743_v4  ;;  %v5284_v38 = vpop.f32.mrb[6].mxu0 }
 0x6e5   : > { %v2772_v9 = vadd.f32 %v5971_v21, %v2764_v2  ;;  %v2765_v44 = vmul.f32 %v5284_v38, %v5966_v20  ;;  %v2746_v11 = vpop.f32.mrb[7].mxu0 }
 0x6e6   : > { %v2770_v46 = vadd.f32 %v5971_v21, %v2762_v6  ;;  %v2763_v13 = vmul.f32 %v5966_v20, %v2746_v11 }
 0x6e7   : > { %v2773_v14 = vadd.f32 %v5971_v21, %v2765_v44  ;;  %v2780_v24 = vmax.f32 %v2772_v9, 0.0 }
 0x6e8   : > { %v2771_v17 = vadd.f32 %v5971_v21, %v2763_v13  ;;  %v2778_v29 = vmax.f32 %v2770_v46, 0.0 }
 0x6e9   : > { %v2781_v27 = vmax.f32 %v2773_v14, 0.0 }
 0x6ea   : > { %v2779_v30 = vmax.f32 %v2771_v17, 0.0 }
 0x6eb   : > { %v2785_v1 = vpack.c.bf16 %v2781_v27, %v2780_v24 }
 0x6ec   : > { %v2784_v18 = vpack.c.bf16 %v2779_v30, %v2778_v29 }
 0x6ee   : > { %5291 = vmatprep.mubr.msk.bf16.mxu1 %vm9016_vm0, %v2784_v18 }
 0x6ef   : > { %5292 = vmatmul.mubr.msk.bf16.gmra.mrb[4].mxu1 %vm9016_vm0, %v2785_v1  ;;  %vm2916_vm0 = vcmask 1041409  }
 0x796   : > { %v5289_v39 = vpop.f32.mrb[0].mxu1 }
 0x797   : > { %v2877_v47 = vmul.f32 %v5289_v39, %v5976_v22  ;;  %v2836_v51 = vpop.f32.mrb[1].mxu1  ;;  %v2873_v39 = vld [vmem:[%s6025_s22 + $0x30] sm:$0xff] }
 0x798   : > { %v2875_v57 = vmul.f32 %v5976_v22, %v2836_v51  ;;  %v5290_v59 = vpop.f32.mrb[2].mxu1 }
 0x799   : > { %v2885_v63 = vadd.f32 %v5981_v23, %v2877_v47  ;;  %v2878_v52 = vmul.f32 %v5290_v59, %v5976_v22  ;;  %v2839_v26 = vpop.f32.mrb[3].mxu1 }
 0x79a   : > { %v2883_v3 = vadd.f32 %v5981_v23, %v2875_v57  ;;  %v2876_v5 = vmul.f32 %v5976_v22, %v2839_v26  ;;  %v2871_v57 = vld [vmem:[%s6025_s22 + $0x20] sm:$0xff]  ;;  %v2874_v26 = vld [vmem:[%s6025_s22 + $0x38] sm:$0xff] }
 0x79b   : > { %v2893_v25 = vadd.f32 %v2885_v63, %v2869_v53  ;;  %v2886_v58 = vadd.f32 %v5981_v23, %v2878_v52 }
 0x79c   : > { %v2884_v12 = vadd.f32 %v5981_v23, %v2876_v5  ;;  %v2891_v19 = vadd.f32 %v2883_v3, %v2867_v7 }
 0x79d   : > { %v2901_v40 = vmax.f32 %v2893_v25, 0.0  ;;  %v2894_v54 = vadd.f32 %v2886_v58, %v2870_v55  ;;  %v2872_v25 = vld [vmem:[%s6025_s22 + $0x28] sm:$0xff] }
 0x79e   : > { %v2892_v15 = vadd.f32 %v2884_v12, %v2868_v0  ;;  %v7461_v50 = vmax.f32 %v2891_v19, 0.0 }
 0x79f   : > { %v2902_v16 = vmax.f32 %v2894_v54, 0.0  ;;  %v2918_v34 = vrot.slane %v2901_v40, 6 }
 0x7a0   : > { %v2900_v37 = vmax.f32 %v2892_v15, 0.0 }
 0x7a1   : > { %v2921_v42 = vrot.slane %v2902_v16, 5 }
 0x7a2   : > { %v2915_v56 = vrot.slane %v2900_v37, 7 }
 0x7a3   : > { %v3019_v61 = vsel %vm2916_vm0, %v2921_v42, %v2918_v34 }
 0x7a4   : > { %v2938_v32 = vsel %vm2919_vm15, %v2915_v56, %v7461_v50  ;;  %v2954_v35 = vsel %vm2922_vm2, %v2915_v56, %v7461_v50  ;;  %v2970_v8 = vsel %vm2925_vm9, %v2915_v56, %v7461_v50  ;;  %v2986_v36 = vsel %vm9027_vm11, %v2915_v56, %v7461_v50 }
 0x7a5   : > { %v2939_v43 = vsel %vm2922_vm2, %v2918_v34, %v2938_v32  ;;  %v2955_v49 = vsel %vm2925_vm9, %v2918_v34, %v2954_v35  ;;  %v2971_v2 = vsel %vm9027_vm11, %v2918_v34, %v2970_v8  ;;  %v2987_v4 = vsel %vm9025_vm10, %v2918_v34, %v2986_v36 }
 0x7a6   : > { %v2940_v6 = vsel %vm2925_vm9, %v2921_v42, %v2939_v43  ;;  %v2956_v38 = vsel %vm9027_vm11, %v2921_v42, %v2955_v49  ;;  %v2972_v9 = vsel %vm9025_vm10, %v2921_v42, %v2971_v2  ;;  %v7480_v44 = vsel %vm9024_vm12, %v2921_v42, %v2987_v4 }
 0x7a7   : > { %v3002_v11 = vsel %vm9025_vm10, %v2915_v56, %v7461_v50  ;;  %v7486_v46 = vsel %vm9024_vm12, %v2915_v56, %v7461_v50  ;;  %v3034_v13 = vsel %vm2916_vm0, %v2918_v34, %v2915_v56  ;;  %v2917_v14 = vsel %vm2916_vm0, %v2915_v56, %v7461_v50 }
 0x7a8   : > { %v7492_v17 = vsel %vm9024_vm12, %v2918_v34, %v3002_v11  ;;  %v3035_v24 = vsel %vm2919_vm15, %v2921_v42, %v3034_v13  ;;  %v2920_v27 = vsel %vm2919_vm15, %v2918_v34, %v2917_v14 }
 0x7a9   : > { %v2923_v29 = vsel %vm2922_vm2, %v2921_v42, %v2920_v27 }
 0x7c2   : > { %v5293_v30 = vpop.f32.mrb[4].mxu1 }
 0x7c3   : > { %v2881_v1 = vmul.f32 %v5293_v30, %v5976_v22  ;;  %v2852_v18 = vpop.f32.mrb[5].mxu1 }
 0x7c4   : > { %v2879_v47 = vmul.f32 %v5976_v22, %v2852_v18  ;;  %v5294_v51 = vpop.f32.mrb[6].mxu1 }
 0x7c5   : > { %v2889_v53 = vadd.f32 %v5981_v23, %v2881_v1  ;;  %v2882_v59 = vmul.f32 %v5294_v51, %v5976_v22  ;;  %v2855_v63 = vpop.f32.mrb[7].mxu1 }
 0x7c6   : > { %v2887_v52 = vadd.f32 %v5981_v23, %v2879_v47  ;;  %v2880_v3 = vmul.f32 %v5976_v22, %v2855_v63 }
 0x7c7   : > { %v2897_v55 = vadd.f32 %v2889_v53, %v2873_v39  ;;  %v2890_v5 = vadd.f32 %v5981_v23, %v2882_v59 }
 0x7c8   : > { %v2895_v7 = vadd.f32 %v2887_v52, %v2871_v57  ;;  %v2888_v58 = vadd.f32 %v5981_v23, %v2880_v3  ;;  %v7582_v52 = vld [vmem:[#allocation2 + $0xf8] sm:$0x3] }
 0x7c9   : > { %v2905_v0 = vmax.f32 %v2897_v55, 0.0  ;;  %v2898_v12 = vadd.f32 %v2890_v5, %v2874_v26  ;;  %v7588_v26 = vld [vmem:[#allocation2 + $0x108] sm:$0x3]  ;;  %v7594_v3 = vld [vmem:[#allocation2 + $0x118] sm:$0x3] }
 0x7ca   : > { %v2903_v40 = vmax.f32 %v2895_v7, 0.0  ;;  %v2896_v54 = vadd.f32 %v2888_v58, %v2872_v25 }
 0x7cb   : > { %v2906_v19 = vmax.f32 %v2898_v12, 0.0  ;;  %v2930_v37 = vrot.slane %v2905_v0, 2 }
 0x7cc   : > { %v2924_v15 = vrot.slane %v2903_v40, 4  ;;  %v2904_v16 = vmax.f32 %v2896_v54, 0.0 }
 0x7cd   : > { %v2933_v34 = vrot.slane %v2906_v19, 1 }
 0x7ce   : > { %v2927_v56 = vrot.slane %v2904_v16, 3  ;;  %v2941_v32 = vsel %vm9027_vm11, %v2924_v15, %v2940_v6  ;;  %v2957_v35 = vsel %vm9025_vm10, %v2924_v15, %v2956_v38  ;;  %v2973_v8 = vsel %vm9024_vm12, %v2924_v15, %v2972_v9 }
 0x7cf   : > { %2946 = vrot.lane.b32.xlu1 %v2933_v34, %s9040_s19  ;;  %v2959_v36 = vsel %vm2916_vm0, %v2933_v34, %v2930_v37  ;;  %v3004_v43 = vsel %vm2916_vm0, %v2924_v15, %v2921_v42  ;;  %v3020_v49 = vsel %vm2919_vm15, %v2924_v15, %v3019_v61  ;;  %v3036_v2 = vsel %vm2922_vm2, %v2924_v15, %v3035_v24 }
 0x7d0   : > { %v2942_v4 = vsel %vm9025_vm10, %v2927_v56, %v2941_v32  ;;  %v2958_v11 = vsel %vm9024_vm12, %v2927_v56, %v2957_v35  ;;  %v2974_v6 = vsel %vm2916_vm0, %v2930_v37, %v2927_v56  ;;  %v2989_v38 = vsel %vm2916_vm0, %v2927_v56, %v2924_v15 }
 0x7d1   : > { %v2943_v9 = vsel %vm9024_vm12, %v2930_v37, %v2942_v4  ;;  %v2975_v13 = vsel %vm2919_vm15, %v2933_v34, %v2974_v6  ;;  %v2990_v14 = vsel %vm2919_vm15, %v2930_v37, %v2989_v38  ;;  %v3005_v42 = vsel %vm2919_vm15, %v2927_v56, %v3004_v43 }
 0x7d2   : > { %2944 = vrot.lane.b32.xlu0 %v2943_v9, %s9040_s19  ;;  %v2991_v61 = vsel %vm2922_vm2, %v2933_v34, %v2990_v14  ;;  %v3006_v24 = vsel %vm2922_vm2, %v2930_v37, %v3005_v42  ;;  %v3021_v27 = vsel %vm2922_vm2, %v2927_v56, %v3020_v49  ;;  %v3037_v30 = vsel %vm2925_vm9, %v2927_v56, %v3036_v2 }
 0x7d3   : > { %2962 = vrot.lane.b32.xlu1 %v2959_v36, %s5542_s25  ;;  %v3007_v1 = vsel %vm2925_vm9, %v2933_v34, %v3006_v24  ;;  %v3022_v18 = vsel %vm2925_vm9, %v2930_v37, %v3021_v27  ;;  %v3038_v39 = vsel %vm9027_vm11, %v2930_v37, %v3037_v30  ;;  %v2926_v47 = vsel %vm2925_vm9, %v2924_v15, %v2923_v29  ;;  %v3051_v29 = vld [vmem:[#allocation2 + $0xa8] sm:$0x3] }
 0x7d4   : > { %v3023_v51 = vsel %vm9027_vm11, %v2933_v34, %v3022_v18  ;;  %v3039_v53 = vsel %vm9025_vm10, %v2933_v34, %v3038_v39  ;;  %v2929_v57 = vsel %vm9027_vm11, %v2927_v56, %v2926_v47  ;;  %vm9030_vm11 = vcmask 518528   ;;  %v7695_v15 = vld [vmem:[#allocation2 + $0x128] sm:$0x3] }
 0x7d5   : > { %v2932_v59 = vsel %vm9025_vm10, %v2930_v37, %v2929_v57  ;;  %vm9028_vm10 = vcmask 386304  }
 0x7d6   : > { %2960 = vrot.lane.b32.xlu0 %v2958_v11, %s5542_s25  ;;  %v2935_v63 = vsel %vm9024_vm12, %v2933_v34, %v2932_v59  ;;  %vm9029_vm12 = vcmask 261249   ;;  %v7800_v59 = vld [vmem:[#allocation2 + $0x170] sm:$0xff] }
 0x7d7   : > { %2978 = vrot.lane.b32.xlu1 %v2975_v13, %s5546_s16  ;;  %2937 = vst.msk [vmem:[%s5985_s12] sm:$0xff] %vm9023_vm3, %v2935_v63  ;;  %vm9026_vm3 = vcmask 254080  }
 0x7da   : > { %2976 = vrot.lane.b32.xlu0 %v2973_v8, %s5546_s16 }
 0x7db   : > { %2994 = vrot.lane.b32.xlu1 %v2991_v61, %s9048_s1 }
 0x7de   : > { %2992 = vrot.lane.b32.xlu0 %v7480_v44, %s9048_s1  ;;  %v7558_v44 = vld [vmem:[#allocation2 + $0xb8] sm:$0x3] }
 0x7df   : > { %3010 = vrot.lane.b32.xlu1 %v3007_v1, %s5554_s21 }
 0x7e2   : > { %3008 = vrot.lane.b32.xlu0 %v7492_v17, %s5554_s21  ;;  %v7564_v17 = vld [vmem:[#allocation2 + $0xc8] sm:$0x3] }
 0x7e3   : > { %3026 = vrot.lane.b32.xlu1 %v3023_v51, %s9044_s30 }
 0x7e6   : > { %3024 = vrot.lane.b32.xlu0 %v7486_v46, %s9044_s30  ;;  %v7570_v46 = vld [vmem:[#allocation2 + $0xd8] sm:$0x3]  ;;  %s9071_s30 = smov 44  }
 0x7e7   : > { %3042 = vrot.lane.b32.xlu1 %v3039_v53, %s9038_s0  ;;  %v7792_v53 = vld [vmem:[#allocation2 + $0x150] sm:$0xff] }
 0x7ea   : > { %3040 = vrot.lane.b32.xlu0 %v7461_v50, %s9038_s0  ;;  %v7576_v50 = vld [vmem:[#allocation2 + $0xe8] sm:$0x3]  ;;  %s9068_s0 = smov 28  }
 0x7eb   : > { %3096 = vrot.lane.b32.xlu1 %v3051_v29, %s5535_s28 }
 0x7ee   : > { %3094 = vrot.lane.b32.xlu0 %v7417_v31, %s5535_s28 }
 0x7ef   : > { %3100 = vrot.lane.b32.xlu1 %v7558_v44, %s5535_s28 }
 0x7f2   : > { %3098 = vrot.lane.b32.xlu0 %v7421_v33, %s5535_s28 }
 0x7f3   : > { %3104 = vrot.lane.b32.xlu1 %v7564_v17, %s5535_s28 }
 0x7f6   : > { %3102 = vrot.lane.b32.xlu0 %v7425_v62, %s5535_s28 }
 0x7f7   : > { %3108 = vrot.lane.b32.xlu1 %v7570_v46, %s5535_s28 }
 0x7fa   : > { %3106 = vrot.lane.b32.xlu0 %v7429_v60, %s5535_s28 }
 0x7fb   : > { %3112 = vrot.lane.b32.xlu1 %v7576_v50, %s5535_s28 }
 0x7fe   : > { %3110 = vrot.lane.b32.xlu0 %v7433_v28, %s5535_s28 }
 0x7ff   : > { %3116 = vrot.lane.b32.xlu1 %v7582_v52, %s5535_s28 }
 0x802   : > { %3114 = vrot.lane.b32.xlu0 %v7437_v45, %s5535_s28 }
 0x803   : > { %3120 = vrot.lane.b32.xlu1 %v7588_v26, %s5535_s28 }
 0x806   : > { %3118 = vrot.lane.b32.xlu0 %v7441_v41, %s5535_s28 }
 0x807   : > { %3124 = vrot.lane.b32.xlu1 %v7594_v3, %s5535_s28 }
 0x80a   : > { %3122 = vrot.lane.b32.xlu0 %v7445_v48, %s5535_s28  ;;  %s9065_s28 = smov 12  }
 0x80b   : > { %3160 = vrot.lane.b32.xlu1 %v3051_v29, %s9037_s29  ;;  %v7807_v29 = vld [vmem:[#allocation2 + $0x160] sm:$0xff] }
 0x80e   : > { %3158 = vrot.lane.b32.xlu0 %v7417_v31, %s9037_s29  ;;  %v7643_v31 = vld [vmem:[#allocation2 + $0x120] sm:$0xff] }
 0x80f   : > { %3164 = vrot.lane.b32.xlu1 %v7558_v44, %s9037_s29 }
 0x812   : > { %3162 = vrot.lane.b32.xlu0 %v7421_v33, %s9037_s29 }
 0x813   : > { %3168 = vrot.lane.b32.xlu1 %v7564_v17, %s9037_s29 }
 0x816   : > { %3166 = vrot.lane.b32.xlu0 %v7425_v62, %s9037_s29 }
 0x817   : > { %3172 = vrot.lane.b32.xlu1 %v7570_v46, %s9037_s29 }
 0x81a   : > { %3170 = vrot.lane.b32.xlu0 %v7429_v60, %s9037_s29 }
 0x81b   : > { %3176 = vrot.lane.b32.xlu1 %v7576_v50, %s9037_s29 }
 0x81e   : > { %3174 = vrot.lane.b32.xlu0 %v7433_v28, %s9037_s29 }
 0x81f   : > { %3180 = vrot.lane.b32.xlu1 %v7582_v52, %s9037_s29 }
 0x822   : > { %3178 = vrot.lane.b32.xlu0 %v7437_v45, %s9037_s29 }
 0x823   : > { %3184 = vrot.lane.b32.xlu1 %v7588_v26, %s9037_s29 }
 0x826   : > { %3182 = vrot.lane.b32.xlu0 %v7441_v41, %s9037_s29 }
 0x827   : > { %3188 = vrot.lane.b32.xlu1 %v7594_v3, %s9037_s29 }
 0x82a   : > { %3186 = vrot.lane.b32.xlu0 %v7445_v48, %s9037_s29  ;;  %s9067_s29 = smov 24  }
 0x82b   : > { %3225 = vrot.lane.b32.xlu1 %v7425_v62, %s9065_s28 }
 0x82e   : > { %3223 = vrot.lane.b32.xlu0 %v7421_v33, %s9065_s28 }
 0x82f   : > { %3229 = vrot.lane.b32.xlu1 %v7433_v28, %s9065_s28 }
 0x832   : > { %3227 = vrot.lane.b32.xlu0 %v7429_v60, %s9065_s28 }
 0x833   : > { %3233 = vrot.lane.b32.xlu1 %v7441_v41, %s9065_s28 }
 0x836   : > { %3231 = vrot.lane.b32.xlu0 %v7437_v45, %s9065_s28 }
 0x837   : > { %3237 = vrot.lane.b32.xlu1 %v7643_v31, %s9065_s28 }
 0x83a   : > { %3235 = vrot.lane.b32.xlu0 %v7445_v48, %s9065_s28  ;;  %s9066_s28 = smov 20  }
 0x83b   : > { %3258 = vrot.lane.b32.xlu1 %v7558_v44, %s9040_s19 }
 0x83e   : > { %3256 = vrot.lane.b32.xlu0 %v7421_v33, %s9040_s19 }
 0x83f   : > { %3262 = vrot.lane.b32.xlu1 %v7564_v17, %s9040_s19 }
 0x841   : > { %v2947_v55 = vpop.permute.xlu1 %2946 }
 0x842   : > { %2953 = vst.msk [vmem:[%s5985_s12 + $0x7] sm:$0x1] %vm9026_vm3, %v2947_v55  ;;  %3260 = vrot.lane.b32.xlu0 %v7425_v62, %s9040_s19  ;;  %vm9031_vm3 = vcmask 392450   ;;  %v7814_v55 = vld [vmem:[#allocation2 + $0x158] sm:$0x3] }
 0x843   : > { %3266 = vrot.lane.b32.xlu1 %v7570_v46, %s9040_s19 }
 0x844   : > { %v2945_v5 = vpop.permute.xlu0 %2944 }
 0x845   : > { %2951 = vst.msk [vmem:[%s5985_s12 - $0x1] sm:$0xfe] %vm9029_vm12, %v2945_v5  ;;  %v2963_v25 = vpop.permute.xlu1 %2962  ;;  %vm9032_vm12 = vcmask 650752  }
 0x846   : > { %2969 = vst.msk [vmem:[%s5985_s12 + $0x6] sm:$0x3] %vm9028_vm10, %v2963_v25  ;;  %3264 = vrot.lane.b32.xlu0 %v7429_v60, %s9040_s19  ;;  %vm9033_vm10 = vcmask 523651  }
 0x847   : > { %3270 = vrot.lane.b32.xlu1 %v7576_v50, %s9040_s19 }
 0x848   : > { %v2961_v7 = vpop.permute.xlu0 %2960 }
 0x849   : > { %2967 = vst.msk [vmem:[%s5985_s12 - $0x2] sm:$0xfc] %vm9031_vm3, %v2961_v7  ;;  %v2979_v58 = vpop.permute.xlu1 %2978  ;;  %vm9034_vm3 = vcmask 782976   ;;  %v7821_v7 = vld [vmem:[#allocation2 + $0x168] sm:$0x3] }
 0x84a   : > { %2985 = vst.msk [vmem:[%s5985_s12 + $0x5] sm:$0x7] %vm9030_vm11, %v2979_v58  ;;  %3268 = vrot.lane.b32.xlu0 %v7433_v28, %s9040_s19  ;;  %vm9035_vm11 = vcmask 654852  }
 0x84b   : > { %3274 = vrot.lane.b32.xlu1 %v7582_v52, %s9040_s19 }
 0x84c   : > { %v2977_v0 = vpop.permute.xlu0 %2976 }
 0x84d   : > { %2983 = vst.msk [vmem:[%s5985_s12 - $0x3] sm:$0xf8] %vm9033_vm10, %v2977_v0  ;;  %v2995_v12 = vpop.permute.xlu1 %2994  ;;  %vm3032_vm10 = vcmask 915200  }
 0x84e   : > { %3001 = vst.msk [vmem:[%s5985_s12 + $0x4] sm:$0xf] %vm9032_vm12, %v2995_v12  ;;  %3272 = vrot.lane.b32.xlu0 %v7437_v45, %s9040_s19  ;;  %vm9036_vm12 = vcmask 786053   ;;  %v7829_v12 = vld [vmem:[#allocation2 + $0x178] sm:$0x3] }
 0x84f   : > { %3278 = vrot.lane.b32.xlu1 %v7588_v26, %s9040_s19 }
 0x850   : > { %v2993_v40 = vpop.permute.xlu0 %2992 }
 0x851   : > { %2999 = vst.msk [vmem:[%s5985_s12 - $0x4] sm:$0xf0] %vm9035_vm11, %v2993_v40  ;;  %v3011_v54 = vpop.permute.xlu1 %3010  ;;  %vm9051_vm11 = vcmask 1047424  }
 0x852   : > { %3017 = vst.msk [vmem:[%s5985_s12 + $0x3] sm:$0x1f] %vm9034_vm3, %v3011_v54  ;;  %3276 = vrot.lane.b32.xlu0 %v7441_v41, %s9040_s19  ;;  %vm9052_vm3 = vcmask 917254  }
 0x853   : > { %3282 = vrot.lane.b32.xlu1 %v7594_v3, %s9040_s19 }
 0x854   : > { %v3009_v19 = vpop.permute.xlu0 %3008 }
 0x855   : > { %3015 = vst.msk [vmem:[%s5985_s12 - $0x5] sm:$0xe0] %vm9036_vm12, %v3009_v19  ;;  %v3027_v16 = vpop.permute.xlu1 %3026  ;;  %vm9050_vm12 = vcmask 1048455  }
 0x856   : > { %3033 = vst.msk [vmem:[%s5985_s12 + $0x2] sm:$0x3f] %vm3032_vm10, %v3027_v16  ;;  %3280 = vrot.lane.b32.xlu0 %v7445_v48, %s9040_s19 }
 0x857   : > { %3286 = vrot.lane.b32.xlu1 %v7695_v15, %s9040_s19 }
 0x858   : > { %v3025_v37 = vpop.permute.xlu0 %3024 }
 0x859   : > { %3031 = vst.msk [vmem:[%s5985_s12 - $0x6] sm:$0xc0] %vm9052_vm3, %v3025_v37  ;;  %v3043_v34 = vpop.permute.xlu1 %3042 }
 0x85a   : > { %3049 = vst.msk [vmem:[%s5985_s12 + $0x1] sm:$0x7f] %vm9051_vm11, %v3043_v34  ;;  %3284 = vrot.lane.b32.xlu0 %v7643_v31, %s9040_s19  ;;  %s9069_s19 = smov 36  }
 0x85b   : > { %3322 = vrot.lane.b32.xlu1 %v7558_v44, %s9066_s28 }
 0x85c   : > { %v3041_v56 = vpop.permute.xlu0 %3040 }
 0x85d   : > { %3047 = vst.msk [vmem:[%s5985_s12 - $0x7] sm:$0x80] %vm9050_vm12, %v3041_v56  ;;  %v3097_v32 = vpop.permute.xlu1 %3096  ;;  %vm9328_vm12 = vcmask 884546  }
 0x85e   : > { %3320 = vrot.lane.b32.xlu0 %v7421_v33, %s9066_s28  ;;  %3143 = vst.msk [vmem:[#allocation3 + $0x7] sm:$0x1] %vm1135_vm5, %v3097_v32 }
 0x85f   : > { %3326 = vrot.lane.b32.xlu1 %v7564_v17, %s9066_s28 }
 0x860   : > { %v3095_v35 = vpop.permute.xlu0 %3094 }
 0x861   : > { %3142 = vst.msk [vmem:[#allocation3 - $0x1] sm:$0xfe] %vm1133_vm4, %v3095_v35  ;;  %v3101_v8 = vpop.permute.xlu1 %3100 }
 0x862   : > { %3324 = vrot.lane.b32.xlu0 %v7425_v62, %s9066_s28  ;;  %3145 = vst.msk [vmem:[#allocation3 + $0xf] sm:$0x1] %vm1135_vm5, %v3101_v8 }
 0x863   : > { %3330 = vrot.lane.b32.xlu1 %v7570_v46, %s9066_s28 }
 0x864   : > { %v3099_v36 = vpop.permute.xlu0 %3098 }
 0x865   : > { %3144 = vst.msk [vmem:[#allocation3 + $0x7] sm:$0xfe] %vm1133_vm4, %v3099_v36  ;;  %v3105_v33 = vpop.permute.xlu1 %3104 }
 0x866   : > { %3328 = vrot.lane.b32.xlu0 %v7429_v60, %s9066_s28  ;;  %3147 = vst.msk [vmem:[#allocation3 + $0x17] sm:$0x1] %vm1135_vm5, %v3105_v33 }
 0x867   : > { %3334 = vrot.lane.b32.xlu1 %v7576_v50, %s9066_s28 }
 0x868   : > { %v3103_v43 = vpop.permute.xlu0 %3102 }
 0x869   : > { %3146 = vst.msk [vmem:[#allocation3 + $0xf] sm:$0xfe] %vm1133_vm4, %v3103_v43  ;;  %v3109_v49 = vpop.permute.xlu1 %3108 }
 0x86a   : > { %3332 = vrot.lane.b32.xlu0 %v7433_v28, %s9066_s28  ;;  %3149 = vst.msk [vmem:[#allocation3 + $0x1f] sm:$0x1] %vm1135_vm5, %v3109_v49 }
 0x86b   : > { %3387 = vrot.lane.b32.xlu1 %v7429_v60, %s9067_s29 }
 0x86c   : > { %v3107_v2 = vpop.permute.xlu0 %3106 }
 0x86d   : > { %3148 = vst.msk [vmem:[#allocation3 + $0x17] sm:$0xfe] %vm1133_vm4, %v3107_v2  ;;  %v3113_v4 = vpop.permute.xlu1 %3112 }
 0x86e   : > { %3385 = vrot.lane.b32.xlu0 %v7425_v62, %s9067_s29  ;;  %3151 = vst.msk [vmem:[#allocation3 + $0x27] sm:$0x1] %vm1135_vm5, %v3113_v4 }
 0x86f   : > { %3391 = vrot.lane.b32.xlu1 %v7437_v45, %s9067_s29 }
 0x870   : > { %v3111_v11 = vpop.permute.xlu0 %3110 }
 0x871   : > { %3150 = vst.msk [vmem:[#allocation3 + $0x1f] sm:$0xfe] %vm1133_vm4, %v3111_v11  ;;  %v3117_v6 = vpop.permute.xlu1 %3116  ;;  %v7877_v11 = vld [vmem:[#allocation2 + $0x180] sm:$0xff] }
 0x872   : > { %3389 = vrot.lane.b32.xlu0 %v7433_v28, %s9067_s29  ;;  %3153 = vst.msk [vmem:[#allocation3 + $0x2f] sm:$0x1] %vm1135_vm5, %v3117_v6 }
 0x873   : > { %3420 = vrot.lane.b32.xlu1 %v7564_v17, %s9068_s0 }
 0x874   : > { %v3115_v38 = vpop.permute.xlu0 %3114 }
 0x875   : > { %3152 = vst.msk [vmem:[#allocation3 + $0x27] sm:$0xfe] %vm1133_vm4, %v3115_v38  ;;  %v3121_v9 = vpop.permute.xlu1 %3120 }
 0x876   : > { %3418 = vrot.lane.b32.xlu0 %v7425_v62, %s9068_s0  ;;  %3155 = vst.msk [vmem:[#allocation3 + $0x37] sm:$0x1] %vm1135_vm5, %v3121_v9 }
 0x877   : > { %3424 = vrot.lane.b32.xlu1 %v7570_v46, %s9068_s0 }
 0x878   : > { %v3119_v13 = vpop.permute.xlu0 %3118 }
 0x879   : > { %3154 = vst.msk [vmem:[#allocation3 + $0x2f] sm:$0xfe] %vm1133_vm4, %v3119_v13  ;;  %v3125_v14 = vpop.permute.xlu1 %3124 }
 0x87a   : > { %3422 = vrot.lane.b32.xlu0 %v7429_v60, %s9068_s0  ;;  %3157 = vst.msk [vmem:[#allocation3 + $0x3f] sm:$0x1] %vm1135_vm5, %v3125_v14  ;;  %vm9073_vm5 = vcmask 162945  }
 0x87b   : > { %3428 = vrot.lane.b32.xlu1 %v7576_v50, %s9068_s0 }
 0x87c   : > { %v3123_v42 = vpop.permute.xlu0 %3122 }
 0x87d   : > { %3156 = vst.msk [vmem:[#allocation3 + $0x37] sm:$0xfe] %vm1133_vm4, %v3123_v42  ;;  %v3161_v61 = vpop.permute.xlu1 %3160  ;;  %vm9072_vm4 = vcmask 155776  }
 0x87e   : > { %3426 = vrot.lane.b32.xlu0 %v7433_v28, %s9068_s0  ;;  %3207 = vst.msk [vmem:[#allocation3 + $0x6] sm:$0x3] %vm1201_vm6, %v3161_v61 }
 0x87f   : > { %3432 = vrot.lane.b32.xlu1 %v7582_v52, %s9068_s0 }
 0x880   : > { %v3159_v24 = vpop.permute.xlu0 %3158 }
 0x881   : > { %3206 = vst.msk [vmem:[#allocation3 - $0x2] sm:$0xfc] %vm1199_vm7, %v3159_v24  ;;  %v3165_v27 = vpop.permute.xlu1 %3164 }
 0x882   : > { %3430 = vrot.lane.b32.xlu0 %v7437_v45, %s9068_s0  ;;  %3209 = vst.msk [vmem:[#allocation3 + $0xe] sm:$0x3] %vm1201_vm6, %v3165_v27 }
 0x883   : > { %3484 = vrot.lane.b32.xlu1 %v7564_v17, %s5542_s25  ;;  %v3547_v17 = vld [vmem:[#allocation2 + $0x148] sm:$0x3] }
 0x884   : > { %v3163_v30 = vpop.permute.xlu0 %3162 }
 0x885   : > { %3208 = vst.msk [vmem:[#allocation3 + $0x6] sm:$0xfc] %vm1199_vm7, %v3163_v30  ;;  %v3169_v1 = vpop.permute.xlu1 %3168 }
 0x886   : > { %3482 = vrot.lane.b32.xlu0 %v7425_v62, %s5542_s25  ;;  %3211 = vst.msk [vmem:[#allocation3 + $0x16] sm:$0x3] %vm1201_vm6, %v3169_v1 }
 0x887   : > { %3488 = vrot.lane.b32.xlu1 %v7570_v46, %s5542_s25 }
 0x888   : > { %v3167_v18 = vpop.permute.xlu0 %3166 }
 0x889   : > { %3210 = vst.msk [vmem:[#allocation3 + $0xe] sm:$0xfc] %vm1199_vm7, %v3167_v18  ;;  %v3173_v39 = vpop.permute.xlu1 %3172 }
 0x88a   : > { %3486 = vrot.lane.b32.xlu0 %v7429_v60, %s5542_s25  ;;  %3213 = vst.msk [vmem:[#allocation3 + $0x1e] sm:$0x3] %vm1201_vm6, %v3173_v39  ;;  %v7921_v39 = vld [vmem:[#allocation2 + $0x188] sm:$0x3] }
 0x88b   : > { %3492 = vrot.lane.b32.xlu1 %v7576_v50, %s5542_s25 }
 0x88c   : > { %v3171_v47 = vpop.permute.xlu0 %3170 }
 0x88d   : > { %3212 = vst.msk [vmem:[#allocation3 + $0x16] sm:$0xfc] %vm1199_vm7, %v3171_v47  ;;  %v3177_v62 = vpop.permute.xlu1 %3176 }
 0x88e   : > { %3490 = vrot.lane.b32.xlu0 %v7433_v28, %s5542_s25  ;;  %3215 = vst.msk [vmem:[#allocation3 + $0x26] sm:$0x3] %vm1201_vm6, %v3177_v62  ;;  %v3546_v28 = vld [vmem:[#allocation2 + $0x140] sm:$0xff] }
 0x88f   : > { %3496 = vrot.lane.b32.xlu1 %v7582_v52, %s5542_s25 }
 0x890   : > { %v3175_v51 = vpop.permute.xlu0 %3174 }
 0x891   : > { %3214 = vst.msk [vmem:[#allocation3 + $0x1e] sm:$0xfc] %vm1199_vm7, %v3175_v51  ;;  %v3181_v60 = vpop.permute.xlu1 %3180 }
 0x892   : > { %3494 = vrot.lane.b32.xlu0 %v7437_v45, %s5542_s25  ;;  %3217 = vst.msk [vmem:[#allocation3 + $0x2e] sm:$0x3] %vm1201_vm6, %v3181_v60 }
 0x893   : > { %3576 = vrot.lane.b32.xlu1 %v7792_v53, %s9069_s19 }
 0x894   : > { %v3179_v57 = vpop.permute.xlu0 %3178 }
 0x895   : > { %3216 = vst.msk [vmem:[#allocation3 + $0x26] sm:$0xfc] %vm1199_vm7, %v3179_v57  ;;  %v3185_v63 = vpop.permute.xlu1 %3184 }
 0x896   : > { %3574 = vrot.lane.b32.xlu0 %v3546_v28, %s9069_s19  ;;  %3219 = vst.msk [vmem:[#allocation3 + $0x36] sm:$0x3] %vm1201_vm6, %v3185_v63  ;;  %v7941_v63 = vld [vmem:[#allocation2 + $0x130] sm:$0xff] }
 0x897   : > { %3580 = vrot.lane.b32.xlu1 %v7800_v59, %s9069_s19 }
 0x898   : > { %v3183_v44 = vpop.permute.xlu0 %3182 }
 0x899   : > { %3218 = vst.msk [vmem:[#allocation3 + $0x2e] sm:$0xfc] %vm1199_vm7, %v3183_v44  ;;  %v3189_v46 = vpop.permute.xlu1 %3188 }
 0x89a   : > { %3578 = vrot.lane.b32.xlu0 %v7807_v29, %s9069_s19  ;;  %3221 = vst.msk [vmem:[#allocation3 + $0x3e] sm:$0x3] %vm1201_vm6, %v3189_v46  ;;  %vm9074_vm6 = vmmov %vm9072_vm4 }
 0x89b   : > { %3616 = vrot.lane.b32.xlu1 %v3547_v17, %s9070_s18 }
 0x89c   : > { %v3187_v50 = vpop.permute.xlu0 %3186 }
 0x89d   : > { %3220 = vst.msk [vmem:[#allocation3 + $0x36] sm:$0xfc] %vm1199_vm7, %v3187_v50  ;;  %v3226_v5 = vpop.permute.xlu1 %3225  ;;  %vm9075_vm7 = vmmov %vm9073_vm5 }
 0x89e   : > { %3614 = vrot.lane.b32.xlu0 %v3546_v28, %s9070_s18  ;;  %3248 = vst.msk [vmem:[#allocation3 + $0x8] sm:$0xff] %vm1242_vm8, %v3226_v5 }
 0x89f   : > { %3620 = vrot.lane.b32.xlu1 %v7814_v55, %s9070_s18 }
 0x8a0   : > { %v3224_v25 = vpop.permute.xlu0 %3223 }
 0x8a1   : > { %3247 = vst.msk [vmem:[#allocation3] sm:$0xff] %vm1242_vm8, %v3224_v25  ;;  %v3230_v58 = vpop.permute.xlu1 %3229 }
 0x8a2   : > { %3618 = vrot.lane.b32.xlu0 %v7792_v53, %s9070_s18  ;;  %3250 = vst.msk [vmem:[#allocation3 + $0x18] sm:$0xff] %vm1242_vm8, %v3230_v58 }
 0x8a3   : > { %3624 = vrot.lane.b32.xlu1 %v7821_v7, %s9070_s18 }
 0x8a4   : > { %v3228_v0 = vpop.permute.xlu0 %3227 }
 0x8a5   : > { %3249 = vst.msk [vmem:[#allocation3 + $0x10] sm:$0xff] %vm1242_vm8, %v3228_v0  ;;  %v3234_v40 = vpop.permute.xlu1 %3233 }
 0x8a6   : > { %3622 = vrot.lane.b32.xlu0 %v7807_v29, %s9070_s18  ;;  %3252 = vst.msk [vmem:[#allocation3 + $0x28] sm:$0xff] %vm1242_vm8, %v3234_v40 }
 0x8a7   : > { %3628 = vrot.lane.b32.xlu1 %v7829_v12, %s9070_s18 }
 0x8a8   : > { %v3232_v54 = vpop.permute.xlu0 %3231 }
 0x8a9   : > { %3251 = vst.msk [vmem:[#allocation3 + $0x20] sm:$0xff] %vm1242_vm8, %v3232_v54  ;;  %v3238_v19 = vpop.permute.xlu1 %3237 }
 0x8aa   : > { %3626 = vrot.lane.b32.xlu0 %v7800_v59, %s9070_s18  ;;  %3254 = vst.msk [vmem:[#allocation3 + $0x38] sm:$0xff] %vm1242_vm8, %v3238_v19 }
 0x8ab   : > { %3680 = vrot.lane.b32.xlu1 %v3547_v17, %s9071_s30 }
 0x8ac   : > { %v3236_v16 = vpop.permute.xlu0 %3235 }
 0x8ad   : > { %3253 = vst.msk [vmem:[#allocation3 + $0x30] sm:$0xff] %vm1242_vm8, %v3236_v16  ;;  %v3259_v37 = vpop.permute.xlu1 %3258  ;;  %vm9076_vm8 = vmmov %vm9072_vm4 }
 0x8ae   : > { %3678 = vrot.lane.b32.xlu0 %v3546_v28, %s9071_s30  ;;  %3305 = vst.msk [vmem:[#allocation3 + $0x7] sm:$0x1] %vm9072_vm4, %v3259_v37  ;;  %vm9077_vm4 = vmmov %vm9073_vm5  ;;  %v3069_v37 = vld [vmem:[#allocation2 + $0x138] sm:$0x3] }
 0x8af   : > { %3684 = vrot.lane.b32.xlu1 %v7814_v55, %s9071_s30 }
 0x8b0   : > { %v3257_v34 = vpop.permute.xlu0 %3256 }
 0x8b1   : > { %3304 = vst.msk [vmem:[#allocation3 - $0x1] sm:$0xfe] %vm9073_vm5, %v3257_v34  ;;  %v3263_v56 = vpop.permute.xlu1 %3262  ;;  %vm9078_vm5 = vmmov %vm9074_vm6 }
 0x8b2   : > { %3682 = vrot.lane.b32.xlu0 %v7792_v53, %s9071_s30  ;;  %3307 = vst.msk [vmem:[#allocation3 + $0xf] sm:$0x1] %vm9074_vm6, %v3263_v56  ;;  %vm9079_vm6 = vmmov %vm9077_vm4 }
 0x8b3   : > { %3688 = vrot.lane.b32.xlu1 %v7821_v7, %s9071_s30 }
 0x8b4   : > { %v3261_v32 = vpop.permute.xlu0 %3260 }
 0x8b5   : > { %3306 = vst.msk [vmem:[#allocation3 + $0x7] sm:$0xfe] %vm9075_vm7, %v3261_v32  ;;  %v3267_v35 = vpop.permute.xlu1 %3266  ;;  %vm9080_vm7 = vmmov %vm9078_vm5 }
 0x8b6   : > { %3686 = vrot.lane.b32.xlu0 %v7807_v29, %s9071_s30  ;;  %3309 = vst.msk [vmem:[#allocation3 + $0x17] sm:$0x1] %vm9076_vm8, %v3267_v35  ;;  %vm9081_vm8 = vmmov %vm9077_vm4 }
 0x8b7   : > { %3692 = vrot.lane.b32.xlu1 %v7829_v12, %s9071_s30 }
 0x8b8   : > { %v3265_v8 = vpop.permute.xlu0 %3264 }
 0x8b9   : > { %3308 = vst.msk [vmem:[#allocation3 + $0xf] sm:$0xfe] %vm9077_vm4, %v3265_v8  ;;  %v3271_v36 = vpop.permute.xlu1 %3270  ;;  %vm9082_vm4 = vmmov %vm9078_vm5 }
 0x8ba   : > { %3690 = vrot.lane.b32.xlu0 %v7800_v59, %s9071_s30  ;;  %3311 = vst.msk [vmem:[#allocation3 + $0x1f] sm:$0x1] %vm9078_vm5, %v3271_v36  ;;  %vm9083_vm5 = vmmov %vm9079_vm6 }
 0x8bb   : > { %3745 = vrot.lane.b32.xlu1 %v7807_v29, %s5546_s16 }
 0x8bc   : > { %v3269_v33 = vpop.permute.xlu0 %3268 }
 0x8bd   : > { %3310 = vst.msk [vmem:[#allocation3 + $0x17] sm:$0xfe] %vm9079_vm6, %v3269_v33  ;;  %v3275_v43 = vpop.permute.xlu1 %3274  ;;  %vm9084_vm6 = vmmov %vm9082_vm4  ;;  %v8002_v33 = vld [vmem:[#allocation2 + $0x190] sm:$0xff] }
 0x8be   : > { %3743 = vrot.lane.b32.xlu0 %v7792_v53, %s5546_s16  ;;  %3313 = vst.msk [vmem:[#allocation3 + $0x27] sm:$0x1] %vm9080_vm7, %v3275_v43  ;;  %vm9085_vm7 = vmmov %vm9083_vm5 }
 0x8bf   : > { %3338 = vrot.lane.b32.xlu1 %v7582_v52, %s9066_s28 }
 0x8c0   : > { %v3273_v49 = vpop.permute.xlu0 %3272 }
 0x8c1   : > { %3312 = vst.msk [vmem:[#allocation3 + $0x1f] sm:$0xfe] %vm9081_vm8, %v3273_v49  ;;  %v3279_v2 = vpop.permute.xlu1 %3278  ;;  %vm9086_vm8 = vmmov %vm9082_vm4 }
 0x8c2   : > { %3336 = vrot.lane.b32.xlu0 %v7437_v45, %s9066_s28  ;;  %3315 = vst.msk [vmem:[#allocation3 + $0x2f] sm:$0x1] %vm9082_vm4, %v3279_v2  ;;  %vm9088_vm4 = vmmov %vm9083_vm5 }
 0x8c3   : > { %3342 = vrot.lane.b32.xlu1 %v7588_v26, %s9066_s28 }
 0x8c4   : > { %v3277_v4 = vpop.permute.xlu0 %3276 }
 0x8c5   : > { %3314 = vst.msk [vmem:[#allocation3 + $0x27] sm:$0xfe] %vm9083_vm5, %v3277_v4  ;;  %v3283_v6 = vpop.permute.xlu1 %3282  ;;  %vm9089_vm5 = vcmask 189600  }
 0x8c6   : > { %3340 = vrot.lane.b32.xlu0 %v7441_v41, %s9066_s28  ;;  %3317 = vst.msk [vmem:[#allocation3 + $0x37] sm:$0x1] %vm9084_vm6, %v3283_v6  ;;  %vm9090_vm6 = vcmask 195746  }
 0x8c7   : > { %3749 = vrot.lane.b32.xlu1 %v7877_v11, %s5546_s16 }
 0x8c8   : > { %v3281_v45 = vpop.permute.xlu0 %3280 }
 0x8c9   : > { %3316 = vst.msk [vmem:[#allocation3 + $0x2f] sm:$0xfe] %vm9085_vm7, %v3281_v45  ;;  %v3287_v52 = vpop.permute.xlu1 %3286  ;;  %vm9091_vm7 = vmmov %vm9089_vm5 }
 0x8ca   : > { %3747 = vrot.lane.b32.xlu0 %v7800_v59, %s5546_s16  ;;  %3319 = vst.msk [vmem:[#allocation3 + $0x3f] sm:$0x1] %vm9086_vm8, %v3287_v52  ;;  %vm9092_vm8 = vmmov %vm9090_vm6 }
 0x8cb   : > { %3778 = vrot.lane.b32.xlu1 %v7814_v55, %s9087_s23 }
 0x8cc   : > { %v3285_v38 = vpop.permute.xlu0 %3284 }
 0x8cd   : > { %3318 = vst.msk [vmem:[#allocation3 + $0x37] sm:$0xfe] %vm9088_vm4, %v3285_v38  ;;  %v3323_v9 = vpop.permute.xlu1 %3322  ;;  %vm9093_vm4 = vmmov %vm9089_vm5 }
 0x8ce   : > { %3776 = vrot.lane.b32.xlu0 %v7792_v53, %s9087_s23  ;;  %3369 = vst.msk [vmem:[#allocation3 + $0x6] sm:$0x3] %vm9089_vm5, %v3323_v9  ;;  %vm9094_vm5 = vmmov %vm9090_vm6  ;;  %v8045_v9 = vld [vmem:[#allocation2 + $0x198] sm:$0x3] }
 0x8cf   : > { %3782 = vrot.lane.b32.xlu1 %v7821_v7, %s9087_s23 }
 0x8d0   : > { %v3321_v13 = vpop.permute.xlu0 %3320 }
 0x8d1   : > { %3368 = vst.msk [vmem:[#allocation3 - $0x2] sm:$0xfc] %vm9090_vm6, %v3321_v13  ;;  %v3327_v14 = vpop.permute.xlu1 %3326  ;;  %vm9095_vm6 = vmmov %vm9093_vm4 }
 0x8d2   : > { %3780 = vrot.lane.b32.xlu0 %v7807_v29, %s9087_s23  ;;  %3371 = vst.msk [vmem:[#allocation3 + $0xe] sm:$0x3] %vm9091_vm7, %v3327_v14  ;;  %vm9096_vm7 = vmmov %vm9094_vm5 }
 0x8d3   : > { %3346 = vrot.lane.b32.xlu1 %v7594_v3, %s9066_s28 }
 0x8d4   : > { %v3325_v42 = vpop.permute.xlu0 %3324 }
 0x8d5   : > { %3370 = vst.msk [vmem:[#allocation3 + $0x6] sm:$0xfc] %vm9092_vm8, %v3325_v42  ;;  %v3331_v61 = vpop.permute.xlu1 %3330  ;;  %vm9097_vm8 = vcmask 228544  }
 0x8d6   : > { %3344 = vrot.lane.b32.xlu0 %v7445_v48, %s9066_s28  ;;  %3373 = vst.msk [vmem:[#allocation3 + $0x16] sm:$0x3] %vm9093_vm4, %v3331_v61  ;;  %vm9098_vm4 = vmmov %vm9097_vm8 }
 0x8d7   : > { %3350 = vrot.lane.b32.xlu1 %v7695_v15, %s9066_s28 }
 0x8d8   : > { %v3329_v24 = vpop.permute.xlu0 %3328 }
 0x8d9   : > { %3372 = vst.msk [vmem:[#allocation3 + $0xe] sm:$0xfc] %vm9094_vm5, %v3329_v24  ;;  %v3335_v27 = vpop.permute.xlu1 %3334  ;;  %vm9099_vm5 = vmmov %vm9098_vm4 }
 0x8da   : > { %3348 = vrot.lane.b32.xlu0 %v7643_v31, %s9066_s28  ;;  %3375 = vst.msk [vmem:[#allocation3 + $0x1e] sm:$0x3] %vm9095_vm6, %v3335_v27  ;;  %vm9100_vm6 = vmmov %vm9098_vm4  ;;  %s9102_s28 = smov 56  }
 0x8db   : > { %3395 = vrot.lane.b32.xlu1 %v7445_v48, %s9067_s29 }
 0x8dc   : > { %v3333_v30 = vpop.permute.xlu0 %3332 }
 0x8dd   : > { %3374 = vst.msk [vmem:[#allocation3 + $0x16] sm:$0xfc] %vm9096_vm7, %v3333_v30  ;;  %v3388_v1 = vpop.permute.xlu1 %3387  ;;  %vm9101_vm7 = vcmask 254176   ;;  %v8065_v30 = vld [vmem:[#allocation2 + $0x1b0] sm:$0xff] }
 0x8de   : > { %3393 = vrot.lane.b32.xlu0 %v7441_v41, %s9067_s29  ;;  %3410 = vst.msk [vmem:[#allocation3 + $0x8] sm:$0xff] %vm9097_vm8, %v3388_v1  ;;  %vm9103_vm8 = vcmask 261345  }
 0x8df   : > { %3786 = vrot.lane.b32.xlu1 %v7829_v12, %s9087_s23 }
 0x8e0   : > { %v3386_v18 = vpop.permute.xlu0 %3385 }
 0x8e1   : > { %3409 = vst.msk [vmem:[#allocation3] sm:$0xff] %vm9098_vm4, %v3386_v18  ;;  %v3392_v47 = vpop.permute.xlu1 %3391  ;;  %vm9104_vm4 = vmmov %vm9101_vm7 }
 0x8e2   : > { %3784 = vrot.lane.b32.xlu0 %v7800_v59, %s9087_s23  ;;  %3412 = vst.msk [vmem:[#allocation3 + $0x18] sm:$0xff] %vm9099_vm5, %v3392_v47  ;;  %vm9105_vm5 = vmmov %vm9103_vm8 }
 0x8e3   : > { %3790 = vrot.lane.b32.xlu1 %v7921_v39, %s9087_s23 }
 0x8e4   : > { %v3390_v62 = vpop.permute.xlu0 %3389 }
 0x8e5   : > { %3411 = vst.msk [vmem:[#allocation3 + $0x10] sm:$0xff] %vm9100_vm6, %v3390_v62  ;;  %v3421_v51 = vpop.permute.xlu1 %3420  ;;  %vm9106_vm6 = vmmov %vm9104_vm4 }
 0x8e6   : > { %3788 = vrot.lane.b32.xlu0 %v7877_v11, %s9087_s23  ;;  %3467 = vst.msk [vmem:[#allocation3 + $0x7] sm:$0x1] %vm9101_vm7, %v3421_v51  ;;  %vm9107_vm7 = vmmov %vm9105_vm5 }
 0x8e7   : > { %3842 = vrot.lane.b32.xlu1 %v7814_v55, %s9102_s28 }
 0x8e8   : > { %v3419_v60 = vpop.permute.xlu0 %3418 }
 0x8e9   : > { %3466 = vst.msk [vmem:[#allocation3 - $0x1] sm:$0xfe] %vm9103_vm8, %v3419_v60  ;;  %v3425_v28 = vpop.permute.xlu1 %3424  ;;  %vm9108_vm8 = vmmov %vm9104_vm4 }
 0x8ea   : > { %3840 = vrot.lane.b32.xlu0 %v7792_v53, %s9102_s28  ;;  %3469 = vst.msk [vmem:[#allocation3 + $0xf] sm:$0x1] %vm9104_vm4, %v3425_v28  ;;  %vm9109_vm4 = vmmov %vm9105_vm5 }
 0x8eb   : > { %3846 = vrot.lane.b32.xlu1 %v7821_v7, %s9102_s28 }
 0x8ec   : > { %v3423_v57 = vpop.permute.xlu0 %3422 }
 0x8ed   : > { %3468 = vst.msk [vmem:[#allocation3 + $0x7] sm:$0xfe] %vm9105_vm5, %v3423_v57  ;;  %v3429_v44 = vpop.permute.xlu1 %3428  ;;  %vm9110_vm5 = vcmask 288000   ;;  %v8099_v57 = vld [vmem:[#allocation2 + $0x1f0] sm:$0xff] }
 0x8ee   : > { %3844 = vrot.lane.b32.xlu0 %v7807_v29, %s9102_s28  ;;  %3471 = vst.msk [vmem:[#allocation3 + $0x17] sm:$0x1] %vm9106_vm6, %v3429_v44  ;;  %vm9111_vm6 = vcmask 294146   ;;  %v8107_v44 = vld [vmem:[#allocation2 + $0x1e0] sm:$0xff] }
 0x8ef   : > { %3399 = vrot.lane.b32.xlu1 %v7941_v63, %s9067_s29 }
 0x8f0   : > { %v3427_v53 = vpop.permute.xlu0 %3426 }
 0x8f1   : > { %3470 = vst.msk [vmem:[#allocation3 + $0xf] sm:$0xfe] %vm9107_vm7, %v3427_v53  ;;  %v3433_v17 = vpop.permute.xlu1 %3432  ;;  %vm9112_vm7 = vmmov %vm9110_vm5 }
 0x8f2   : > { %3397 = vrot.lane.b32.xlu0 %v7643_v31, %s9067_s29  ;;  %3473 = vst.msk [vmem:[#allocation3 + $0x1f] sm:$0x1] %vm9108_vm8, %v3433_v17  ;;  %vm9113_vm8 = vmmov %vm9111_vm6  ;;  %s9117_s29 = smov 60   ;;  %v8109_v17 = vld [vmem:[#allocation2 + $0x1a8] sm:$0x3] }
 0x8f3   : > { %3436 = vrot.lane.b32.xlu1 %v7588_v26, %s9068_s0 }
 0x8f4   : > { %v3431_v46 = vpop.permute.xlu0 %3430 }
 0x8f5   : > { %3472 = vst.msk [vmem:[#allocation3 + $0x17] sm:$0xfe] %vm9109_vm4, %v3431_v46  ;;  %v3485_v50 = vpop.permute.xlu1 %3484  ;;  %vm9114_vm4 = vmmov %vm9110_vm5 }
 0x8f6   : > { %3434 = vrot.lane.b32.xlu0 %v7441_v41, %s9068_s0  ;;  %3531 = vst.msk [vmem:[#allocation3 + $0x6] sm:$0x3] %vm9110_vm5, %v3485_v50  ;;  %vm9115_vm5 = vmmov %vm9111_vm6 }
 0x8f7   : > { %3440 = vrot.lane.b32.xlu1 %v7594_v3, %s9068_s0 }
 0x8f8   : > { %v3483_v55 = vpop.permute.xlu0 %3482 }
 0x8f9   : > { %3530 = vst.msk [vmem:[#allocation3 - $0x2] sm:$0xfc] %vm9111_vm6, %v3483_v55  ;;  %v3489_v5 = vpop.permute.xlu1 %3488  ;;  %vm9116_vm6 = vmmov %vm9114_vm4  ;;  %v8117_v55 = vld [vmem:[#allocation2 + $0x1b8] sm:$0x3] }
 0x8fa   : > { %3438 = vrot.lane.b32.xlu0 %v7445_v48, %s9068_s0  ;;  %3533 = vst.msk [vmem:[#allocation3 + $0xe] sm:$0x3] %vm9112_vm7, %v3489_v5  ;;  %vm9118_vm7 = vmmov %vm9115_vm5 }
 0x8fb   : > { %3850 = vrot.lane.b32.xlu1 %v7829_v12, %s9102_s28 }
 0x8fc   : > { %v3487_v25 = vpop.permute.xlu0 %3486 }
 0x8fd   : > { %3532 = vst.msk [vmem:[#allocation3 + $0x6] sm:$0xfc] %vm9113_vm8, %v3487_v25  ;;  %v3493_v58 = vpop.permute.xlu1 %3492  ;;  %vm9119_vm8 = vcmask 326944  }
 0x8fe   : > { %3848 = vrot.lane.b32.xlu0 %v7800_v59, %s9102_s28  ;;  %3535 = vst.msk [vmem:[#allocation3 + $0x16] sm:$0x3] %vm9114_vm4, %v3493_v58  ;;  %vm9120_vm4 = vmmov %vm9119_vm8 }
 0x8ff   : > { %3854 = vrot.lane.b32.xlu1 %v7921_v39, %s9102_s28 }
 0x900   : > { %v3491_v0 = vpop.permute.xlu0 %3490 }
 0x901   : > { %3534 = vst.msk [vmem:[#allocation3 + $0xe] sm:$0xfc] %vm9115_vm5, %v3491_v0  ;;  %v3497_v40 = vpop.permute.xlu1 %3496  ;;  %vm9121_vm5 = vmmov %vm9120_vm4 }
 0x902   : > { %3852 = vrot.lane.b32.xlu0 %v7877_v11, %s9102_s28  ;;  %3537 = vst.msk [vmem:[#allocation3 + $0x1e] sm:$0x3] %vm9116_vm6, %v3497_v40  ;;  %vm9122_vm6 = vmmov %vm9120_vm4 }
 0x903   : > { %3907 = vrot.lane.b32.xlu1 %v7800_v59, %s9117_s29 }
 0x904   : > { %v3495_v54 = vpop.permute.xlu0 %3494 }
 0x905   : > { %3536 = vst.msk [vmem:[#allocation3 + $0x16] sm:$0xfc] %vm9118_vm7, %v3495_v54  ;;  %v3577_v19 = vpop.permute.xlu1 %3576  ;;  %vm9123_vm7 = vcmask 352576  }
 0x906   : > { %3905 = vrot.lane.b32.xlu0 %v7807_v29, %s9117_s29  ;;  %3599 = vst.msk [vmem:[#allocation3 + $0x8] sm:$0xff] %vm9119_vm8, %v3577_v19  ;;  %vm9124_vm8 = vcmask 359745   ;;  %v8137_v19 = vld [vmem:[#allocation2 + $0x210] sm:$0xff] }
 0x907   : > { %3444 = vrot.lane.b32.xlu1 %v7695_v15, %s9068_s0 }
 0x908   : > { %v3575_v16 = vpop.permute.xlu0 %3574 }
 0x909   : > { %3598 = vst.msk [vmem:[#allocation3] sm:$0xff] %vm9120_vm4, %v3575_v16  ;;  %v3581_v34 = vpop.permute.xlu1 %3580  ;;  %vm9125_vm4 = vmmov %vm9123_vm7 }
 0x90a   : > { %3442 = vrot.lane.b32.xlu0 %v7643_v31, %s9068_s0  ;;  %3601 = vst.msk [vmem:[#allocation3 + $0x18] sm:$0xff] %vm9121_vm5, %v3581_v34  ;;  %vm9126_vm5 = vmmov %vm9124_vm8 }
 0x90b   : > { %3448 = vrot.lane.b32.xlu1 %v3069_v37, %s9068_s0 }
 0x90c   : > { %v3579_v56 = vpop.permute.xlu0 %3578 }
 0x90d   : > { %3600 = vst.msk [vmem:[#allocation3 + $0x10] sm:$0xff] %vm9122_vm6, %v3579_v56  ;;  %v3617_v32 = vpop.permute.xlu1 %3616  ;;  %vm9127_vm6 = vmmov %vm9125_vm4 }
 0x90e   : > { %3446 = vrot.lane.b32.xlu0 %v7941_v63, %s9068_s0  ;;  %3663 = vst.msk [vmem:[#allocation3 + $0x7] sm:$0x1] %vm9123_vm7, %v3617_v32  ;;  %vm9128_vm7 = vmmov %vm9126_vm5  ;;  %s9144_s0 = smov 68   ;;  %v8152_v32 = vld [vmem:[#allocation2 + $0x1f8] sm:$0x3] }
 0x90f   : > { %3500 = vrot.lane.b32.xlu1 %v7588_v26, %s5542_s25 }
 0x910   : > { %v3615_v35 = vpop.permute.xlu0 %3614 }
 0x911   : > { %3662 = vst.msk [vmem:[#allocation3 - $0x1] sm:$0xfe] %vm9124_vm8, %v3615_v35  ;;  %v3621_v8 = vpop.permute.xlu1 %3620  ;;  %vm9129_vm8 = vmmov %vm9125_vm4 }
 0x912   : > { %3498 = vrot.lane.b32.xlu0 %v7441_v41, %s5542_s25  ;;  %3665 = vst.msk [vmem:[#allocation3 + $0xf] sm:$0x1] %vm9125_vm4, %v3621_v8  ;;  %vm9130_vm4 = vmmov %vm9126_vm5 }
 0x913   : > { %3504 = vrot.lane.b32.xlu1 %v7594_v3, %s5542_s25 }
 0x914   : > { %v3619_v36 = vpop.permute.xlu0 %3618 }
 0x915   : > { %3664 = vst.msk [vmem:[#allocation3 + $0x7] sm:$0xfe] %vm9126_vm5, %v3619_v36  ;;  %v3625_v43 = vpop.permute.xlu1 %3624  ;;  %vm9131_vm5 = vcmask 386400  }
 0x916   : > { %3502 = vrot.lane.b32.xlu0 %v7445_v48, %s5542_s25  ;;  %3667 = vst.msk [vmem:[#allocation3 + $0x17] sm:$0x1] %vm9127_vm6, %v3625_v43  ;;  %vm9132_vm6 = vcmask 392546  }
 0x917   : > { %3911 = vrot.lane.b32.xlu1 %v8002_v33, %s9117_s29 }
 0x918   : > { %v3623_v41 = vpop.permute.xlu0 %3622 }
 0x919   : > { %3666 = vst.msk [vmem:[#allocation3 + $0xf] sm:$0xfe] %vm9128_vm7, %v3623_v41  ;;  %v3629_v26 = vpop.permute.xlu1 %3628  ;;  %vm9133_vm7 = vmmov %vm9131_vm5 }
 0x91a   : > { %3909 = vrot.lane.b32.xlu0 %v7877_v11, %s9117_s29  ;;  %3669 = vst.msk [vmem:[#allocation3 + $0x1f] sm:$0x1] %vm9129_vm8, %v3629_v26  ;;  %vm9134_vm8 = vmmov %vm9132_vm6 }
 0x91b   : > { %3940 = vrot.lane.b32.xlu1 %v7821_v7, %s9048_s1 }
 0x91c   : > { %v3627_v3 = vpop.permute.xlu0 %3626 }
 0x91d   : > { %3668 = vst.msk [vmem:[#allocation3 + $0x17] sm:$0xfe] %vm9130_vm4, %v3627_v3  ;;  %v3681_v48 = vpop.permute.xlu1 %3680  ;;  %vm9135_vm4 = vmmov %vm9131_vm5 }
 0x91e   : > { %3938 = vrot.lane.b32.xlu0 %v7807_v29, %s9048_s1  ;;  %3727 = vst.msk [vmem:[#allocation3 + $0x6] sm:$0x3] %vm9131_vm5, %v3681_v48  ;;  %vm9136_vm5 = vmmov %vm9132_vm6 }
 0x91f   : > { %3944 = vrot.lane.b32.xlu1 %v7829_v12, %s9048_s1 }
 0x920   : > { %v3679_v49 = vpop.permute.xlu0 %3678 }
 0x921   : > { %3726 = vst.msk [vmem:[#allocation3 - $0x2] sm:$0xfc] %vm9132_vm6, %v3679_v49  ;;  %v3685_v2 = vpop.permute.xlu1 %3684  ;;  %vm9137_vm6 = vmmov %vm9135_vm4  ;;  %v8178_v49 = vld [vmem:[#allocation2 + $0x208] sm:$0x3] }
 0x922   : > { %3942 = vrot.lane.b32.xlu0 %v7800_v59, %s9048_s1  ;;  %3729 = vst.msk [vmem:[#allocation3 + $0xe] sm:$0x3] %vm9133_vm7, %v3685_v2  ;;  %vm9138_vm7 = vmmov %vm9136_vm5 }
 0x923   : > { %3508 = vrot.lane.b32.xlu1 %v7695_v15, %s5542_s25 }
 0x924   : > { %v3683_v4 = vpop.permute.xlu0 %3682 }
 0x925   : > { %3728 = vst.msk [vmem:[#allocation3 + $0x6] sm:$0xfc] %vm9134_vm8, %v3683_v4  ;;  %v3689_v6 = vpop.permute.xlu1 %3688  ;;  %vm9139_vm8 = vcmask 425344  }
 0x926   : > { %3506 = vrot.lane.b32.xlu0 %v7643_v31, %s5542_s25  ;;  %3731 = vst.msk [vmem:[#allocation3 + $0x16] sm:$0x3] %vm9135_vm4, %v3689_v6  ;;  %vm9140_vm4 = vmmov %vm9139_vm8  ;;  %v8186_v6 = vld [vmem:[#allocation2 + $0x218] sm:$0x3] }
 0x927   : > { %3512 = vrot.lane.b32.xlu1 %v3069_v37, %s5542_s25  ;;  %v4068_v37 = vld [vmem:[#allocation2 + $0x1e8] sm:$0x3] }
 0x928   : > { %v3687_v45 = vpop.permute.xlu0 %3686 }
 0x929   : > { %3730 = vst.msk [vmem:[#allocation3 + $0xe] sm:$0xfc] %vm9136_vm5, %v3687_v45  ;;  %v3693_v52 = vpop.permute.xlu1 %3692  ;;  %vm9141_vm5 = vcmask 189600  }
 0x92a   : > { %3510 = vrot.lane.b32.xlu0 %v7941_v63, %s5542_s25  ;;  %3733 = vst.msk [vmem:[#allocation3 + $0x1e] sm:$0x3] %vm9137_vm6, %v3693_v52  ;;  %vm9142_vm6 = vcmask 195746  }
 0x92b   : > { %3584 = vrot.lane.b32.xlu1 %v8002_v33, %s9069_s19 }
 0x92c   : > { %v3691_v15 = vpop.permute.xlu0 %3690 }
 0x92d   : > { %3732 = vst.msk [vmem:[#allocation3 + $0x16] sm:$0xfc] %vm9138_vm7, %v3691_v15  ;;  %v3746_v31 = vpop.permute.xlu1 %3745  ;;  %vm9143_vm7 = vmmov %vm9141_vm5 }
 0x92e   : > { %3582 = vrot.lane.b32.xlu0 %v7877_v11, %s9069_s19  ;;  %3768 = vst.msk [vmem:[#allocation3 + $0x8] sm:$0xff] %vm9139_vm8, %v3746_v31  ;;  %vm9145_vm8 = vmmov %vm9142_vm6 }
 0x92f   : > { %3948 = vrot.lane.b32.xlu1 %v7921_v39, %s9048_s1 }
 0x930   : > { %v3744_v38 = vpop.permute.xlu0 %3743 }
 0x931   : > { %3767 = vst.msk [vmem:[#allocation3] sm:$0xff] %vm9140_vm4, %v3744_v38  ;;  %v3339_v13 = vpop.permute.xlu1 %3338 }
 0x932   : > { %3946 = vrot.lane.b32.xlu0 %v7877_v11, %s9048_s1  ;;  %3377 = vst.msk [vmem:[#allocation3 + $0x26] sm:$0x3] %vm9141_vm5, %v3339_v13  ;;  %vm9146_vm5 = vmmov %vm9140_vm4 }
 0x933   : > { %3952 = vrot.lane.b32.xlu1 %v8045_v9, %s9048_s1 }
 0x934   : > { %v3337_v14 = vpop.permute.xlu0 %3336 }
 0x935   : > { %3376 = vst.msk [vmem:[#allocation3 + $0x1e] sm:$0xfc] %vm9142_vm6, %v3337_v14  ;;  %v3343_v42 = vpop.permute.xlu1 %3342  ;;  %vm9147_vm6 = vcmask 450976   ;;  %v8205_v14 = vld [vmem:[#allocation2 + $0x1c0] sm:$0xff] }
 0x936   : > { %3950 = vrot.lane.b32.xlu0 %v8002_v33, %s9048_s1  ;;  %3379 = vst.msk [vmem:[#allocation3 + $0x2e] sm:$0x3] %vm9143_vm7, %v3343_v42  ;;  %vm9148_vm7 = vcmask 458145  }
 0x937   : > { %4004 = vrot.lane.b32.xlu1 %v7821_v7, %s9144_s0 }
 0x938   : > { %v3341_v61 = vpop.permute.xlu0 %3340 }
 0x939   : > { %3378 = vst.msk [vmem:[#allocation3 + $0x26] sm:$0xfc] %vm9145_vm8, %v3341_v61  ;;  %v3750_v24 = vpop.permute.xlu1 %3749  ;;  %vm9149_vm8 = vmmov %vm9147_vm6 }
 0x93a   : > { %4002 = vrot.lane.b32.xlu0 %v7807_v29, %s9144_s0  ;;  %3770 = vst.msk [vmem:[#allocation3 + $0x18] sm:$0xff] %vm9140_vm4, %v3750_v24  ;;  %v8073_v29 = vld [vmem:[#allocation2 + $0x1a0] sm:$0xff]  ;;  %vm9150_vm4 = vmmov %vm9148_vm7 }
 0x93b   : > { %4008 = vrot.lane.b32.xlu1 %v7829_v12, %s9144_s0 }
 0x93c   : > { %v3748_v27 = vpop.permute.xlu0 %3747 }
 0x93d   : > { %3769 = vst.msk [vmem:[#allocation3 + $0x10] sm:$0xff] %vm9146_vm5, %v3748_v27  ;;  %v3779_v1 = vpop.permute.xlu1 %3778  ;;  %vm9151_vm5 = vcmask 189600  }
 0x93e   : > { %4006 = vrot.lane.b32.xlu0 %v7800_v59, %s9144_s0  ;;  %3825 = vst.msk [vmem:[#allocation3 + $0x7] sm:$0x1] %vm9147_vm6, %v3779_v1  ;;  %vm9152_vm6 = vcmask 195746  }
 0x93f   : > { %3588 = vrot.lane.b32.xlu1 %v8065_v30, %s9069_s19 }
 0x940   : > { %v3777_v7 = vpop.permute.xlu0 %3776 }
 0x941   : > { %3824 = vst.msk [vmem:[#allocation3 - $0x1] sm:$0xfe] %vm9148_vm7, %v3777_v7  ;;  %v3783_v12 = vpop.permute.xlu1 %3782  ;;  %vm9153_vm7 = vmmov %vm9151_vm5 }
 0x942   : > { %3586 = vrot.lane.b32.xlu0 %v8073_v29, %s9069_s19  ;;  %3827 = vst.msk [vmem:[#allocation3 + $0xf] sm:$0x1] %vm9149_vm8, %v3783_v12  ;;  %vm9154_vm8 = vmmov %vm9152_vm6  ;;  %s9158_s19 = smov 72  }
 0x943   : > { %3632 = vrot.lane.b32.xlu1 %v7921_v39, %s9070_s18 }
 0x944   : > { %v3781_v59 = vpop.permute.xlu0 %3780 }
 0x945   : > { %3826 = vst.msk [vmem:[#allocation3 + $0x7] sm:$0xfe] %vm9150_vm4, %v3781_v59  ;;  %v3347_v18 = vpop.permute.xlu1 %3346  ;;  %vm9155_vm4 = vcmask 228544  }
 0x946   : > { %3630 = vrot.lane.b32.xlu0 %v7877_v11, %s9070_s18  ;;  %3381 = vst.msk [vmem:[#allocation3 + $0x36] sm:$0x3] %vm9151_vm5, %v3347_v18  ;;  %vm9156_vm5 = vmmov %vm9155_vm4 }
 0x947   : > { %3636 = vrot.lane.b32.xlu1 %v8045_v9, %s9070_s18 }
 0x948   : > { %v3345_v47 = vpop.permute.xlu0 %3344 }
 0x949   : > { %3380 = vst.msk [vmem:[#allocation3 + $0x2e] sm:$0xfc] %vm9152_vm6, %v3345_v47  ;;  %v3351_v62 = vpop.permute.xlu1 %3350  ;;  %vm9157_vm6 = vcmask 450976  }
 0x94a   : > { %3634 = vrot.lane.b32.xlu0 %v8002_v33, %s9070_s18  ;;  %3383 = vst.msk [vmem:[#allocation3 + $0x3e] sm:$0x3] %vm9153_vm7, %v3351_v62  ;;  %vm9159_vm7 = vcmask 458145  }
 0x94b   : > { %4012 = vrot.lane.b32.xlu1 %v7921_v39, %s9144_s0 }
 0x94c   : > { %v3349_v51 = vpop.permute.xlu0 %3348 }
 0x94d   : > { %3382 = vst.msk [vmem:[#allocation3 + $0x36] sm:$0xfc] %vm9154_vm8, %v3349_v51  ;;  %v3396_v60 = vpop.permute.xlu1 %3395  ;;  %vm9160_vm8 = vmmov %vm9157_vm6 }
 0x94e   : > { %4010 = vrot.lane.b32.xlu0 %v7877_v11, %s9144_s0  ;;  %3414 = vst.msk [vmem:[#allocation3 + $0x28] sm:$0xff] %vm9155_vm4, %v3396_v60  ;;  %vm9161_vm4 = vmmov %vm9159_vm7 }
 0x94f   : > { %4016 = vrot.lane.b32.xlu1 %v8045_v9, %s9144_s0 }
 0x950   : > { %v3394_v28 = vpop.permute.xlu0 %3393 }
 0x951   : > { %3413 = vst.msk [vmem:[#allocation3 + $0x20] sm:$0xff] %vm9156_vm5, %v3394_v28  ;;  %v3787_v63 = vpop.permute.xlu1 %3786  ;;  %vm9162_vm5 = vcmask 484800  }
 0x952   : > { %4014 = vrot.lane.b32.xlu0 %v8002_v33, %s9144_s0  ;;  %3829 = vst.msk [vmem:[#allocation3 + $0x17] sm:$0x1] %vm9157_vm6, %v3787_v63  ;;  %vm9163_vm6 = vcmask 490946   ;;  %v8249_v63 = vld [vmem:[#allocation2 + $0x1c8] sm:$0x3] }
 0x953   : > { %4097 = vrot.lane.b32.xlu1 %v8099_v57, %s9158_s19 }
 0x954   : > { %v3785_v53 = vpop.permute.xlu0 %3784 }
 0x955   : > { %3828 = vst.msk [vmem:[#allocation3 + $0xf] sm:$0xfe] %vm9159_vm7, %v3785_v53  ;;  %v3791_v46 = vpop.permute.xlu1 %3790  ;;  %vm9164_vm7 = vmmov %vm9162_vm5 }
 0x956   : > { %4095 = vrot.lane.b32.xlu0 %v8107_v44, %s9158_s19  ;;  %3831 = vst.msk [vmem:[#allocation3 + $0x1f] sm:$0x1] %vm9160_vm8, %v3791_v46  ;;  %vm9165_vm8 = vmmov %vm9163_vm6 }
 0x957   : > { %3640 = vrot.lane.b32.xlu1 %v8109_v17, %s9070_s18 }
 0x958   : > { %v3789_v50 = vpop.permute.xlu0 %3788 }
 0x959   : > { %3830 = vst.msk [vmem:[#allocation3 + $0x17] sm:$0xfe] %vm9161_vm4, %v3789_v50  ;;  %v3843_v5 = vpop.permute.xlu1 %3842  ;;  %vm9166_vm4 = vcmask 228544  }
 0x95a   : > { %3638 = vrot.lane.b32.xlu0 %v8073_v29, %s9070_s18  ;;  %3889 = vst.msk [vmem:[#allocation3 + $0x6] sm:$0x3] %vm9162_vm5, %v3843_v5  ;;  %vm9167_vm5 = vmmov %vm9166_vm4 }
 0x95b   : > { %3644 = vrot.lane.b32.xlu1 %v8117_v55, %s9070_s18 }
 0x95c   : > { %v3841_v25 = vpop.permute.xlu0 %3840 }
 0x95d   : > { %3888 = vst.msk [vmem:[#allocation3 - $0x2] sm:$0xfc] %vm9163_vm6, %v3841_v25  ;;  %v3847_v58 = vpop.permute.xlu1 %3846  ;;  %vm9168_vm6 = vcmask 254176  }
 0x95e   : > { %3642 = vrot.lane.b32.xlu0 %v8065_v30, %s9070_s18  ;;  %3891 = vst.msk [vmem:[#allocation3 + $0xe] sm:$0x3] %vm9164_vm7, %v3847_v58  ;;  %vm9169_vm7 = vcmask 261345   ;;  %s9171_s18 = smov 76   ;;  %v8269_v58 = vld [vmem:[#allocation2 + $0x220] sm:$0xff] }
 0x95f   : > { %3696 = vrot.lane.b32.xlu1 %v7921_v39, %s9071_s30 }
 0x960   : > { %v3845_v0 = vpop.permute.xlu0 %3844 }
 0x961   : > { %3890 = vst.msk [vmem:[#allocation3 + $0x6] sm:$0xfc] %vm9165_vm8, %v3845_v0  ;;  %v3400_v40 = vpop.permute.xlu1 %3399  ;;  %vm9170_vm8 = vmmov %vm9168_vm6 }
 0x962   : > { %3694 = vrot.lane.b32.xlu0 %v7877_v11, %s9071_s30  ;;  %3416 = vst.msk [vmem:[#allocation3 + $0x38] sm:$0xff] %vm9166_vm4, %v3400_v40  ;;  %v8145_v11 = vld [vmem:[#allocation2 + $0x200] sm:$0xff]  ;;  %vm9172_vm4 = vmmov %vm9169_vm7 }
 0x963   : > { %3700 = vrot.lane.b32.xlu1 %v8045_v9, %s9071_s30 }
 0x964   : > { %v3398_v54 = vpop.permute.xlu0 %3397 }
 0x965   : > { %3415 = vst.msk [vmem:[#allocation3 + $0x30] sm:$0xff] %vm9167_vm5, %v3398_v54  ;;  %v3437_v16 = vpop.permute.xlu1 %3436  ;;  %vm9173_vm5 = vcmask 484800  }
 0x966   : > { %3698 = vrot.lane.b32.xlu0 %v8002_v33, %s9071_s30  ;;  %3475 = vst.msk [vmem:[#allocation3 + $0x27] sm:$0x1] %vm9168_vm6, %v3437_v16  ;;  %vm9174_vm6 = vcmask 490946  }
 0x967   : > { %4101 = vrot.lane.b32.xlu1 %v8137_v19, %s9158_s19 }
 0x968   : > { %v3435_v39 = vpop.permute.xlu0 %3434 }
 0x969   : > { %3474 = vst.msk [vmem:[#allocation3 + $0x1f] sm:$0xfe] %vm9169_vm7, %v3435_v39  ;;  %v3441_v34 = vpop.permute.xlu1 %3440  ;;  %vm9175_vm7 = vmmov %vm9173_vm5 }
 0x96a   : > { %4099 = vrot.lane.b32.xlu0 %v8145_v11, %s9158_s19  ;;  %3477 = vst.msk [vmem:[#allocation3 + $0x2f] sm:$0x1] %vm9170_vm8, %v3441_v34  ;;  %vm9176_vm8 = vmmov %vm9174_vm6 }
 0x96b   : > { %4137 = vrot.lane.b32.xlu1 %v4068_v37, %s9171_s18 }
 0x96c   : > { %v3439_v56 = vpop.permute.xlu0 %3438 }
 0x96d   : > { %3476 = vst.msk [vmem:[#allocation3 + $0x27] sm:$0xfe] %vm9172_vm4, %v3439_v56  ;;  %v3851_v35 = vpop.permute.xlu1 %3850  ;;  %vm9177_vm4 = vcmask 523744  }
 0x96e   : > { %4135 = vrot.lane.b32.xlu0 %v8107_v44, %s9171_s18  ;;  %3893 = vst.msk [vmem:[#allocation3 + $0x16] sm:$0x3] %vm9173_vm5, %v3851_v35  ;;  %vm9178_vm5 = vmmov %vm9177_vm4 }
 0x96f   : > { %4141 = vrot.lane.b32.xlu1 %v8152_v32, %s9171_s18 }
 0x970   : > { %v3849_v8 = vpop.permute.xlu0 %3848 }
 0x971   : > { %3892 = vst.msk [vmem:[#allocation3 + $0xe] sm:$0xfc] %vm9174_vm6, %v3849_v8  ;;  %v3855_v36 = vpop.permute.xlu1 %3854  ;;  %vm9179_vm6 = vcmask 254176  }
 0x972   : > { %4139 = vrot.lane.b32.xlu0 %v8099_v57, %s9171_s18  ;;  %3895 = vst.msk [vmem:[#allocation3 + $0x1e] sm:$0x3] %vm9175_vm7, %v3855_v36  ;;  %vm9180_vm7 = vcmask 261345  }
 0x973   : > { %3704 = vrot.lane.b32.xlu1 %v8109_v17, %s9071_s30 }
 0x974   : > { %v3853_v43 = vpop.permute.xlu0 %3852 }
 0x975   : > { %3894 = vst.msk [vmem:[#allocation3 + $0x16] sm:$0xfc] %vm9176_vm8, %v3853_v43  ;;  %v3908_v41 = vpop.permute.xlu1 %3907  ;;  %vm9181_vm8 = vmmov %vm9179_vm6 }
 0x976   : > { %3702 = vrot.lane.b32.xlu0 %v8073_v29, %s9071_s30  ;;  %3930 = vst.msk [vmem:[#allocation3 + $0x8] sm:$0xff] %vm9177_vm4, %v3908_v41  ;;  %vm9182_vm4 = vmmov %vm9180_vm7  ;;  %v8313_v41 = vld [vmem:[#allocation2 + $0x228] sm:$0x3] }
 0x977   : > { %3708 = vrot.lane.b32.xlu1 %v8117_v55, %s9071_s30 }
 0x978   : > { %v3906_v26 = vpop.permute.xlu0 %3905 }
 0x979   : > { %3929 = vst.msk [vmem:[#allocation3] sm:$0xff] %vm9178_vm5, %v3906_v26  ;;  %v3445_v3 = vpop.permute.xlu1 %3444  ;;  %vm9183_vm5 = vcmask 288000  }
 0x97a   : > { %3706 = vrot.lane.b32.xlu0 %v8065_v30, %s9071_s30  ;;  %3479 = vst.msk [vmem:[#allocation3 + $0x37] sm:$0x1] %vm9179_vm6, %v3445_v3  ;;  %vm9184_vm6 = vcmask 294146   ;;  %s9200_s30 = smov 84  }
 0x97b   : > { %3753 = vrot.lane.b32.xlu1 %v8073_v29, %s5546_s16 }
 0x97c   : > { %v3443_v48 = vpop.permute.xlu0 %3442 }
 0x97d   : > { %3478 = vst.msk [vmem:[#allocation3 + $0x2f] sm:$0xfe] %vm9180_vm7, %v3443_v48  ;;  %v3449_v2 = vpop.permute.xlu1 %3448  ;;  %vm9185_vm7 = vmmov %vm9183_vm5 }
 0x97e   : > { %3751 = vrot.lane.b32.xlu0 %v8002_v33, %s5546_s16  ;;  %3481 = vst.msk [vmem:[#allocation3 + $0x3f] sm:$0x1] %vm9181_vm8, %v3449_v2  ;;  %vm9186_vm8 = vmmov %vm9184_vm6 }
 0x97f   : > { %4145 = vrot.lane.b32.xlu1 %v8178_v49, %s9171_s18 }
 0x980   : > { %v3447_v4 = vpop.permute.xlu0 %3446 }
 0x981   : > { %3480 = vst.msk [vmem:[#allocation3 + $0x37] sm:$0xfe] %vm9182_vm4, %v3447_v4  ;;  %v3501_v45 = vpop.permute.xlu1 %3500  ;;  %vm9187_vm4 = vcmask 523744  }
 0x982   : > { %4143 = vrot.lane.b32.xlu0 %v8145_v11, %s9171_s18  ;;  %3539 = vst.msk [vmem:[#allocation3 + $0x26] sm:$0x3] %vm9183_vm5, %v3501_v45  ;;  %vm9188_vm5 = vmmov %vm9187_vm4 }
 0x983   : > { %4149 = vrot.lane.b32.xlu1 %v8186_v6, %s9171_s18 }
 0x984   : > { %v3499_v52 = vpop.permute.xlu0 %3498 }
 0x985   : > { %3538 = vst.msk [vmem:[#allocation3 + $0x1e] sm:$0xfc] %vm9184_vm6, %v3499_v52  ;;  %v3505_v15 = vpop.permute.xlu1 %3504  ;;  %vm9189_vm6 = vcmask 549376   ;;  %v8333_v52 = vld [vmem:[#allocation2 + $0x1d0] sm:$0xff] }
 0x986   : > { %4147 = vrot.lane.b32.xlu0 %v8137_v19, %s9171_s18  ;;  %3541 = vst.msk [vmem:[#allocation3 + $0x2e] sm:$0x3] %vm9185_vm7, %v3505_v15  ;;  %vm9190_vm7 = vcmask 556545  }
 0x987   : > { %4201 = vrot.lane.b32.xlu1 %v4068_v37, %s5554_s21 }
 0x988   : > { %v3503_v31 = vpop.permute.xlu0 %3502 }
 0x989   : > { %3540 = vst.msk [vmem:[#allocation3 + $0x26] sm:$0xfc] %vm9186_vm8, %v3503_v31  ;;  %v3912_v38 = vpop.permute.xlu1 %3911  ;;  %vm9191_vm8 = vmmov %vm9189_vm6 }
 0x98a   : > { %4199 = vrot.lane.b32.xlu0 %v8107_v44, %s5554_s21  ;;  %3932 = vst.msk [vmem:[#allocation3 + $0x18] sm:$0xff] %vm9187_vm4, %v3912_v38  ;;  %vm9192_vm4 = vmmov %vm9190_vm7 }
 0x98b   : > { %4205 = vrot.lane.b32.xlu1 %v8152_v32, %s5554_s21 }
 0x98c   : > { %v3910_v13 = vpop.permute.xlu0 %3909 }
 0x98d   : > { %3931 = vst.msk [vmem:[#allocation3 + $0x10] sm:$0xff] %vm9188_vm5, %v3910_v13  ;;  %v3941_v42 = vpop.permute.xlu1 %3940  ;;  %vm9193_vm5 = vcmask 288000  }
 0x98e   : > { %4203 = vrot.lane.b32.xlu0 %v8099_v57, %s5554_s21  ;;  %3987 = vst.msk [vmem:[#allocation3 + $0x7] sm:$0x1] %vm9189_vm6, %v3941_v42  ;;  %vm9194_vm6 = vcmask 294146  }
 0x98f   : > { %3757 = vrot.lane.b32.xlu1 %v8205_v14, %s5546_s16 }
 0x990   : > { %v3939_v61 = vpop.permute.xlu0 %3938 }
 0x991   : > { %3986 = vst.msk [vmem:[#allocation3 - $0x1] sm:$0xfe] %vm9190_vm7, %v3939_v61  ;;  %v3945_v24 = vpop.permute.xlu1 %3944  ;;  %vm9195_vm7 = vmmov %vm9193_vm5 }
 0x992   : > { %3755 = vrot.lane.b32.xlu0 %v8065_v30, %s5546_s16  ;;  %3989 = vst.msk [vmem:[#allocation3 + $0xf] sm:$0x1] %vm9191_vm8, %v3945_v24  ;;  %vm9196_vm8 = vmmov %vm9194_vm6 }
 0x993   : > { %3794 = vrot.lane.b32.xlu1 %v8045_v9, %s9087_s23 }
 0x994   : > { %v3943_v27 = vpop.permute.xlu0 %3942 }
 0x995   : > { %3988 = vst.msk [vmem:[#allocation3 + $0x7] sm:$0xfe] %vm9192_vm4, %v3943_v27  ;;  %v3509_v1 = vpop.permute.xlu1 %3508  ;;  %vm9197_vm4 = vcmask 326944  }
 0x996   : > { %3792 = vrot.lane.b32.xlu0 %v8002_v33, %s9087_s23  ;;  %3543 = vst.msk [vmem:[#allocation3 + $0x36] sm:$0x3] %vm9193_vm5, %v3509_v1  ;;  %vm9198_vm5 = vmmov %vm9197_vm4 }
 0x997   : > { %3798 = vrot.lane.b32.xlu1 %v8109_v17, %s9087_s23 }
 0x998   : > { %v3507_v7 = vpop.permute.xlu0 %3506 }
 0x999   : > { %3542 = vst.msk [vmem:[#allocation3 + $0x2e] sm:$0xfc] %vm9194_vm6, %v3507_v7  ;;  %v3513_v12 = vpop.permute.xlu1 %3512  ;;  %vm9199_vm6 = vcmask 549376  }
 0x99a   : > { %3796 = vrot.lane.b32.xlu0 %v8073_v29, %s9087_s23  ;;  %3545 = vst.msk [vmem:[#allocation3 + $0x3e] sm:$0x3] %vm9195_vm7, %v3513_v12  ;;  %vm9201_vm7 = vcmask 556545  }
 0x99b   : > { %4209 = vrot.lane.b32.xlu1 %v8178_v49, %s5554_s21 }
 0x99c   : > { %v3511_v59 = vpop.permute.xlu0 %3510 }
 0x99d   : > { %3544 = vst.msk [vmem:[#allocation3 + $0x36] sm:$0xfc] %vm9196_vm8, %v3511_v59  ;;  %v3585_v18 = vpop.permute.xlu1 %3584  ;;  %vm9202_vm8 = vmmov %vm9199_vm6 }
 0x99e   : > { %4207 = vrot.lane.b32.xlu0 %v8145_v11, %s5554_s21  ;;  %3603 = vst.msk [vmem:[#allocation3 + $0x28] sm:$0xff] %vm9197_vm4, %v3585_v18  ;;  %vm9203_vm4 = vmmov %vm9201_vm7  ;;  %v3565_v18 = vld [vmem:[#allocation2 + $0x1d8] sm:$0x3] }
 0x99f   : > { %4213 = vrot.lane.b32.xlu1 %v8186_v6, %s5554_s21 }
 0x9a0   : > { %v3583_v47 = vpop.permute.xlu0 %3582 }
 0x9a1   : > { %3602 = vst.msk [vmem:[#allocation3 + $0x20] sm:$0xff] %vm9198_vm5, %v3583_v47  ;;  %v3949_v62 = vpop.permute.xlu1 %3948  ;;  %vm9204_vm5 = vcmask 583200  }
 0x9a2   : > { %4211 = vrot.lane.b32.xlu0 %v8137_v19, %s5554_s21  ;;  %3991 = vst.msk [vmem:[#allocation3 + $0x17] sm:$0x1] %vm9199_vm6, %v3949_v62  ;;  %vm9205_vm6 = vcmask 589346  }
 0x9a3   : > { %4266 = vrot.lane.b32.xlu1 %v8145_v11, %s9200_s30 }
 0x9a4   : > { %v3947_v51 = vpop.permute.xlu0 %3946 }
 0x9a5   : > { %3990 = vst.msk [vmem:[#allocation3 + $0xf] sm:$0xfe] %vm9201_vm7, %v3947_v51  ;;  %v3953_v60 = vpop.permute.xlu1 %3952  ;;  %vm9206_vm7 = vmmov %vm9204_vm5 }
 0x9a6   : > { %4264 = vrot.lane.b32.xlu0 %v8099_v57, %s9200_s30  ;;  %3993 = vst.msk [vmem:[#allocation3 + $0x1f] sm:$0x1] %vm9202_vm8, %v3953_v60  ;;  %vm9207_vm8 = vmmov %vm9205_vm6 }
 0x9a7   : > { %3802 = vrot.lane.b32.xlu1 %v8117_v55, %s9087_s23 }
 0x9a8   : > { %v3951_v28 = vpop.permute.xlu0 %3950 }
 0x9a9   : > { %3992 = vst.msk [vmem:[#allocation3 + $0x17] sm:$0xfe] %vm9203_vm4, %v3951_v28  ;;  %v4005_v44 = vpop.permute.xlu1 %4004  ;;  %vm9208_vm4 = vcmask 326944  }
 0x9aa   : > { %3800 = vrot.lane.b32.xlu0 %v8065_v30, %s9087_s23  ;;  %4051 = vst.msk [vmem:[#allocation3 + $0x6] sm:$0x3] %vm9204_vm5, %v4005_v44  ;;  %vm9209_vm5 = vmmov %vm9208_vm4 }
 0x9ab   : > { %3806 = vrot.lane.b32.xlu1 %v8249_v63, %s9087_s23 }
 0x9ac   : > { %v4003_v53 = vpop.permute.xlu0 %4002 }
 0x9ad   : > { %4050 = vst.msk [vmem:[#allocation3 - $0x2] sm:$0xfc] %vm9205_vm6, %v4003_v53  ;;  %v4009_v46 = vpop.permute.xlu1 %4008  ;;  %vm9210_vm6 = vcmask 352576   ;;  %v8394_v53 = vld [vmem:[#allocation2 + $0x230] sm:$0xff] }
 0x9ae   : > { %3804 = vrot.lane.b32.xlu0 %v8205_v14, %s9087_s23  ;;  %4053 = vst.msk [vmem:[#allocation3 + $0xe] sm:$0x3] %vm9206_vm7, %v4009_v46  ;;  %vm9211_vm7 = vcmask 359745   ;;  %s9213_s23 = smov 88  }
 0x9af   : > { %3858 = vrot.lane.b32.xlu1 %v8045_v9, %s9102_s28 }
 0x9b0   : > { %v4007_v50 = vpop.permute.xlu0 %4006 }
 0x9b1   : > { %4052 = vst.msk [vmem:[#allocation3 + $0x6] sm:$0xfc] %vm9207_vm8, %v4007_v50  ;;  %v3589_v5 = vpop.permute.xlu1 %3588  ;;  %vm9212_vm8 = vmmov %vm9210_vm6 }
 0x9b2   : > { %3856 = vrot.lane.b32.xlu0 %v8002_v33, %s9102_s28  ;;  %3605 = vst.msk [vmem:[#allocation3 + $0x38] sm:$0xff] %vm9208_vm4, %v3589_v5  ;;  %vm9214_vm4 = vmmov %vm9211_vm7 }
 0x9b3   : > { %3862 = vrot.lane.b32.xlu1 %v8109_v17, %s9102_s28 }
 0x9b4   : > { %v3587_v25 = vpop.permute.xlu0 %3586 }
 0x9b5   : > { %3604 = vst.msk [vmem:[#allocation3 + $0x30] sm:$0xff] %vm9209_vm5, %v3587_v25  ;;  %v3633_v0 = vpop.permute.xlu1 %3632  ;;  %vm9215_vm5 = vcmask 583200  }
 0x9b6   : > { %3860 = vrot.lane.b32.xlu0 %v8073_v29, %s9102_s28  ;;  %3671 = vst.msk [vmem:[#allocation3 + $0x27] sm:$0x1] %vm9210_vm6, %v3633_v0  ;;  %vm9216_vm6 = vcmask 589346  }
 0x9b7   : > { %4270 = vrot.lane.b32.xlu1 %v8269_v58, %s9200_s30 }
 0x9b8   : > { %v3631_v33 = vpop.permute.xlu0 %3630 }
 0x9b9   : > { %3670 = vst.msk [vmem:[#allocation3 + $0x1f] sm:$0xfe] %vm9211_vm7, %v3631_v33  ;;  %v3637_v9 = vpop.permute.xlu1 %3636  ;;  %vm9217_vm7 = vmmov %vm9215_vm5 }
 0x9ba   : > { %4268 = vrot.lane.b32.xlu0 %v8137_v19, %s9200_s30  ;;  %3673 = vst.msk [vmem:[#allocation3 + $0x2f] sm:$0x1] %vm9212_vm8, %v3637_v9  ;;  %vm9218_vm8 = vmmov %vm9216_vm6 }
 0x9bb   : > { %4299 = vrot.lane.b32.xlu1 %v8152_v32, %s9213_s23 }
 0x9bc   : > { %v3635_v40 = vpop.permute.xlu0 %3634 }
 0x9bd   : > { %3672 = vst.msk [vmem:[#allocation3 + $0x27] sm:$0xfe] %vm9214_vm4, %v3635_v40  ;;  %v4013_v54 = vpop.permute.xlu1 %4012  ;;  %vm9219_vm4 = vcmask 622144  }
 0x9be   : > { %4297 = vrot.lane.b32.xlu0 %v8099_v57, %s9213_s23  ;;  %4055 = vst.msk [vmem:[#allocation3 + $0x16] sm:$0x3] %vm9215_vm5, %v4013_v54  ;;  %vm9220_vm5 = vmmov %vm9219_vm4  ;;  %v8437_v54 = vld [vmem:[#allocation2 + $0x238] sm:$0x3] }
 0x9bf   : > { %4303 = vrot.lane.b32.xlu1 %v8178_v49, %s9213_s23 }
 0x9c0   : > { %v4011_v16 = vpop.permute.xlu0 %4010 }
 0x9c1   : > { %4054 = vst.msk [vmem:[#allocation3 + $0xe] sm:$0xfc] %vm9216_vm6, %v4011_v16  ;;  %v4017_v39 = vpop.permute.xlu1 %4016  ;;  %vm9221_vm6 = vcmask 352576  }
 0x9c2   : > { %4301 = vrot.lane.b32.xlu0 %v8145_v11, %s9213_s23  ;;  %4057 = vst.msk [vmem:[#allocation3 + $0x1e] sm:$0x3] %vm9217_vm7, %v4017_v39  ;;  %vm9222_vm7 = vcmask 359745  }
 0x9c3   : > { %3866 = vrot.lane.b32.xlu1 %v8117_v55, %s9102_s28 }
 0x9c4   : > { %v4015_v37 = vpop.permute.xlu0 %4014 }
 0x9c5   : > { %4056 = vst.msk [vmem:[#allocation3 + $0x16] sm:$0xfc] %vm9218_vm8, %v4015_v37  ;;  %v4098_v34 = vpop.permute.xlu1 %4097  ;;  %vm9223_vm8 = vmmov %vm9221_vm6 }
 0x9c6   : > { %3864 = vrot.lane.b32.xlu0 %v8065_v30, %s9102_s28  ;;  %4120 = vst.msk [vmem:[#allocation3 + $0x8] sm:$0xff] %vm9219_vm4, %v4098_v34  ;;  %vm9224_vm4 = vmmov %vm9222_vm7 }
 0x9c7   : > { %3870 = vrot.lane.b32.xlu1 %v8249_v63, %s9102_s28 }
 0x9c8   : > { %v4096_v56 = vpop.permute.xlu0 %4095 }
 0x9c9   : > { %4119 = vst.msk [vmem:[#allocation3] sm:$0xff] %vm9220_vm5, %v4096_v56  ;;  %v3641_v35 = vpop.permute.xlu1 %3640  ;;  %vm9225_vm5 = vcmask 386400  }
 0x9ca   : > { %3868 = vrot.lane.b32.xlu0 %v8205_v14, %s9102_s28  ;;  %3675 = vst.msk [vmem:[#allocation3 + $0x37] sm:$0x1] %vm9221_vm6, %v3641_v35  ;;  %vm9226_vm6 = vcmask 392546   ;;  %s9228_s28 = smov 92  }
 0x9cb   : > { %3915 = vrot.lane.b32.xlu1 %v8065_v30, %s9117_s29 }
 0x9cc   : > { %v3639_v8 = vpop.permute.xlu0 %3638 }
 0x9cd   : > { %3674 = vst.msk [vmem:[#allocation3 + $0x2f] sm:$0xfe] %vm9222_vm7, %v3639_v8  ;;  %v3645_v36 = vpop.permute.xlu1 %3644  ;;  %vm9227_vm7 = vmmov %vm9225_vm5  ;;  %v8457_v8 = vld [vmem:[#allocation2 + $0x250] sm:$0xff] }
 0x9ce   : > { %3913 = vrot.lane.b32.xlu0 %v8073_v29, %s9117_s29  ;;  %3677 = vst.msk [vmem:[#allocation3 + $0x3f] sm:$0x1] %vm9223_vm8, %v3645_v36  ;;  %vm9229_vm8 = vmmov %vm9226_vm6 }
 0x9cf   : > { %4307 = vrot.lane.b32.xlu1 %v8186_v6, %s9213_s23 }
 0x9d0   : > { %v3643_v43 = vpop.permute.xlu0 %3642 }
 0x9d1   : > { %3676 = vst.msk [vmem:[#allocation3 + $0x37] sm:$0xfe] %vm9224_vm4, %v3643_v43  ;;  %v3697_v26 = vpop.permute.xlu1 %3696  ;;  %vm9230_vm4 = vcmask 622144  }
 0x9d2   : > { %4305 = vrot.lane.b32.xlu0 %v8137_v19, %s9213_s23  ;;  %3735 = vst.msk [vmem:[#allocation3 + $0x26] sm:$0x3] %vm9225_vm5, %v3697_v26  ;;  %vm9231_vm5 = vmmov %vm9230_vm4 }
 0x9d3   : > { %4311 = vrot.lane.b32.xlu1 %v8313_v41, %s9213_s23 }
 0x9d4   : > { %v3695_v3 = vpop.permute.xlu0 %3694 }
 0x9d5   : > { %3734 = vst.msk [vmem:[#allocation3 + $0x1e] sm:$0xfc] %vm9226_vm6, %v3695_v3  ;;  %v3701_v48 = vpop.permute.xlu1 %3700  ;;  %vm9232_vm6 = vcmask 647776  }
 0x9d6   : > { %4309 = vrot.lane.b32.xlu0 %v8269_v58, %s9213_s23  ;;  %3737 = vst.msk [vmem:[#allocation3 + $0x2e] sm:$0x3] %vm9227_vm7, %v3701_v48  ;;  %vm9233_vm7 = vcmask 654945  }
 0x9d7   : > { %4363 = vrot.lane.b32.xlu1 %v8152_v32, %s9228_s28 }
 0x9d8   : > { %v3699_v2 = vpop.permute.xlu0 %3698 }
 0x9d9   : > { %3736 = vst.msk [vmem:[#allocation3 + $0x26] sm:$0xfc] %vm9229_vm8, %v3699_v2  ;;  %v4102_v4 = vpop.permute.xlu1 %4101  ;;  %vm9234_vm8 = vmmov %vm9232_vm6 }
 0x9da   : > { %4361 = vrot.lane.b32.xlu0 %v8099_v57, %s9228_s28  ;;  %4122 = vst.msk [vmem:[#allocation3 + $0x18] sm:$0xff] %vm9230_vm4, %v4102_v4  ;;  %vm9235_vm4 = vmmov %vm9233_vm7 }
 0x9db   : > { %4367 = vrot.lane.b32.xlu1 %v8178_v49, %s9228_s28 }
 0x9dc   : > { %v4100_v45 = vpop.permute.xlu0 %4099 }
 0x9dd   : > { %4121 = vst.msk [vmem:[#allocation3 + $0x10] sm:$0xff] %vm9231_vm5, %v4100_v45  ;;  %v4138_v15 = vpop.permute.xlu1 %4137  ;;  %vm9236_vm5 = vcmask 386400   ;;  %v8491_v45 = vld [vmem:[#allocation2 + $0x248] sm:$0x3] }
 0x9de   : > { %4365 = vrot.lane.b32.xlu0 %v8145_v11, %s9228_s28  ;;  %4184 = vst.msk [vmem:[#allocation3 + $0x7] sm:$0x1] %vm9232_vm6, %v4138_v15  ;;  %vm9237_vm6 = vcmask 392546  }
 0x9df   : > { %3919 = vrot.lane.b32.xlu1 %v8333_v52, %s9117_s29 }
 0x9e0   : > { %v4136_v57 = vpop.permute.xlu0 %4135 }
 0x9e1   : > { %4183 = vst.msk [vmem:[#allocation3 - $0x1] sm:$0xfe] %vm9233_vm7, %v4136_v57  ;;  %v4142_v32 = vpop.permute.xlu1 %4141  ;;  %vm9238_vm7 = vmmov %vm9236_vm5  ;;  %v8499_v57 = vld [vmem:[#allocation2 + $0x258] sm:$0x3] }
 0x9e2   : > { %3917 = vrot.lane.b32.xlu0 %v8205_v14, %s9117_s29  ;;  %4186 = vst.msk [vmem:[#allocation3 + $0xf] sm:$0x1] %vm9234_vm8, %v4142_v32  ;;  %vm9239_vm8 = vmmov %vm9237_vm6  ;;  %s9243_s29 = smov 96  }
 0x9e3   : > { %3956 = vrot.lane.b32.xlu1 %v8109_v17, %s9048_s1 }
 0x9e4   : > { %v4140_v31 = vpop.permute.xlu0 %4139 }
 0x9e5   : > { %4185 = vst.msk [vmem:[#allocation3 + $0x7] sm:$0xfe] %vm9235_vm4, %v4140_v31  ;;  %v3705_v38 = vpop.permute.xlu1 %3704  ;;  %vm9240_vm4 = vcmask 425344  }
 0x9e6   : > { %3954 = vrot.lane.b32.xlu0 %v8073_v29, %s9048_s1  ;;  %3739 = vst.msk [vmem:[#allocation3 + $0x36] sm:$0x3] %vm9236_vm5, %v3705_v38  ;;  %vm9241_vm5 = vmmov %vm9240_vm4 }
 0x9e7   : > { %3960 = vrot.lane.b32.xlu1 %v8117_v55, %s9048_s1 }
 0x9e8   : > { %v3703_v13 = vpop.permute.xlu0 %3702 }
 0x9e9   : > { %3738 = vst.msk [vmem:[#allocation3 + $0x2e] sm:$0xfc] %vm9237_vm6, %v3703_v13  ;;  %v3709_v42 = vpop.permute.xlu1 %3708  ;;  %vm9242_vm6 = vcmask 647776  }
 0x9ea   : > { %3958 = vrot.lane.b32.xlu0 %v8065_v30, %s9048_s1  ;;  %3741 = vst.msk [vmem:[#allocation3 + $0x3e] sm:$0x3] %vm9238_vm7, %v3709_v42  ;;  %vm9244_vm7 = vcmask 654945  }
 0x9eb   : > { %4371 = vrot.lane.b32.xlu1 %v8186_v6, %s9228_s28 }
 0x9ec   : > { %v3707_v61 = vpop.permute.xlu0 %3706 }
 0x9ed   : > { %3740 = vst.msk [vmem:[#allocation3 + $0x36] sm:$0xfc] %vm9239_vm8, %v3707_v61  ;;  %v3754_v24 = vpop.permute.xlu1 %3753  ;;  %vm9245_vm8 = vmmov %vm9242_vm6 }
 0x9ee   : > { %4369 = vrot.lane.b32.xlu0 %v8137_v19, %s9228_s28  ;;  %3772 = vst.msk [vmem:[#allocation3 + $0x28] sm:$0xff] %vm9240_vm4, %v3754_v24  ;;  %vm9246_vm4 = vmmov %vm9244_vm7 }
 0x9ef   : > { %4375 = vrot.lane.b32.xlu1 %v8313_v41, %s9228_s28 }
 0x9f0   : > { %v3752_v27 = vpop.permute.xlu0 %3751 }
 0x9f1   : > { %3771 = vst.msk [vmem:[#allocation3 + $0x20] sm:$0xff] %vm9241_vm5, %v3752_v27  ;;  %v4146_v1 = vpop.permute.xlu1 %4145  ;;  %vm9247_vm5 = vcmask 681600  }
 0x9f2   : > { %4373 = vrot.lane.b32.xlu0 %v8269_v58, %s9228_s28  ;;  %4188 = vst.msk [vmem:[#allocation3 + $0x17] sm:$0x1] %vm9242_vm6, %v4146_v1  ;;  %vm9248_vm6 = vcmask 687746  }
 0x9f3   : > { %4428 = vrot.lane.b32.xlu1 %v8137_v19, %s9243_s29 }
 0x9f4   : > { %v4144_v7 = vpop.permute.xlu0 %4143 }
 0x9f5   : > { %4187 = vst.msk [vmem:[#allocation3 + $0xf] sm:$0xfe] %vm9244_vm7, %v4144_v7  ;;  %v4150_v12 = vpop.permute.xlu1 %4149  ;;  %vm9249_vm7 = vmmov %vm9247_vm5 }
 0x9f6   : > { %4426 = vrot.lane.b32.xlu0 %v8145_v11, %s9243_s29  ;;  %4190 = vst.msk [vmem:[#allocation3 + $0x1f] sm:$0x1] %vm9245_vm8, %v4150_v12  ;;  %vm9250_vm8 = vmmov %vm9248_vm6  ;;  %v8537_v12 = vld [vmem:[#allocation2 + $0x260] sm:$0xff] }
 0x9f7   : > { %3964 = vrot.lane.b32.xlu1 %v8249_v63, %s9048_s1 }
 0x9f8   : > { %v4148_v59 = vpop.permute.xlu0 %4147 }
 0x9f9   : > { %4189 = vst.msk [vmem:[#allocation3 + $0x17] sm:$0xfe] %vm9246_vm4, %v4148_v59  ;;  %v4202_v47 = vpop.permute.xlu1 %4201  ;;  %vm9251_vm4 = vcmask 425344  }
 0x9fa   : > { %3962 = vrot.lane.b32.xlu0 %v8205_v14, %s9048_s1  ;;  %4248 = vst.msk [vmem:[#allocation3 + $0x6] sm:$0x3] %vm9247_vm5, %v4202_v47  ;;  %vm9252_vm5 = vmmov %vm9251_vm4 }
 0x9fb   : > { %3968 = vrot.lane.b32.xlu1 %v3565_v18, %s9048_s1 }
 0x9fc   : > { %v4200_v62 = vpop.permute.xlu0 %4199 }
 0x9fd   : > { %4247 = vst.msk [vmem:[#allocation3 - $0x2] sm:$0xfc] %vm9248_vm6, %v4200_v62  ;;  %v4206_v51 = vpop.permute.xlu1 %4205  ;;  %vm9253_vm6 = vcmask 450976  }
 0x9fe   : > { %3966 = vrot.lane.b32.xlu0 %v8333_v52, %s9048_s1  ;;  %4250 = vst.msk [vmem:[#allocation3 + $0xe] sm:$0x3] %vm9249_vm7, %v4206_v51  ;;  %vm9254_vm7 = vcmask 458145   ;;  %s9256_s1 = smov 100  }
 0x9ff   : > { %4020 = vrot.lane.b32.xlu1 %v8109_v17, %s9144_s0 }
 0xa00   : > { %v4204_v60 = vpop.permute.xlu0 %4203 }
 0xa01   : > { %4249 = vst.msk [vmem:[#allocation3 + $0x6] sm:$0xfc] %vm9250_vm8, %v4204_v60  ;;  %v3758_v28 = vpop.permute.xlu1 %3757  ;;  %vm9255_vm8 = vmmov %vm9253_vm6 }
 0xa02   : > { %4018 = vrot.lane.b32.xlu0 %v8073_v29, %s9144_s0  ;;  %3774 = vst.msk [vmem:[#allocation3 + $0x38] sm:$0xff] %vm9251_vm4, %v3758_v28  ;;  %vm9257_vm4 = vmmov %vm9254_vm7 }
 0xa03   : > { %4024 = vrot.lane.b32.xlu1 %v8117_v55, %s9144_s0 }
 0xa04   : > { %v3756_v44 = vpop.permute.xlu0 %3755 }
 0xa05   : > { %3773 = vst.msk [vmem:[#allocation3 + $0x30] sm:$0xff] %vm9252_vm5, %v3756_v44  ;;  %v3795_v46 = vpop.permute.xlu1 %3794  ;;  %vm9258_vm5 = vcmask 681600  }
 0xa06   : > { %4022 = vrot.lane.b32.xlu0 %v8065_v30, %s9144_s0  ;;  %3833 = vst.msk [vmem:[#allocation3 + $0x27] sm:$0x1] %vm9253_vm6, %v3795_v46  ;;  %vm9259_vm6 = vcmask 687746   ;;  %v8563_v46 = vld [vmem:[#allocation2 + $0x268] sm:$0x3] }
 0xa07   : > { %4432 = vrot.lane.b32.xlu1 %v8394_v53, %s9243_s29 }
 0xa08   : > { %v3793_v29 = vpop.permute.xlu0 %3792 }
 0xa09   : > { %3832 = vst.msk [vmem:[#allocation3 + $0x1f] sm:$0xfe] %vm9254_vm7, %v3793_v29  ;;  %v3799_v17 = vpop.permute.xlu1 %3798  ;;  %vm9260_vm7 = vmmov %vm9258_vm5 }
 0xa0a   : > { %4430 = vrot.lane.b32.xlu0 %v8269_v58, %s9243_s29  ;;  %3835 = vst.msk [vmem:[#allocation3 + $0x2f] sm:$0x1] %vm9255_vm8, %v3799_v17  ;;  %vm9261_vm8 = vmmov %vm9259_vm6 }
 0xa0b   : > { %4461 = vrot.lane.b32.xlu1 %v8178_v49, %s9256_s1 }
 0xa0c   : > { %v3797_v55 = vpop.permute.xlu0 %3796 }
 0xa0d   : > { %3834 = vst.msk [vmem:[#allocation3 + $0x27] sm:$0xfe] %vm9257_vm4, %v3797_v55  ;;  %v4210_v30 = vpop.permute.xlu1 %4209  ;;  %vm9262_vm4 = vcmask 720544  }
 0xa0e   : > { %4459 = vrot.lane.b32.xlu0 %v8145_v11, %s9256_s1  ;;  %4252 = vst.msk [vmem:[#allocation3 + $0x16] sm:$0x3] %vm9258_vm5, %v4210_v30  ;;  %vm9263_vm5 = vmmov %vm9262_vm4 }
 0xa0f   : > { %4465 = vrot.lane.b32.xlu1 %v8186_v6, %s9256_s1 }
 0xa10   : > { %v4208_v50 = vpop.permute.xlu0 %4207 }
 0xa11   : > { %4251 = vst.msk [vmem:[#allocation3 + $0xe] sm:$0xfc] %vm9259_vm6, %v4208_v50  ;;  %v4214_v5 = vpop.permute.xlu1 %4213  ;;  %vm9264_vm6 = vcmask 450976  }
 0xa12   : > { %4463 = vrot.lane.b32.xlu0 %v8137_v19, %s9256_s1  ;;  %4254 = vst.msk [vmem:[#allocation3 + $0x1e] sm:$0x3] %vm9260_vm7, %v4214_v5  ;;  %vm9265_vm7 = vcmask 458145  }
 0xa13   : > { %4028 = vrot.lane.b32.xlu1 %v8249_v63, %s9144_s0 }
 0xa14   : > { %v4212_v25 = vpop.permute.xlu0 %4211 }
 0xa15   : > { %4253 = vst.msk [vmem:[#allocation3 + $0x16] sm:$0xfc] %vm9261_vm8, %v4212_v25  ;;  %v4267_v0 = vpop.permute.xlu1 %4266  ;;  %vm9266_vm8 = vmmov %vm9264_vm6 }
 0xa16   : > { %4026 = vrot.lane.b32.xlu0 %v8205_v14, %s9144_s0  ;;  %4289 = vst.msk [vmem:[#allocation3 + $0x8] sm:$0xff] %vm9262_vm4, %v4267_v0  ;;  %vm9267_vm4 = vmmov %vm9265_vm7 }
 0xa17   : > { %4032 = vrot.lane.b32.xlu1 %v3565_v18, %s9144_s0 }
 0xa18   : > { %v4265_v33 = vpop.permute.xlu0 %4264 }
 0xa19   : > { %4288 = vst.msk [vmem:[#allocation3] sm:$0xff] %vm9263_vm5, %v4265_v33  ;;  %v3803_v9 = vpop.permute.xlu1 %3802  ;;  %vm9268_vm5 = vcmask 484800  }
 0xa1a   : > { %4030 = vrot.lane.b32.xlu0 %v8333_v52, %s9144_s0  ;;  %3837 = vst.msk [vmem:[#allocation3 + $0x37] sm:$0x1] %vm9264_vm6, %v3803_v9  ;;  %vm9269_vm6 = vcmask 490946   ;;  %s9271_s0 = smov 104  }
 0xa1b   : > { %4105 = vrot.lane.b32.xlu1 %v8394_v53, %s9158_s19 }
 0xa1c   : > { %v3801_v63 = vpop.permute.xlu0 %3800 }
 0xa1d   : > { %3836 = vst.msk [vmem:[#allocation3 + $0x2f] sm:$0xfe] %vm9265_vm7, %v3801_v63  ;;  %v3807_v14 = vpop.permute.xlu1 %3806  ;;  %vm9270_vm7 = vmmov %vm9268_vm5 }
 0xa1e   : > { %4103 = vrot.lane.b32.xlu0 %v8269_v58, %s9158_s19  ;;  %3839 = vst.msk [vmem:[#allocation3 + $0x3f] sm:$0x1] %vm9266_vm8, %v3807_v14  ;;  %vm9272_vm8 = vmmov %vm9269_vm6  ;;  %v4085_v14 = vld [vmem:[#allocation2 + $0x270] sm:$0xff] }
 0xa1f   : > { %4469 = vrot.lane.b32.xlu1 %v8313_v41, %s9256_s1 }
 0xa20   : > { %v3805_v40 = vpop.permute.xlu0 %3804 }
 0xa21   : > { %3838 = vst.msk [vmem:[#allocation3 + $0x37] sm:$0xfe] %vm9267_vm4, %v3805_v40  ;;  %v3859_v16 = vpop.permute.xlu1 %3858  ;;  %vm9273_vm4 = vcmask 720544  }
 0xa22   : > { %4467 = vrot.lane.b32.xlu0 %v8269_v58, %s9256_s1  ;;  %3897 = vst.msk [vmem:[#allocation3 + $0x26] sm:$0x3] %vm9268_vm5, %v3859_v16  ;;  %vm9274_vm5 = vmmov %vm9273_vm4 }
 0xa23   : > { %4473 = vrot.lane.b32.xlu1 %v8437_v54, %s9256_s1 }
 0xa24   : > { %v3857_v39 = vpop.permute.xlu0 %3856 }
 0xa25   : > { %3896 = vst.msk [vmem:[#allocation3 + $0x1e] sm:$0xfc] %vm9269_vm6, %v3857_v39  ;;  %v3863_v37 = vpop.permute.xlu1 %3862  ;;  %vm9275_vm6 = vcmask 746176  }
 0xa26   : > { %4471 = vrot.lane.b32.xlu0 %v8394_v53, %s9256_s1  ;;  %3899 = vst.msk [vmem:[#allocation3 + $0x2e] sm:$0x3] %vm9270_vm7, %v3863_v37  ;;  %vm9276_vm7 = vcmask 753345  }
 0xa27   : > { %4525 = vrot.lane.b32.xlu1 %v8178_v49, %s9271_s0 }
 0xa28   : > { %v3861_v34 = vpop.permute.xlu0 %3860 }
 0xa29   : > { %3898 = vst.msk [vmem:[#allocation3 + $0x26] sm:$0xfc] %vm9272_vm8, %v3861_v34  ;;  %v4271_v56 = vpop.permute.xlu1 %4270  ;;  %vm9277_vm8 = vmmov %vm9275_vm6 }
 0xa2a   : > { %4523 = vrot.lane.b32.xlu0 %v8145_v11, %s9271_s0  ;;  %4291 = vst.msk [vmem:[#allocation3 + $0x18] sm:$0xff] %vm9273_vm4, %v4271_v56  ;;  %v8465_v11 = vld [vmem:[#allocation2 + $0x240] sm:$0xff]  ;;  %vm9278_vm4 = vmmov %vm9276_vm7 }
 0xa2b   : > { %4529 = vrot.lane.b32.xlu1 %v8186_v6, %s9271_s0 }
 0xa2c   : > { %v4269_v35 = vpop.permute.xlu0 %4268 }
 0xa2d   : > { %4290 = vst.msk [vmem:[#allocation3 + $0x10] sm:$0xff] %vm9274_vm5, %v4269_v35  ;;  %v4300_v36 = vpop.permute.xlu1 %4299  ;;  %vm9279_vm5 = vcmask 484800  }
 0xa2e   : > { %4527 = vrot.lane.b32.xlu0 %v8137_v19, %s9271_s0  ;;  %4346 = vst.msk [vmem:[#allocation3 + $0x7] sm:$0x1] %vm9275_vm6, %v4300_v36  ;;  %vm9280_vm6 = vcmask 490946   ;;  %v4086_v36 = vld [vmem:[#allocation2 + $0x278] sm:$0x3] }
 0xa2f   : > { %4109 = vrot.lane.b32.xlu1 %v8457_v8, %s9158_s19 }
 0xa30   : > { %v4298_v49 = vpop.permute.xlu0 %4297 }
 0xa31   : > { %4345 = vst.msk [vmem:[#allocation3 - $0x1] sm:$0xfe] %vm9276_vm7, %v4298_v49  ;;  %v4304_v6 = vpop.permute.xlu1 %4303  ;;  %vm9281_vm7 = vmmov %vm9279_vm5 }
 0xa32   : > { %4107 = vrot.lane.b32.xlu0 %v8465_v11, %s9158_s19  ;;  %4348 = vst.msk [vmem:[#allocation3 + $0xf] sm:$0x1] %vm9277_vm8, %v4304_v6  ;;  %vm9282_vm8 = vmmov %vm9280_vm6  ;;  %s4960_s19 = sshll.u32 %s5985_s12, 4  ;;  %s8873_s19 = int_to_ptr.vmem [resolvable:$true] %s4960_s19 }
 0xa33   : > { %4153 = vrot.lane.b32.xlu1 %v8313_v41, %s9171_s18 }
 0xa34   : > { %v4302_v19 = vpop.permute.xlu0 %4301 }
 0xa35   : > { %4347 = vst.msk [vmem:[#allocation3 + $0x7] sm:$0xfe] %vm9278_vm4, %v4302_v19  ;;  %v3867_v43 = vpop.permute.xlu1 %3866  ;;  %vm9283_vm4 = vcmask 523744  }
 0xa36   : > { %4151 = vrot.lane.b32.xlu0 %v8269_v58, %s9171_s18  ;;  %3901 = vst.msk [vmem:[#allocation3 + $0x36] sm:$0x3] %vm9279_vm5, %v3867_v43  ;;  %vm9284_vm5 = vmmov %vm9283_vm4 }
 0xa37   : > { %4157 = vrot.lane.b32.xlu1 %v8437_v54, %s9171_s18 }
 0xa38   : > { %v3865_v26 = vpop.permute.xlu0 %3864 }
 0xa39   : > { %3900 = vst.msk [vmem:[#allocation3 + $0x2e] sm:$0xfc] %vm9280_vm6, %v3865_v26  ;;  %v3871_v3 = vpop.permute.xlu1 %3870  ;;  %vm9285_vm6 = vcmask 746176  }
 0xa3a   : > { %4155 = vrot.lane.b32.xlu0 %v8394_v53, %s9171_s18  ;;  %3903 = vst.msk [vmem:[#allocation3 + $0x3e] sm:$0x3] %vm9281_vm7, %v3871_v3  ;;  %vm9286_vm7 = vcmask 753345  }
 0xa3b   : > { %4533 = vrot.lane.b32.xlu1 %v8313_v41, %s9271_s0 }
 0xa3c   : > { %v3869_v48 = vpop.permute.xlu0 %3868 }
 0xa3d   : > { %3902 = vst.msk [vmem:[#allocation3 + $0x36] sm:$0xfc] %vm9282_vm8, %v3869_v48  ;;  %v3916_v2 = vpop.permute.xlu1 %3915  ;;  %vm9287_vm8 = vmmov %vm9285_vm6 }
 0xa3e   : > { %4531 = vrot.lane.b32.xlu0 %v8269_v58, %s9271_s0  ;;  %3934 = vst.msk [vmem:[#allocation3 + $0x28] sm:$0xff] %vm9283_vm4, %v3916_v2  ;;  %vm9288_vm4 = vmmov %vm9286_vm7 }
 0xa3f   : > { %4537 = vrot.lane.b32.xlu1 %v8437_v54, %s9271_s0 }
 0xa40   : > { %v3914_v4 = vpop.permute.xlu0 %3913 }
 0xa41   : > { %3933 = vst.msk [vmem:[#allocation3 + $0x20] sm:$0xff] %vm9284_vm5, %v3914_v4  ;;  %v4308_v52 = vpop.permute.xlu1 %4307 }
 0xa42   : > { %4535 = vrot.lane.b32.xlu0 %v8394_v53, %s9271_s0  ;;  %4350 = vst.msk [vmem:[#allocation3 + $0x17] sm:$0x1] %vm9285_vm6, %v4308_v52  ;;  %vm9289_vm6 = vmmov %vm9284_vm5 }
 0xa43   : > { %4161 = vrot.lane.b32.xlu1 %v8491_v45, %s9171_s18 }
 0xa44   : > { %v4306_v15 = vpop.permute.xlu0 %4305 }
 0xa45   : > { %4349 = vst.msk [vmem:[#allocation3 + $0xf] sm:$0xfe] %vm9286_vm7, %v4306_v15  ;;  %v4312_v32 = vpop.permute.xlu1 %4311  ;;  %vm9290_vm7 = vcmask 549376  }
 0xa46   : > { %4159 = vrot.lane.b32.xlu0 %v8465_v11, %s9171_s18  ;;  %4352 = vst.msk [vmem:[#allocation3 + $0x1f] sm:$0x1] %vm9287_vm8, %v4312_v32  ;;  %vm9291_vm8 = vcmask 556545  }
 0xa47   : > { %4165 = vrot.lane.b32.xlu1 %v8499_v57, %s9171_s18 }
 0xa48   : > { %v4310_v31 = vpop.permute.xlu0 %4309 }
 0xa49   : > { %4351 = vst.msk [vmem:[#allocation3 + $0x17] sm:$0xfe] %vm9288_vm4, %v4310_v31  ;;  %v4364_v38 = vpop.permute.xlu1 %4363  ;;  %vm9292_vm4 = vmmov %vm9290_vm7 }
 0xa4a   : > { %4163 = vrot.lane.b32.xlu0 %v8457_v8, %s9171_s18  ;;  %4410 = vst.msk [vmem:[#allocation3 + $0x6] sm:$0x3] %vm2440_vm14, %v4364_v38 }
 0xa4b   : > { %4217 = vrot.lane.b32.xlu1 %v8313_v41, %s5554_s21 }
 0xa4c   : > { %v4362_v13 = vpop.permute.xlu0 %4361 }
 0xa4d   : > { %4409 = vst.msk [vmem:[#allocation3 - $0x2] sm:$0xfc] %vm2438_vm13, %v4362_v13  ;;  %v4368_v42 = vpop.permute.xlu1 %4367 }
 0xa4e   : > { %4215 = vrot.lane.b32.xlu0 %v8269_v58, %s5554_s21  ;;  %4412 = vst.msk [vmem:[#allocation3 + $0xe] sm:$0x3] %vm2440_vm14, %v4368_v42 }
 0xa4f   : > { %4221 = vrot.lane.b32.xlu1 %v8437_v54, %s5554_s21 }
 0xa50   : > { %v4366_v61 = vpop.permute.xlu0 %4365 }
 0xa51   : > { %4411 = vst.msk [vmem:[#allocation3 + $0x6] sm:$0xfc] %vm2438_vm13, %v4366_v61  ;;  %v3920_v24 = vpop.permute.xlu1 %3919 }
 0xa52   : > { %4219 = vrot.lane.b32.xlu0 %v8394_v53, %s5554_s21  ;;  %3936 = vst.msk [vmem:[#allocation3 + $0x38] sm:$0xff] %vm9284_vm5, %v3920_v24  ;;  %vm9293_vm5 = vmmov %vm9291_vm8 }
 0xa53   : > { %4225 = vrot.lane.b32.xlu1 %v8491_v45, %s5554_s21 }
 0xa54   : > { %v3918_v41 = vpop.permute.xlu0 %3917 }
 0xa55   : > { %3935 = vst.msk [vmem:[#allocation3 + $0x30] sm:$0xff] %vm9289_vm6, %v3918_v41  ;;  %v3957_v58 = vpop.permute.xlu1 %3956  ;;  %vm9294_vm6 = vmmov %vm9292_vm4 }
 0xa56   : > { %4223 = vrot.lane.b32.xlu0 %v8465_v11, %s5554_s21  ;;  %3995 = vst.msk [vmem:[#allocation3 + $0x27] sm:$0x1] %vm9290_vm7, %v3957_v58  ;;  %vm9295_vm7 = vmmov %vm9293_vm5 }
 0xa57   : > { %4229 = vrot.lane.b32.xlu1 %v8499_v57, %s5554_s21 }
 0xa58   : > { %v3955_v27 = vpop.permute.xlu0 %3954 }
 0xa59   : > { %3994 = vst.msk [vmem:[#allocation3 + $0x1f] sm:$0xfe] %vm9291_vm8, %v3955_v27  ;;  %v3961_v1 = vpop.permute.xlu1 %3960  ;;  %vm9296_vm8 = vmmov %vm9292_vm4 }
 0xa5a   : > { %4227 = vrot.lane.b32.xlu0 %v8457_v8, %s5554_s21  ;;  %3997 = vst.msk [vmem:[#allocation3 + $0x2f] sm:$0x1] %vm9292_vm4, %v3961_v1  ;;  %vm9297_vm4 = vmmov %vm9293_vm5 }
 0xa5b   : > { %4274 = vrot.lane.b32.xlu1 %v8465_v11, %s9200_s30 }
 0xa5c   : > { %v3959_v7 = vpop.permute.xlu0 %3958 }
 0xa5d   : > { %3996 = vst.msk [vmem:[#allocation3 + $0x27] sm:$0xfe] %vm9293_vm5, %v3959_v7  ;;  %v4372_v59 = vpop.permute.xlu1 %4371  ;;  %vm9298_vm5 = vcmask 583200  }
 0xa5e   : > { %4272 = vrot.lane.b32.xlu0 %v8394_v53, %s9200_s30  ;;  %4414 = vst.msk [vmem:[#allocation3 + $0x16] sm:$0x3] %vm2440_vm14, %v4372_v59 }
 0xa5f   : > { %4278 = vrot.lane.b32.xlu1 %v8537_v12, %s9200_s30 }
 0xa60   : > { %v4370_v18 = vpop.permute.xlu0 %4369 }
 0xa61   : > { %4413 = vst.msk [vmem:[#allocation3 + $0xe] sm:$0xfc] %vm2438_vm13, %v4370_v18  ;;  %v4376_v47 = vpop.permute.xlu1 %4375 }
 0xa62   : > { %4276 = vrot.lane.b32.xlu0 %v8457_v8, %s9200_s30  ;;  %4416 = vst.msk [vmem:[#allocation3 + $0x1e] sm:$0x3] %vm2440_vm14, %v4376_v47 }
 0xa63   : > { %4315 = vrot.lane.b32.xlu1 %v8437_v54, %s9213_s23 }
 0xa64   : > { %v4374_v62 = vpop.permute.xlu0 %4373 }
 0xa65   : > { %4415 = vst.msk [vmem:[#allocation3 + $0x16] sm:$0xfc] %vm2438_vm13, %v4374_v62  ;;  %v4429_v51 = vpop.permute.xlu1 %4428 }
 0xa66   : > { %4313 = vrot.lane.b32.xlu0 %v8394_v53, %s9213_s23  ;;  %4451 = vst.msk [vmem:[#allocation3 + $0x8] sm:$0xff] %vm2481_vm1, %v4429_v51 }
 0xa67   : > { %4319 = vrot.lane.b32.xlu1 %v8491_v45, %s9213_s23 }
 0xa68   : > { %v4427_v60 = vpop.permute.xlu0 %4426 }
 0xa69   : > { %4450 = vst.msk [vmem:[#allocation3] sm:$0xff] %vm2481_vm1, %v4427_v60  ;;  %v3965_v28 = vpop.permute.xlu1 %3964 }
 0xa6a   : > { %4317 = vrot.lane.b32.xlu0 %v8465_v11, %s9213_s23  ;;  %3999 = vst.msk [vmem:[#allocation3 + $0x37] sm:$0x1] %vm9294_vm6, %v3965_v28  ;;  %vm9299_vm6 = vcmask 589346  }
 0xa6b   : > { %4323 = vrot.lane.b32.xlu1 %v8499_v57, %s9213_s23 }
 0xa6c   : > { %v3963_v44 = vpop.permute.xlu0 %3962 }
 0xa6d   : > { %3998 = vst.msk [vmem:[#allocation3 + $0x2f] sm:$0xfe] %vm9295_vm7, %v3963_v44  ;;  %v3969_v29 = vpop.permute.xlu1 %3968  ;;  %vm9300_vm7 = vmmov %vm9298_vm5 }
 0xa6e   : > { %4321 = vrot.lane.b32.xlu0 %v8457_v8, %s9213_s23  ;;  %4001 = vst.msk [vmem:[#allocation3 + $0x3f] sm:$0x1] %vm9296_vm8, %v3969_v29  ;;  %vm9301_vm8 = vmmov %vm9299_vm6 }
 0xa6f   : > { %4327 = vrot.lane.b32.xlu1 %v8563_v46, %s9213_s23 }
 0xa70   : > { %v3967_v17 = vpop.permute.xlu0 %3966 }
 0xa71   : > { %4000 = vst.msk [vmem:[#allocation3 + $0x37] sm:$0xfe] %vm9297_vm4, %v3967_v17  ;;  %v4021_v55 = vpop.permute.xlu1 %4020  ;;  %vm9302_vm4 = vcmask 844576  }
 0xa72   : > { %4325 = vrot.lane.b32.xlu0 %v8537_v12, %s9213_s23  ;;  %4059 = vst.msk [vmem:[#allocation3 + $0x26] sm:$0x3] %vm9298_vm5, %v4021_v55  ;;  %vm9303_vm5 = vcmask 851745  }
 0xa73   : > { %4379 = vrot.lane.b32.xlu1 %v8437_v54, %s9228_s28 }
 0xa74   : > { %v4019_v30 = vpop.permute.xlu0 %4018 }
 0xa75   : > { %4058 = vst.msk [vmem:[#allocation3 + $0x1e] sm:$0xfc] %vm9299_vm6, %v4019_v30  ;;  %v4025_v50 = vpop.permute.xlu1 %4024  ;;  %vm9304_vm6 = vmmov %vm9302_vm4 }
 0xa76   : > { %4377 = vrot.lane.b32.xlu0 %v8394_v53, %s9228_s28  ;;  %4061 = vst.msk [vmem:[#allocation3 + $0x2e] sm:$0x3] %vm9300_vm7, %v4025_v50  ;;  %vm9305_vm7 = vmmov %vm9303_vm5 }
 0xa77   : > { %4383 = vrot.lane.b32.xlu1 %v8491_v45, %s9228_s28 }
 0xa78   : > { %v4023_v5 = vpop.permute.xlu0 %4022 }
 0xa79   : > { %4060 = vst.msk [vmem:[#allocation3 + $0x26] sm:$0xfc] %vm9301_vm8, %v4023_v5  ;;  %v4433_v25 = vpop.permute.xlu1 %4432  ;;  %vm9306_vm8 = vcmask 583200  }
 0xa7a   : > { %4381 = vrot.lane.b32.xlu0 %v8465_v11, %s9228_s28  ;;  %4453 = vst.msk [vmem:[#allocation3 + $0x18] sm:$0xff] %vm2481_vm1, %v4433_v25 }
 0xa7b   : > { %4387 = vrot.lane.b32.xlu1 %v8499_v57, %s9228_s28 }
 0xa7c   : > { %v4431_v0 = vpop.permute.xlu0 %4430 }
 0xa7d   : > { %4452 = vst.msk [vmem:[#allocation3 + $0x10] sm:$0xff] %vm2481_vm1, %v4431_v0  ;;  %v4462_v53 = vpop.permute.xlu1 %4461 }
 0xa7e   : > { %4385 = vrot.lane.b32.xlu0 %v8457_v8, %s9228_s28  ;;  %4508 = vst.msk [vmem:[#allocation3 + $0x7] sm:$0x1] %vm9302_vm4, %v4462_v53  ;;  %vm9307_vm4 = vcmask 589346  }
 0xa7f   : > { %4391 = vrot.lane.b32.xlu1 %v8563_v46, %s9228_s28 }
 0xa80   : > { %v4460_v33 = vpop.permute.xlu0 %4459 }
 0xa81   : > { %4507 = vst.msk [vmem:[#allocation3 - $0x1] sm:$0xfe] %vm9303_vm5, %v4460_v33  ;;  %v4466_v9 = vpop.permute.xlu1 %4465  ;;  %vm9308_vm5 = vmmov %vm9306_vm8 }
 0xa82   : > { %4389 = vrot.lane.b32.xlu0 %v8537_v12, %s9228_s28  ;;  %4510 = vst.msk [vmem:[#allocation3 + $0xf] sm:$0x1] %vm9304_vm6, %v4466_v9  ;;  %vm9309_vm6 = vmmov %vm9307_vm4 }
 0xa83   : > { %4436 = vrot.lane.b32.xlu1 %v8457_v8, %s9243_s29 }
 0xa84   : > { %v4464_v63 = vpop.permute.xlu0 %4463 }
 0xa85   : > { %4509 = vst.msk [vmem:[#allocation3 + $0x7] sm:$0xfe] %vm9305_vm7, %v4464_v63  ;;  %v4029_v40 = vpop.permute.xlu1 %4028  ;;  %vm9310_vm7 = vcmask 622144  }
 0xa86   : > { %4434 = vrot.lane.b32.xlu0 %v8465_v11, %s9243_s29  ;;  %4063 = vst.msk [vmem:[#allocation3 + $0x36] sm:$0x3] %vm9306_vm8, %v4029_v40  ;;  %vm9311_vm8 = vmmov %vm9310_vm7 }
 0xa87   : > { %4440 = vrot.lane.b32.xlu1 %v4085_v14, %s9243_s29 }
 0xa88   : > { %v4027_v54 = vpop.permute.xlu0 %4026 }
 0xa89   : > { %4062 = vst.msk [vmem:[#allocation3 + $0x2e] sm:$0xfc] %vm9307_vm4, %v4027_v54  ;;  %v4033_v16 = vpop.permute.xlu1 %4032  ;;  %vm9312_vm4 = vcmask 844576  }
 0xa8a   : > { %4438 = vrot.lane.b32.xlu0 %v8537_v12, %s9243_s29  ;;  %4065 = vst.msk [vmem:[#allocation3 + $0x3e] sm:$0x3] %vm9308_vm5, %v4033_v16  ;;  %vm9313_vm5 = vcmask 851745  }
 0xa8b   : > { %4477 = vrot.lane.b32.xlu1 %v8491_v45, %s9256_s1 }
 0xa8c   : > { %v4031_v39 = vpop.permute.xlu0 %4030 }
 0xa8d   : > { %4064 = vst.msk [vmem:[#allocation3 + $0x36] sm:$0xfc] %vm9309_vm6, %v4031_v39  ;;  %v4106_v37 = vpop.permute.xlu1 %4105  ;;  %vm9314_vm6 = vmmov %vm9312_vm4 }
 0xa8e   : > { %4475 = vrot.lane.b32.xlu0 %v8465_v11, %s9256_s1  ;;  %4124 = vst.msk [vmem:[#allocation3 + $0x28] sm:$0xff] %vm9310_vm7, %v4106_v37  ;;  %vm9315_vm7 = vmmov %vm9313_vm5 }
 0xa8f   : > { %4481 = vrot.lane.b32.xlu1 %v8499_v57, %s9256_s1 }
 0xa90   : > { %v4104_v34 = vpop.permute.xlu0 %4103 }
 0xa91   : > { %4123 = vst.msk [vmem:[#allocation3 + $0x20] sm:$0xff] %vm9311_vm8, %v4104_v34  ;;  %v4470_v56 = vpop.permute.xlu1 %4469  ;;  %vm9316_vm8 = vcmask 878400  }
 0xa92   : > { %4479 = vrot.lane.b32.xlu0 %v8457_v8, %s9256_s1  ;;  %4512 = vst.msk [vmem:[#allocation3 + $0x17] sm:$0x1] %vm9312_vm4, %v4470_v56  ;;  %vm9317_vm4 = vcmask 884546  }
 0xa93   : > { %4485 = vrot.lane.b32.xlu1 %v8563_v46, %s9256_s1 }
 0xa94   : > { %v4468_v35 = vpop.permute.xlu0 %4467 }
 0xa95   : > { %4511 = vst.msk [vmem:[#allocation3 + $0xf] sm:$0xfe] %vm9313_vm5, %v4468_v35  ;;  %v4474_v49 = vpop.permute.xlu1 %4473  ;;  %vm9318_vm5 = vmmov %vm9316_vm8 }
 0xa96   : > { %4483 = vrot.lane.b32.xlu0 %v8537_v12, %s9256_s1  ;;  %4514 = vst.msk [vmem:[#allocation3 + $0x1f] sm:$0x1] %vm9314_vm6, %v4474_v49  ;;  %vm9319_vm6 = vmmov %vm9317_vm4 }
 0xa97   : > { %4489 = vrot.lane.b32.xlu1 %v4086_v36, %s9256_s1 }
 0xa98   : > { %v4472_v6 = vpop.permute.xlu0 %4471 }
 0xa99   : > { %4513 = vst.msk [vmem:[#allocation3 + $0x17] sm:$0xfe] %vm9315_vm7, %v4472_v6  ;;  %v4526_v19 = vpop.permute.xlu1 %4525  ;;  %vm9320_vm7 = vcmask 622144  }
 0xa9a   : > { %4487 = vrot.lane.b32.xlu0 %v4085_v14, %s9256_s1  ;;  %4572 = vst.msk [vmem:[#allocation3 + $0x6] sm:$0x3] %vm9316_vm8, %v4526_v19  ;;  %vm9321_vm8 = vmmov %vm9320_vm7  ;;  %s9400_s1 = smov 64  }
 0xa9b   : > { %4541 = vrot.lane.b32.xlu1 %v8491_v45, %s9271_s0 }
 0xa9c   : > { %v4524_v43 = vpop.permute.xlu0 %4523 }
 0xa9d   : > { %4571 = vst.msk [vmem:[#allocation3 - $0x2] sm:$0xfc] %vm9317_vm4, %v4524_v43  ;;  %v4530_v26 = vpop.permute.xlu1 %4529  ;;  %vm9322_vm4 = vcmask 647776  }
 0xa9e   : > { %4539 = vrot.lane.b32.xlu0 %v8465_v11, %s9271_s0  ;;  %4574 = vst.msk [vmem:[#allocation3 + $0xe] sm:$0x3] %vm9318_vm5, %v4530_v26  ;;  %vm9323_vm5 = vcmask 654945  }
 0xa9f   : > { %4545 = vrot.lane.b32.xlu1 %v8499_v57, %s9271_s0 }
 0xaa0   : > { %v4528_v3 = vpop.permute.xlu0 %4527 }
 0xaa1   : > { %4573 = vst.msk [vmem:[#allocation3 + $0x6] sm:$0xfc] %vm9319_vm6, %v4528_v3  ;;  %v4110_v48 = vpop.permute.xlu1 %4109  ;;  %vm9324_vm6 = vmmov %vm9322_vm4 }
 0xaa2   : > { %4543 = vrot.lane.b32.xlu0 %v8457_v8, %s9271_s0  ;;  %4126 = vst.msk [vmem:[#allocation3 + $0x38] sm:$0xff] %vm9320_vm7, %v4110_v48  ;;  %vm9325_vm7 = vcmask 883712   ;;  %vm9331_vm3 = vmmov %vm9324_vm6 }
 0xaa3   : > { %4549 = vrot.lane.b32.xlu1 %v8563_v46, %s9271_s0 }
 0xaa4   : > { %v4108_v2 = vpop.permute.xlu0 %4107  ;;  %v4587_v45 = vld [vmem:[#allocation3] sm:$0xff] }
 0xaa5   : > { %4125 = vst.msk [vmem:[#allocation3 + $0x30] sm:$0xff] %vm9321_vm8, %v4108_v2  ;;  %v4154_v11 = vpop.permute.xlu1 %4153  ;;  %vm9326_vm8 = vmmov %vm9323_vm5 }
 0xaa6   : > { %4547 = vrot.lane.b32.xlu0 %v8537_v12, %s9271_s0  ;;  %4192 = vst.msk [vmem:[#allocation3 + $0x27] sm:$0x1] %vm9322_vm4, %v4154_v11  ;;  %vm9327_vm4 = vcmask 878400  }
 0xaa7   : > { %4553 = vrot.lane.b32.xlu1 %v4086_v36, %s9271_s0  ;;  %vm9329_vm11 = vmmov %vm9327_vm4 }
 0xaa8   : > { %v4152_v4 = vpop.permute.xlu0 %4151  ;;  %v4588_v52 = vld [vmem:[#allocation3 + $0x8] sm:$0xff] }
 0xaa9   : > { %4191 = vst.msk [vmem:[#allocation3 + $0x1f] sm:$0xfe] %vm9323_vm5, %v4152_v4  ;;  %v4595_v8 = vpack.c.bf16 %v4588_v52, %v4587_v45  ;;  %v4158_v15 = vpop.permute.xlu1 %4157  ;;  %vm9330_vm5 = vmmov %vm9328_vm12 }
 0xaaa   : > { %4551 = vrot.lane.b32.xlu0 %v4085_v14, %s9271_s0  ;;  %4194 = vst.msk [vmem:[#allocation3 + $0x2f] sm:$0x1] %vm9324_vm6, %v4158_v15  ;;  %vm9332_vm6 = vmmov %vm9326_vm8  ;;  %s5562_s0 = smov [#allocation4]  }
 0xaab   : > { %5309 = vmatprep.mubr.msk.bf16.mxu1 %vm9325_vm7, %v4595_v8  ;;  %vm9333_vm7 = vmmov %vm9331_vm3 }
 0xaac   : > { %v4156_v57 = vpop.permute.xlu0 %4155 }
 0xaad   : > { %4193 = vst.msk [vmem:[#allocation3 + $0x27] sm:$0xfe] %vm9326_vm8, %v4156_v57  ;;  %v4534_v32 = vpop.permute.xlu1 %4533  ;;  %vm9334_vm8 = vmmov %vm9332_vm6 }
 0xaae   : > { %4576 = vst.msk [vmem:[#allocation3 + $0x16] sm:$0x3] %vm9327_vm4, %v4534_v32 }
 0xab0   : > { %v4532_v31 = vpop.permute.xlu0 %4531 }
 0xab1   : > { %4575 = vst.msk [vmem:[#allocation3 + $0xe] sm:$0xfc] %vm9328_vm12, %v4532_v31  ;;  %v4538_v38 = vpop.permute.xlu1 %4537  ;;  %vm9336_vm12 = vcmask 883712  }
 0xab2   : > { %4578 = vst.msk [vmem:[#allocation3 + $0x1e] sm:$0x3] %vm9329_vm11, %v4538_v38  ;;  %vm9335_vm11 = vcmask 681600  }
 0xab3   : > { %vm9338_vm4 = vmmov %vm9335_vm11 }
 0xab4   : > { %v4536_v13 = vpop.permute.xlu0 %4535 }
 0xab5   : > { %4577 = vst.msk [vmem:[#allocation3 + $0x16] sm:$0xfc] %vm9330_vm5, %v4536_v13  ;;  %v4162_v42 = vpop.permute.xlu1 %4161 }
 0xab6   : > { %4196 = vst.msk [vmem:[#allocation3 + $0x37] sm:$0x1] %vm9331_vm3, %v4162_v42  ;;  %vm9337_vm3 = vcmask 687746  }
 0xab7   : > { %vm9339_vm5 = vmmov %vm9337_vm3 }
 0xab8   : > { %v4160_v61 = vpop.permute.xlu0 %4159  ;;  %v4589_v58 = vld [vmem:[#allocation3 + $0x10] sm:$0xff] }
 0xab9   : > { %4195 = vst.msk [vmem:[#allocation3 + $0x2f] sm:$0xfe] %vm9332_vm6, %v4160_v61  ;;  %v4166_v24 = vpop.permute.xlu1 %4165  ;;  %vm9340_vm6 = vmmov %vm9338_vm4 }
 0xaba   : > { %4198 = vst.msk [vmem:[#allocation3 + $0x3f] sm:$0x1] %vm9333_vm7, %v4166_v24  ;;  %vm9341_vm7 = vmmov %vm9337_vm3 }
 0xabc   : > { %v4164_v41 = vpop.permute.xlu0 %4163  ;;  %v4590_v27 = vld [vmem:[#allocation3 + $0x18] sm:$0xff] }
 0xabd   : > { %4197 = vst.msk [vmem:[#allocation3 + $0x37] sm:$0xfe] %vm9334_vm8, %v4164_v41  ;;  %v4596_v1 = vpack.c.bf16 %v4590_v27, %v4589_v58  ;;  %v4218_v7 = vpop.permute.xlu1 %4217  ;;  %vm9342_vm8 = vmmov %vm9338_vm4 }
 0xabe   : > { %4256 = vst.msk [vmem:[#allocation3 + $0x26] sm:$0x3] %vm9335_vm11, %v4218_v7  ;;  %vm9343_vm11 = vmmov %vm9337_vm3 }
 0xabf   : > { %5310 = vmatmul.mubr.msk.bf16.vlgmr.msra.gmra.mrb[8].mxu1 %vm9336_vm12, %v4596_v1  ;;  %vm9344_vm12 = vcmask 720544  }
 0xac0   : > { %v4216_v12 = vpop.permute.xlu0 %4215  ;;  %5332 = vmatpush3.bf16.msra.mxu1 %v7374_v10 }
 0xac1   : > { %4255 = vst.msk [vmem:[#allocation3 + $0x1e] sm:$0xfc] %vm9337_vm3, %v4216_v12  ;;  %v4222_v59 = vpop.permute.xlu1 %4221  ;;  %vm9345_vm3 = vmmov %vm9344_vm12 }
 0xac2   : > { %4258 = vst.msk [vmem:[#allocation3 + $0x2e] sm:$0x3] %vm9338_vm4, %v4222_v59  ;;  %vm9346_vm4 = vmmov %vm9345_vm3 }
 0xac4   : > { %v4220_v18 = vpop.permute.xlu0 %4219 }
 0xac5   : > { %4257 = vst.msk [vmem:[#allocation3 + $0x26] sm:$0xfc] %vm9339_vm5, %v4220_v18  ;;  %v4226_v47 = vpop.permute.xlu1 %4225  ;;  %vm9347_vm5 = vmmov %vm9345_vm3 }
 0xac6   : > { %4260 = vst.msk [vmem:[#allocation3 + $0x36] sm:$0x3] %vm9340_vm6, %v4226_v47  ;;  %vm9348_vm6 = vcmask 746176  }
 0xac8   : > { %v4224_v62 = vpop.permute.xlu0 %4223 }
 0xac9   : > { %4259 = vst.msk [vmem:[#allocation3 + $0x2e] sm:$0xfc] %vm9341_vm7, %v4224_v62  ;;  %v4230_v51 = vpop.permute.xlu1 %4229  ;;  %vm9349_vm7 = vcmask 753345  }
 0xaca   : > { %4262 = vst.msk [vmem:[#allocation3 + $0x3e] sm:$0x3] %vm9342_vm8, %v4230_v51  ;;  %vm9350_vm8 = vmmov %vm9348_vm6 }
 0xacc   : > { %v4228_v60 = vpop.permute.xlu0 %4227 }
 0xacd   : > { %4261 = vst.msk [vmem:[#allocation3 + $0x36] sm:$0xfc] %vm9343_vm11, %v4228_v60  ;;  %v4275_v10 = vpop.permute.xlu1 %4274  ;;  %vm9351_vm11 = vmmov %vm9349_vm7 }
 0xace   : > { %4293 = vst.msk [vmem:[#allocation3 + $0x28] sm:$0xff] %vm9344_vm12, %v4275_v10  ;;  %vm9352_vm12 = vmmov %vm9348_vm6 }
 0xad0   : > { %v4273_v28 = vpop.permute.xlu0 %4272 }
 0xad1   : > { %4292 = vst.msk [vmem:[#allocation3 + $0x20] sm:$0xff] %vm9345_vm3, %v4273_v28  ;;  %v4279_v44 = vpop.permute.xlu1 %4278  ;;  %vm9353_vm3 = vmmov %vm9349_vm7 }
 0xad2   : > { %4295 = vst.msk [vmem:[#allocation3 + $0x38] sm:$0xff] %vm9346_vm4, %v4279_v44  ;;  %vm9354_vm4 = vmmov %vm9348_vm6 }
 0xad4   : > { %v4277_v46 = vpop.permute.xlu0 %4276 }
 0xad5   : > { %4294 = vst.msk [vmem:[#allocation3 + $0x30] sm:$0xff] %vm9347_vm5, %v4277_v46  ;;  %v4316_v29 = vpop.permute.xlu1 %4315  ;;  %vm9355_vm5 = vmmov %vm9353_vm3 }
 0xad6   : > { %4354 = vst.msk [vmem:[#allocation3 + $0x27] sm:$0x1] %vm9348_vm6, %v4316_v29  ;;  %vm9356_vm6 = vcmask 844576  }
 0xad8   : > { %v4314_v17 = vpop.permute.xlu0 %4313 }
 0xad9   : > { %4353 = vst.msk [vmem:[#allocation3 + $0x1f] sm:$0xfe] %vm9349_vm7, %v4314_v17  ;;  %v4320_v55 = vpop.permute.xlu1 %4319 }
 0xada   : > { %4356 = vst.msk [vmem:[#allocation3 + $0x2f] sm:$0x1] %vm9350_vm8, %v4320_v55  ;;  %vm9360_vm8 = vmmov %vm9356_vm6 }
 0xadc   : > { %v4318_v30 = vpop.permute.xlu0 %4317 }
 0xadd   : > { %4355 = vst.msk [vmem:[#allocation3 + $0x27] sm:$0xfe] %vm9351_vm11, %v4318_v30  ;;  %v4324_v50 = vpop.permute.xlu1 %4323 }
 0xade   : > { %4358 = vst.msk [vmem:[#allocation3 + $0x37] sm:$0x1] %vm9352_vm12, %v4324_v50 }
 0xae0   : > { %v4322_v5 = vpop.permute.xlu0 %4321 }
 0xae1   : > { %4357 = vst.msk [vmem:[#allocation3 + $0x2f] sm:$0xfe] %vm9353_vm3, %v4322_v5  ;;  %v4328_v25 = vpop.permute.xlu1 %4327  ;;  %vm9364_vm3 = vcmask 878400  }
 0xae2   : > { %4360 = vst.msk [vmem:[#allocation3 + $0x3f] sm:$0x1] %vm9354_vm4, %v4328_v25  ;;  %vm9365_vm4 = vcmask 884546  }
 0xae4   : > { %v4326_v0 = vpop.permute.xlu0 %4325 }
 0xae5   : > { %4359 = vst.msk [vmem:[#allocation3 + $0x37] sm:$0xfe] %vm9355_vm5, %v4326_v0  ;;  %v4380_v53 = vpop.permute.xlu1 %4379  ;;  %vm9366_vm5 = vmmov %vm9364_vm3 }
 0xae6   : > { %4418 = vst.msk [vmem:[#allocation3 + $0x26] sm:$0x3] %vm2440_vm14, %v4380_v53 }
 0xae8   : > { %v4378_v33 = vpop.permute.xlu0 %4377 }
 0xae9   : > { %4417 = vst.msk [vmem:[#allocation3 + $0x1e] sm:$0xfc] %vm2438_vm13, %v4378_v33  ;;  %v4384_v9 = vpop.permute.xlu1 %4383 }
 0xaea   : > { %4420 = vst.msk [vmem:[#allocation3 + $0x2e] sm:$0x3] %vm2440_vm14, %v4384_v9 }
 0xaec   : > { %v4382_v63 = vpop.permute.xlu0 %4381 }
 0xaed   : > { %4419 = vst.msk [vmem:[#allocation3 + $0x26] sm:$0xfc] %vm2438_vm13, %v4382_v63  ;;  %v4388_v14 = vpop.permute.xlu1 %4387 }
 0xaee   : > { %4422 = vst.msk [vmem:[#allocation3 + $0x36] sm:$0x3] %vm2440_vm14, %v4388_v14 }
 0xaf0   : > { %v4386_v40 = vpop.permute.xlu0 %4385 }
 0xaf1   : > { %4421 = vst.msk [vmem:[#allocation3 + $0x2e] sm:$0xfc] %vm2438_vm13, %v4386_v40  ;;  %v4392_v54 = vpop.permute.xlu1 %4391 }
 0xaf2   : > { %4424 = vst.msk [vmem:[#allocation3 + $0x3e] sm:$0x3] %vm2440_vm14, %v4392_v54  ;;  %vm9357_vm14 = vcmask 851745  }
 0xaf3   : > { %vm9359_vm7 = vmmov %vm9357_vm14 }
 0xaf4   : > { %v4390_v16 = vpop.permute.xlu0 %4389  ;;  %vm9361_vm11 = vmmov %vm9359_vm7 }
 0xaf5   : > { %4423 = vst.msk [vmem:[#allocation3 + $0x36] sm:$0xfc] %vm2438_vm13, %v4390_v16  ;;  %v4437_v39 = vpop.permute.xlu1 %4436  ;;  %vm9358_vm13 = vmmov %vm9356_vm6 }
 0xaf6   : > { %4455 = vst.msk [vmem:[#allocation3 + $0x28] sm:$0xff] %vm2481_vm1, %v4437_v39  ;;  %vm9363_vm12 = vmmov %vm9359_vm7 }
 0xaf8   : > { %v4435_v37 = vpop.permute.xlu0 %4434 }
 0xaf9   : > { %4454 = vst.msk [vmem:[#allocation3 + $0x20] sm:$0xff] %vm2481_vm1, %v4435_v37  ;;  %v4441_v34 = vpop.permute.xlu1 %4440 }
 0xafa   : > { %4457 = vst.msk [vmem:[#allocation3 + $0x38] sm:$0xff] %vm2481_vm1, %v4441_v34 }
 0xafc   : > { %v4439_v56 = vpop.permute.xlu0 %4438 }
 0xafd   : > { %4456 = vst.msk [vmem:[#allocation3 + $0x30] sm:$0xff] %vm2481_vm1, %v4439_v56  ;;  %v4478_v35 = vpop.permute.xlu1 %4477  ;;  %vm9362_vm1 = vmmov %vm9356_vm6 }
 0xafe   : > { %4516 = vst.msk [vmem:[#allocation3 + $0x27] sm:$0x1] %vm9356_vm6, %v4478_v35  ;;  %vm9367_vm6 = vmmov %vm9365_vm4  ;;  %v5139_v35 = vld [vmem:[%s6025_s22 + $0x50] sm:$0xff] }
 0xb00   : > { %v4476_v36 = vpop.permute.xlu0 %4475 }
 0xb01   : > { %4515 = vst.msk [vmem:[#allocation3 + $0x1f] sm:$0xfe] %vm9357_vm14, %v4476_v36  ;;  %v4482_v49 = vpop.permute.xlu1 %4481  ;;  %vm9368_vm14 = vmmov %vm9364_vm3 }
 0xb02   : > { %4518 = vst.msk [vmem:[#allocation3 + $0x2f] sm:$0x1] %vm9358_vm13, %v4482_v49  ;;  %vm9369_vm13 = vmmov %vm9365_vm4 }
 0xb04   : > { %v4480_v6 = vpop.permute.xlu0 %4479 }
 0xb05   : > { %4517 = vst.msk [vmem:[#allocation3 + $0x27] sm:$0xfe] %vm9359_vm7, %v4480_v6  ;;  %v4486_v19 = vpop.permute.xlu1 %4485  ;;  %vm9370_vm7 = vmmov %vm9364_vm3 }
 0xb06   : > { %4520 = vst.msk [vmem:[#allocation3 + $0x37] sm:$0x1] %vm9360_vm8, %v4486_v19  ;;  %vm9371_vm8 = vmmov %vm9365_vm4 }
 0xb08   : > { %v4484_v43 = vpop.permute.xlu0 %4483 }
 0xb09   : > { %4519 = vst.msk [vmem:[#allocation3 + $0x2f] sm:$0xfe] %vm9361_vm11, %v4484_v43  ;;  %v4490_v26 = vpop.permute.xlu1 %4489  ;;  %vm9372_vm11 = vcmask 883712  }
 0xb0a   : > { %4522 = vst.msk [vmem:[#allocation3 + $0x3f] sm:$0x1] %vm9362_vm1, %v4490_v26  ;;  %vm9373_vm1 = vmmov %vm9372_vm11  ;;  %v5140_v26 = vld [vmem:[%s6025_s22 + $0x58] sm:$0xff] }
 0xb0c   : > { %v4488_v3 = vpop.permute.xlu0 %4487 }
 0xb0d   : > { %4521 = vst.msk [vmem:[#allocation3 + $0x37] sm:$0xfe] %vm9363_vm12, %v4488_v3  ;;  %v4542_v48 = vpop.permute.xlu1 %4541  ;;  %vm9374_vm12 = vcmask 31744  }
 0xb0e   : > { %4580 = vst.msk [vmem:[#allocation3 + $0x26] sm:$0x3] %vm9364_vm3, %v4542_v48  ;;  %vm9375_vm3 = vmmov %vm9374_vm12 }
 0xb10   : > { %v4540_v2 = vpop.permute.xlu0 %4539 }
 0xb11   : > { %4579 = vst.msk [vmem:[#allocation3 + $0x1e] sm:$0xfc] %vm9365_vm4, %v4540_v2  ;;  %v4546_v11 = vpop.permute.xlu1 %4545  ;;  %vm9376_vm4 = vmmov %vm9375_vm3  ;;  %v5137_v2 = vld [vmem:[%s6025_s22 + $0x40] sm:$0xff] }
 0xb12   : > { %4582 = vst.msk [vmem:[#allocation3 + $0x2e] sm:$0x3] %vm9366_vm5, %v4546_v11  ;;  %vm9377_vm5 = vmmov %vm9375_vm3 }
 0xb14   : > { %v4544_v4 = vpop.permute.xlu0 %4543 }
 0xb15   : > { %4581 = vst.msk [vmem:[#allocation3 + $0x26] sm:$0xfc] %vm9367_vm6, %v4544_v4  ;;  %v4550_v45 = vpop.permute.xlu1 %4549  ;;  %v5138_v4 = vld [vmem:[%s6025_s22 + $0x48] sm:$0xff]  ;;  %vm9378_vm6 = vcmask 1045509  }
 0xb16   : > { %4584 = vst.msk [vmem:[#allocation3 + $0x36] sm:$0x3] %vm9368_vm14, %v4550_v45  ;;  %vm9379_vm14 = vmmov %vm9378_vm6 }
 0xb18   : > { %v4548_v52 = vpop.permute.xlu0 %4547  ;;  %v4591_v57 = vld [vmem:[#allocation3 + $0x20] sm:$0xff] }
 0xb19   : > { %4583 = vst.msk [vmem:[#allocation3 + $0x2e] sm:$0xfc] %vm9369_vm13, %v4548_v52  ;;  %v4554_v8 = vpop.permute.xlu1 %4553  ;;  %vm9380_vm13 = vcmask 1046534  }
 0xb1a   : > { %4586 = vst.msk [vmem:[#allocation3 + $0x3e] sm:$0x3] %vm9370_vm7, %v4554_v8  ;;  %vm9381_vm7 = vmmov %vm9378_vm6 }
 0xb1c   : > { %v4552_v15 = vpop.permute.xlu0 %4551  ;;  %v4592_v32 = vld [vmem:[#allocation3 + $0x28] sm:$0xff] }
 0xb1d   : > { %4585 = vst.msk [vmem:[#allocation3 + $0x36] sm:$0xfc] %vm9371_vm8, %v4552_v15  ;;  %v4597_v31 = vpack.c.bf16 %v4592_v32, %v4591_v57  ;;  %vm9382_vm8 = vmmov %vm9380_vm13 }
 0xb1f   : > { %5313 = vmatprep.mubr.msk.bf16.mxu1 %vm9372_vm11, %v4597_v31  ;;  %vm9383_vm11 = vcmask 1047559  }
 0xb20   : > { %v4593_v38 = vld [vmem:[#allocation3 + $0x30] sm:$0xff] }
 0xb24   : > { %v4594_v13 = vld [vmem:[#allocation3 + $0x38] sm:$0xff] }
 0xb25   : > { %v4598_v42 = vpack.c.bf16 %v4594_v13, %v4593_v38 }
 0xb27   : > { %5314 = vmatmul.mubr.msk.bf16.gmra.mrb[12].mxu1 %vm9373_vm1, %v4598_v42  ;;  %vm9384_vm1 = vmmov %vm9382_vm8 }
 0xb92   : > { %v5311_v61 = vpop.f32.mrb[8].mxu1 }
 0xb93   : > { %v4678_v24 = vmul.f32 %v5311_v61, %v5966_v20  ;;  %v4645_v41 = vpop.f32.mrb[9].mxu1 }
 0xb94   : > { %v4676_v58 = vmul.f32 %v5966_v20, %v4645_v41  ;;  %v5312_v27 = vpop.f32.mrb[10].mxu1 }
 0xb95   : > { %v4686_v1 = vadd.f32 %v5971_v21, %v4678_v24  ;;  %v4679_v7 = vmul.f32 %v5312_v27, %v5966_v20  ;;  %v4648_v12 = vpop.f32.mrb[11].mxu1 }
 0xb96   : > { %v4684_v59 = vadd.f32 %v5971_v21, %v4676_v58  ;;  %v4677_v18 = vmul.f32 %v5966_v20, %v4648_v12 }
 0xb97   : > { %v4687_v47 = vadd.f32 %v5971_v21, %v4679_v7  ;;  %v4694_v51 = vmax.f32 %v4686_v1, 0.0 }
 0xb98   : > { %v4685_v62 = vadd.f32 %v5971_v21, %v4677_v18  ;;  %v4692_v10 = vmax.f32 %v4684_v59, 0.0 }
 0xb99   : > { %v4695_v60 = vmax.f32 %v4687_v47, 0.0 }
 0xb9a   : > { %v4693_v28 = vmax.f32 %v4685_v62, 0.0 }
 0xb9b   : > { %v4701_v44 = vpack.c.bf16 %v4695_v60, %v4694_v51 }
 0xb9c   : > { %v4700_v46 = vpack.c.bf16 %v4693_v28, %v4692_v10 }
 0xb9e   : > { %5319 = vmatprep.mubr.msk.bf16.mxu0 %vm9374_vm12, %v4700_v46  ;;  %vm9385_vm12 = vmmov %vm9383_vm11 }
 0xb9f   : > { %5320 = vmatmul.mubr.msk.bf16.vlgmr.msra.gmra.mrb[8].mxu0 %vm9375_vm3, %v4701_v44  ;;  %vm9386_vm3 = vmmov %vm9383_vm11 }
 0xbfa   : > { %v5315_v29 = vpop.f32.mrb[12].mxu1 }
 0xbfb   : > { %v4682_v17 = vmul.f32 %v5315_v29, %v5966_v20  ;;  %v4661_v55 = vpop.f32.mrb[13].mxu1 }
 0xbfc   : > { %v4680_v30 = vmul.f32 %v5966_v20, %v4661_v55  ;;  %v5316_v50 = vpop.f32.mrb[14].mxu1 }
 0xbfd   : > { %v4690_v5 = vadd.f32 %v5971_v21, %v4682_v17  ;;  %v4683_v25 = vmul.f32 %v5316_v50, %v5966_v20  ;;  %v4664_v0 = vpop.f32.mrb[15].mxu1 }
 0xbfe   : > { %v4688_v53 = vadd.f32 %v5971_v21, %v4680_v30  ;;  %v4681_v33 = vmul.f32 %v5966_v20, %v4664_v0  ;;  %v5143_v0 = vld [vmem:[%s6025_s22 + $0x70] sm:$0xff] }
 0xbff   : > { %v4691_v9 = vadd.f32 %v5971_v21, %v4683_v25  ;;  %v4698_v14 = vmax.f32 %v4690_v5, 0.0 }
 0xc00   : > { %v4689_v63 = vadd.f32 %v5971_v21, %v4681_v33  ;;  %v4696_v54 = vmax.f32 %v4688_v53, 0.0 }
 0xc01   : > { %v4699_v40 = vmax.f32 %v4691_v9, 0.0 }
 0xc02   : > { %v4697_v16 = vmax.f32 %v4689_v63, 0.0  ;;  %v5141_v63 = vld [vmem:[%s6025_s22 + $0x60] sm:$0xff] }
 0xc03   : > { %v4703_v39 = vpack.c.bf16 %v4699_v40, %v4698_v14 }
 0xc04   : > { %v4702_v37 = vpack.c.bf16 %v4697_v16, %v4696_v54  ;;  %v5144_v16 = vld [vmem:[%s6025_s22 + $0x78] sm:$0xff] }
 0xc06   : > { %5323 = vmatprep.mubr.msk.bf16.mxu1 %vm9376_vm4, %v4702_v37  ;;  %vm9387_vm4 = vmmov %vm9378_vm6 }
 0xc07   : > { %5324 = vmatmul.mubr.msk.bf16.vlgmr.msra.gmra.mrb[16].mxu1 %vm9377_vm5, %v4703_v39  ;;  %vm9388_vm5 = vmmov %vm9384_vm1 }
 0xc72   : > { %v5321_v34 = vpop.f32.mrb[8].mxu0 }
 0xc73   : > { %v4791_v20 = vmul.f32 %v5321_v34, %v5976_v22  ;;  %v4750_v56 = vpop.f32.mrb[9].mxu0 }
 0xc74   : > { %v4789_v21 = vmul.f32 %v5976_v22, %v4750_v56  ;;  %v5322_v36 = vpop.f32.mrb[10].mxu0 }
 0xc75   : > { %v4799_v49 = vadd.f32 %v5981_v23, %v4791_v20  ;;  %v4792_v6 = vmul.f32 %v5322_v36, %v5976_v22  ;;  %v4753_v19 = vpop.f32.mrb[11].mxu0  ;;  %v5142_v20 = vld [vmem:[%s6025_s22 + $0x68] sm:$0xff]  ;;  %s9390_s22 = smov 16  }
 0xc76   : > { %v4797_v43 = vadd.f32 %v5981_v23, %v4789_v21  ;;  %v4790_v3 = vmul.f32 %v5976_v22, %v4753_v19 }
 0xc77   : > { %v4807_v48 = vadd.f32 %v5139_v35, %v4799_v49  ;;  %v4800_v11 = vadd.f32 %v5981_v23, %v4792_v6 }
 0xc78   : > { %v4798_v45 = vadd.f32 %v5981_v23, %v4790_v3  ;;  %v4805_v15 = vadd.f32 %v5137_v2, %v4797_v43 }
 0xc79   : > { %v4815_v52 = vmax.f32 %v4807_v48, 0.0  ;;  %v4808_v8 = vadd.f32 %v5140_v26, %v4800_v11 }
 0xc7a   : > { %v4806_v57 = vadd.f32 %v5138_v4, %v4798_v45  ;;  %v8748_v42 = vmax.f32 %v4805_v15, 0.0 }
 0xc7b   : > { %v4816_v32 = vmax.f32 %v4808_v8, 0.0  ;;  %v4831_v38 = vrot.slane %v4815_v52, 6 }
 0xc7c   : > { %v4814_v31 = vmax.f32 %v4806_v57, 0.0 }
 0xc7d   : > { %v4833_v13 = vrot.slane %v4816_v32, 5 }
 0xc7e   : > { %v4829_v61 = vrot.slane %v4814_v31, 7 }
 0xc7f   : > { %v4917_v24 = vsel %vm2916_vm0, %v4833_v13, %v4831_v38 }
 0xc80   : > { %v4846_v41 = vsel %vm2919_vm15, %v4829_v61, %v8748_v42  ;;  %v4860_v58 = vsel %vm2922_vm2, %v4829_v61, %v8748_v42  ;;  %v4874_v27 = vsel %vm2925_vm9, %v4829_v61, %v8748_v42  ;;  %v4888_v1 = vsel %vm9378_vm6, %v4829_v61, %v8748_v42  ;;  %vm9389_vm6 = vmmov %vm9386_vm3 }
 0xc81   : > { %v4847_v7 = vsel %vm2922_vm2, %v4831_v38, %v4846_v41  ;;  %v4861_v12 = vsel %vm2925_vm9, %v4831_v38, %v4860_v58  ;;  %v4875_v59 = vsel %vm9379_vm14, %v4831_v38, %v4874_v27  ;;  %v4889_v18 = vsel %vm9380_vm13, %v4831_v38, %v4888_v1  ;;  %vm9391_vm14 = vmmov %vm9384_vm1 }
 0xc82   : > { %v4848_v47 = vsel %vm2925_vm9, %v4833_v13, %v4847_v7  ;;  %v4862_v62 = vsel %vm9381_vm7, %v4833_v13, %v4861_v12  ;;  %v4876_v51 = vsel %vm9382_vm8, %v4833_v13, %v4875_v59  ;;  %v8767_v60 = vsel %vm9383_vm11, %v4833_v13, %v4889_v18  ;;  %vm9392_vm13 = vmmov %vm9386_vm3 }
 0xc83   : > { %v4902_v10 = vsel %vm9384_vm1, %v4829_v61, %v8748_v42  ;;  %v8773_v28 = vsel %vm9385_vm12, %v4829_v61, %v8748_v42  ;;  %v4930_v44 = vsel %vm2916_vm0, %v4831_v38, %v4829_v61  ;;  %v4830_v46 = vsel %vm2916_vm0, %v4829_v61, %v8748_v42  ;;  %vm9393_vm7 = vmmov %vm9386_vm3 }
 0xc84   : > { %v8779_v29 = vsel %vm9386_vm3, %v4831_v38, %v4902_v10  ;;  %v4931_v17 = vsel %vm2919_vm15, %v4833_v13, %v4930_v44  ;;  %v4832_v55 = vsel %vm2919_vm15, %v4831_v38, %v4830_v46  ;;  %vm9396_vm8 = vmmov %vm9384_vm1  ;;  %vm9399_vm12 = vcmask 130048  }
 0xc85   : > { %v4834_v30 = vsel %vm2922_vm2, %v4833_v13, %v4832_v55 }
 0xcda   : > { %v5325_v50 = vpop.f32.mrb[16].mxu1 }
 0xcdb   : > { %v4795_v5 = vmul.f32 %v5325_v50, %v5976_v22  ;;  %v4766_v25 = vpop.f32.mrb[17].mxu1 }
 0xcdc   : > { %v4793_v53 = vmul.f32 %v5976_v22, %v4766_v25  ;;  %v5326_v33 = vpop.f32.mrb[18].mxu1 }
 0xcdd   : > { %v4803_v9 = vadd.f32 %v5981_v23, %v4795_v5  ;;  %v4796_v14 = vmul.f32 %v5326_v33, %v5976_v22  ;;  %v4769_v40 = vpop.f32.mrb[19].mxu1 }
 0xcde   : > { %v4801_v54 = vadd.f32 %v5981_v23, %v4793_v53  ;;  %v4794_v39 = vmul.f32 %v5976_v22, %v4769_v40 }
 0xcdf   : > { %v4811_v37 = vadd.f32 %v5143_v0, %v4803_v9  ;;  %v4804_v34 = vadd.f32 %v5981_v23, %v4796_v14 }
 0xce0   : > { %v4809_v56 = vadd.f32 %v5141_v63, %v4801_v54  ;;  %v4802_v35 = vadd.f32 %v5981_v23, %v4794_v39 }
 0xce1   : > { %v4819_v21 = vmax.f32 %v4811_v37, 0.0  ;;  %v4812_v36 = vadd.f32 %v5144_v16, %v4804_v34 }
 0xce2   : > { %v4817_v49 = vmax.f32 %v4809_v56, 0.0  ;;  %v4810_v6 = vadd.f32 %v5142_v20, %v4802_v35 }
 0xce3   : > { %v4820_v19 = vmax.f32 %v4812_v36, 0.0  ;;  %v4839_v3 = vrot.slane %v4819_v21, 2 }
 0xce4   : > { %v4835_v43 = vrot.slane %v4817_v49, 4  ;;  %v4818_v26 = vmax.f32 %v4810_v6, 0.0 }
 0xce5   : > { %v4841_v48 = vrot.slane %v4820_v19, 1 }
 0xce6   : > { %v4837_v2 = vrot.slane %v4818_v26, 3  ;;  %v4849_v11 = vsel %vm9387_vm4, %v4835_v43, %v4848_v47  ;;  %v4863_v22 = vsel %vm9388_vm5, %v4835_v43, %v4862_v62  ;;  %v4877_v4 = vsel %vm9389_vm6, %v4835_v43, %v4876_v51 }
 0xce7   : > { %4854 = vrot.lane.b32.xlu1 %v4841_v48, %s9390_s22  ;;  %v4865_v23 = vsel %vm2916_vm0, %v4841_v48, %v4839_v3  ;;  %v4904_v45 = vsel %vm2916_vm0, %v4835_v43, %v4833_v13  ;;  %v4918_v52 = vsel %vm2919_vm15, %v4835_v43, %v4917_v24  ;;  %v4932_v8 = vsel %vm2922_vm2, %v4835_v43, %v4931_v17 }
 0xce8   : > { %v4850_v15 = vsel %vm9391_vm14, %v4837_v2, %v4849_v11  ;;  %v4864_v57 = vsel %vm9392_vm13, %v4837_v2, %v4863_v22  ;;  %v4878_v32 = vsel %vm2916_vm0, %v4839_v3, %v4837_v2  ;;  %v4891_v31 = vsel %vm2916_vm0, %v4837_v2, %v4835_v43  ;;  %vm9394_vm0 = vmmov %vm9387_vm4 }
 0xce9   : > { %v4851_v38 = vsel %vm9393_vm7, %v4839_v3, %v4850_v15  ;;  %v4879_v61 = vsel %vm2919_vm15, %v4841_v48, %v4878_v32  ;;  %v4892_v41 = vsel %vm2919_vm15, %v4839_v3, %v4891_v31  ;;  %v4905_v13 = vsel %vm2919_vm15, %v4837_v2, %v4904_v45  ;;  %vm9395_vm15 = vmmov %vm9394_vm0 }
 0xcea   : > { %4852 = vrot.lane.b32.xlu0 %v4851_v38, %s9390_s22  ;;  %v4893_v24 = vsel %vm2922_vm2, %v4841_v48, %v4892_v41  ;;  %v4906_v58 = vsel %vm2922_vm2, %v4839_v3, %v4905_v13  ;;  %v4919_v27 = vsel %vm2922_vm2, %v4837_v2, %v4918_v52  ;;  %v4933_v1 = vsel %vm2925_vm9, %v4837_v2, %v4932_v8  ;;  %vm9397_vm11 = vmmov %vm9394_vm0  ;;  %s5442_s22 = sshll.u32 %s5562_s0, 4  ;;  %s5443_s22 = int_to_ptr.vmem [resolvable:$false] %s5442_s22 }
 0xceb   : > { %4868 = vrot.lane.b32.xlu1 %v4865_v23, %s5542_s25  ;;  %v4907_v7 = vsel %vm2925_vm9, %v4841_v48, %v4906_v58  ;;  %v4920_v12 = vsel %vm2925_vm9, %v4839_v3, %v4919_v27  ;;  %v4934_v59 = vsel %vm9394_vm0, %v4839_v3, %v4933_v1  ;;  %v4836_v18 = vsel %vm2925_vm9, %v4835_v43, %v4834_v30  ;;  %vm9398_vm2 = vmmov %vm9386_vm3  ;;  %p5445_p10 = scmp.lt.s32.totalorder %s8873_s19, %s5443_s22 }
 0xcec   : > { %v4921_v47 = vsel %vm9395_vm15, %v4841_v48, %v4920_v12  ;;  %v4935_v62 = vsel %vm9396_vm8, %v4841_v48, %v4934_v59  ;;  %v4838_v51 = vsel %vm9397_vm11, %v4837_v2, %v4836_v18  ;;  %vm9402_vm9 = vcmask 254080  }
 0xced   : > { %v4840_v10 = vsel %vm9384_vm1, %v4839_v3, %v4838_v51  ;;  %vm9403_vm3 = vcmask 261249   ;;  %vm9404_vm4 = vcmask 386304   ;;  %vm9405_vm5 = vcmask 392450  }
 0xcee   : > { %4866 = vrot.lane.b32.xlu0 %v4864_v57, %s5542_s25  ;;  %v4842_v44 = vsel %vm9398_vm2, %v4841_v48, %v4840_v10  ;;  %s9401_s25 = smov 112   ;;  %vm9406_vm6 = vcmask 518528   ;;  %vm9407_vm14 = vcmask 523651   ;;  %vm9408_vm13 = vcmask 650752  }
 0xcef   : > { %4882 = vrot.lane.b32.xlu1 %v4879_v61, %s5546_s16  ;;  %5145 = vst.msk [vmem:[%s5985_s12 + $0x8] sm:$0xff] %vm9399_vm12, %v4842_v44  ;;  %vm9409_vm7 = vcmask 654852   ;;  %vm9410_vm0 = vcmask 782976   ;;  %vm9411_vm15 = vcmask 786053   ;;  %vm9412_vm8 = vcmask 917254  }
 0xcf0   : > { %vm9413_vm11 = vcmask 1047424  }
 0xcf2   : > { %4880 = vrot.lane.b32.xlu0 %v4877_v4, %s5546_s16 }
 0xcf3   : > { %4896 = vrot.lane.b32.xlu1 %v4893_v24, %s9400_s1 }
 0xcf6   : > { %4894 = vrot.lane.b32.xlu0 %v8767_v60, %s9400_s1  ;;  %s5444_s1 = scalar_lea.vmem %s5443_s22, 512 }
 0xcf7   : > { %4910 = vrot.lane.b32.xlu1 %v4907_v7, %s5554_s21 }
 0xcfa   : > { %4908 = vrot.lane.b32.xlu0 %v8779_v29, %s5554_s21  ;;  %s5162_s21 = sshll.u32 %s5520_s17, 2 }
 0xcfb   : > { %4924 = vrot.lane.b32.xlu1 %v4921_v47, %s9243_s29  ;;  %s4957_s16 = sadd.s32 %s5162_s21, %s5926_s24  ;;  %s9415_s24 = sand.u32 1, %s5508_s14  }
 0xcfc   : > { %s5163_s18 = sshll.u32 %s4957_s16, 7  ;;  %s8884_s28 = scalar_lea.sflag [#allocation5], %s9415_s24 }
 0xcfd   : > { %s8878_s23 = scalar_lea.hbm %s8947_s10, %s5163_s18 }
 0xcfe   : > { %4922 = vrot.lane.b32.xlu0 %v8773_v28, %s9243_s29  ;;  %s5438_s29 = scalar_lea.vmem %s8873_s19, 256 }
 0xcff   : > { %4938 = vrot.lane.b32.xlu1 %v4935_v62, %s9401_s25  ;;  %p5439_p6 = scmp.ne.s32.totalorder %s8873_s19, %s5438_s29  ;;  %p5446_p11 = scmp.lt.s32.totalorder %s5444_s1, %s5438_s29 }
 0xd01   : > { %p5440_p7 = pnand %p5439_p6, %p5670_p3  ;;  %p5447_p12 = por %p5446_p11, %p5445_p10 }
 0xd02   : > { %4936 = vrot.lane.b32.xlu0 %v8748_v42, %s9401_s25 }
 0xd03   : > { %p5441_p9 = pneg %p5440_p7 }
 0xd05   : > { %p5448_p13 = pnand %p5447_p12, %p5441_p9 }
 0xd59   : > { %v4855_v60 = vpop.permute.xlu1 %4854 }
 0xd5a   : > { %5147 = vst.msk [vmem:[%s5985_s12 + $0xf] sm:$0x1] %vm9402_vm9, %v4855_v60 }
 0xd5c   : > { %v4853_v46 = vpop.permute.xlu0 %4852 }
 0xd5d   : > { %5146 = vst.msk [vmem:[%s5985_s12 + $0x7] sm:$0xfe] %vm9403_vm3, %v4853_v46  ;;  %v4869_v29 = vpop.permute.xlu1 %4868 }
 0xd5e   : > { %5149 = vst.msk [vmem:[%s5985_s12 + $0xe] sm:$0x3] %vm9404_vm4, %v4869_v29 }
 0xd60   : > { %v4867_v28 = vpop.permute.xlu0 %4866 }
 0xd61   : > { %5148 = vst.msk [vmem:[%s5985_s12 + $0x6] sm:$0xfc] %vm9405_vm5, %v4867_v28  ;;  %v4883_v17 = vpop.permute.xlu1 %4882 }
 0xd62   : > { %5151 = vst.msk [vmem:[%s5985_s12 + $0xd] sm:$0x7] %vm9406_vm6, %v4883_v17 }
 0xd64   : > { %v4881_v42 = vpop.permute.xlu0 %4880 }
 0xd65   : > { %5150 = vst.msk [vmem:[%s5985_s12 + $0x5] sm:$0xf8] %vm9407_vm14, %v4881_v42  ;;  %v4897_v55 = vpop.permute.xlu1 %4896 }
 0xd66   : > { %5153 = vst.msk [vmem:[%s5985_s12 + $0xc] sm:$0xf] %vm9408_vm13, %v4897_v55 }
 0xd68   : > { %v4895_v30 = vpop.permute.xlu0 %4894 }
 0xd69   : > { %5152 = vst.msk [vmem:[%s5985_s12 + $0x4] sm:$0xf0] %vm9409_vm7, %v4895_v30  ;;  %v4911_v50 = vpop.permute.xlu1 %4910 }
 0xd6a   : > { %5155 = vst.msk [vmem:[%s5985_s12 + $0xb] sm:$0x1f] %vm9410_vm0, %v4911_v50 }
 0xd6c   : > { %v4909_v5 = vpop.permute.xlu0 %4908 }
 0xd6d   : > { %5154 = vst.msk [vmem:[%s5985_s12 + $0x3] sm:$0xe0] %vm9411_vm15, %v4909_v5  ;;  %v4925_v25 = vpop.permute.xlu1 %4924 }
 0xd6e   : > { %5157 = vst.msk [vmem:[%s5985_s12 + $0xa] sm:$0x3f] %vm3032_vm10, %v4925_v25  ;;  %vm9414_vm10 = vcmask 1048455  }
 0xd70   : > { %v4923_v0 = vpop.permute.xlu0 %4922 }
 0xd71   : > { %5156 = vst.msk [vmem:[%s5985_s12 + $0x2] sm:$0xc0] %vm9412_vm8, %v4923_v0  ;;  %v4939_v53 = vpop.permute.xlu1 %4938 }
 0xd72   : > { %5159 = vst.msk [vmem:[%s5985_s12 + $0x9] sm:$0x7f] %vm9413_vm11, %v4939_v53 }
 0xd74   : > { %v4937_v33 = vpop.permute.xlu0 %4936 }
 0xd75   : > { %5158 = vst.msk [vmem:[%s5985_s12 + $0x1] sm:$0x80] %vm9414_vm10, %v4937_v33 }
 0xd76   : > { %5451 = shalt.err (!%p5448_p13)
}
 0xd77   : > { %s5452_s12 = scalar_lea.hbm %s8878_s23, 256  ;;  %s5456_s16 = scalar_lea.hbm %s8947_s10, 1024 }
 0xd78   : > { %p5453_p0 = scmp.ne.s32.totalorder %s8878_s23, %s5452_s12  ;;  %p5457_p4 = scmp.lt.u32.totalorder %s8878_s23, %s8947_s10 }
 0xd79   : > { %p5458_p5 = scmp.lt.u32.totalorder %s5456_s16, %s5452_s12  ;;  %p5460_p7 = scmp.lt.u32.totalorder %s5452_s12, %s8878_s23 }
 0xd7a   : > { %p5454_p1 = pnand %p5453_p0, %p5670_p3 }
 0xd7b   : > { %p5459_p6 = por %p5458_p5, %p5457_p4 }
 0xd7c   : > { %p5455_p2 = pneg %p5454_p1 }
 0xd7d   : > { %p5461_p9 = por %p5460_p7, %p5459_p6 }
 0xd7f   : > { %p5462_p10 = pnand %p5461_p9, %p5455_p2 }
 0xd81   : > { %5465 = shalt.err (!%p5462_p10)
}
 0xd82   : > { %s5563_s30 = smov 128   ;;  %s9416_s24 = smov 8  }
 0xd83   : > { %5338 = dma.vmem_to_hbm [thread:$0]  (%p5670_p3), %s8873_s19, 256, %s8878_s23, %s8884_s28, %s5563_s30, %s5563_s30, %s9416_s24  }
 0xd84 PF: > { %p5344_p11 = scmp.ge.s32.totalorder %s5532_s20, 2  ;;  %s4975_s29 = sand.u32 1, %s5504_s13  }
 0xd85   : > { %s4976_s0 = scalar_lea.sflag [#allocation5], %s4975_s29 }
 0xd86   : > { %p5341_p12 = pnand %p5344_p11, %p5679_p8 }
 0xd88   : > { %5499 = dma.done.wait (!%p5341_p12), %s4976_s0, 256  }
 0xd89   : > { %5501 = vsyncadd (!%p5341_p12), %s4976_s0, 4294967040  ;;  %s23_s20 = sadd.s32 1, %s5532_s20   ;;  %s9417_s16 = sld [smem:[#allocation7_spill]] }
 0xd8a   : > { %p20_p13 = scmp.ge.s32.totalorder %s23_s20, 6   ;;  %s9418_s17 = sld [smem:[#allocation8_spill]] }
 0xd8b   : > { %s9419_s18 = sld [smem:[#allocation9_spill]]  ;;  %s9420_s19 = sld [smem:[#allocation10_spill]] }
 0xd8c   : > { %s9421_s13 = smov %s5508_s14  ;;  %s9422_s14 = smov %s5512_s15 }
 0xd8d   : > { %s9423_s15 = smov %s5688_s11  ;;  %22 = sbr.rel (!%p20_p13) target bundleno = 8 (0x8), region = 115 }
 0xd94   :  { %4981 = vsyncpa [#allocation5], 1 }
 0xd95   :  { %4983 = vsyncpa [#allocation5 + $0x1], 1 }

</bundles_post_ra>
